<compile_context>
chip_gen: v7x
topology: tpu7x:2x2x1
jax: 0.10.0
libtpu: 0.0.40
codegen_flags: <defaults>
</compile_context>

<pallas_src>
import functools
import math

import jax
import jax.numpy as jnp
from jax.experimental import pallas as pl
from jax.experimental.pallas import tpu as pltpu


# ----- logical layer dims (PyTorch spec) and padded on-device dims -----------
D_IN = 10000      # 100 * 100
D_H1 = 784
D_H2 = 256
D_LAT = 64

DP_IN = 10240     # multiple of both K tiles (2048 / 5120) and the N tile (2560)
DP_H1 = 896       # 7 * 128
DP_H2 = 256
DP_LAT = 128

MP_MIN = 16       # batch rows padded to the bf16 sublane tile
TN_BIG = 2560     # decoder N tile -> 4 output tiles

_LAYER_DIMS = [(10000, 784), (784, 256), (256, 64),
               (64, 256), (256, 784), (784, 10000)]


def _device_kind():
    try:
        return jax.devices()[0].device_kind.lower()
    except Exception:
        return ""


_KIND = _device_kind()
# v5e / v5p / v6e have 128 MiB physical VMEM -> big K tile + raised scoped limit.
_BIG_VMEM_CHIP = ("v5" in _KIND) or ("v6" in _KIND)
TK_BIG = 5120 if _BIG_VMEM_CHIP else 2048
# Worst case (TK=5120): 2x9.2 MB W0 blocks + 2x4.6 MB W5 blocks + ~2 MB resident mid
# weights + small blocks/scratch ~= 30 MB -> 64 MiB scoped limit on 128 MiB chips.
# Default case (TK=2048): ~19 MB -> 32 MiB scoped limit (safe on v7x's 64 MiB).
_VMEM_LIMIT = (64 if _BIG_VMEM_CHIP else 32) * 1024 * 1024


# ----------------------------------------------------------------------------
# The fused kernel: phased grid = (NK encoder K steps) + (NN decoder N steps).
# ----------------------------------------------------------------------------
def _fused_kernel(x_ref, w0_ref, b0_ref,
                  w1_ref, b1_ref, w2_ref, b2_ref,
                  w3_ref, b3_ref, w4_ref, b4_ref,
                  w5_ref, b5_ref,
                  o_ref,
                  acc_ref, hm_ref, *, nk):
    i = pl.program_id(0)
    f32, bf16 = jnp.float32, jnp.bfloat16

    @pl.when(i == 0)
    def _():
        acc_ref[...] = jnp.zeros_like(acc_ref)

    # ---- encoder L0: accumulate one K tile of x @ W0 ----
    @pl.when(i < nk)
    def _():
        acc_ref[...] += jnp.dot(x_ref[...], w0_ref[...],
                                preferred_element_type=f32)

    # ---- last K step: bias+ReLU, then the four tiny middle layers, all fused ----
    @pl.when(i == nk - 1)
    def _():
        h = jnp.maximum(acc_ref[...] + b0_ref[...], 0.0)                  # ReLU(L0)
        h = jnp.maximum(jnp.dot(h.astype(bf16), w1_ref[...],
                                preferred_element_type=f32) + b1_ref[...], 0.0)   # 784->256, ReLU
        h = (jnp.dot(h.astype(bf16), w2_ref[...],
                     preferred_element_type=f32) + b2_ref[...])                    # 256->64 latent, no act
        h = jnp.maximum(jnp.dot(h.astype(bf16), w3_ref[...],
                                preferred_element_type=f32) + b3_ref[...], 0.0)   # 64->256, ReLU
        h = jnp.maximum(jnp.dot(h.astype(bf16), w4_ref[...],
                                preferred_element_type=f32) + b4_ref[...], 0.0)   # 256->784, ReLU
        hm_ref[...] = h.astype(hm_ref.dtype)

    # ---- decoder L5: one N tile of sigmoid(hm @ W5 + b5) ----
    @pl.when(i >= nk)
    def _():
        y = jnp.dot(hm_ref[...], w5_ref[0], preferred_element_type=f32)
        o_ref[...] = jax.nn.sigmoid(y + b5_ref[...]).astype(o_ref.dtype)


def _fused_autoencoder(hp, p):
    mp = hp.shape[0]
    nk = DP_IN // TK_BIG
    nn = DP_IN // TN_BIG

    def kx(i):   # K-block index: clamped during the decoder phase -> no refetch
        return jnp.minimum(i, nk - 1)

    def nx(i):   # decoder N-block index: 0 during the encoder phase (prefetched early)
        return jnp.maximum(i - nk, 0)

    in_specs = [
        pl.BlockSpec((mp, TK_BIG), lambda i: (0, kx(i))),            # x
        pl.BlockSpec((TK_BIG, DP_H1), lambda i: (kx(i), 0)),         # W0 (contiguous K blocks)
        pl.BlockSpec((1, DP_H1), lambda i: (0, 0)),                  # b0
        pl.BlockSpec((DP_H1, DP_H2), lambda i: (0, 0)),              # W1 (VMEM-resident)
        pl.BlockSpec((1, DP_H2), lambda i: (0, 0)),                  # b1
        pl.BlockSpec((DP_H2, DP_LAT), lambda i: (0, 0)),             # W2
        pl.BlockSpec((1, DP_LAT), lambda i: (0, 0)),                 # b2
        pl.BlockSpec((DP_LAT, DP_H2), lambda i: (0, 0)),             # W3
        pl.BlockSpec((1, DP_H2), lambda i: (0, 0)),                  # b3
        pl.BlockSpec((DP_H2, DP_H1), lambda i: (0, 0)),              # W4
        pl.BlockSpec((1, DP_H1), lambda i: (0, 0)),                  # b4
        pl.BlockSpec((1, DP_H1, TN_BIG), lambda i: (nx(i), 0, 0)),   # W5 pre-tiled (contiguous)
        pl.BlockSpec((1, TN_BIG), lambda i: (0, nx(i))),             # b5
    ]
    out_spec = pl.BlockSpec((mp, TN_BIG), lambda i: (0, nx(i)))

    return pl.pallas_call(
        functools.partial(_fused_kernel, nk=nk),
        out_shape=jax.ShapeDtypeStruct((mp, DP_IN), jnp.bfloat16),
        grid=(nk + nn,),
        in_specs=in_specs,
        out_specs=out_spec,
        scratch_shapes=[pltpu.VMEM((mp, DP_H1), jnp.float32),   # L0 accumulator
                        pltpu.VMEM((mp, DP_H1), jnp.bfloat16)], # mid-layer output (hm)
        compiler_params=pltpu.CompilerParams(
            dimension_semantics=("arbitrary",),
            vmem_limit_bytes=_VMEM_LIMIT,
        ),
    )(hp, p["w0"], p["b0"], p["w1"], p["b1"], p["w2"], p["b2"],
      p["w3"], p["b3"], p["w4"], p["b4"], p["w5t"], p["b5"])


# ----------------------------------------------------------------------------
# Parameters: PyTorch nn.Linear-style init, then one-time padded/bf16 prep.
# ----------------------------------------------------------------------------
def init_params(key):
    """Weights stored (in, out) = W.T relative to PyTorch's (out, in)."""
    params = []
    for fan_in, fan_out in _LAYER_DIMS:
        key, kw, kb = jax.random.split(key, 3)
        bound = 1.0 / math.sqrt(fan_in)
        w = jax.random.uniform(kw, (fan_in, fan_out), jnp.float32, -bound, bound)
        b = jax.random.uniform(kb, (fan_out,), jnp.float32, -bound, bound)
        params.append((w, b))
    return params


def prepare_params(params):
    """Zero-pad to tiled shapes, cast weights to bf16, and pre-tile W5 — ONCE."""
    (w0, b0), (w1, b1), (w2, b2), (w3, b3), (w4, b4), (w5, b5) = params

    def pad_w(w, kp, np_):
        return (jnp.zeros((kp, np_), jnp.bfloat16)
                .at[: w.shape[0], : w.shape[1]].set(w.astype(jnp.bfloat16)))

    def pad_b(b, np_):
        return jnp.zeros((1, np_), jnp.float32).at[0, : b.shape[0]].set(b)

    nn = DP_IN // TN_BIG
    w5p = pad_w(w5, DP_H1, DP_IN)                                # (896, 10240)
    w5t = w5p.reshape(DP_H1, nn, TN_BIG).transpose(1, 0, 2)      # (nn, 896, TN) contiguous blocks

    return dict(
        w0=pad_w(w0, DP_IN, DP_H1), b0=pad_b(b0, DP_H1),
        w1=pad_w(w1, DP_H1, DP_H2), b1=pad_b(b1, DP_H2),
        w2=pad_w(w2, DP_H2, DP_LAT), b2=pad_b(b2, DP_LAT),
        w3=pad_w(w3, DP_LAT, DP_H2), b3=pad_b(b3, DP_H2),
        w4=pad_w(w4, DP_H2, DP_H1), b4=pad_b(b4, DP_H1),
        w5t=w5t, b5=pad_b(b5, DP_IN),
    )


# ----------------------------------------------------------------------------
# Forward pass (matches Autoencoder.forward semantics).
# ----------------------------------------------------------------------------
def _round_up(x, m):
    return ((x + m - 1) // m) * m


@functools.partial(jax.jit, static_argnames=("batch_size",))
def autoencoder_forward(prepared, x, *, batch_size):
    # NCHW (B, 1, 100, 100) -> (B, 10000), pad once to the (MP, DP_IN) layout.
    h = x.reshape(x.shape[0], -1)
    mp = max(MP_MIN, _round_up(h.shape[0], MP_MIN))
    hp = (jnp.zeros((mp, DP_IN), jnp.bfloat16)
          .at[: h.shape[0], :D_IN].set(h.astype(jnp.bfloat16)))

    y = _fused_autoencoder(hp, prepared)                 # (mp, DP_IN) bf16, sigmoid applied

    # Padded rows/cols (garbage / 0.5) sliced off exactly once; upcast to f32 here.
    y = y[:batch_size, :D_IN].astype(jnp.float32)
    return y.reshape(batch_size, 1, 100, 100)


# Pure-JAX f32 reference (structural correctness check).
def reference_forward(params, x, batch_size):
    (w0, b0), (w1, b1), (w2, b2), (w3, b3), (w4, b4), (w5, b5) = params
    h = x.reshape(x.shape[0], -1)
    h = jax.nn.relu(h @ w0 + b0)
    h = jax.nn.relu(h @ w1 + b1)
    h = h @ w2 + b2                      # latent, no activation
    h = jax.nn.relu(h @ w3 + b3)
    h = jax.nn.relu(h @ w4 + b4)
    h = jax.nn.sigmoid(h @ w5 + b5)
    return h.reshape(batch_size, 1, 100, 100)


if __name__ == "__main__":
    key = jax.random.PRNGKey(0)
    pkey, xkey = jax.random.split(key)

    params = init_params(pkey)
    prepared = prepare_params(params)   # one-time pad + bf16 cast + W5 pre-tile

    batch_size = 2
    x = jax.random.normal(xkey, (batch_size, 1, 100, 100), dtype=jnp.float32)

    y = autoencoder_forward(prepared, x, batch_size=batch_size)
    y = jax.block_until_ready(y)

    assert y.shape == (batch_size, 1, 100, 100), y.shape
    assert y.dtype == jnp.float32
    # Sigmoid output range sanity check.
    assert bool(jnp.all((y >= 0.0) & (y <= 1.0)))

    # Structural check vs. f32 reference (bf16 weight storage -> small numeric drift).
    y_ref = reference_forward(params, x, batch_size)
    max_err = float(jnp.max(jnp.abs(y - y_ref)))
    assert max_err < 0.1, f"max abs diff vs reference = {max_err}"

    print("KERNEL_OK")
</pallas_src>

<mosaic_0001>
module attributes {stable_mosaic.version = 11 : i64} {
  func.func @_fused_kernel(%arg0: i32, %arg1: memref<16x2048xbf16, #tpu.memory_space<vmem>>, %arg2: memref<2048x896xbf16, #tpu.memory_space<vmem>>, %arg3: memref<1x896xf32, #tpu.memory_space<vmem>>, %arg4: memref<896x256xbf16, #tpu.memory_space<vmem>>, %arg5: memref<1x256xf32, #tpu.memory_space<vmem>>, %arg6: memref<256x128xbf16, #tpu.memory_space<vmem>>, %arg7: memref<1x128xf32, #tpu.memory_space<vmem>>, %arg8: memref<128x256xbf16, #tpu.memory_space<vmem>>, %arg9: memref<1x256xf32, #tpu.memory_space<vmem>>, %arg10: memref<256x896xbf16, #tpu.memory_space<vmem>>, %arg11: memref<1x896xf32, #tpu.memory_space<vmem>>, %arg12: memref<1x896x2560xbf16, #tpu.memory_space<vmem>>, %arg13: memref<1x2560xf32, #tpu.memory_space<vmem>>, %arg14: memref<16x2560xbf16, #tpu.memory_space<vmem>>, %arg15: memref<16x896xf32, #tpu.memory_space<vmem>>, %arg16: memref<16x896xbf16, #tpu.memory_space<vmem>>) attributes {dimension_semantics = [#tpu.dimension_semantics<arbitrary>], iteration_bounds = array<i64: 9>, scalar_prefetch = 0 : i64, scratch_operands = 2 : i64, tpu.core_type = #tpu.core_type<tc>, window_params = [{transform_indices = @transform_0, window_bounds = array<i64: 16, 2048>}, {transform_indices = @transform_1, window_bounds = array<i64: 2048, 896>}, {pipeline_mode = #tpu.pipeline_mode<synchronous>, transform_indices = @transform_2, window_bounds = array<i64: 1, 896>}, {pipeline_mode = #tpu.pipeline_mode<synchronous>, transform_indices = @transform_3, window_bounds = array<i64: 896, 256>}, {pipeline_mode = #tpu.pipeline_mode<synchronous>, transform_indices = @transform_4, window_bounds = array<i64: 1, 256>}, {pipeline_mode = #tpu.pipeline_mode<synchronous>, transform_indices = @transform_5, window_bounds = array<i64: 256, 128>}, {pipeline_mode = #tpu.pipeline_mode<synchronous>, transform_indices = @transform_6, window_bounds = array<i64: 1, 128>}, {pipeline_mode = #tpu.pipeline_mode<synchronous>, transform_indices = @transform_7, window_bounds = array<i64: 128, 256>}, {pipeline_mode = #tpu.pipeline_mode<synchronous>, transform_indices = @transform_8, window_bounds = array<i64: 1, 256>}, {pipeline_mode = #tpu.pipeline_mode<synchronous>, transform_indices = @transform_9, window_bounds = array<i64: 256, 896>}, {pipeline_mode = #tpu.pipeline_mode<synchronous>, transform_indices = @transform_10, window_bounds = array<i64: 1, 896>}, {transform_indices = @transform_11, window_bounds = array<i64: 1, 896, 2560>}, {transform_indices = @transform_12, window_bounds = array<i64: 1, 2560>}, {transform_indices = @transform_13, window_bounds = array<i64: 16, 2560>}]} {
    %c0_i32 = arith.constant 0 : i32
    %0 = arith.cmpi eq, %arg0, %c0_i32 : i32
    %1 = arith.extui %0 : i1 to i32
    %c0_i32_0 = arith.constant 0 : i32
    %2 = arith.cmpi ne, %1, %c0_i32_0 : i32
    scf.if %2 {
      %cst = arith.constant 0.000000e+00 : f32
      %12 = vector.broadcast %cst : f32 to vector<16x896xf32>
      %c0 = arith.constant 0 : index
      %c0_5 = arith.constant 0 : index
      %13 = vector.load %arg15[%c0, %c0_5] : memref<16x896xf32, #tpu.memory_space<vmem>>, vector<16x896xf32>
      tpu.vector_store %arg15[%c0, %c0_5], %12 {strides = array<i32>} : memref<16x896xf32, #tpu.memory_space<vmem>>, vector<16x896xf32>,
    } else {
    }
    %c5_i32 = arith.constant 5 : i32
    %3 = arith.cmpi slt, %arg0, %c5_i32 : i32
    %4 = arith.extui %3 : i1 to i32
    %c0_i32_1 = arith.constant 0 : i32
    %5 = arith.cmpi ne, %4, %c0_i32_1 : i32
    scf.if %5 {
      %c0 = arith.constant 0 : index
      %c0_5 = arith.constant 0 : index
      %12 = vector.load %arg15[%c0, %c0_5] : memref<16x896xf32, #tpu.memory_space<vmem>>, vector<16x896xf32>
      %c0_6 = arith.constant 0 : index
      %c0_7 = arith.constant 0 : index
      %13 = vector.load %arg1[%c0_6, %c0_7] : memref<16x2048xbf16, #tpu.memory_space<vmem>>, vector<16x2048xbf16>
      %c0_8 = arith.constant 0 : index
      %c0_9 = arith.constant 0 : index
      %14 = vector.load %arg2[%c0_8, %c0_9] : memref<2048x896xbf16, #tpu.memory_space<vmem>>, vector<2048x896xbf16>
      %cst = arith.constant dense<0.000000e+00> : vector<16x896xf32>
      %15 = tpu.matmul %13, %14, %cst {dimension_numbers = #tpu.dot_dimension_numbers<[1], [0], [0], [1], [0, 0, 1, 1], [], []>} : vector<16x2048xbf16>, vector<2048x896xbf16>, vector<16x896xf32> -> vector<16x896xf32>
      %16 = arith.addf %12, %15 : vector<16x896xf32>
      %c0_10 = arith.constant 0 : index
      %c0_11 = arith.constant 0 : index
      %17 = vector.load %arg15[%c0_10, %c0_11] : memref<16x896xf32, #tpu.memory_space<vmem>>, vector<16x896xf32>
      tpu.vector_store %arg15[%c0_10, %c0_11], %16 {strides = array<i32>} : memref<16x896xf32, #tpu.memory_space<vmem>>, vector<16x896xf32>,
    } else {
    }
    %c4_i32 = arith.constant 4 : i32
    %6 = arith.cmpi eq, %arg0, %c4_i32 : i32
    %7 = arith.extui %6 : i1 to i32
    %c0_i32_2 = arith.constant 0 : i32
    %8 = arith.cmpi ne, %7, %c0_i32_2 : i32
    scf.if %8 {
      %c0 = arith.constant 0 : index
      %c0_5 = arith.constant 0 : index
      %12 = vector.load %arg15[%c0, %c0_5] : memref<16x896xf32, #tpu.memory_space<vmem>>, vector<16x896xf32>
      %c0_6 = arith.constant 0 : index
      %c0_7 = arith.constant 0 : index
      %13 = vector.load %arg3[%c0_6, %c0_7] : memref<1x896xf32, #tpu.memory_space<vmem>>, vector<1x896xf32>
      %14 = vector.broadcast %13 : vector<1x896xf32> to vector<16x896xf32>
      %15 = arith.addf %12, %14 : vector<16x896xf32>
      %cst = arith.constant 0.000000e+00 : f32
      %16 = vector.broadcast %cst : f32 to vector<16x896xf32>
      %17 = arith.maximumf %15, %16 : vector<16x896xf32>
      %18 = arith.truncf %17 : vector<16x896xf32> to vector<16x896xbf16>
      %c0_8 = arith.constant 0 : index
      %c0_9 = arith.constant 0 : index
      %19 = vector.load %arg4[%c0_8, %c0_9] : memref<896x256xbf16, #tpu.memory_space<vmem>>, vector<896x256xbf16>
      %cst_10 = arith.constant dense<0.000000e+00> : vector<16x256xf32>
      %20 = tpu.matmul %18, %19, %cst_10 {dimension_numbers = #tpu.dot_dimension_numbers<[1], [0], [0], [1], [0, 0, 1, 1], [], []>} : vector<16x896xbf16>, vector<896x256xbf16>, vector<16x256xf32> -> vector<16x256xf32>
      %c0_11 = arith.constant 0 : index
      %c0_12 = arith.constant 0 : index
      %21 = vector.load %arg5[%c0_11, %c0_12] : memref<1x256xf32, #tpu.memory_space<vmem>>, vector<1x256xf32>
      %22 = vector.broadcast %21 : vector<1x256xf32> to vector<16x256xf32>
      %23 = arith.addf %20, %22 : vector<16x256xf32>
      %cst_13 = arith.constant 0.000000e+00 : f32
      %24 = vector.broadcast %cst_13 : f32 to vector<16x256xf32>
      %25 = arith.maximumf %23, %24 : vector<16x256xf32>
      %26 = arith.truncf %25 : vector<16x256xf32> to vector<16x256xbf16>
      %c0_14 = arith.constant 0 : index
      %c0_15 = arith.constant 0 : index
      %27 = vector.load %arg6[%c0_14, %c0_15] : memref<256x128xbf16, #tpu.memory_space<vmem>>, vector<256x128xbf16>
      %cst_16 = arith.constant dense<0.000000e+00> : vector<16x128xf32>
      %28 = tpu.matmul %26, %27, %cst_16 {dimension_numbers = #tpu.dot_dimension_numbers<[1], [0], [0], [1], [0, 0, 1, 1], [], []>} : vector<16x256xbf16>, vector<256x128xbf16>, vector<16x128xf32> -> vector<16x128xf32>
      %c0_17 = arith.constant 0 : index
      %c0_18 = arith.constant 0 : index
      %29 = vector.load %arg7[%c0_17, %c0_18] : memref<1x128xf32, #tpu.memory_space<vmem>>, vector<1x128xf32>
      %30 = vector.broadcast %29 : vector<1x128xf32> to vector<16x128xf32>
      %31 = arith.addf %28, %30 : vector<16x128xf32>
      %32 = arith.truncf %31 : vector<16x128xf32> to vector<16x128xbf16>
      %c0_19 = arith.constant 0 : index
      %c0_20 = arith.constant 0 : index
      %33 = vector.load %arg8[%c0_19, %c0_20] : memref<128x256xbf16, #tpu.memory_space<vmem>>, vector<128x256xbf16>
      %cst_21 = arith.constant dense<0.000000e+00> : vector<16x256xf32>
      %34 = tpu.matmul %32, %33, %cst_21 {dimension_numbers = #tpu.dot_dimension_numbers<[1], [0], [0], [1], [0, 0, 1, 1], [], []>} : vector<16x128xbf16>, vector<128x256xbf16>, vector<16x256xf32> -> vector<16x256xf32>
      %c0_22 = arith.constant 0 : index
      %c0_23 = arith.constant 0 : index
      %35 = vector.load %arg9[%c0_22, %c0_23] : memref<1x256xf32, #tpu.memory_space<vmem>>, vector<1x256xf32>
      %36 = vector.broadcast %35 : vector<1x256xf32> to vector<16x256xf32>
      %37 = arith.addf %34, %36 : vector<16x256xf32>
      %cst_24 = arith.constant 0.000000e+00 : f32
      %38 = vector.broadcast %cst_24 : f32 to vector<16x256xf32>
      %39 = arith.maximumf %37, %38 : vector<16x256xf32>
      %40 = arith.truncf %39 : vector<16x256xf32> to vector<16x256xbf16>
      %c0_25 = arith.constant 0 : index
      %c0_26 = arith.constant 0 : index
      %41 = vector.load %arg10[%c0_25, %c0_26] : memref<256x896xbf16, #tpu.memory_space<vmem>>, vector<256x896xbf16>
      %cst_27 = arith.constant dense<0.000000e+00> : vector<16x896xf32>
      %42 = tpu.matmul %40, %41, %cst_27 {dimension_numbers = #tpu.dot_dimension_numbers<[1], [0], [0], [1], [0, 0, 1, 1], [], []>} : vector<16x256xbf16>, vector<256x896xbf16>, vector<16x896xf32> -> vector<16x896xf32>
      %c0_28 = arith.constant 0 : index
      %c0_29 = arith.constant 0 : index
      %43 = vector.load %arg11[%c0_28, %c0_29] : memref<1x896xf32, #tpu.memory_space<vmem>>, vector<1x896xf32>
      %44 = vector.broadcast %43 : vector<1x896xf32> to vector<16x896xf32>
      %45 = arith.addf %42, %44 : vector<16x896xf32>
      %cst_30 = arith.constant 0.000000e+00 : f32
      %46 = vector.broadcast %cst_30 : f32 to vector<16x896xf32>
      %47 = arith.maximumf %45, %46 : vector<16x896xf32>
      %48 = arith.truncf %47 : vector<16x896xf32> to vector<16x896xbf16>
      %c0_31 = arith.constant 0 : index
      %c0_32 = arith.constant 0 : index
      %49 = vector.load %arg16[%c0_31, %c0_32] : memref<16x896xbf16, #tpu.memory_space<vmem>>, vector<16x896xbf16>
      tpu.vector_store %arg16[%c0_31, %c0_32], %48 {strides = array<i32>} : memref<16x896xbf16, #tpu.memory_space<vmem>>, vector<16x896xbf16>,
    } else {
    }
    %c5_i32_3 = arith.constant 5 : i32
    %9 = arith.cmpi sge, %arg0, %c5_i32_3 : i32
    %10 = arith.extui %9 : i1 to i32
    %c0_i32_4 = arith.constant 0 : i32
    %11 = arith.cmpi ne, %10, %c0_i32_4 : i32
    scf.if %11 {
      %c0 = arith.constant 0 : index
      %c0_5 = arith.constant 0 : index
      %12 = vector.load %arg16[%c0, %c0_5] : memref<16x896xbf16, #tpu.memory_space<vmem>>, vector<16x896xbf16>
      %c0_6 = arith.constant 0 : index
      %c0_7 = arith.constant 0 : index
      %c0_8 = arith.constant 0 : index
      %13 = vector.load %arg12[%c0_6, %c0_7, %c0_8] : memref<1x896x2560xbf16, #tpu.memory_space<vmem>>, vector<1x896x2560xbf16>
      %14 = vector.shape_cast %13 : vector<1x896x2560xbf16> to vector<896x2560xbf16>
      %cst = arith.constant dense<0.000000e+00> : vector<16x2560xf32>
      %15 = tpu.matmul %12, %14, %cst {dimension_numbers = #tpu.dot_dimension_numbers<[1], [0], [0], [1], [0, 0, 1, 1], [], []>} : vector<16x896xbf16>, vector<896x2560xbf16>, vector<16x2560xf32> -> vector<16x2560xf32>
      %c0_9 = arith.constant 0 : index
      %c0_10 = arith.constant 0 : index
      %16 = vector.load %arg13[%c0_9, %c0_10] : memref<1x2560xf32, #tpu.memory_space<vmem>>, vector<1x2560xf32>
      %17 = vector.broadcast %16 : vector<1x2560xf32> to vector<16x2560xf32>
      %18 = arith.addf %15, %17 : vector<16x2560xf32>
      %19 = arith.negf %18 : vector<16x2560xf32>
      %20 = math.exp %19 : vector<16x2560xf32>
      %cst_11 = arith.constant 1.000000e+00 : f32
      %21 = vector.broadcast %cst_11 : f32 to vector<16x2560xf32>
      %22 = arith.addf %21, %20 : vector<16x2560xf32>
      %23 = arith.divf %21, %22 : vector<16x2560xf32>
      %24 = arith.truncf %23 : vector<16x2560xf32> to vector<16x2560xbf16>
      %c0_12 = arith.constant 0 : index
      %c0_13 = arith.constant 0 : index
      %25 = vector.load %arg14[%c0_12, %c0_13] : memref<16x2560xbf16, #tpu.memory_space<vmem>>, vector<16x2560xbf16>
      tpu.vector_store %arg14[%c0_12, %c0_13], %24 {strides = array<i32>} : memref<16x2560xbf16, #tpu.memory_space<vmem>>, vector<16x2560xbf16>,
    } else {
    }
    return
  }
  func.func @transform_0(%arg0: i32) -> (i32, i32) {
    %c4_i32 = arith.constant 4 : i32
    %0 = arith.minsi %arg0, %c4_i32 : i32
    %c0_i32 = arith.constant 0 : i32
    %c0_i32_0 = arith.constant 0 : i32
    return %c0_i32, %0 : i32, i32
  }
  func.func @transform_1(%arg0: i32) -> (i32, i32) {
    %c4_i32 = arith.constant 4 : i32
    %0 = arith.minsi %arg0, %c4_i32 : i32
    %c0_i32 = arith.constant 0 : i32
    %c0_i32_0 = arith.constant 0 : i32
    return %0, %c0_i32 : i32, i32
  }
  func.func @transform_2(%arg0: i32) -> (i32, i32) {
    %c0_i32 = arith.constant 0 : i32
    %c0_i32_0 = arith.constant 0 : i32
    %c0_i32_1 = arith.constant 0 : i32
    return %c0_i32, %c0_i32_0 : i32, i32
  }
  func.func @transform_3(%arg0: i32) -> (i32, i32) {
    %c0_i32 = arith.constant 0 : i32
    %c0_i32_0 = arith.constant 0 : i32
    %c0_i32_1 = arith.constant 0 : i32
    return %c0_i32, %c0_i32_0 : i32, i32
  }
  func.func @transform_4(%arg0: i32) -> (i32, i32) {
    %c0_i32 = arith.constant 0 : i32
    %c0_i32_0 = arith.constant 0 : i32
    %c0_i32_1 = arith.constant 0 : i32
    return %c0_i32, %c0_i32_0 : i32, i32
  }
  func.func @transform_5(%arg0: i32) -> (i32, i32) {
    %c0_i32 = arith.constant 0 : i32
    %c0_i32_0 = arith.constant 0 : i32
    %c0_i32_1 = arith.constant 0 : i32
    return %c0_i32, %c0_i32_0 : i32, i32
  }
  func.func @transform_6(%arg0: i32) -> (i32, i32) {
    %c0_i32 = arith.constant 0 : i32
    %c0_i32_0 = arith.constant 0 : i32
    %c0_i32_1 = arith.constant 0 : i32
    return %c0_i32, %c0_i32_0 : i32, i32
  }
  func.func @transform_7(%arg0: i32) -> (i32, i32) {
    %c0_i32 = arith.constant 0 : i32
    %c0_i32_0 = arith.constant 0 : i32
    %c0_i32_1 = arith.constant 0 : i32
    return %c0_i32, %c0_i32_0 : i32, i32
  }
  func.func @transform_8(%arg0: i32) -> (i32, i32) {
    %c0_i32 = arith.constant 0 : i32
    %c0_i32_0 = arith.constant 0 : i32
    %c0_i32_1 = arith.constant 0 : i32
    return %c0_i32, %c0_i32_0 : i32, i32
  }
  func.func @transform_9(%arg0: i32) -> (i32, i32) {
    %c0_i32 = arith.constant 0 : i32
    %c0_i32_0 = arith.constant 0 : i32
    %c0_i32_1 = arith.constant 0 : i32
    return %c0_i32, %c0_i32_0 : i32, i32
  }
  func.func @transform_10(%arg0: i32) -> (i32, i32) {
    %c0_i32 = arith.constant 0 : i32
    %c0_i32_0 = arith.constant 0 : i32
    %c0_i32_1 = arith.constant 0 : i32
    return %c0_i32, %c0_i32_0 : i32, i32
  }
  func.func @transform_11(%arg0: i32) -> (i32, i32, i32) {
    %c5_i32 = arith.constant 5 : i32
    %0 = arith.subi %arg0, %c5_i32 : i32
    %c0_i32 = arith.constant 0 : i32
    %1 = arith.maxsi %0, %c0_i32 : i32
    %c0_i32_0 = arith.constant 0 : i32
    %c0_i32_1 = arith.constant 0 : i32
    %c0_i32_2 = arith.constant 0 : i32
    return %1, %c0_i32_0, %c0_i32_1 : i32, i32, i32
  }
  func.func @transform_12(%arg0: i32) -> (i32, i32) {
    %c5_i32 = arith.constant 5 : i32
    %0 = arith.subi %arg0, %c5_i32 : i32
    %c0_i32 = arith.constant 0 : i32
    %1 = arith.maxsi %0, %c0_i32 : i32
    %c0_i32_0 = arith.constant 0 : i32
    %c0_i32_1 = arith.constant 0 : i32
    return %c0_i32_0, %1 : i32, i32
  }
  func.func @transform_13(%arg0: i32) -> (i32, i32) {
    %c5_i32 = arith.constant 5 : i32
    %0 = arith.subi %arg0, %c5_i32 : i32
    %c0_i32 = arith.constant 0 : i32
    %1 = arith.maxsi %0, %c0_i32 : i32
    %c0_i32_0 = arith.constant 0 : i32
    %c0_i32_1 = arith.constant 0 : i32
    return %c0_i32_0, %1 : i32, i32
  }
}

</mosaic_0001>

<bundles_post_ra>
// kernel: autoencoder_forward.1
= control target key start
LH: loop header
LB: loop body
LE: loop exit
PB: predicated region body
PF: predicated region fallthrough
CT: control target
= control target key end

     0   :  { %s29324_s0 = inlined_call_operand.vmem [shape: bf16[16,10240], index: 0, kind: input, shape index: {}]   ;;  %s29325_s1 = inlined_call_operand.hbm [shape: bf16[10240,896], index: 1, kind: input, shape index: {}]   ;;  %s29326_s2 = inlined_call_operand.hbm [shape: f32[1,896], index: 2, kind: input, shape index: {}]   ;;  %s29327_s3 = inlined_call_operand.hbm [shape: bf16[896,256], index: 3, kind: input, shape index: {}]   ;;  %s29328_s4 = inlined_call_operand.hbm [shape: f32[1,256], index: 4, kind: input, shape index: {}]   ;;  %s29329_s5 = inlined_call_operand.hbm [shape: bf16[256,128], index: 5, kind: input, shape index: {}]   ;;  %s29330_s6 = inlined_call_operand.hbm [shape: f32[1,128], index: 6, kind: input, shape index: {}]   ;;  %s29331_s7 = inlined_call_operand.hbm [shape: bf16[128,256], index: 7, kind: input, shape index: {}]   ;;  %s29332_s8 = inlined_call_operand.hbm [shape: f32[1,256], index: 8, kind: input, shape index: {}]   ;;  %s29333_s9 = inlined_call_operand.hbm [shape: bf16[256,896], index: 9, kind: input, shape index: {}]   ;;  %s29334_s10 = inlined_call_operand.hbm [shape: f32[1,896], index: 10, kind: input, shape index: {}]   ;;  %s29335_s11 = inlined_call_operand.hbm [shape: bf16[4,896,2560], index: 11, kind: input, shape index: {}]   ;;  %s29336_s12 = inlined_call_operand.hbm [shape: f32[1,10240], index: 12, kind: input, shape index: {}]   ;;  %s29337_s13 = inlined_call_operand.vmem [shape: bf16[16,10240], index: 13, kind: output, shape index: {}]  }
   0x1   :  { %29364 = sst [smem:[#allocation43_spill]] %s29324_s0 }
   0x2   :  { %29365 = sst [smem:[#allocation44_spill]] %s29325_s1 }
   0x3   :  { %29366 = sst [smem:[#allocation45_spill]] %s29326_s2 }
   0x4   :  { %29367 = sst [smem:[#allocation46_spill]] %s29327_s3 }
   0x5   :  { %29368 = sst [smem:[#allocation47_spill]] %s29328_s4 }
   0x6   :  { %29369 = sst [smem:[#allocation48_spill]] %s29335_s11 }
   0x7   :  { %29370 = sst [smem:[#allocation49_spill]] %s29336_s12 }
   0x8   :  { %29371 = sst [smem:[#allocation50_spill]] %s29337_s13 }
   0x9   :  { %18 = vsyncpa [#allocation6], 0 }
   0xa   :  { %20 = vsyncpa [#allocation6 + $0x1], 0 }
   0xb   :  { %21 = vsyncpa [#allocation8], 0 }
   0xc   :  { %22 = vsyncpa [#allocation11], 0 }
   0xd   :  { %23 = vsyncpa [#allocation14], 0 }
   0xe   :  { %24 = vsyncpa [#allocation17], 0 }
   0xf   :  { %25 = vsyncpa [#allocation20], 0  ;;  %s26469_s25 = smov 0   ;;  %s26471_s26 = smov 0  }
  0x10   :  { %s26473_s27 = smov 0   ;;  %s26475_s28 = smov 0  }
  0x11   :  { %s26477_s29 = smov 0   ;;  %s26479_s30 = smov 0  }
  0x12   :  { %s26481_s14 = smov 0  }
  0x13 LB: > { %29372 = sst [smem:[#allocation31_spill]] %s26352_s26  ;;  %s26503_s15 = sadd.s32 4294967295, %s26372_s14   ;;  %s26372_s14 = sphi %s26481_s14, %s29434_s14   ;;  %s26368_s30 = sphi %s26479_s30, %s29442_s30   ;;  %s26364_s29 = sphi %s26477_s29, %s29441_s29   ;;  %s26360_s28 = sphi %s26475_s28, %s29437_s28   ;;  %s26356_s27 = sphi %s26473_s27, %s29440_s27   ;;  %s26352_s26 = sphi %s26471_s26, %s29439_s26   ;;  %s26348_s25 = sphi %s26469_s25, %s29435_s25  }
  0x14   : > { %29373 = sst [smem:[#allocation32_spill]] %s26364_s29  ;;  %s26506_s16 = sadd.s32 1, %s26372_s14  }
  0x15   : > { %29374 = sst [smem:[#allocation33_spill]] %s26503_s15  ;;  %p35_p0 = scmp.lt.s32.totalorder %s26372_s14, 4 }
  0x16   : > { %29375 = sst [smem:[#allocation34_spill]] %s26506_s16  ;;  %p37_p1 = scmp.lt.s32.totalorder %s26506_s16, 4 }
  0x17   : > { %s42_s17 = sadd.s32 1, %s26368_s30  ;;  %p49_p2 = scmp.ne.s32.totalorder %s26368_s30, %s26364_s29 }
  0x18   : > { %s26514_s18 = scalar_select %p35_p0, %s26372_s14, 4 }
  0x19   : > { %s38_s19 = scalar_select %p37_p1, %s26506_s16, 4 }
  0x1a   : > { %p50_p3 = scmp.eq.s32.totalorder %s26372_s14, 0  ;;  %p85_p4 = scmp.ne.s32.totalorder %s26364_s29, %s26360_s28 }
  0x1b   : > { %s39_s20 = ssub.s32 %s26514_s18, %s38_s19  ;;  %p29353_p5 = scmp.eq.s32.totalorder %s26503_s15, 0 }
  0x1c   : > { %p40_p6 = scmp.eq.s32.totalorder %s39_s20, 0  ;;  %p26523_p7 = por %p50_p3, %p49_p2 }
  0x1d   : > { %p26529_p8 = por %p29353_p5, %p85_p4  ;;  %s19362_s23 = sadd.s32 4294967291, %s26372_s14 }
  0x1e   : > { %s29376_s21 = scalar_select %p26523_p7, 1, 0 }
  0x1f   : > { %s29377_s22 = scalar_select %p26529_p8, 1, 0 }
  0x20   : > { %s26535_s24 = scalar_select %p40_p6, %s26368_s30, %s42_s17  }
  0x21   : > { %29378 = sst [smem:[#allocation35_spill]] %s29377_s22  ;;  %p285_p9 = scmp.gt.s32.totalorder %s19362_s23, 0 }
  0x22   : > { %29379 = sst [smem:[#allocation36_spill]] %s26535_s24  ;;  %s19363_s28 = sadd.s32 4294967291, %s26506_s16 }
  0x23   : > { %p288_p10 = scmp.gt.s32.totalorder %s19363_s28, 0  ;;  %s293_s19 = sadd.s32 1, %s26356_s27 }
  0x24   : > { %s29444_s23 = smov (!%p285_p9, %s19362_s23), 0  ;;  %p300_p11 = scmp.ne.s32.totalorder %s26356_s27, %s26352_s26 }
  0x25   : > { %29380 = sst [smem:[#allocation37_spill]] %s29444_s23  ;;  %s29446_s28 = smov (!%p288_p10, %s19363_s28), 0 }
  0x26   : > { %p306_p12 = scmp.ne.s32.totalorder %s26352_s26, %s26348_s25  ;;  %s290_s20 = ssub.s32 %s29444_s23, %s29446_s28 }
  0x27   : > { %p368_p13 = scmp.eq.s32.totalorder %s26503_s15, 8  ;;  %p291_p0 = scmp.eq.s32.totalorder %s290_s20, 0 }
  0x28   : > { %p26549_p1 = por %p300_p11, %p50_p3  ;;  %p26555_p2 = por %p306_p12, %p29353_p5 }
  0x29   : > { %p26559_p4 = por %p368_p13, %p300_p11  ;;  %p19368_p6 = scmp.ge.s32.totalorder %s26372_s14, 1 }
  0x2a   : > { %s29381_s17 = scalar_select %p26549_p1, 1, 0 }
  0x2b   : > { %s29383_s24 = scalar_select %p26555_p2, 1, 0 }
  0x2c   : > { %29382 = sst [smem:[#allocation38_spill]] %s29381_s17  ;;  %p381_p9 = scmp.lt.s32.totalorder %s26372_s14, 10 }
  0x2d   : > { %29384 = sst [smem:[#allocation39_spill]] %s29383_s24  ;;  %s26374_s28 = smov [#allocation7]  }
  0x2e   : > { %s29385_s16 = scalar_select %p26559_p4, 1, 0 }
  0x2f   : > { %s26564_s13 = scalar_select %p291_p0, %s26356_s27, %s293_s19  }
  0x30   : > { %29386 = sst [smem:[#allocation40_spill]] %s29385_s16  ;;  %p26569_p8 = pnand %p19368_p6, %p381_p9 }
  0x31   : > { %29387 = sst [smem:[#allocation41_spill]] %s26564_s13  ;;  %s394_s20 = sshll.u32 %s26374_s28, 4  ;;  %s26573_s20 = int_to_ptr.vmem [resolvable:$true] %s394_s20 }
  0x32   : > { %s29388_s25 = scalar_select %p26569_p8, 1, 0 }
  0x33   : > { %p22311_p3 = pneg %p26569_p8  ;;  %s26375_s24 = smov [#allocation10]  }
  0x34   : > { %29389 = sst [smem:[#allocation42_spill]] %s29388_s25  ;;  %s418_s26 = sshll.u32 %s26375_s24, 4  ;;  %s26577_s26 = int_to_ptr.vmem [resolvable:$true] %s418_s26 }
  0x35   : > { %p26581_p11 = pnand %p22311_p3, %p29353_p5  ;;  %s26376_s13 = smov [#allocation13]  }
  0x36   : > { %s442_s16 = sshll.u32 %s26376_s13, 4  ;;  %s26377_s22 = smov [#allocation16]   ;;  %s26585_s16 = int_to_ptr.vmem [resolvable:$true] %s442_s16 }
  0x37   : > { %s26587_s28 = sshll.u32 %s26377_s22, 4  ;;  %s29391_s2 = sld [smem:[#allocation45_spill]]  ;;  %s467_s28 = int_to_ptr.vmem [resolvable:$true] %s26587_s28 }
  0x38   : > { %p26597_p13 = pneg %p26581_p11 }
  0x3d   : > { %s25954_s12 = scalar_lea.hbm %s29391_s2, 112 }
  0x3e   : > { %p25955_p12 = scmp.ne.s32.totalorder %s29391_s2, %s25954_s12  ;;  %p25961_p9 = scmp.lt.u32.totalorder %s25954_s12, %s29391_s2 }
  0x40   : > { %p25957_p0 = pnand %p26597_p13, %p25955_p12 }
  0x42   : > { %p25958_p6 = pneg %p25957_p0 }
  0x44   : > { %p25963_p3 = pnand %p25961_p9, %p25958_p6 }
  0x46   : > { %25966 = shalt.err (!%p25963_p3)
}
  0x47   : > { %s25967_s11 = scalar_lea.vmem %s26573_s20, 112  ;;  %s25974_s29 = scalar_lea.vmem %s26573_s20, 128 }
  0x48   : > { %p25968_p10 = scmp.ne.s32.totalorder %s26573_s20, %s25967_s11  ;;  %p25975_p12 = scmp.lt.s32.totalorder %s26573_s20, %s26573_s20 }
  0x49   : > { %p25976_p0 = scmp.lt.s32.totalorder %s25974_s29, %s25967_s11 }
  0x4a   : > { %p25970_p5 = pnand %p25968_p10, %p26597_p13 }
  0x4b   : > { %p25977_p2 = por %p25976_p0, %p25975_p12 }
  0x4c   : > { %p25971_p4 = pneg %p25970_p5 }
  0x4e   : > { %p25978_p8 = pnand %p25977_p2, %p25971_p4 }
  0x50   : > { %25981 = shalt.err (!%p25978_p8)
}
  0x51   : > { %22314 = dma.hbm_to_vmem [thread:$0]  (!%p26581_p11), %s29391_s2, 112, %s26573_s20, [#allocation8]  }
  0x52   : > { %s29393_s4 = sld [smem:[#allocation47_spill]] }
  0x58   : > { %s25982_s22 = scalar_lea.hbm %s29393_s4, 32 }
  0x59   : > { %p25983_p5 = scmp.ne.s32.totalorder %s29393_s4, %s25982_s22  ;;  %p25989_p8 = scmp.lt.u32.totalorder %s25982_s22, %s29393_s4 }
  0x5b   : > { %p25985_p10 = pnand %p25983_p5, %p26597_p13 }
  0x5d   : > { %p25986_p2 = pneg %p25985_p10 }
  0x5f   : > { %p25991_p4 = pnand %p25989_p8, %p25986_p2 }
  0x61   : > { %25994 = shalt.err (!%p25991_p4)
}
  0x62   : > { %s25995_s20 = scalar_lea.vmem %s26577_s26, 32  ;;  %p26003_p12 = scmp.lt.s32.totalorder %s26577_s26, %s26577_s26 }
  0x63   : > { %p25996_p6 = scmp.ne.s32.totalorder %s26577_s26, %s25995_s20  ;;  %p26004_p0 = scmp.lt.s32.totalorder %s25995_s20, %s25995_s20 }
  0x65   : > { %p25998_p9 = pnand %p25996_p6, %p26597_p13  ;;  %p26005_p5 = por %p26004_p0, %p26003_p12 }
  0x67   : > { %p25999_p3 = pneg %p25998_p9 }
  0x69   : > { %p26006_p10 = pnand %p26005_p5, %p25999_p3 }
  0x6b   : > { %26009 = shalt.err (!%p26006_p10)
}
  0x6c   : > { %22320 = dma.hbm_to_vmem [thread:$0]  (!%p26581_p11), %s29393_s4, 32, %s26577_s26, [#allocation11]  }
  0x6d   : > { %s26010_s24 = scalar_lea.hbm %s29330_s6, 16 }
  0x6e   : > { %p26011_p2 = scmp.ne.s32.totalorder %s29330_s6, %s26010_s24  ;;  %p26017_p6 = scmp.lt.u32.totalorder %s26010_s24, %s29330_s6 }
  0x70   : > { %p26013_p8 = pnand %p26011_p2, %p26597_p13 }
  0x72   : > { %p26014_p4 = pneg %p26013_p8 }
  0x74   : > { %p26019_p9 = pnand %p26017_p6, %p26014_p4 }
  0x76   : > { %26022 = shalt.err (!%p26019_p9)
}
  0x77   : > { %s26023_s26 = scalar_lea.vmem %s26585_s16, 16  ;;  %s26030_s20 = scalar_lea.vmem %s26585_s16, 32 }
  0x78   : > { %p26024_p3 = scmp.ne.s32.totalorder %s26585_s16, %s26023_s26  ;;  %p26031_p5 = scmp.lt.s32.totalorder %s26585_s16, %s26585_s16 }
  0x79   : > { %p26032_p10 = scmp.lt.s32.totalorder %s26030_s20, %s26023_s26 }
  0x7a   : > { %p26026_p12 = pnand %p26024_p3, %p26597_p13 }
  0x7b   : > { %p26033_p2 = por %p26032_p10, %p26031_p5 }
  0x7c   : > { %p26027_p0 = pneg %p26026_p12 }
  0x7e   : > { %p26034_p8 = pnand %p26033_p2, %p26027_p0 }
  0x80   : > { %26037 = shalt.err (!%p26034_p8)
}
  0x81   : > { %22326 = dma.hbm_to_vmem [thread:$0]  (!%p26581_p11), %s29330_s6, 16, %s26585_s16, [#allocation14]  }
  0x82   : > { %s26038_s24 = scalar_lea.hbm %s29332_s8, 32 }
  0x83   : > { %p26039_p4 = scmp.ne.s32.totalorder %s29332_s8, %s26038_s24  ;;  %p26045_p3 = scmp.lt.u32.totalorder %s26038_s24, %s29332_s8 }
  0x85   : > { %p26041_p6 = pnand %p26039_p4, %p26597_p13 }
  0x87   : > { %p26042_p9 = pneg %p26041_p6 }
  0x89   : > { %p26047_p12 = pnand %p26045_p3, %p26042_p9 }
  0x8b   : > { %26050 = shalt.err (!%p26047_p12)
}
  0x8c   : > { %s26051_s26 = scalar_lea.vmem %s467_s28, 32  ;;  %p26059_p2 = scmp.lt.s32.totalorder %s467_s28, %s467_s28 }
  0x8d   : > { %p26052_p0 = scmp.ne.s32.totalorder %s467_s28, %s26051_s26  ;;  %p26060_p8 = scmp.lt.s32.totalorder %s26051_s26, %s26051_s26 }
  0x8f   : > { %p26054_p5 = pnand %p26052_p0, %p26597_p13  ;;  %p26061_p1 = por %p26060_p8, %p26059_p2 }
  0x91   : > { %p26055_p10 = pneg %p26054_p5 }
  0x93   : > { %p26062_p7 = pnand %p26061_p1, %p26055_p10 }
  0x95   : > { %26065 = shalt.err (!%p26062_p7)
}
  0x96   : > { %22332 = dma.hbm_to_vmem [thread:$0]  (!%p26581_p11), %s29332_s8, 32, %s467_s28, [#allocation17]  }
  0x97   : > { %s26378_s23 = smov [#allocation9]   ;;  %s29394_s3 = sld [smem:[#allocation46_spill]] }
  0x98   : > { %s404_s17 = sshll.u32 %s26378_s23, 4  ;;  %s405_s17 = int_to_ptr.vmem [resolvable:$true] %s404_s17 }
  0x9d   : > { %s26066_s24 = scalar_lea.hbm %s29394_s3, 14336 }
  0x9e   : > { %p26067_p4 = scmp.ne.s32.totalorder %s29394_s3, %s26066_s24  ;;  %p26073_p6 = scmp.lt.u32.totalorder %s26066_s24, %s29394_s3 }
  0xa0   : > { %p26069_p7 = pnand %p26067_p4, %p26597_p13 }
  0xa2   : > { %p26070_p1 = pneg %p26069_p7 }
  0xa4   : > { %p26075_p9 = pnand %p26073_p6, %p26070_p1 }
  0xa6   : > { %26078 = shalt.err (!%p26075_p9)
}
  0xa7   : > { %s26079_s28 = scalar_lea.vmem %s405_s17, 14336  ;;  %p26087_p5 = scmp.lt.s32.totalorder %s405_s17, %s405_s17 }
  0xa8   : > { %p26080_p3 = scmp.ne.s32.totalorder %s405_s17, %s26079_s28  ;;  %p26088_p10 = scmp.lt.s32.totalorder %s26079_s28, %s26079_s28 }
  0xaa   : > { %p26082_p12 = pnand %p26080_p3, %p26597_p13  ;;  %p26089_p2 = por %p26088_p10, %p26087_p5 }
  0xac   : > { %p26083_p0 = pneg %p26082_p12 }
  0xae   : > { %p26090_p8 = pnand %p26089_p2, %p26083_p0 }
  0xb0   : > { %26093 = shalt.err (!%p26090_p8)
}
  0xb1   : > { %s29362_s26 = smov 128   ;;  %s29363_s16 = smov 8  }
  0xb2   : > { %22317 = dma.hbm_to_vmem [thread:$0]  (!%p26581_p11), %s29394_s3, 14336, %s405_s17, [#allocation8], %s29362_s26, %s29362_s26, %s29363_s16  }
  0xb3   : > { %s26381_s12 = smov [#allocation12]   ;;  %s26094_s22 = scalar_lea.hbm %s29329_s5, 2048 }
  0xb4   : > { %s428_s25 = sshll.u32 %s26381_s12, 4  ;;  %p26095_p4 = scmp.ne.s32.totalorder %s29329_s5, %s26094_s22  ;;  %s429_s25 = int_to_ptr.vmem [resolvable:$true] %s428_s25 }
  0xb5   : > { %p26101_p6 = scmp.lt.u32.totalorder %s26094_s22, %s29329_s5 }
  0xb6   : > { %p26097_p7 = pnand %p26095_p4, %p26597_p13 }
  0xb8   : > { %p26098_p1 = pneg %p26097_p7 }
  0xba   : > { %p26103_p9 = pnand %p26101_p6, %p26098_p1 }
  0xbc   : > { %26106 = shalt.err (!%p26103_p9)
}
  0xbd   : > { %s26107_s17 = scalar_lea.vmem %s429_s25, 2048  ;;  %p26115_p5 = scmp.lt.s32.totalorder %s429_s25, %s429_s25 }
  0xbe   : > { %p26108_p3 = scmp.ne.s32.totalorder %s429_s25, %s26107_s17  ;;  %p26116_p10 = scmp.lt.s32.totalorder %s26107_s17, %s26107_s17 }
  0xc0   : > { %p26110_p12 = pnand %p26108_p3, %p26597_p13  ;;  %p26117_p2 = por %p26116_p10, %p26115_p5 }
  0xc2   : > { %p26111_p0 = pneg %p26110_p12 }
  0xc4   : > { %p26118_p8 = pnand %p26117_p2, %p26111_p0 }
  0xc6   : > { %26121 = shalt.err (!%p26118_p8)
}
  0xc7   : > { %s26382_s20 = smov 64   ;;  %s26383_s23 = smov 4  }
  0xc8   : > { %22323 = dma.hbm_to_vmem [thread:$0]  (!%p26581_p11), %s29329_s5, 2048, %s429_s25, [#allocation11], %s26382_s20, %s26382_s20, %s26383_s23  }
  0xc9   : > { %s26384_s24 = smov [#allocation15]   ;;  %s26385_s22 = smov [#allocation18]  }
  0xca   : > { %s452_s13 = sshll.u32 %s26384_s24, 4  ;;  %s476_s11 = sshll.u32 %s26385_s22, 4  ;;  %s453_s13 = int_to_ptr.vmem [resolvable:$true] %s452_s13  ;;  %s477_s11 = int_to_ptr.vmem [resolvable:$true] %s476_s11 }
  0xcb   : > { %s26122_s17 = scalar_lea.hbm %s29331_s7, 2048 }
  0xcc   : > { %p26123_p4 = scmp.ne.s32.totalorder %s29331_s7, %s26122_s17  ;;  %p26129_p6 = scmp.lt.u32.totalorder %s26122_s17, %s29331_s7 }
  0xce   : > { %p26125_p7 = pnand %p26123_p4, %p26597_p13 }
  0xd0   : > { %p26126_p1 = pneg %p26125_p7 }
  0xd2   : > { %p26131_p9 = pnand %p26129_p6, %p26126_p1 }
  0xd4   : > { %26134 = shalt.err (!%p26131_p9)
}
  0xd5   : > { %s26135_s25 = scalar_lea.vmem %s453_s13, 2048  ;;  %p26143_p5 = scmp.lt.s32.totalorder %s453_s13, %s453_s13 }
  0xd6   : > { %p26136_p3 = scmp.ne.s32.totalorder %s453_s13, %s26135_s25  ;;  %p26144_p10 = scmp.lt.s32.totalorder %s26135_s25, %s26135_s25 }
  0xd8   : > { %p26138_p12 = pnand %p26136_p3, %p26597_p13  ;;  %p26145_p2 = por %p26144_p10, %p26143_p5 }
  0xda   : > { %p26139_p0 = pneg %p26138_p12 }
  0xdc   : > { %p26146_p8 = pnand %p26145_p2, %p26139_p0 }
  0xde   : > { %26149 = shalt.err (!%p26146_p8)
}
  0xdf   : > { %s29395_s26 = smov 8   ;;  %s29396_s16 = smov 128  }
  0xe0   : > { %22329 = dma.hbm_to_vmem [thread:$0]  (!%p26581_p11), %s29331_s7, 2048, %s453_s13, [#allocation14], %s29396_s16, %s29396_s16, %s29395_s26  }
  0xe1   : > { %s26150_s2 = scalar_lea.hbm %s29333_s9, 14336 }
  0xe2   : > { %p26151_p4 = scmp.ne.s32.totalorder %s29333_s9, %s26150_s2  ;;  %p26157_p6 = scmp.lt.u32.totalorder %s26150_s2, %s29333_s9 }
  0xe4   : > { %p26153_p7 = pnand %p26151_p4, %p26597_p13 }
  0xe6   : > { %p26154_p1 = pneg %p26153_p7 }
  0xe8   : > { %p26159_p9 = pnand %p26157_p6, %p26154_p1 }
  0xea   : > { %26162 = shalt.err (!%p26159_p9)
}
  0xeb   : > { %s26163_s28 = scalar_lea.vmem %s477_s11, 14336  ;;  %p26171_p5 = scmp.lt.s32.totalorder %s477_s11, %s477_s11 }
  0xec   : > { %p26164_p3 = scmp.ne.s32.totalorder %s477_s11, %s26163_s28  ;;  %p26172_p10 = scmp.lt.s32.totalorder %s26163_s28, %s26163_s28 }
  0xee   : > { %p26166_p12 = pnand %p26164_p3, %p26597_p13  ;;  %p26173_p2 = por %p26172_p10, %p26171_p5 }
  0xf0   : > { %p26167_p0 = pneg %p26166_p12 }
  0xf2   : > { %p26174_p8 = pnand %p26173_p2, %p26167_p0 }
  0xf4   : > { %26177 = shalt.err (!%p26174_p8)
}
  0xf5   : > { %s26386_s13 = smov 448   ;;  %s26387_s17 = smov 28  }
  0xf6   : > { %22335 = dma.hbm_to_vmem [thread:$0]  (!%p26581_p11), %s29333_s9, 14336, %s477_s11, [#allocation17], %s26386_s13, %s26386_s13, %s26387_s17  }
  0xf7   : > { %s26388_s16 = smov [#allocation19]   ;;  %s26178_s23 = scalar_lea.hbm %s29334_s10, 112 }
  0xf8   : > { %s490_s3 = sshll.u32 %s26388_s16, 4  ;;  %p26179_p4 = scmp.ne.s32.totalorder %s29334_s10, %s26178_s23  ;;  %s491_s3 = int_to_ptr.vmem [resolvable:$true] %s490_s3 }
  0xf9   : > { %p26185_p6 = scmp.lt.u32.totalorder %s26178_s23, %s29334_s10 }
  0xfa   : > { %p26181_p7 = pnand %p26179_p4, %p26597_p13 }
  0xfc   : > { %p26182_p1 = pneg %p26181_p7 }
  0xfe   : > { %p26187_p9 = pnand %p26185_p6, %p26182_p1 }
 0x100   : > { %26190 = shalt.err (!%p26187_p9)
}
 0x101   : > { %s26191_s11 = scalar_lea.vmem %s491_s3, 112  ;;  %s26198_s29 = scalar_lea.vmem %s491_s3, 128 }
 0x102   : > { %p26192_p3 = scmp.ne.s32.totalorder %s491_s3, %s26191_s11  ;;  %p26199_p5 = scmp.lt.s32.totalorder %s491_s3, %s491_s3 }
 0x103   : > { %p26200_p10 = scmp.lt.s32.totalorder %s26198_s29, %s26191_s11 }
 0x104   : > { %p26194_p12 = pnand %p26192_p3, %p26597_p13 }
 0x105   : > { %p26201_p2 = por %p26200_p10, %p26199_p5 }
 0x106   : > { %p26195_p0 = pneg %p26194_p12 }
 0x108   : > { %p26202_p8 = pnand %p26201_p2, %p26195_p0 }
 0x10a   : > { %26205 = shalt.err (!%p26202_p8)
}
 0x10b   : > { %22338 = dma.hbm_to_vmem [thread:$0]  (!%p26581_p11), %s29334_s10, 112, %s491_s3, [#allocation20]  }
 0x10c   : > { %p19378_p4 = scmp.ge.s32.totalorder %s26372_s14, 9 }
 0x10d   : > { %p29397_p7 = scmp.ne.s32.totalorder (!%p19378_p4), %s29376_s21, 0 }
 0x10e   : > { %497 = sbr.rel (%p19378_p4) target bundleno = 385 (0x181), region = 52 }
 0x115   : > { %500 = sbr.rel (!%p29397_p7) target bundleno = 295 (0x127), region = 56  ;;  %s502_s15 = sand.u32 (%p29397_p7), 1, %s26368_s30  }
 0x116   : > { %s21757_s17 = sshll.u32 (%p29397_p7), %s26514_s18, 6  ;;  %s19379_s25 = sshll.u32 (%p29397_p7), %s502_s15, 7 }
 0x117   : > { %s29398_s0 = sld [smem:[#allocation43_spill]] (%p29397_p7)  ;;  %s504_s19 = scalar_lea.vmem (%p29397_p7), [#allocation4], %s19379_s25 }
 0x11d   : > { %s26789_s4 = scalar_lea.vmem %s29398_s0, %s21757_s17 }
 0x11e   : > { %v522_v0 = vld [vmem:[%s26789_s4] sm:$0xff]  ;;  %v524_v1 = vld [vmem:[%s26789_s4 + $0x8] sm:$0xff]  ;;  %v526_v2 = vld [vmem:[%s26789_s4 + $0x10] sm:$0xff] }
 0x11f   : > { %523 = vst [vmem:[%s504_s19] sm:$0xff] %v522_v0  ;;  %525 = vst [vmem:[%s504_s19 + $0x8] sm:$0xff] %v524_v1  ;;  %v528_v3 = vld [vmem:[%s26789_s4 + $0x18] sm:$0xff]  ;;  %v530_v4 = vld [vmem:[%s26789_s4 + $0x20] sm:$0xff] }
 0x120   : > { %527 = vst [vmem:[%s504_s19 + $0x10] sm:$0xff] %v526_v2  ;;  %v532_v5 = vld [vmem:[%s26789_s4 + $0x28] sm:$0xff]  ;;  %529 = vst [vmem:[%s504_s19 + $0x18] sm:$0xff] %v528_v3  ;;  %v534_v6 = vld [vmem:[%s26789_s4 + $0x30] sm:$0xff] }
 0x121   : > { %531 = vst [vmem:[%s504_s19 + $0x20] sm:$0xff] %v530_v4  ;;  %533 = vst [vmem:[%s504_s19 + $0x28] sm:$0xff] %v532_v5  ;;  %v536_v7 = vld [vmem:[%s26789_s4 + $0x38] sm:$0xff]  ;;  %v538_v8 = vld [vmem:[%s26789_s4 + $0x140] sm:$0xff] }
 0x122   : > { %535 = vst [vmem:[%s504_s19 + $0x30] sm:$0xff] %v534_v6  ;;  %537 = vst [vmem:[%s504_s19 + $0x38] sm:$0xff] %v536_v7  ;;  %v540_v9 = vld [vmem:[%s26789_s4 + $0x148] sm:$0xff]  ;;  %v542_v10 = vld [vmem:[%s26789_s4 + $0x150] sm:$0xff] }
 0x123   : > { %539 = vst [vmem:[%s504_s19 + $0x40] sm:$0xff] %v538_v8  ;;  %v544_v11 = vld [vmem:[%s26789_s4 + $0x158] sm:$0xff]  ;;  %541 = vst [vmem:[%s504_s19 + $0x48] sm:$0xff] %v540_v9  ;;  %v546_v12 = vld [vmem:[%s26789_s4 + $0x160] sm:$0xff] }
 0x124   : > { %543 = vst [vmem:[%s504_s19 + $0x50] sm:$0xff] %v542_v10  ;;  %545 = vst [vmem:[%s504_s19 + $0x58] sm:$0xff] %v544_v11  ;;  %v548_v13 = vld [vmem:[%s26789_s4 + $0x168] sm:$0xff]  ;;  %v550_v14 = vld [vmem:[%s26789_s4 + $0x170] sm:$0xff] }
 0x125   : > { %547 = vst [vmem:[%s504_s19 + $0x60] sm:$0xff] %v546_v12  ;;  %549 = vst [vmem:[%s504_s19 + $0x68] sm:$0xff] %v548_v13  ;;  %v552_v15 = vld [vmem:[%s26789_s4 + $0x178] sm:$0xff] }
 0x126   : > { %551 = vst [vmem:[%s504_s19 + $0x70] sm:$0xff] %v550_v14  ;;  %553 = vst [vmem:[%s504_s19 + $0x78] sm:$0xff] %v552_v15 }
 0x127 PF: > { %s560_s3 = sand.u32 1, %s26372_s14   ;;  %s562_s20 = sand.u32 1, %s26368_s30  }
 0x128   : > { %s22260_s23 = smul.u32 7168, %s562_s20  ;;  %s29399_s1 = sld [smem:[#allocation44_spill]] }
 0x129   : > { %s22261_s2 = smul.u32 114688, %s26514_s18  ;;  %s586_s28 = sand.u32 1, %s26356_s27  }
 0x12a   : > { %s564_s11 = scalar_lea.vmem [#allocation5], %s22260_s23  ;;  %s26818_s13 = scalar_lea.sflag [#allocation6], %s560_s3 }
 0x12b   : > { %s574_s29 = sshll.u32 %s564_s11, 4  ;;  %p29400_p13 = scmp.ne.s32.totalorder %s29376_s21, 0  ;;  %s26815_s29 = int_to_ptr.vmem [resolvable:$true] %s574_s29 }
 0x12e   : > { %s26813_s22 = scalar_lea.hbm %s29399_s1, %s22261_s2  ;;  %s26210_s17 = scalar_lea.hbm %s29399_s1, 573440 }
 0x12f   : > { %s26206_s14 = scalar_lea.hbm %s26813_s22, 114688  ;;  %p26211_p9 = scmp.lt.u32.totalorder %s26813_s22, %s29399_s1 }
 0x130   : > { %p26207_p11 = scmp.ne.s32.totalorder %s26813_s22, %s26206_s14  ;;  %p26212_p3 = scmp.lt.u32.totalorder %s26210_s17, %s26206_s14 }
 0x131   : > { %p26214_p0 = scmp.lt.u32.totalorder %s26206_s14, %s26813_s22 }
 0x132   : > { %p26208_p1 = pnand %p26207_p11, %p29400_p13  ;;  %p26213_p12 = por %p26212_p3, %p26211_p9 }
 0x134   : > { %p26209_p6 = pneg %p26208_p1  ;;  %p26215_p5 = por %p26214_p0, %p26213_p12 }
 0x136   : > { %p26216_p10 = pnand %p26215_p5, %p26209_p6 }
 0x138   : > { %26219 = shalt.err (!%p26216_p10)
}
 0x139   : > { %s26220_s16 = scalar_lea.vmem %s26815_s29, 114688  ;;  %s26389_s4 = smov [#allocation5]  }
 0x13a   : > { %p26221_p2 = scmp.ne.s32.totalorder %s26815_s29, %s26220_s16  ;;  %s26224_s19 = sshll.u32 %s26389_s4, 4  ;;  %s26225_s19 = int_to_ptr.vmem [resolvable:$false] %s26224_s19 }
 0x13b   : > { %s26226_s3 = scalar_lea.vmem %s26225_s19, 229376  ;;  %p26227_p7 = scmp.lt.s32.totalorder %s26815_s29, %s26225_s19 }
 0x13c   : > { %p26222_p8 = pnand %p26221_p2, %p29400_p13  ;;  %p26228_p11 = scmp.lt.s32.totalorder %s26226_s3, %s26220_s16 }
 0x13e   : > { %p26223_p4 = pneg %p26222_p8  ;;  %p26229_p1 = por %p26228_p11, %p26227_p7 }
 0x140   : > { %p26230_p9 = pnand %p26229_p1, %p26223_p4 }
 0x142   : > { %26233 = shalt.err (!%p26230_p9)
}
 0x143   : > { %s26390_s20 = smov 448   ;;  %s29401_s23 = sld [smem:[#allocation37_spill]] }
 0x144   : > { %s29402_s2 = sld [smem:[#allocation38_spill]]  ;;  %s26391_s12 = smov 28  }
 0x145   : > { %22287 = dma.hbm_to_vmem [thread:$0]  (%p29400_p13), %s26813_s22, 114688, %s26815_s29, %s26818_s13, %s26390_s20, %s26390_s20, %s26391_s12  }
 0x146   : > { %s22262_s24 = smul.u32 8960, %s586_s28  ;;  %s29403_s17 = sld [smem:[#allocation48_spill]] }
 0x147   : > { %s26847_s14 = smul.u32 20, %s586_s28 }
 0x148   : > { %s588_s26 = scalar_lea.vmem [#allocation21], %s22262_s24 }
 0x149   : > { %s22263_s11 = smul.u32 143360, %s29401_s23  ;;  %s598_s16 = sshll.u32 %s588_s26, 4  ;;  %s26854_s16 = int_to_ptr.vmem [resolvable:$true] %s598_s16 }
 0x14a   : > { %p29404_p6 = scmp.ne.s32.totalorder %s29402_s2, 0 }
 0x14c   : > { %s26852_s25 = scalar_lea.hbm %s29403_s17, %s22263_s11  ;;  %s26238_s28 = scalar_lea.hbm %s29403_s17, 573440 }
 0x14d   : > { %s26234_s21 = scalar_lea.hbm %s26852_s25, 143360  ;;  %p26239_p0 = scmp.lt.u32.totalorder %s26852_s25, %s29403_s17 }
 0x14e   : > { %p26235_p13 = scmp.ne.s32.totalorder %s26852_s25, %s26234_s21  ;;  %p26240_p5 = scmp.lt.u32.totalorder %s26238_s28, %s26234_s21 }
 0x14f   : > { %p26242_p2 = scmp.lt.u32.totalorder %s26234_s21, %s26852_s25 }
 0x150   : > { %p26236_p3 = pnand %p26235_p13, %p29404_p6  ;;  %p26241_p10 = por %p26240_p5, %p26239_p0 }
 0x152   : > { %p26237_p12 = pneg %p26236_p3  ;;  %p26243_p8 = por %p26242_p2, %p26241_p10 }
 0x154   : > { %p26244_p4 = pnand %p26243_p8, %p26237_p12 }
 0x156   : > { %26247 = shalt.err (!%p26244_p4)
}
 0x157   : > { %s26248_s3 = scalar_lea.vmem %s26854_s16, 143360  ;;  %s26392_s20 = smov [#allocation21]  }
 0x158   : > { %p26249_p7 = scmp.ne.s32.totalorder %s26854_s16, %s26248_s3  ;;  %s26252_s12 = sshll.u32 %s26392_s20, 4  ;;  %s26253_s12 = int_to_ptr.vmem [resolvable:$false] %s26252_s12 }
 0x159   : > { %s26254_s24 = scalar_lea.vmem %s26253_s12, 286720  ;;  %p26255_p9 = scmp.lt.s32.totalorder %s26854_s16, %s26253_s12 }
 0x15a   : > { %p26250_p11 = pnand %p26249_p7, %p29404_p6  ;;  %p26256_p13 = scmp.lt.s32.totalorder %s26254_s24, %s26248_s3 }
 0x15c   : > { %p26251_p1 = pneg %p26250_p11  ;;  %p26257_p3 = por %p26256_p13, %p26255_p9 }
 0x15e   : > { %p26258_p0 = pnand %p26257_p3, %p26251_p1 }
 0x160   : > { %26261 = shalt.err (!%p26258_p0)
}
 0x161   : > { %s26393_s11 = smov 1280   ;;  %s26394_s18 = smov 80  }
 0x162   : > { %22288 = dma.hbm_to_vmem [thread:$0]  (%p29404_p6), %s26852_s25, 143360, %s26854_s16, %s26818_s13, %s26393_s11, %s26393_s11, %s26394_s18  }
 0x163   : > { %s21758_s15 = smul.u32 320, %s29401_s23  ;;  %s612_s26 = scalar_lea.vmem [#allocation22], %s26847_s14 }
 0x164   : > { %s623_s21 = sshll.u32 %s612_s26, 4  ;;  %s29405_s28 = sld [smem:[#allocation49_spill]]  ;;  %s624_s21 = int_to_ptr.vmem [resolvable:$true] %s623_s21 }
 0x16a   : > { %s29406_s4 = smov %s29405_s28  ;;  %s621_s19 = scalar_lea.hbm %s29405_s28, %s21758_s15 }
 0x16b   : > { %s26262_s3 = scalar_lea.hbm %s621_s19, 320  ;;  %s26266_s24 = scalar_lea.hbm %s29406_s4, 1280 }
 0x16c   : > { %p26263_p12 = scmp.ne.s32.totalorder %s621_s19, %s26262_s3  ;;  %p26267_p2 = scmp.lt.u32.totalorder %s621_s19, %s29406_s4 }
 0x16d   : > { %p26268_p8 = scmp.lt.u32.totalorder %s26266_s24, %s26262_s3  ;;  %p26270_p7 = scmp.lt.u32.totalorder %s26262_s3, %s621_s19 }
 0x16e   : > { %p26264_p5 = pnand %p26263_p12, %p29404_p6 }
 0x16f   : > { %p26269_p4 = por %p26268_p8, %p26267_p2 }
 0x170   : > { %p26265_p10 = pneg %p26264_p5 }
 0x171   : > { %p26271_p11 = por %p26270_p7, %p26269_p4 }
 0x173   : > { %p26272_p1 = pnand %p26271_p11, %p26265_p10 }
 0x175   : > { %26275 = shalt.err (!%p26272_p1)
}
 0x176   : > { %s26276_s23 = scalar_lea.vmem %s624_s21, 320  ;;  %s26395_s14 = smov [#allocation22]  }
 0x177   : > { %p26277_p9 = scmp.ne.s32.totalorder %s624_s21, %s26276_s23  ;;  %s26280_s25 = sshll.u32 %s26395_s14, 4  ;;  %s26281_s25 = int_to_ptr.vmem [resolvable:$false] %s26280_s25 }
 0x178   : > { %s26282_s16 = scalar_lea.vmem %s26281_s25, 640  ;;  %p26283_p0 = scmp.lt.s32.totalorder %s624_s21, %s26281_s25 }
 0x179   : > { %p26278_p13 = pnand %p26277_p9, %p29404_p6  ;;  %p26284_p12 = scmp.lt.s32.totalorder %s26282_s16, %s26276_s23 }
 0x17b   : > { %p26279_p3 = pneg %p26278_p13  ;;  %p26285_p5 = por %p26284_p12, %p26283_p0 }
 0x17d   : > { %p26286_p2 = pnand %p26285_p5, %p26279_p3 }
 0x17f   : > { %26289 = shalt.err (!%p26286_p2)
}
 0x180   : > { %22289 = dma.hbm_to_vmem [thread:$0]  (%p29404_p6), %s621_s19, 320, %s624_s21, %s26818_s13  }
 0x181 PF: > { %s29407_s0 = sld [smem:[#allocation42_spill]] }
 0x187   : > { %p29408_p10 = scmp.ne.s32.totalorder %s29407_s0, 0 }
 0x188   : > { %s29409_s1 = sld [smem:[#allocation32_spill]] (!%p29408_p10)  ;;  %s29410_s11 = sld [smem:[#allocation33_spill]] (!%p29408_p10) }
 0x189   : > { %632 = sbr.rel (%p29408_p10) target bundleno = 4222 (0x107e), region = 91  ;;  %s29411_s18 = sld [smem:[#allocation35_spill]] (!%p29408_p10) }
 0x18e   : > { %s635_s15 = sand.u32 (!%p29408_p10), 1, %s29409_s1   ;;  %s641_s26 = sand.u32 (!%p29408_p10), 1, %s29410_s11  }
 0x18f   : > { %s19390_s22 = sshll.u32 (!%p29408_p10), %s635_s15, 7  ;;  %s22265_s29 = smul.u32 (!%p29408_p10), 7168, %s635_s15 }
 0x190   : > { %s26900_s28 = scalar_lea.vmem [#allocation4], %s19390_s22  ;;  %s642_s3 = scalar_lea.sflag [#allocation6], %s641_s26 }
 0x191   : > { %s26902_s20 = scalar_lea.vmem [#allocation5], %s22265_s29  ;;  %p29412_p8 = scmp.ne.s32.totalorder %s29411_s18, 0 }
 0x193   : > { %26319 = dma.done.wait (%p29412_p8), %s642_s3, 114688  }
 0x194   : > { %26321 = vsyncadd (%p29412_p8), %s642_s3, 4294852608  ;;  %p29413_p6 = scmp.eq.s32.totalorder %s29410_s11, 0 }
 0x196   : > { %26323 = dma.done.wait (%p29413_p6), [#allocation8], 14448   ;;  %p29414_p4 = pmov %p29413_p6 }
 0x198   : > { %26325 = vsyncadd (%p29414_p4), [#allocation8], 4294952848  ;;  %p29415_p7 = pmov %p29414_p4 }
 0x199   : > { %p29416_p11 = pmov %p29414_p4 }
 0x19a   : > { %26327 = dma.done.wait (%p29415_p7), [#allocation11], 2080  }
 0x19b   : > { %26329 = vsyncadd (%p29416_p11), [#allocation11], 4294965216  ;;  %p29417_p1 = pmov %p29414_p4 }
 0x19d   : > { %26331 = dma.done.wait (%p29417_p1), [#allocation14], 2064   ;;  %p29418_p9 = pmov %p29417_p1 }
 0x19e   : > { %p29419_p13 = pmov %p29417_p1 }
 0x19f   : > { %26333 = vsyncadd (%p29418_p9), [#allocation14], 4294965232 }
 0x1a0   : > { %26335 = dma.done.wait (%p29419_p13), [#allocation17], 14368   ;;  %p29420_p3 = pmov %p29417_p1 }
 0x1a1   : > { %p29421_p0 = pmov %p29417_p1 }
 0x1a2   : > { %26337 = vsyncadd (%p29420_p3), [#allocation17], 4294952928 }
 0x1a3   : > { %26339 = dma.done.wait (%p29421_p0), [#allocation20], 112   ;;  %p29422_p12 = pmov %p29421_p0 }
 0x1a4   : > { %s29423_s13 = sld [smem:[#allocation31_spill]]  ;;  %s29424_s2 = sld [smem:[#allocation39_spill]] }
 0x1a5   : > { %26341 = vsyncadd (%p29422_p12), [#allocation20], 4294967184 }
 0x1aa   : > { %s688_s21 = sand.u32 1, %s29423_s13   ;;  %p29425_p5 = scmp.ne.s32.totalorder %s29424_s2, 0 }
 0x1ab   : > { %s22266_s19 = smul.u32 8960, %s688_s21 }
 0x1ad   : > { %s26929_s12 = scalar_lea.vmem [#allocation21], %s22266_s19 }
 0x1ae   : > { %26343 = dma.done.wait (%p29425_p5), %s642_s3, 143680  }
 0x1af   : > { %26345 = vsyncadd (%p29425_p5), %s642_s3, 4294823616  ;;  %s22267_s24 = smul.u32 20, %s688_s21  ;;  %p29426_p2 = scmp.ne.s32.totalorder %s29410_s11, 0 }
 0x1b0   : > { %s22268_s23 = smul.u32 160, %s688_s21  ;;  %v26396_v16 = vmov (!%p29426_p2), 0.0  }
 0x1b1   : > { %s26935_s14 = scalar_lea.vmem [#allocation22], %s22267_s24  ;;  %776 = sbr.rel (%p29426_p2) target bundleno = 440 (0x1b8), region = 147  ;;  %777 = vst [vmem:[#allocation2] sm:$0xff] (!%p29426_p2), %v26396_v16  ;;  %778 = vst [vmem:[#allocation2 + $0x8] sm:$0xff] (!%p29426_p2), %v26396_v16 }
 0x1b2   : > { %s26937_s25 = scalar_lea.vmem [#allocation23], %s22268_s23  ;;  %779 = vst [vmem:[#allocation2 + $0x10] sm:$0xff] (!%p29426_p2), %v26396_v16  ;;  %780 = vst [vmem:[#allocation2 + $0x18] sm:$0xff] (!%p29426_p2), %v26396_v16 }
 0x1b3   : > { %781 = vst [vmem:[#allocation2 + $0x20] sm:$0xff] (!%p29426_p2), %v26396_v16  ;;  %782 = vst [vmem:[#allocation2 + $0x28] sm:$0xff] (!%p29426_p2), %v26396_v16 }
 0x1b4   : > { %783 = vst [vmem:[#allocation2 + $0x30] sm:$0xff] (!%p29426_p2), %v26396_v16  ;;  %784 = vst [vmem:[#allocation2 + $0x38] sm:$0xff] (!%p29426_p2), %v26396_v16 }
 0x1b5   : > { %785 = vst [vmem:[#allocation2 + $0x40] sm:$0xff] (!%p29426_p2), %v26396_v16  ;;  %786 = vst [vmem:[#allocation2 + $0x48] sm:$0xff] (!%p29426_p2), %v26396_v16 }
 0x1b6   : > { %787 = vst [vmem:[#allocation2 + $0x50] sm:$0xff] (!%p29426_p2), %v26396_v16  ;;  %788 = vst [vmem:[#allocation2 + $0x58] sm:$0xff] (!%p29426_p2), %v26396_v16 }
 0x1b7   : > { %789 = vst [vmem:[#allocation2 + $0x60] sm:$0xff] (!%p29426_p2), %v26396_v16  ;;  %790 = vst [vmem:[#allocation2 + $0x68] sm:$0xff] (!%p29426_p2), %v26396_v16 }
 0x1b8 PF: > { %s29427_s16 = sld [smem:[#allocation33_spill]] }
 0x1be   : > { %p19401_p10 = scmp.ge.s32.totalorder %s29427_s16, 5 }
 0x1bf   : > { %v22435_v17 = vld [vmem:[%s26902_s20 + $0x4] ss:$28 sps:$4 sm:$0xff] (!%p19401_p10)   ;;  %v22441_v21 = vld [vmem:[%s26902_s20 + $0x3c] ss:$28 sps:$4 sm:$0xff] (!%p19401_p10)   ;;  %v22447_v25 = vld [vmem:[%s26902_s20 + $0x74] ss:$28 sps:$4 sm:$0xff] (!%p19401_p10)  }
 0x1c0   : > { %794 = sbr.rel (%p19401_p10) target bundleno = 1567 (0x61f), region = 151  ;;  %v22437_v18 = vld [vmem:[%s26902_s20 + $0x704] ss:$28 sps:$4 sm:$0xff] (!%p19401_p10)   ;;  %6537 = vmatprep.subr.bf16.mxu1 (!%p19401_p10), %v22435_v17  ;;  %v22443_v22 = vld [vmem:[%s26902_s20 + $0x73c] ss:$28 sps:$4 sm:$0xff] (!%p19401_p10)   ;;  %v811_v6 = vld [vmem:[%s26900_s28 + $0x10] sm:$0xff] (!%p19401_p10) }
 0x1c1   : > { %v22439_v19 = vld [vmem:[%s26902_s20] ss:$28 sps:$4 sm:$0xff] (!%p19401_p10)   ;;  %6623 = vmatprep.subr.bf16.mxu0 (!%p19401_p10), %v22437_v18  ;;  %v22445_v23 = vld [vmem:[%s26902_s20 + $0x38] ss:$28 sps:$4 sm:$0xff] (!%p19401_p10)   ;;  %v22451_v27 = vld [vmem:[%s26902_s20 + $0x70] ss:$28 sps:$4 sm:$0xff] (!%p19401_p10)  }
 0x1c2   : > { %v22440_v20 = vld [vmem:[%s26902_s20 + $0x700] ss:$28 sps:$4 sm:$0xff] (!%p19401_p10)   ;;  %6538 = vmatpush1.bf16.msra.mxu1 (!%p19401_p10), %v22439_v19  ;;  %v22446_v24 = vld [vmem:[%s26902_s20 + $0x738] ss:$28 sps:$4 sm:$0xff] (!%p19401_p10)   ;;  %v22452_v28 = vld [vmem:[%s26902_s20 + $0x770] ss:$28 sps:$4 sm:$0xff] (!%p19401_p10)  }
 0x1c3   : > { %6624 = vmatpush1.bf16.msra.mxu0 (!%p19401_p10), %v22440_v20  ;;  %6539 = vmatprep.subr.bf16.mxu1 (!%p19401_p10), %v22441_v21  ;;  %v22449_v26 = vld [vmem:[%s26902_s20 + $0x774] ss:$28 sps:$4 sm:$0xff] (!%p19401_p10)   ;;  %v22453_v29 = vld [vmem:[%s26902_s20 + $0xac] ss:$28 sps:$4 sm:$0xff] (!%p19401_p10)   ;;  %v22459_v33 = vld [vmem:[%s26902_s20 + $0xe4] ss:$28 sps:$4 sm:$0xff] (!%p19401_p10)  }
 0x1c4   : > { %6625 = vmatprep.subr.bf16.mxu0 (!%p19401_p10), %v22443_v22  ;;  %v22455_v30 = vld [vmem:[%s26902_s20 + $0x7ac] ss:$28 sps:$4 sm:$0xff] (!%p19401_p10)   ;;  %v22461_v34 = vld [vmem:[%s26902_s20 + $0x7e4] ss:$28 sps:$4 sm:$0xff] (!%p19401_p10)   ;;  %v22465_v37 = vld [vmem:[%s26902_s20 + $0x11c] ss:$28 sps:$4 sm:$0xff] (!%p19401_p10)  }
 0x1c5   : > { %v22457_v31 = vld [vmem:[%s26902_s20 + $0xa8] ss:$28 sps:$4 sm:$0xff] (!%p19401_p10)   ;;  %v22463_v35 = vld [vmem:[%s26902_s20 + $0xe0] ss:$28 sps:$4 sm:$0xff] (!%p19401_p10)   ;;  %v22469_v39 = vld [vmem:[%s26902_s20 + $0x118] ss:$28 sps:$4 sm:$0xff] (!%p19401_p10)  }
 0x1c6   : > { %6540 = vmatpush1.bf16.msra.mxu1 (!%p19401_p10), %v22445_v23  ;;  %v22458_v32 = vld [vmem:[%s26902_s20 + $0x7a8] ss:$28 sps:$4 sm:$0xff] (!%p19401_p10)   ;;  %v22464_v36 = vld [vmem:[%s26902_s20 + $0x7e0] ss:$28 sps:$4 sm:$0xff] (!%p19401_p10)   ;;  %v22470_v40 = vld [vmem:[%s26902_s20 + $0x818] ss:$28 sps:$4 sm:$0xff] (!%p19401_p10)  }
 0x1c7   : > { %6626 = vmatpush1.bf16.msra.mxu0 %v22446_v24  ;;  %6541 = vmatprep.subr.bf16.mxu1 %v22447_v25  ;;  %v22467_v38 = vld [vmem:[%s26902_s20 + $0x81c] ss:$28 sps:$4 sm:$0xff]   ;;  %v22471_v41 = vld [vmem:[%s26902_s20 + $0x154] ss:$28 sps:$4 sm:$0xff]   ;;  %v22477_v45 = vld [vmem:[%s26902_s20 + $0x18c] ss:$28 sps:$4 sm:$0xff]  }
 0x1c8   : > { %6627 = vmatprep.subr.bf16.mxu0 %v22449_v26  ;;  %v22473_v42 = vld [vmem:[%s26902_s20 + $0x854] ss:$28 sps:$4 sm:$0xff]   ;;  %v22479_v46 = vld [vmem:[%s26902_s20 + $0x88c] ss:$28 sps:$4 sm:$0xff]   ;;  %v22483_v49 = vld [vmem:[%s26902_s20 + $0x1c4] ss:$28 sps:$4 sm:$0xff]  }
 0x1c9   : > { %v22475_v43 = vld [vmem:[%s26902_s20 + $0x150] ss:$28 sps:$4 sm:$0xff]   ;;  %v22481_v47 = vld [vmem:[%s26902_s20 + $0x188] ss:$28 sps:$4 sm:$0xff]   ;;  %v22487_v51 = vld [vmem:[%s26902_s20 + $0x1c0] ss:$28 sps:$4 sm:$0xff]  }
 0x1ca   : > { %6542 = vmatpush1.bf16.msra.mxu1 %v22451_v27  ;;  %v22476_v44 = vld [vmem:[%s26902_s20 + $0x850] ss:$28 sps:$4 sm:$0xff]   ;;  %v22482_v48 = vld [vmem:[%s26902_s20 + $0x888] ss:$28 sps:$4 sm:$0xff]   ;;  %v22488_v52 = vld [vmem:[%s26902_s20 + $0x8c0] ss:$28 sps:$4 sm:$0xff]  }
 0x1cb   : > { %6628 = vmatpush1.bf16.msra.mxu0 %v22452_v28  ;;  %6543 = vmatprep.subr.bf16.mxu1 %v22453_v29  ;;  %v22485_v50 = vld [vmem:[%s26902_s20 + $0x8c4] ss:$28 sps:$4 sm:$0xff]   ;;  %v22489_v53 = vld [vmem:[%s26902_s20 + $0x1fc] ss:$28 sps:$4 sm:$0xff]   ;;  %v22495_v57 = vld [vmem:[%s26902_s20 + $0x234] ss:$28 sps:$4 sm:$0xff]  }
 0x1cc   : > { %6629 = vmatprep.subr.bf16.mxu0 %v22455_v30  ;;  %v22491_v54 = vld [vmem:[%s26902_s20 + $0x8fc] ss:$28 sps:$4 sm:$0xff]   ;;  %v22497_v58 = vld [vmem:[%s26902_s20 + $0x934] ss:$28 sps:$4 sm:$0xff]   ;;  %v22501_v61 = vld [vmem:[%s26902_s20 + $0x26c] ss:$28 sps:$4 sm:$0xff]  }
 0x1cd   : > { %v22493_v55 = vld [vmem:[%s26902_s20 + $0x1f8] ss:$28 sps:$4 sm:$0xff]   ;;  %v22499_v59 = vld [vmem:[%s26902_s20 + $0x230] ss:$28 sps:$4 sm:$0xff]   ;;  %v22505_v63 = vld [vmem:[%s26902_s20 + $0x268] ss:$28 sps:$4 sm:$0xff]  }
 0x1ce   : > { %6544 = vmatpush1.bf16.msra.mxu1 %v22457_v31  ;;  %v22494_v56 = vld [vmem:[%s26902_s20 + $0x8f8] ss:$28 sps:$4 sm:$0xff]   ;;  %v22500_v60 = vld [vmem:[%s26902_s20 + $0x930] ss:$28 sps:$4 sm:$0xff]   ;;  %v22506_v0 = vld [vmem:[%s26902_s20 + $0x968] ss:$28 sps:$4 sm:$0xff]  }
 0x1cf   : > { %6630 = vmatpush1.bf16.msra.mxu0 %v22458_v32  ;;  %6545 = vmatprep.subr.bf16.mxu1 %v22459_v33  ;;  %v22503_v62 = vld [vmem:[%s26902_s20 + $0x96c] ss:$28 sps:$4 sm:$0xff]   ;;  %v809_v1 = vld [vmem:[%s26900_s28] sm:$0xff]  ;;  %v819_v7 = vld [vmem:[%s26900_s28 + $0x50] sm:$0xff] }
 0x1d0   : > { %6631 = vmatprep.subr.bf16.mxu0 %v22461_v34  ;;  %v817_v2 = vld [vmem:[%s26900_s28 + $0x40] sm:$0xff]  ;;  %v26999_v8 = vcombine.high %v811_v6, %v819_v7  ;;  %v22513_v11 = vld [vmem:[%s26902_s20 + $0x2dc] ss:$28 sps:$4 sm:$0xff]   ;;  %v22519_v15 = vld [vmem:[%s26902_s20 + $0x314] ss:$28 sps:$4 sm:$0xff]   ;;  %v27022_v28 = vcombine.low %v811_v6, %v819_v7 }
 0x1d1   : > { %v22507_v3 = vld [vmem:[%s26902_s20 + $0x2a4] ss:$28 sps:$4 sm:$0xff]   ;;  %v26994_v5 = vcombine.high %v809_v1, %v817_v2  ;;  %v22515_v12 = vld [vmem:[%s26902_s20 + $0x9dc] ss:$28 sps:$4 sm:$0xff]   ;;  %v22521_v16 = vld [vmem:[%s26902_s20 + $0xa14] ss:$28 sps:$4 sm:$0xff]   ;;  %v27020_v27 = vcombine.low %v809_v1, %v817_v2 }
 0x1d2   : > { %6546 = vmatpush1.bf16.msra.mxu1 %v22463_v35  ;;  %v22509_v4 = vld [vmem:[%s26902_s20 + $0x9a4] ss:$28 sps:$4 sm:$0xff]   ;;  %6655 = vmatprep.mubr.bf16.mxu0 %v26999_v8  ;;  %v22517_v13 = vld [vmem:[%s26902_s20 + $0x2d8] ss:$28 sps:$4 sm:$0xff]   ;;  %v22523_v17 = vld [vmem:[%s26902_s20 + $0x310] ss:$28 sps:$4 sm:$0xff]  }
 0x1d3   : > { %6632 = vmatpush1.bf16.msra.mxu0 %v22464_v36  ;;  %6547 = vmatprep.subr.bf16.mxu1 %v22465_v37  ;;  %v22511_v9 = vld [vmem:[%s26902_s20 + $0x2a0] ss:$28 sps:$4 sm:$0xff]   ;;  %v22518_v14 = vld [vmem:[%s26902_s20 + $0x9d8] ss:$28 sps:$4 sm:$0xff]   ;;  %v22524_v18 = vld [vmem:[%s26902_s20 + $0xa10] ss:$28 sps:$4 sm:$0xff]  }
 0x1d4   : > { %6633 = vmatprep.subr.bf16.mxu0 %v22467_v38  ;;  %6569 = vmatprep.mubr.bf16.mxu1 %v26994_v5  ;;  %v22512_v10 = vld [vmem:[%s26902_s20 + $0x9a0] ss:$28 sps:$4 sm:$0xff]   ;;  %v22525_v19 = vld [vmem:[%s26902_s20 + $0x34c] ss:$28 sps:$4 sm:$0xff]   ;;  %v22537_v31 = vld [vmem:[%s26902_s20 + $0x3b8] ss:$28 sps:$4 sm:$0xff]  }
 0x1d5   : > { %v22527_v20 = vld [vmem:[%s26902_s20 + $0xa4c] ss:$28 sps:$4 sm:$0xff]   ;;  %v22533_v23 = vld [vmem:[%s26902_s20 + $0x384] ss:$28 sps:$4 sm:$0xff]   ;;  %v22539_v29 = vld [vmem:[%s26902_s20 + $0x3bc] ss:$28 sps:$4 sm:$0xff]  }
 0x1d6   : > { %6548 = vmatpush1.bf16.msra.mxu1 %v22469_v39  ;;  %v22529_v21 = vld [vmem:[%s26902_s20 + $0x348] ss:$28 sps:$4 sm:$0xff]   ;;  %v22531_v25 = vld [vmem:[%s26902_s20 + $0x380] ss:$28 sps:$4 sm:$0xff]   ;;  %v22540_v32 = vld [vmem:[%s26902_s20 + $0xab8] ss:$28 sps:$4 sm:$0xff]  }
 0x1d7   : > { %6634 = vmatpush1.bf16.msra.mxu0 %v22470_v40  ;;  %6549 = vmatprep.subr.bf16.mxu1 %v22471_v41  ;;  %v22530_v22 = vld [vmem:[%s26902_s20 + $0xa48] ss:$28 sps:$4 sm:$0xff]   ;;  %v22534_v26 = vld [vmem:[%s26902_s20 + $0xa80] ss:$28 sps:$4 sm:$0xff]   ;;  %v22545_v33 = vld [vmem:[%s26902_s20 + $0x3f4] ss:$28 sps:$4 sm:$0xff]  }
 0x1d8   : > { %6635 = vmatprep.subr.bf16.mxu0 %v22473_v42  ;;  %v22536_v24 = vld [vmem:[%s26902_s20 + $0xa84] ss:$28 sps:$4 sm:$0xff]   ;;  %v22542_v30 = vld [vmem:[%s26902_s20 + $0xabc] ss:$28 sps:$4 sm:$0xff]   ;;  %v22548_v34 = vld [vmem:[%s26902_s20 + $0xaf4] ss:$28 sps:$4 sm:$0xff]  }
 0x1d9   : > { %v22543_v35 = vld [vmem:[%s26902_s20 + $0x3f0] ss:$28 sps:$4 sm:$0xff]   ;;  %v22549_v39 = vld [vmem:[%s26902_s20 + $0x428] ss:$28 sps:$4 sm:$0xff]   ;;  %v22579_v1 = vld [vmem:[%s26902_s20 + $0x540] ss:$28 sps:$4 sm:$0xff]  }
 0x1da   : > { %6550 = vmatpush1.bf16.msra.mxu1 %v22475_v43  ;;  %v22546_v36 = vld [vmem:[%s26902_s20 + $0xaf0] ss:$28 sps:$4 sm:$0xff]   ;;  %v22552_v40 = vld [vmem:[%s26902_s20 + $0xb28] ss:$28 sps:$4 sm:$0xff]   ;;  %v22555_v43 = vld [vmem:[%s26902_s20 + $0x460] ss:$28 sps:$4 sm:$0xff]  }
 0x1db   : > { %6636 = vmatpush1.bf16.msra.mxu0 %v22476_v44  ;;  %6551 = vmatprep.subr.bf16.mxu1 %v22477_v45  ;;  %v22551_v37 = vld [vmem:[%s26902_s20 + $0x42c] ss:$28 sps:$4 sm:$0xff]   ;;  %v22557_v41 = vld [vmem:[%s26902_s20 + $0x464] ss:$28 sps:$4 sm:$0xff]   ;;  %v22563_v45 = vld [vmem:[%s26902_s20 + $0x49c] ss:$28 sps:$4 sm:$0xff]  }
 0x1dc   : > { %6637 = vmatprep.subr.bf16.mxu0 %v22479_v46  ;;  %v22554_v38 = vld [vmem:[%s26902_s20 + $0xb2c] ss:$28 sps:$4 sm:$0xff]   ;;  %v22560_v42 = vld [vmem:[%s26902_s20 + $0xb64] ss:$28 sps:$4 sm:$0xff]   ;;  %v22566_v46 = vld [vmem:[%s26902_s20 + $0xb9c] ss:$28 sps:$4 sm:$0xff]  }
 0x1dd   : > { %v22558_v44 = vld [vmem:[%s26902_s20 + $0xb60] ss:$28 sps:$4 sm:$0xff]   ;;  %v22585_v6 = vld [vmem:[%s26902_s20 + $0x578] ss:$28 sps:$4 sm:$0xff]  }
 0x1de   : > { %6552 = vmatpush1.bf16.msra.mxu1 %v22481_v47  ;;  %v22561_v47 = vld [vmem:[%s26902_s20 + $0x498] ss:$28 sps:$4 sm:$0xff]   ;;  %v22582_v2 = vld [vmem:[%s26902_s20 + $0xc40] ss:$28 sps:$4 sm:$0xff]  }
 0x1df   : > { %6638 = vmatpush1.bf16.msra.mxu0 %v22482_v48  ;;  %6553 = vmatprep.subr.bf16.mxu1 %v22483_v49  ;;  %v22564_v48 = vld [vmem:[%s26902_s20 + $0xb98] ss:$28 sps:$4 sm:$0xff]  }
 0x1e0   : > { %6639 = vmatprep.subr.bf16.mxu0 %v22485_v50  ;;  %v22569_v49 = vld [vmem:[%s26902_s20 + $0x4d4] ss:$28 sps:$4 sm:$0xff]  }
 0x1e1   : > { %v22572_v50 = vld [vmem:[%s26902_s20 + $0xbd4] ss:$28 sps:$4 sm:$0xff]  }
 0x1e2   : > { %6554 = vmatpush1.bf16.msra.mxu1 %v22487_v51  ;;  %v22567_v51 = vld [vmem:[%s26902_s20 + $0x4d0] ss:$28 sps:$4 sm:$0xff]   ;;  %v22588_v7 = vld [vmem:[%s26902_s20 + $0xc78] ss:$28 sps:$4 sm:$0xff]  }
 0x1e3   : > { %6640 = vmatpush1.bf16.msra.mxu0 %v22488_v52  ;;  %6555 = vmatprep.subr.bf16.mxu1 %v22489_v53  ;;  %v22570_v52 = vld [vmem:[%s26902_s20 + $0xbd0] ss:$28 sps:$4 sm:$0xff]  }
 0x1e4   : > { %6641 = vmatprep.subr.bf16.mxu0 %v22491_v54  ;;  %v27051_v53 = vld [vmem:[%s26900_s28 + $0x8] sm:$0xff] }
 0x1e5   : > { %v27054_v54 = vld [vmem:[%s26900_s28 + $0x48] sm:$0xff] }
 0x1e6   : > { %6556 = vmatpush1.bf16.msra.mxu1 %v22493_v55  ;;  %v27057_v55 = vld [vmem:[%s26900_s28 + $0x18] sm:$0xff] }
 0x1e7   : > { %6642 = vmatpush1.bf16.msra.mxu0 %v22494_v56  ;;  %6557 = vmatprep.subr.bf16.mxu1 %v22495_v57  ;;  %v27060_v56 = vld [vmem:[%s26900_s28 + $0x58] sm:$0xff]  ;;  %v22575_v57 = vld [vmem:[%s26902_s20 + $0x50c] ss:$28 sps:$4 sm:$0xff]  }
 0x1e8   : > { %6643 = vmatprep.subr.bf16.mxu0 %v22497_v58  ;;  %v27065_v58 = vcombine.high %v27051_v53, %v27054_v54 }
 0x1ea   : > { %6558 = vmatpush1.bf16.msra.mxu1 %v22499_v59  ;;  %v27069_v59 = vcombine.high %v27057_v55, %v27060_v56 }
 0x1eb   : > { %6644 = vmatpush1.bf16.msra.mxu0 %v22500_v60  ;;  %6559 = vmatprep.subr.bf16.mxu1 %v22501_v61  ;;  %v22578_v60 = vld [vmem:[%s26902_s20 + $0xc0c] ss:$28 sps:$4 sm:$0xff]  }
 0x1ec   : > { %6645 = vmatprep.subr.bf16.mxu0 %v22503_v62  ;;  %v22573_v61 = vld [vmem:[%s26902_s20 + $0x508] ss:$28 sps:$4 sm:$0xff]  }
 0x1ed   : > { %v22576_v62 = vld [vmem:[%s26902_s20 + $0xc08] ss:$28 sps:$4 sm:$0xff]  }
 0x1ee   : > { %6560 = vmatpush1.bf16.msra.mxu1 %v22505_v63  ;;  %v22581_v63 = vld [vmem:[%s26902_s20 + $0x544] ss:$28 sps:$4 sm:$0xff]  }
 0x1ef   : > { %6646 = vmatpush1.bf16.msra.mxu0 %v22506_v0  ;;  %6561 = vmatprep.subr.bf16.mxu1 %v22507_v3  ;;  %v22584_v0 = vld [vmem:[%s26902_s20 + $0xc44] ss:$28 sps:$4 sm:$0xff]   ;;  %v22587_v3 = vld [vmem:[%s26902_s20 + $0x57c] ss:$28 sps:$4 sm:$0xff]  }
 0x1f0   : > { %6647 = vmatprep.subr.bf16.mxu0 %v22509_v4  ;;  %v22590_v4 = vld [vmem:[%s26902_s20 + $0xc7c] ss:$28 sps:$4 sm:$0xff]  }
 0x1f2   : > { %6562 = vmatpush1.bf16.msra.mxu1 %v22511_v9  ;;  %v22593_v9 = vld [vmem:[%s26902_s20 + $0x5b4] ss:$28 sps:$4 sm:$0xff]  }
 0x1f3   : > { %6648 = vmatpush1.bf16.msra.mxu0 %v22512_v10  ;;  %6563 = vmatprep.subr.bf16.mxu1 %v22513_v11  ;;  %v22596_v10 = vld [vmem:[%s26902_s20 + $0xcb4] ss:$28 sps:$4 sm:$0xff]  }
 0x1f4   : > { %6649 = vmatprep.subr.bf16.mxu0 %v22515_v12  ;;  %v22591_v11 = vld [vmem:[%s26902_s20 + $0x5b0] ss:$28 sps:$4 sm:$0xff]  }
 0x1f5   : > { %v22594_v12 = vld [vmem:[%s26902_s20 + $0xcb0] ss:$28 sps:$4 sm:$0xff]  }
 0x1f6   : > { %6564 = vmatpush1.bf16.msra.mxu1 %v22517_v13  ;;  %v22599_v13 = vld [vmem:[%s26902_s20 + $0x5ec] ss:$28 sps:$4 sm:$0xff]  }
 0x1f7   : > { %6650 = vmatpush1.bf16.msra.mxu0 %v22518_v14  ;;  %6565 = vmatprep.subr.bf16.mxu1 %v22519_v15  ;;  %v22602_v14 = vld [vmem:[%s26902_s20 + $0xcec] ss:$28 sps:$4 sm:$0xff]  }
 0x1f8   : > { %6651 = vmatprep.subr.bf16.mxu0 %v22521_v16  ;;  %v22597_v15 = vld [vmem:[%s26902_s20 + $0x5e8] ss:$28 sps:$4 sm:$0xff]  }
 0x1f9   : > { %v22600_v16 = vld [vmem:[%s26902_s20 + $0xce8] ss:$28 sps:$4 sm:$0xff]  }
 0x1fa   : > { %6566 = vmatpush1.bf16.msra.mxu1 %v22523_v17  ;;  %v22605_v17 = vld [vmem:[%s26902_s20 + $0x624] ss:$28 sps:$4 sm:$0xff]  }
 0x1fb   : > { %6652 = vmatpush1.bf16.msra.mxu0 %v22524_v18  ;;  %6567 = vmatprep.subr.bf16.mxu1 %v22525_v19  ;;  %v22608_v18 = vld [vmem:[%s26902_s20 + $0xd24] ss:$28 sps:$4 sm:$0xff]  }
 0x1fc   : > { %6653 = vmatprep.subr.bf16.mxu0 %v22527_v20  ;;  %v22603_v19 = vld [vmem:[%s26902_s20 + $0x620] ss:$28 sps:$4 sm:$0xff]  }
 0x1fd   : > { %v22606_v20 = vld [vmem:[%s26902_s20 + $0xd20] ss:$28 sps:$4 sm:$0xff]  }
 0x1fe   : > { %6568 = vmatpush1.bf16.msra.mxu1 %v22529_v21  ;;  %v22611_v21 = vld [vmem:[%s26902_s20 + $0x65c] ss:$28 sps:$4 sm:$0xff]  }
 0x1ff   : > { %6654 = vmatpush1.bf16.msra.mxu0 %v22530_v22  ;;  %6580 = vmatprep.subr.bf16.mxu1 %v22533_v23  ;;  %v22614_v22 = vld [vmem:[%s26902_s20 + $0xd5c] ss:$28 sps:$4 sm:$0xff]  }
 0x200   : > { %6666 = vmatprep.subr.bf16.mxu0 %v22536_v24  ;;  %v22609_v23 = vld [vmem:[%s26902_s20 + $0x658] ss:$28 sps:$4 sm:$0xff]  }
 0x201   : > { %6570 = vmatmul.mubr.bf16.vlgmr.msra.gmra.mrb[0].mxu1 %v27020_v27  ;;  %v22612_v24 = vld [vmem:[%s26902_s20 + $0xd58] ss:$28 sps:$4 sm:$0xff]  }
 0x202   : > { %6656 = vmatmul.mubr.bf16.vlgmr.msra.gmra.mrb[0].mxu0 %v27022_v28  ;;  %6581 = vmatpush1.bf16.msra.mxu1 %v22531_v25  ;;  %v22617_v25 = vld [vmem:[%s26902_s20 + $0x694] ss:$28 sps:$4 sm:$0xff]  }
 0x203   : > { %6667 = vmatpush1.bf16.msra.mxu0 %v22534_v26  ;;  %6582 = vmatprep.subr.bf16.mxu1 %v22539_v29  ;;  %v22620_v26 = vld [vmem:[%s26902_s20 + $0xd94] ss:$28 sps:$4 sm:$0xff]  }
 0x204   : > { %6668 = vmatprep.subr.bf16.mxu0 %v22542_v30  ;;  %6612 = vmatprep.mubr.bf16.mxu1 %v27065_v58  ;;  %v22615_v29 = vld [vmem:[%s26902_s20 + $0x690] ss:$28 sps:$4 sm:$0xff]  }
 0x205   : > { %6698 = vmatprep.mubr.bf16.mxu0 %v27069_v59  ;;  %v22618_v30 = vld [vmem:[%s26902_s20 + $0xd90] ss:$28 sps:$4 sm:$0xff]  }
 0x206   : > { %6583 = vmatpush1.bf16.msra.mxu1 %v22537_v31  ;;  %v22623_v31 = vld [vmem:[%s26902_s20 + $0x6cc] ss:$28 sps:$4 sm:$0xff]  }
 0x207   : > { %6669 = vmatpush1.bf16.msra.mxu0 %v22540_v32  ;;  %6584 = vmatprep.subr.bf16.mxu1 %v22545_v33  ;;  %v22626_v32 = vld [vmem:[%s26902_s20 + $0xdcc] ss:$28 sps:$4 sm:$0xff]  }
 0x208   : > { %6670 = vmatprep.subr.bf16.mxu0 %v22548_v34  ;;  %v22621_v33 = vld [vmem:[%s26902_s20 + $0x6c8] ss:$28 sps:$4 sm:$0xff]  }
 0x209   : > { %v22624_v34 = vld [vmem:[%s26902_s20 + $0xdc8] ss:$28 sps:$4 sm:$0xff]  }
 0x20a   : > { %6585 = vmatpush1.bf16.msra.mxu1 %v22543_v35  ;;  %v22629_v35 = vld [vmem:[%s26902_s20 + $0xe04] ss:$28 sps:$4 sm:$0xff]  }
 0x20b   : > { %6671 = vmatpush1.bf16.msra.mxu0 %v22546_v36  ;;  %6586 = vmatprep.subr.bf16.mxu1 %v22551_v37  ;;  %v22632_v36 = vld [vmem:[%s26902_s20 + $0xc] ss:$28 sps:$4 sm:$0xff]   ;;  %v27112_v37 = vcombine.low %v27051_v53, %v27054_v54  ;;  %v22650_v53 = vld [vmem:[%s26902_s20 + $0xb4] ss:$28 sps:$4 sm:$0xff]  }
 0x20c   : > { %6672 = vmatprep.subr.bf16.mxu0 %v22554_v38  ;;  %v22627_v38 = vld [vmem:[%s26902_s20 + $0xe00] ss:$28 sps:$4 sm:$0xff]   ;;  %v22645_v54 = vld [vmem:[%s26902_s20 + $0xea8] ss:$28 sps:$4 sm:$0xff]  }
 0x20e   : > { %6587 = vmatpush1.bf16.msra.mxu1 %v22549_v39  ;;  %v22630_v39 = vld [vmem:[%s26902_s20 + $0x8] ss:$28 sps:$4 sm:$0xff]  }
 0x20f   : > { %6673 = vmatpush1.bf16.msra.mxu0 %v22552_v40  ;;  %6588 = vmatprep.subr.bf16.mxu1 %v22557_v41  ;;  %v27118_v40 = vcombine.low %v27057_v55, %v27060_v56  ;;  %v22635_v41 = vld [vmem:[%s26902_s20 + $0xe3c] ss:$28 sps:$4 sm:$0xff]   ;;  %v22648_v55 = vld [vmem:[%s26902_s20 + $0xb0] ss:$28 sps:$4 sm:$0xff]   ;;  %v22653_v56 = vld [vmem:[%s26902_s20 + $0xee4] ss:$28 sps:$4 sm:$0xff]  }
 0x210   : > { %6674 = vmatprep.subr.bf16.mxu0 %v22560_v42  ;;  %v22638_v42 = vld [vmem:[%s26902_s20 + $0x44] ss:$28 sps:$4 sm:$0xff]  }
 0x212   : > { %6589 = vmatpush1.bf16.msra.mxu1 %v22555_v43  ;;  %v27123_v43 = vld [vmem:[%s26900_s28 + $0x20] sm:$0xff] }
 0x213   : > { %6675 = vmatpush1.bf16.msra.mxu0 %v22558_v44  ;;  %6590 = vmatprep.subr.bf16.mxu1 %v22563_v45  ;;  %v27128_v44 = vld [vmem:[%s26900_s28 + $0x60] sm:$0xff]  ;;  %v22633_v45 = vld [vmem:[%s26902_s20 + $0xe38] ss:$28 sps:$4 sm:$0xff]  }
 0x214   : > { %6676 = vmatprep.subr.bf16.mxu0 %v22566_v46  ;;  %v22636_v46 = vld [vmem:[%s26902_s20 + $0x40] ss:$28 sps:$4 sm:$0xff]  }
 0x216   : > { %6591 = vmatpush1.bf16.msra.mxu1 %v22561_v47  ;;  %v27134_v47 = vcombine.high %v27123_v43, %v27128_v44 }
 0x217   : > { %6677 = vmatpush1.bf16.msra.mxu0 %v22564_v48  ;;  %6592 = vmatprep.subr.bf16.mxu1 %v22569_v49  ;;  %v22641_v48 = vld [vmem:[%s26902_s20 + $0xe74] ss:$28 sps:$4 sm:$0xff]   ;;  %v22644_v49 = vld [vmem:[%s26902_s20 + $0x7c] ss:$28 sps:$4 sm:$0xff]  }
 0x218   : > { %6678 = vmatprep.subr.bf16.mxu0 %v22572_v50  ;;  %v22639_v50 = vld [vmem:[%s26902_s20 + $0xe70] ss:$28 sps:$4 sm:$0xff]  }
 0x21a   : > { %6593 = vmatpush1.bf16.msra.mxu1 %v22567_v51  ;;  %v22642_v51 = vld [vmem:[%s26902_s20 + $0x78] ss:$28 sps:$4 sm:$0xff]  }
 0x21b   : > { %6679 = vmatpush1.bf16.msra.mxu0 %v22570_v52  ;;  %6594 = vmatprep.subr.bf16.mxu1 %v22575_v57  ;;  %v22647_v52 = vld [vmem:[%s26902_s20 + $0xeac] ss:$28 sps:$4 sm:$0xff]  }
 0x21c   : > { %6680 = vmatprep.subr.bf16.mxu0 %v22578_v60  ;;  %v22656_v57 = vld [vmem:[%s26902_s20 + $0xec] ss:$28 sps:$4 sm:$0xff]   ;;  %v22651_v60 = vld [vmem:[%s26902_s20 + $0xee0] ss:$28 sps:$4 sm:$0xff]  }
 0x21e   : > { %6595 = vmatpush1.bf16.msra.mxu1 %v22573_v61  ;;  %v22654_v61 = vld [vmem:[%s26902_s20 + $0xe8] ss:$28 sps:$4 sm:$0xff]  }
 0x21f   : > { %6681 = vmatpush1.bf16.msra.mxu0 %v22576_v62  ;;  %6596 = vmatprep.subr.bf16.mxu1 %v22581_v63  ;;  %v22659_v62 = vld [vmem:[%s26902_s20 + $0xf1c] ss:$28 sps:$4 sm:$0xff]   ;;  %v22662_v63 = vld [vmem:[%s26902_s20 + $0x124] ss:$28 sps:$4 sm:$0xff]  }
 0x220   : > { %6682 = vmatprep.subr.bf16.mxu0 %v22584_v0  ;;  %v22657_v0 = vld [vmem:[%s26902_s20 + $0xf18] ss:$28 sps:$4 sm:$0xff]  }
 0x222   : > { %6597 = vmatpush1.bf16.msra.mxu1 %v22579_v1  ;;  %v22660_v1 = vld [vmem:[%s26902_s20 + $0x120] ss:$28 sps:$4 sm:$0xff]  }
 0x223   : > { %6683 = vmatpush1.bf16.msra.mxu0 %v22582_v2  ;;  %6598 = vmatprep.subr.bf16.mxu1 %v22587_v3  ;;  %v22665_v2 = vld [vmem:[%s26902_s20 + $0xf54] ss:$28 sps:$4 sm:$0xff]   ;;  %v22668_v3 = vld [vmem:[%s26902_s20 + $0x15c] ss:$28 sps:$4 sm:$0xff]  }
 0x224   : > { %6684 = vmatprep.subr.bf16.mxu0 %v22590_v4  ;;  %v22663_v4 = vld [vmem:[%s26902_s20 + $0xf50] ss:$28 sps:$4 sm:$0xff]  }
 0x226   : > { %6599 = vmatpush1.bf16.msra.mxu1 %v22585_v6  ;;  %v22666_v6 = vld [vmem:[%s26902_s20 + $0x158] ss:$28 sps:$4 sm:$0xff]  }
 0x227   : > { %6685 = vmatpush1.bf16.msra.mxu0 %v22588_v7  ;;  %6600 = vmatprep.subr.bf16.mxu1 %v22593_v9  ;;  %v22671_v7 = vld [vmem:[%s26902_s20 + $0xf8c] ss:$28 sps:$4 sm:$0xff]   ;;  %v22674_v9 = vld [vmem:[%s26902_s20 + $0x194] ss:$28 sps:$4 sm:$0xff]  }
 0x228   : > { %6686 = vmatprep.subr.bf16.mxu0 %v22596_v10  ;;  %v22669_v10 = vld [vmem:[%s26902_s20 + $0xf88] ss:$28 sps:$4 sm:$0xff]  }
 0x22a   : > { %6601 = vmatpush1.bf16.msra.mxu1 %v22591_v11  ;;  %v22672_v11 = vld [vmem:[%s26902_s20 + $0x190] ss:$28 sps:$4 sm:$0xff]  }
 0x22b   : > { %6687 = vmatpush1.bf16.msra.mxu0 %v22594_v12  ;;  %6602 = vmatprep.subr.bf16.mxu1 %v22599_v13  ;;  %v22677_v12 = vld [vmem:[%s26902_s20 + $0xfc4] ss:$28 sps:$4 sm:$0xff]   ;;  %v22680_v13 = vld [vmem:[%s26902_s20 + $0x1cc] ss:$28 sps:$4 sm:$0xff]  }
 0x22c   : > { %6688 = vmatprep.subr.bf16.mxu0 %v22602_v14  ;;  %v22675_v14 = vld [vmem:[%s26902_s20 + $0xfc0] ss:$28 sps:$4 sm:$0xff]  }
 0x22e   : > { %6603 = vmatpush1.bf16.msra.mxu1 %v22597_v15  ;;  %v22678_v15 = vld [vmem:[%s26902_s20 + $0x1c8] ss:$28 sps:$4 sm:$0xff]  }
 0x22f   : > { %6689 = vmatpush1.bf16.msra.mxu0 %v22600_v16  ;;  %6604 = vmatprep.subr.bf16.mxu1 %v22605_v17  ;;  %v22683_v16 = vld [vmem:[%s26902_s20 + $0xffc] ss:$28 sps:$4 sm:$0xff]   ;;  %v22686_v17 = vld [vmem:[%s26902_s20 + $0x204] ss:$28 sps:$4 sm:$0xff]  }
 0x230   : > { %6690 = vmatprep.subr.bf16.mxu0 %v22608_v18  ;;  %v22681_v18 = vld [vmem:[%s26902_s20 + $0xff8] ss:$28 sps:$4 sm:$0xff]  }
 0x232   : > { %6605 = vmatpush1.bf16.msra.mxu1 %v22603_v19  ;;  %v22684_v19 = vld [vmem:[%s26902_s20 + $0x200] ss:$28 sps:$4 sm:$0xff]  }
 0x233   : > { %6691 = vmatpush1.bf16.msra.mxu0 %v22606_v20  ;;  %6606 = vmatprep.subr.bf16.mxu1 %v22611_v21  ;;  %v22689_v20 = vld [vmem:[%s26902_s20 + $0x1034] ss:$28 sps:$4 sm:$0xff]   ;;  %v22692_v21 = vld [vmem:[%s26902_s20 + $0x23c] ss:$28 sps:$4 sm:$0xff]  }
 0x234   : > { %6692 = vmatprep.subr.bf16.mxu0 %v22614_v22  ;;  %v22687_v22 = vld [vmem:[%s26902_s20 + $0x1030] ss:$28 sps:$4 sm:$0xff]  }
 0x236   : > { %6607 = vmatpush1.bf16.msra.mxu1 %v22609_v23  ;;  %v22690_v23 = vld [vmem:[%s26902_s20 + $0x238] ss:$28 sps:$4 sm:$0xff]  }
 0x237   : > { %6693 = vmatpush1.bf16.msra.mxu0 %v22612_v24  ;;  %6608 = vmatprep.subr.bf16.mxu1 %v22617_v25  ;;  %v22695_v24 = vld [vmem:[%s26902_s20 + $0x106c] ss:$28 sps:$4 sm:$0xff]   ;;  %v22698_v25 = vld [vmem:[%s26902_s20 + $0x274] ss:$28 sps:$4 sm:$0xff]  }
 0x238   : > { %6694 = vmatprep.subr.bf16.mxu0 %v22620_v26  ;;  %v22693_v26 = vld [vmem:[%s26902_s20 + $0x1068] ss:$28 sps:$4 sm:$0xff]  }
 0x23a   : > { %6609 = vmatpush1.bf16.msra.mxu1 %v22615_v29  ;;  %v22696_v29 = vld [vmem:[%s26902_s20 + $0x270] ss:$28 sps:$4 sm:$0xff]  }
 0x23b   : > { %6695 = vmatpush1.bf16.msra.mxu0 %v22618_v30  ;;  %6610 = vmatprep.subr.bf16.mxu1 %v22623_v31  ;;  %v22701_v30 = vld [vmem:[%s26902_s20 + $0x10a4] ss:$28 sps:$4 sm:$0xff]   ;;  %v22704_v31 = vld [vmem:[%s26902_s20 + $0x2ac] ss:$28 sps:$4 sm:$0xff]  }
 0x23c   : > { %6696 = vmatprep.subr.bf16.mxu0 %v22626_v32  ;;  %v22699_v32 = vld [vmem:[%s26902_s20 + $0x10a0] ss:$28 sps:$4 sm:$0xff]  }
 0x23e   : > { %6611 = vmatpush1.bf16.msra.mxu1 %v22621_v33  ;;  %v22702_v33 = vld [vmem:[%s26902_s20 + $0x2a8] ss:$28 sps:$4 sm:$0xff]  }
 0x23f   : > { %6697 = vmatpush1.bf16.msra.mxu0 %v22624_v34  ;;  %6881 = vmatprep.subr.bf16.mxu1 %v22632_v36  ;;  %v22707_v34 = vld [vmem:[%s26902_s20 + $0x10dc] ss:$28 sps:$4 sm:$0xff]  }
 0x240   : > { %6709 = vmatprep.subr.bf16.mxu0 %v22629_v35  ;;  %v22710_v35 = vld [vmem:[%s26902_s20 + $0x2e4] ss:$28 sps:$4 sm:$0xff]   ;;  %v22705_v36 = vld [vmem:[%s26902_s20 + $0x10d8] ss:$28 sps:$4 sm:$0xff]  }
 0x241   : > { %6613 = vmatmul.mubr.bf16.vlgmr.msra.gmra.mrb[0].mxu1 %v27112_v37 }
 0x242   : > { %6699 = vmatmul.mubr.bf16.vlgmr.msra.gmra.mrb[0].mxu0 %v27118_v40  ;;  %6882 = vmatpush1.bf16.msra.mxu1 %v22630_v39  ;;  %v22713_v39 = vld [vmem:[%s26902_s20 + $0x1114] ss:$28 sps:$4 sm:$0xff]  }
 0x243   : > { %6710 = vmatpush1.bf16.msra.mxu0 %v22627_v38  ;;  %6883 = vmatprep.subr.bf16.mxu1 %v22638_v42  ;;  %v22708_v38 = vld [vmem:[%s26902_s20 + $0x2e0] ss:$28 sps:$4 sm:$0xff]   ;;  %v22711_v42 = vld [vmem:[%s26902_s20 + $0x1110] ss:$28 sps:$4 sm:$0xff]  }
 0x244   : > { %6711 = vmatprep.subr.bf16.mxu0 %v22635_v41  ;;  %6741 = vmatprep.mubr.bf16.mxu0 %v27134_v47  ;;  %v22716_v41 = vld [vmem:[%s26902_s20 + $0x31c] ss:$28 sps:$4 sm:$0xff]  }
 0x245   : > { %6913 = vmatprep.mubr.bf16.mxu1 %v26994_v5 }
 0x246   : > { %6884 = vmatpush1.bf16.msra.mxu1 %v22636_v46  ;;  %v22719_v46 = vld [vmem:[%s26902_s20 + $0x114c] ss:$28 sps:$4 sm:$0xff]  }
 0x247   : > { %6712 = vmatpush1.bf16.msra.mxu0 %v22633_v45  ;;  %6885 = vmatprep.subr.bf16.mxu1 %v22644_v49  ;;  %v22714_v45 = vld [vmem:[%s26902_s20 + $0x318] ss:$28 sps:$4 sm:$0xff]   ;;  %v22717_v49 = vld [vmem:[%s26902_s20 + $0x1148] ss:$28 sps:$4 sm:$0xff]  }
 0x248   : > { %6713 = vmatprep.subr.bf16.mxu0 %v22641_v48  ;;  %v22722_v48 = vld [vmem:[%s26902_s20 + $0x354] ss:$28 sps:$4 sm:$0xff]  }
 0x24a   : > { %6886 = vmatpush1.bf16.msra.mxu1 %v22642_v51  ;;  %v22725_v51 = vld [vmem:[%s26902_s20 + $0x1184] ss:$28 sps:$4 sm:$0xff]  }
 0x24b   : > { %6714 = vmatpush1.bf16.msra.mxu0 %v22639_v50  ;;  %6887 = vmatprep.subr.bf16.mxu1 %v22650_v53  ;;  %v22720_v50 = vld [vmem:[%s26902_s20 + $0x350] ss:$28 sps:$4 sm:$0xff]   ;;  %v22723_v53 = vld [vmem:[%s26902_s20 + $0x1180] ss:$28 sps:$4 sm:$0xff]  }
 0x24c   : > { %6715 = vmatprep.subr.bf16.mxu0 %v22647_v52  ;;  %v22728_v52 = vld [vmem:[%s26902_s20 + $0x38c] ss:$28 sps:$4 sm:$0xff]  }
 0x24e   : > { %6888 = vmatpush1.bf16.msra.mxu1 %v22648_v55  ;;  %v27200_v55 = vcombine.low %v27123_v43, %v27128_v44  ;;  %v22729_v43 = vld [vmem:[%s26902_s20 + $0x11b8] ss:$28 sps:$4 sm:$0xff]   ;;  %v22732_v44 = vld [vmem:[%s26902_s20 + $0x3c0] ss:$28 sps:$4 sm:$0xff]  }
 0x24f   : > { %6716 = vmatpush1.bf16.msra.mxu0 %v22645_v54  ;;  %6889 = vmatprep.subr.bf16.mxu1 %v22656_v57  ;;  %v22726_v54 = vld [vmem:[%s26902_s20 + $0x388] ss:$28 sps:$4 sm:$0xff]  }
 0x250   : > { %6717 = vmatprep.subr.bf16.mxu0 %v22653_v56  ;;  %v27203_v56 = vld [vmem:[%s26900_s28 + $0x28] sm:$0xff] }
 0x251   : > { %v27206_v57 = vld [vmem:[%s26900_s28 + $0x68] sm:$0xff] }
 0x252   : > { %6890 = vmatpush1.bf16.msra.mxu1 %v22654_v61  ;;  %v22734_v61 = vld [vmem:[%s26902_s20 + $0x3c4] ss:$28 sps:$4 sm:$0xff]  }
 0x253   : > { %6718 = vmatpush1.bf16.msra.mxu0 %v22651_v60  ;;  %6891 = vmatprep.subr.bf16.mxu1 %v22662_v63  ;;  %v22731_v60 = vld [vmem:[%s26902_s20 + $0x11bc] ss:$28 sps:$4 sm:$0xff]   ;;  %v22737_v63 = vld [vmem:[%s26902_s20 + $0x11f4] ss:$28 sps:$4 sm:$0xff]  }
 0x254   : > { %6719 = vmatprep.subr.bf16.mxu0 %v22659_v62  ;;  %v27212_v62 = vcombine.high %v27203_v56, %v27206_v57 }
 0x256   : > { %6892 = vmatpush1.bf16.msra.mxu1 %v22660_v1  ;;  %v22735_v1 = vld [vmem:[%s26902_s20 + $0x11f0] ss:$28 sps:$4 sm:$0xff]  }
 0x257   : > { %6720 = vmatpush1.bf16.msra.mxu0 %v22657_v0  ;;  %6893 = vmatprep.subr.bf16.mxu1 %v22668_v3  ;;  %v22740_v0 = vld [vmem:[%s26902_s20 + $0x3fc] ss:$28 sps:$4 sm:$0xff]   ;;  %v22743_v3 = vld [vmem:[%s26902_s20 + $0x122c] ss:$28 sps:$4 sm:$0xff]  }
 0x258   : > { %6721 = vmatprep.subr.bf16.mxu0 %v22665_v2  ;;  %v22738_v2 = vld [vmem:[%s26902_s20 + $0x3f8] ss:$28 sps:$4 sm:$0xff]  }
 0x25a   : > { %6894 = vmatpush1.bf16.msra.mxu1 %v22666_v6  ;;  %v22741_v6 = vld [vmem:[%s26902_s20 + $0x1228] ss:$28 sps:$4 sm:$0xff]  }
 0x25b   : > { %6722 = vmatpush1.bf16.msra.mxu0 %v22663_v4  ;;  %6895 = vmatprep.subr.bf16.mxu1 %v22674_v9  ;;  %v22746_v4 = vld [vmem:[%s26902_s20 + $0x434] ss:$28 sps:$4 sm:$0xff]   ;;  %v22749_v9 = vld [vmem:[%s26902_s20 + $0x1264] ss:$28 sps:$4 sm:$0xff]  }
 0x25c   : > { %6723 = vmatprep.subr.bf16.mxu0 %v22671_v7  ;;  %v22744_v7 = vld [vmem:[%s26902_s20 + $0x430] ss:$28 sps:$4 sm:$0xff]  }
 0x25e   : > { %6896 = vmatpush1.bf16.msra.mxu1 %v22672_v11  ;;  %v22747_v11 = vld [vmem:[%s26902_s20 + $0x1260] ss:$28 sps:$4 sm:$0xff]  }
 0x25f   : > { %6724 = vmatpush1.bf16.msra.mxu0 %v22669_v10  ;;  %6897 = vmatprep.subr.bf16.mxu1 %v22680_v13  ;;  %v22752_v10 = vld [vmem:[%s26902_s20 + $0x46c] ss:$28 sps:$4 sm:$0xff]   ;;  %v22755_v13 = vld [vmem:[%s26902_s20 + $0x129c] ss:$28 sps:$4 sm:$0xff]  }
 0x260   : > { %6725 = vmatprep.subr.bf16.mxu0 %v22677_v12  ;;  %v22750_v12 = vld [vmem:[%s26902_s20 + $0x468] ss:$28 sps:$4 sm:$0xff]  }
 0x262   : > { %6898 = vmatpush1.bf16.msra.mxu1 %v22678_v15  ;;  %v22753_v15 = vld [vmem:[%s26902_s20 + $0x1298] ss:$28 sps:$4 sm:$0xff]  }
 0x263   : > { %6726 = vmatpush1.bf16.msra.mxu0 %v22675_v14  ;;  %6899 = vmatprep.subr.bf16.mxu1 %v22686_v17  ;;  %v22758_v14 = vld [vmem:[%s26902_s20 + $0x4a4] ss:$28 sps:$4 sm:$0xff]   ;;  %v22761_v17 = vld [vmem:[%s26902_s20 + $0x12d4] ss:$28 sps:$4 sm:$0xff]  }
 0x264   : > { %6727 = vmatprep.subr.bf16.mxu0 %v22683_v16  ;;  %v22756_v16 = vld [vmem:[%s26902_s20 + $0x4a0] ss:$28 sps:$4 sm:$0xff]  }
 0x266   : > { %6900 = vmatpush1.bf16.msra.mxu1 %v22684_v19  ;;  %v22759_v19 = vld [vmem:[%s26902_s20 + $0x12d0] ss:$28 sps:$4 sm:$0xff]  }
 0x267   : > { %6728 = vmatpush1.bf16.msra.mxu0 %v22681_v18  ;;  %6901 = vmatprep.subr.bf16.mxu1 %v22692_v21  ;;  %v22764_v18 = vld [vmem:[%s26902_s20 + $0x4dc] ss:$28 sps:$4 sm:$0xff]   ;;  %v22767_v21 = vld [vmem:[%s26902_s20 + $0x130c] ss:$28 sps:$4 sm:$0xff]  }
 0x268   : > { %6729 = vmatprep.subr.bf16.mxu0 %v22689_v20  ;;  %v22762_v20 = vld [vmem:[%s26902_s20 + $0x4d8] ss:$28 sps:$4 sm:$0xff]  }
 0x26a   : > { %6902 = vmatpush1.bf16.msra.mxu1 %v22690_v23  ;;  %v22765_v23 = vld [vmem:[%s26902_s20 + $0x1308] ss:$28 sps:$4 sm:$0xff]  }
 0x26b   : > { %6730 = vmatpush1.bf16.msra.mxu0 %v22687_v22  ;;  %6903 = vmatprep.subr.bf16.mxu1 %v22698_v25  ;;  %v22770_v22 = vld [vmem:[%s26902_s20 + $0x514] ss:$28 sps:$4 sm:$0xff]   ;;  %v22773_v25 = vld [vmem:[%s26902_s20 + $0x1344] ss:$28 sps:$4 sm:$0xff]  }
 0x26c   : > { %6731 = vmatprep.subr.bf16.mxu0 %v22695_v24  ;;  %v22768_v24 = vld [vmem:[%s26902_s20 + $0x510] ss:$28 sps:$4 sm:$0xff]  }
 0x26e   : > { %6904 = vmatpush1.bf16.msra.mxu1 %v22696_v29  ;;  %v22771_v29 = vld [vmem:[%s26902_s20 + $0x1340] ss:$28 sps:$4 sm:$0xff]  }
 0x26f   : > { %6732 = vmatpush1.bf16.msra.mxu0 %v22693_v26  ;;  %6905 = vmatprep.subr.bf16.mxu1 %v22704_v31  ;;  %v22776_v26 = vld [vmem:[%s26902_s20 + $0x54c] ss:$28 sps:$4 sm:$0xff]   ;;  %v22779_v31 = vld [vmem:[%s26902_s20 + $0x137c] ss:$28 sps:$4 sm:$0xff]  }
 0x270   : > { %6733 = vmatprep.subr.bf16.mxu0 %v22701_v30  ;;  %v22774_v30 = vld [vmem:[%s26902_s20 + $0x548] ss:$28 sps:$4 sm:$0xff]  }
 0x272   : > { %6906 = vmatpush1.bf16.msra.mxu1 %v22702_v33  ;;  %v22777_v33 = vld [vmem:[%s26902_s20 + $0x1378] ss:$28 sps:$4 sm:$0xff]  }
 0x273   : > { %6734 = vmatpush1.bf16.msra.mxu0 %v22699_v32  ;;  %6907 = vmatprep.subr.bf16.mxu1 %v22710_v35  ;;  %v22782_v32 = vld [vmem:[%s26902_s20 + $0x584] ss:$28 sps:$4 sm:$0xff]   ;;  %v22785_v35 = vld [vmem:[%s26902_s20 + $0x13b4] ss:$28 sps:$4 sm:$0xff]  }
 0x274   : > { %6735 = vmatprep.subr.bf16.mxu0 %v22707_v34  ;;  %v22780_v34 = vld [vmem:[%s26902_s20 + $0x580] ss:$28 sps:$4 sm:$0xff]  }
 0x276   : > { %6908 = vmatpush1.bf16.msra.mxu1 %v22708_v38  ;;  %v22783_v38 = vld [vmem:[%s26902_s20 + $0x13b0] ss:$28 sps:$4 sm:$0xff]  }
 0x277   : > { %6736 = vmatpush1.bf16.msra.mxu0 %v22705_v36  ;;  %6909 = vmatprep.subr.bf16.mxu1 %v22716_v41  ;;  %v22788_v36 = vld [vmem:[%s26902_s20 + $0x5bc] ss:$28 sps:$4 sm:$0xff]   ;;  %v22791_v41 = vld [vmem:[%s26902_s20 + $0x13ec] ss:$28 sps:$4 sm:$0xff]  }
 0x278   : > { %6737 = vmatprep.subr.bf16.mxu0 %v22713_v39  ;;  %v22786_v39 = vld [vmem:[%s26902_s20 + $0x5b8] ss:$28 sps:$4 sm:$0xff]  }
 0x27a   : > { %6910 = vmatpush1.bf16.msra.mxu1 %v22714_v45  ;;  %v22789_v45 = vld [vmem:[%s26902_s20 + $0x13e8] ss:$28 sps:$4 sm:$0xff]  }
 0x27b   : > { %6738 = vmatpush1.bf16.msra.mxu0 %v22711_v42  ;;  %6911 = vmatprep.subr.bf16.mxu1 %v22722_v48  ;;  %v22794_v42 = vld [vmem:[%s26902_s20 + $0x5f4] ss:$28 sps:$4 sm:$0xff]   ;;  %v22797_v48 = vld [vmem:[%s26902_s20 + $0x1424] ss:$28 sps:$4 sm:$0xff]  }
 0x27c   : > { %6739 = vmatprep.subr.bf16.mxu0 %v22719_v46  ;;  %v22792_v46 = vld [vmem:[%s26902_s20 + $0x5f0] ss:$28 sps:$4 sm:$0xff]  }
 0x27e   : > { %6912 = vmatpush1.bf16.msra.mxu1 %v22720_v50  ;;  %v22795_v50 = vld [vmem:[%s26902_s20 + $0x1420] ss:$28 sps:$4 sm:$0xff]  }
 0x27f   : > { %6740 = vmatpush1.bf16.msra.mxu0 %v22717_v49  ;;  %6924 = vmatprep.subr.bf16.mxu1 %v22728_v52  ;;  %v22800_v49 = vld [vmem:[%s26902_s20 + $0x62c] ss:$28 sps:$4 sm:$0xff]   ;;  %v22803_v52 = vld [vmem:[%s26902_s20 + $0x145c] ss:$28 sps:$4 sm:$0xff]  }
 0x280   : > { %6752 = vmatprep.subr.bf16.mxu0 %v22725_v51  ;;  %v22798_v51 = vld [vmem:[%s26902_s20 + $0x628] ss:$28 sps:$4 sm:$0xff]  }
 0x281   : > { %6914 = vmatmul.mubr.bf16.vlgmr.msra.gmra.mrb[4].mxu1 %v27020_v27 }
 0x282   : > { %6742 = vmatmul.mubr.bf16.vlgmr.msra.gmra.mrb[0].mxu0 %v27200_v55  ;;  %6925 = vmatpush1.bf16.msra.mxu1 %v22726_v54  ;;  %v22801_v54 = vld [vmem:[%s26902_s20 + $0x1458] ss:$28 sps:$4 sm:$0xff]  }
 0x283   : > { %6753 = vmatpush1.bf16.msra.mxu0 %v22723_v53  ;;  %6926 = vmatprep.subr.bf16.mxu1 %v22734_v61  ;;  %v22806_v53 = vld [vmem:[%s26902_s20 + $0x664] ss:$28 sps:$4 sm:$0xff]   ;;  %v22809_v61 = vld [vmem:[%s26902_s20 + $0x1494] ss:$28 sps:$4 sm:$0xff]  }
 0x284   : > { %6754 = vmatprep.subr.bf16.mxu0 %v22731_v60  ;;  %6784 = vmatprep.mubr.bf16.mxu0 %v27212_v62  ;;  %v22804_v60 = vld [vmem:[%s26902_s20 + $0x660] ss:$28 sps:$4 sm:$0xff]  }
 0x285   : > { %6956 = vmatprep.mubr.bf16.mxu1 %v27065_v58 }
 0x286   : > { %6927 = vmatpush1.bf16.msra.mxu1 %v22732_v44  ;;  %v22807_v44 = vld [vmem:[%s26902_s20 + $0x1490] ss:$28 sps:$4 sm:$0xff]  }
 0x287   : > { %6755 = vmatpush1.bf16.msra.mxu0 %v22729_v43  ;;  %6928 = vmatprep.subr.bf16.mxu1 %v22740_v0  ;;  %v22812_v43 = vld [vmem:[%s26902_s20 + $0x69c] ss:$28 sps:$4 sm:$0xff]   ;;  %v22815_v0 = vld [vmem:[%s26902_s20 + $0x14cc] ss:$28 sps:$4 sm:$0xff]  }
 0x288   : > { %6756 = vmatprep.subr.bf16.mxu0 %v22737_v63  ;;  %v22810_v63 = vld [vmem:[%s26902_s20 + $0x698] ss:$28 sps:$4 sm:$0xff]  }
 0x28a   : > { %6929 = vmatpush1.bf16.msra.mxu1 %v22738_v2  ;;  %v22813_v2 = vld [vmem:[%s26902_s20 + $0x14c8] ss:$28 sps:$4 sm:$0xff]  }
 0x28b   : > { %6757 = vmatpush1.bf16.msra.mxu0 %v22735_v1  ;;  %6930 = vmatprep.subr.bf16.mxu1 %v22746_v4  ;;  %v22818_v1 = vld [vmem:[%s26902_s20 + $0x6d4] ss:$28 sps:$4 sm:$0xff]   ;;  %v22821_v4 = vld [vmem:[%s26902_s20 + $0x1504] ss:$28 sps:$4 sm:$0xff]  }
 0x28c   : > { %6758 = vmatprep.subr.bf16.mxu0 %v22743_v3  ;;  %v22816_v3 = vld [vmem:[%s26902_s20 + $0x6d0] ss:$28 sps:$4 sm:$0xff]  }
 0x28e   : > { %6931 = vmatpush1.bf16.msra.mxu1 %v22744_v7  ;;  %v27279_v7 = vld [vmem:[%s26900_s28 + $0x30] sm:$0xff] }
 0x28f   : > { %6759 = vmatpush1.bf16.msra.mxu0 %v22741_v6  ;;  %6932 = vmatprep.subr.bf16.mxu1 %v22752_v10  ;;  %v22824_v6 = vld [vmem:[%s26902_s20 + $0x70c] ss:$28 sps:$4 sm:$0xff]   ;;  %v27286_v10 = vld [vmem:[%s26900_s28 + $0x70] sm:$0xff] }
 0x290   : > { %6760 = vmatprep.subr.bf16.mxu0 %v22749_v9  ;;  %v27283_v9 = vcombine.low %v27203_v56, %v27206_v57  ;;  %v22825_v56 = vld [vmem:[%s26902_s20 + $0x1538] ss:$28 sps:$4 sm:$0xff]   ;;  %v22828_v57 = vld [vmem:[%s26902_s20 + $0x740] ss:$28 sps:$4 sm:$0xff]  }
 0x292   : > { %6933 = vmatpush1.bf16.msra.mxu1 %v22750_v12  ;;  %v22822_v12 = vld [vmem:[%s26902_s20 + $0x708] ss:$28 sps:$4 sm:$0xff]  }
 0x293   : > { %6761 = vmatpush1.bf16.msra.mxu0 %v22747_v11  ;;  %6934 = vmatprep.subr.bf16.mxu1 %v22758_v14  ;;  %v22819_v11 = vld [vmem:[%s26902_s20 + $0x1500] ss:$28 sps:$4 sm:$0xff]  }
 0x294   : > { %6762 = vmatprep.subr.bf16.mxu0 %v22755_v13  ;;  %v22827_v13 = vld [vmem:[%s26902_s20 + $0x153c] ss:$28 sps:$4 sm:$0xff]   ;;  %v22830_v14 = vld [vmem:[%s26902_s20 + $0x744] ss:$28 sps:$4 sm:$0xff]  }
 0x296   : > { %6935 = vmatpush1.bf16.msra.mxu1 %v22756_v16  ;;  %v22833_v16 = vld [vmem:[%s26902_s20 + $0x1574] ss:$28 sps:$4 sm:$0xff]  }
 0x297   : > { %6763 = vmatpush1.bf16.msra.mxu0 %v22753_v15  ;;  %6936 = vmatprep.subr.bf16.mxu1 %v22764_v18  ;;  %v27294_v15 = vcombine.high %v27279_v7, %v27286_v10  ;;  %v22831_v18 = vld [vmem:[%s26902_s20 + $0x1570] ss:$28 sps:$4 sm:$0xff]  }
 0x298   : > { %6764 = vmatprep.subr.bf16.mxu0 %v22761_v17  ;;  %v22836_v17 = vld [vmem:[%s26902_s20 + $0x77c] ss:$28 sps:$4 sm:$0xff]  }
 0x29a   : > { %6937 = vmatpush1.bf16.msra.mxu1 %v22762_v20  ;;  %v22839_v20 = vld [vmem:[%s26902_s20 + $0x15ac] ss:$28 sps:$4 sm:$0xff]  }
 0x29b   : > { %6765 = vmatpush1.bf16.msra.mxu0 %v22759_v19  ;;  %6938 = vmatprep.subr.bf16.mxu1 %v22770_v22  ;;  %v22834_v19 = vld [vmem:[%s26902_s20 + $0x778] ss:$28 sps:$4 sm:$0xff]   ;;  %v22837_v22 = vld [vmem:[%s26902_s20 + $0x15a8] ss:$28 sps:$4 sm:$0xff]  }
 0x29c   : > { %6766 = vmatprep.subr.bf16.mxu0 %v22767_v21  ;;  %v22842_v21 = vld [vmem:[%s26902_s20 + $0x7b4] ss:$28 sps:$4 sm:$0xff]  }
 0x29e   : > { %6939 = vmatpush1.bf16.msra.mxu1 %v22768_v24  ;;  %v22845_v24 = vld [vmem:[%s26902_s20 + $0x15e4] ss:$28 sps:$4 sm:$0xff]  }
 0x29f   : > { %6767 = vmatpush1.bf16.msra.mxu0 %v22765_v23  ;;  %6940 = vmatprep.subr.bf16.mxu1 %v22776_v26  ;;  %v22840_v23 = vld [vmem:[%s26902_s20 + $0x7b0] ss:$28 sps:$4 sm:$0xff]   ;;  %v22843_v26 = vld [vmem:[%s26902_s20 + $0x15e0] ss:$28 sps:$4 sm:$0xff]  }
 0x2a0   : > { %6768 = vmatprep.subr.bf16.mxu0 %v22773_v25  ;;  %v22848_v25 = vld [vmem:[%s26902_s20 + $0x7ec] ss:$28 sps:$4 sm:$0xff]  }
 0x2a2   : > { %6941 = vmatpush1.bf16.msra.mxu1 %v22774_v30  ;;  %v22851_v30 = vld [vmem:[%s26902_s20 + $0x161c] ss:$28 sps:$4 sm:$0xff]  }
 0x2a3   : > { %6769 = vmatpush1.bf16.msra.mxu0 %v22771_v29  ;;  %6942 = vmatprep.subr.bf16.mxu1 %v22782_v32  ;;  %v22846_v29 = vld [vmem:[%s26902_s20 + $0x7e8] ss:$28 sps:$4 sm:$0xff]   ;;  %v22849_v32 = vld [vmem:[%s26902_s20 + $0x1618] ss:$28 sps:$4 sm:$0xff]  }
 0x2a4   : > { %6770 = vmatprep.subr.bf16.mxu0 %v22779_v31  ;;  %v22854_v31 = vld [vmem:[%s26902_s20 + $0x824] ss:$28 sps:$4 sm:$0xff]  }
 0x2a6   : > { %6943 = vmatpush1.bf16.msra.mxu1 %v22780_v34  ;;  %v22857_v34 = vld [vmem:[%s26902_s20 + $0x1654] ss:$28 sps:$4 sm:$0xff]  }
 0x2a7   : > { %6771 = vmatpush1.bf16.msra.mxu0 %v22777_v33  ;;  %6944 = vmatprep.subr.bf16.mxu1 %v22788_v36  ;;  %v22852_v33 = vld [vmem:[%s26902_s20 + $0x820] ss:$28 sps:$4 sm:$0xff]   ;;  %v22855_v36 = vld [vmem:[%s26902_s20 + $0x1650] ss:$28 sps:$4 sm:$0xff]  }
 0x2a8   : > { %6772 = vmatprep.subr.bf16.mxu0 %v22785_v35  ;;  %v22860_v35 = vld [vmem:[%s26902_s20 + $0x85c] ss:$28 sps:$4 sm:$0xff]  }
 0x2aa   : > { %6945 = vmatpush1.bf16.msra.mxu1 %v22786_v39  ;;  %v22863_v39 = vld [vmem:[%s26902_s20 + $0x168c] ss:$28 sps:$4 sm:$0xff]  }
 0x2ab   : > { %6773 = vmatpush1.bf16.msra.mxu0 %v22783_v38  ;;  %6946 = vmatprep.subr.bf16.mxu1 %v22794_v42  ;;  %v22858_v38 = vld [vmem:[%s26902_s20 + $0x858] ss:$28 sps:$4 sm:$0xff]   ;;  %v22861_v42 = vld [vmem:[%s26902_s20 + $0x1688] ss:$28 sps:$4 sm:$0xff]  }
 0x2ac   : > { %6774 = vmatprep.subr.bf16.mxu0 %v22791_v41  ;;  %v22866_v41 = vld [vmem:[%s26902_s20 + $0x894] ss:$28 sps:$4 sm:$0xff]  }
 0x2ae   : > { %6947 = vmatpush1.bf16.msra.mxu1 %v22792_v46  ;;  %v22869_v46 = vld [vmem:[%s26902_s20 + $0x16c4] ss:$28 sps:$4 sm:$0xff]  }
 0x2af   : > { %6775 = vmatpush1.bf16.msra.mxu0 %v22789_v45  ;;  %6948 = vmatprep.subr.bf16.mxu1 %v22800_v49  ;;  %v22864_v45 = vld [vmem:[%s26902_s20 + $0x890] ss:$28 sps:$4 sm:$0xff]   ;;  %v22867_v49 = vld [vmem:[%s26902_s20 + $0x16c0] ss:$28 sps:$4 sm:$0xff]  }
 0x2b0   : > { %6776 = vmatprep.subr.bf16.mxu0 %v22797_v48  ;;  %v22872_v48 = vld [vmem:[%s26902_s20 + $0x8cc] ss:$28 sps:$4 sm:$0xff]  }
 0x2b2   : > { %6949 = vmatpush1.bf16.msra.mxu1 %v22798_v51  ;;  %v22875_v51 = vld [vmem:[%s26902_s20 + $0x16fc] ss:$28 sps:$4 sm:$0xff]  }
 0x2b3   : > { %6777 = vmatpush1.bf16.msra.mxu0 %v22795_v50  ;;  %6950 = vmatprep.subr.bf16.mxu1 %v22806_v53  ;;  %v22870_v50 = vld [vmem:[%s26902_s20 + $0x8c8] ss:$28 sps:$4 sm:$0xff]   ;;  %v22873_v53 = vld [vmem:[%s26902_s20 + $0x16f8] ss:$28 sps:$4 sm:$0xff]  }
 0x2b4   : > { %6778 = vmatprep.subr.bf16.mxu0 %v22803_v52  ;;  %v22878_v52 = vld [vmem:[%s26902_s20 + $0x904] ss:$28 sps:$4 sm:$0xff]  }
 0x2b6   : > { %6951 = vmatpush1.bf16.msra.mxu1 %v22804_v60  ;;  %v22881_v60 = vld [vmem:[%s26902_s20 + $0x1734] ss:$28 sps:$4 sm:$0xff]  }
 0x2b7   : > { %6779 = vmatpush1.bf16.msra.mxu0 %v22801_v54  ;;  %6952 = vmatprep.subr.bf16.mxu1 %v22812_v43  ;;  %v22876_v54 = vld [vmem:[%s26902_s20 + $0x900] ss:$28 sps:$4 sm:$0xff]   ;;  %v22879_v43 = vld [vmem:[%s26902_s20 + $0x1730] ss:$28 sps:$4 sm:$0xff]  }
 0x2b8   : > { %6780 = vmatprep.subr.bf16.mxu0 %v22809_v61  ;;  %v22884_v61 = vld [vmem:[%s26902_s20 + $0x93c] ss:$28 sps:$4 sm:$0xff]  }
 0x2ba   : > { %6953 = vmatpush1.bf16.msra.mxu1 %v22810_v63  ;;  %v22887_v63 = vld [vmem:[%s26902_s20 + $0x176c] ss:$28 sps:$4 sm:$0xff]  }
 0x2bb   : > { %6781 = vmatpush1.bf16.msra.mxu0 %v22807_v44  ;;  %6954 = vmatprep.subr.bf16.mxu1 %v22818_v1  ;;  %v22882_v44 = vld [vmem:[%s26902_s20 + $0x938] ss:$28 sps:$4 sm:$0xff]   ;;  %v22885_v1 = vld [vmem:[%s26902_s20 + $0x1768] ss:$28 sps:$4 sm:$0xff]  }
 0x2bc   : > { %6782 = vmatprep.subr.bf16.mxu0 %v22815_v0  ;;  %v22890_v0 = vld [vmem:[%s26902_s20 + $0x974] ss:$28 sps:$4 sm:$0xff]  }
 0x2be   : > { %6955 = vmatpush1.bf16.msra.mxu1 %v22816_v3  ;;  %v22893_v3 = vld [vmem:[%s26902_s20 + $0x17a4] ss:$28 sps:$4 sm:$0xff]  }
 0x2bf   : > { %6783 = vmatpush1.bf16.msra.mxu0 %v22813_v2  ;;  %6967 = vmatprep.subr.bf16.mxu1 %v22824_v6  ;;  %v22888_v2 = vld [vmem:[%s26902_s20 + $0x970] ss:$28 sps:$4 sm:$0xff]   ;;  %v22891_v6 = vld [vmem:[%s26902_s20 + $0x17a0] ss:$28 sps:$4 sm:$0xff]  }
 0x2c0   : > { %6795 = vmatprep.subr.bf16.mxu0 %v22821_v4  ;;  %v22896_v4 = vld [vmem:[%s26902_s20 + $0x9ac] ss:$28 sps:$4 sm:$0xff]  }
 0x2c1   : > { %6957 = vmatmul.mubr.bf16.vlgmr.msra.gmra.mrb[4].mxu1 %v27112_v37 }
 0x2c2   : > { %6785 = vmatmul.mubr.bf16.vlgmr.msra.gmra.mrb[0].mxu0 %v27283_v9  ;;  %6968 = vmatpush1.bf16.msra.mxu1 %v22822_v12  ;;  %v22899_v12 = vld [vmem:[%s26902_s20 + $0x17dc] ss:$28 sps:$4 sm:$0xff]  }
 0x2c3   : > { %6796 = vmatpush1.bf16.msra.mxu0 %v22819_v11  ;;  %6969 = vmatprep.subr.bf16.mxu1 %v22830_v14  ;;  %v22894_v11 = vld [vmem:[%s26902_s20 + $0x9a8] ss:$28 sps:$4 sm:$0xff]   ;;  %v22897_v14 = vld [vmem:[%s26902_s20 + $0x17d8] ss:$28 sps:$4 sm:$0xff]  }
 0x2c4   : > { %6797 = vmatprep.subr.bf16.mxu0 %v22827_v13  ;;  %6827 = vmatprep.mubr.bf16.mxu0 %v27294_v15  ;;  %v22902_v13 = vld [vmem:[%s26902_s20 + $0x9e4] ss:$28 sps:$4 sm:$0xff]  }
 0x2c5   : > { %6999 = vmatprep.mubr.bf16.mxu1 %v26999_v8 }
 0x2c6   : > { %6970 = vmatpush1.bf16.msra.mxu1 %v22828_v57  ;;  %v22905_v57 = vld [vmem:[%s26902_s20 + $0x1814] ss:$28 sps:$4 sm:$0xff]  }
 0x2c7   : > { %6798 = vmatpush1.bf16.msra.mxu0 %v22825_v56  ;;  %6971 = vmatprep.subr.bf16.mxu1 %v22836_v17  ;;  %v22900_v56 = vld [vmem:[%s26902_s20 + $0x9e0] ss:$28 sps:$4 sm:$0xff]   ;;  %v22903_v17 = vld [vmem:[%s26902_s20 + $0x1810] ss:$28 sps:$4 sm:$0xff]  }
 0x2c8   : > { %6799 = vmatprep.subr.bf16.mxu0 %v22833_v16  ;;  %v22908_v16 = vld [vmem:[%s26902_s20 + $0xa1c] ss:$28 sps:$4 sm:$0xff]  }
 0x2ca   : > { %6972 = vmatpush1.bf16.msra.mxu1 %v22834_v19  ;;  %v22911_v19 = vld [vmem:[%s26902_s20 + $0x184c] ss:$28 sps:$4 sm:$0xff]  }
 0x2cb   : > { %6800 = vmatpush1.bf16.msra.mxu0 %v22831_v18  ;;  %6973 = vmatprep.subr.bf16.mxu1 %v22842_v21  ;;  %v22906_v18 = vld [vmem:[%s26902_s20 + $0xa18] ss:$28 sps:$4 sm:$0xff]   ;;  %v22909_v21 = vld [vmem:[%s26902_s20 + $0x1848] ss:$28 sps:$4 sm:$0xff]  }
 0x2cc   : > { %6801 = vmatprep.subr.bf16.mxu0 %v22839_v20  ;;  %v22914_v20 = vld [vmem:[%s26902_s20 + $0xa54] ss:$28 sps:$4 sm:$0xff]  }
 0x2ce   : > { %6974 = vmatpush1.bf16.msra.mxu1 %v22840_v23  ;;  %v22917_v23 = vld [vmem:[%s26902_s20 + $0x1884] ss:$28 sps:$4 sm:$0xff]  }
 0x2cf   : > { %6802 = vmatpush1.bf16.msra.mxu0 %v22837_v22  ;;  %6975 = vmatprep.subr.bf16.mxu1 %v22848_v25  ;;  %v22912_v22 = vld [vmem:[%s26902_s20 + $0xa50] ss:$28 sps:$4 sm:$0xff]   ;;  %v27361_v25 = vld [vmem:[%s26900_s28 + $0x38] sm:$0xff] }
 0x2d0   : > { %6803 = vmatprep.subr.bf16.mxu0 %v22845_v24  ;;  %v22920_v24 = vld [vmem:[%s26902_s20 + $0xa8c] ss:$28 sps:$4 sm:$0xff]  }
 0x2d2   : > { %6976 = vmatpush1.bf16.msra.mxu1 %v22846_v29  ;;  %v27368_v29 = vcombine.low %v27279_v7, %v27286_v10  ;;  %v22921_v7 = vld [vmem:[%s26902_s20 + $0x18b8] ss:$28 sps:$4 sm:$0xff]   ;;  %v22924_v10 = vld [vmem:[%s26902_s20 + $0xac0] ss:$28 sps:$4 sm:$0xff]  }
 0x2d3   : > { %6804 = vmatpush1.bf16.msra.mxu0 %v22843_v26  ;;  %6977 = vmatprep.subr.bf16.mxu1 %v22854_v31  ;;  %v27364_v26 = vld [vmem:[%s26900_s28 + $0x78] sm:$0xff]  ;;  %v22918_v31 = vld [vmem:[%s26902_s20 + $0xa88] ss:$28 sps:$4 sm:$0xff]  }
 0x2d4   : > { %6805 = vmatprep.subr.bf16.mxu0 %v22851_v30  ;;  %v22915_v30 = vld [vmem:[%s26902_s20 + $0x1880] ss:$28 sps:$4 sm:$0xff]  }
 0x2d6   : > { %6978 = vmatpush1.bf16.msra.mxu1 %v22852_v33  ;;  %v22926_v33 = vld [vmem:[%s26902_s20 + $0xac4] ss:$28 sps:$4 sm:$0xff]  }
 0x2d7   : > { %6806 = vmatpush1.bf16.msra.mxu0 %v22849_v32  ;;  %6979 = vmatprep.subr.bf16.mxu1 %v22860_v35  ;;  %v22923_v32 = vld [vmem:[%s26902_s20 + $0x18bc] ss:$28 sps:$4 sm:$0xff]   ;;  %v22929_v35 = vld [vmem:[%s26902_s20 + $0x18f4] ss:$28 sps:$4 sm:$0xff]  }
 0x2d8   : > { %6807 = vmatprep.subr.bf16.mxu0 %v22857_v34  ;;  %v27376_v34 = vcombine.high %v27361_v25, %v27364_v26 }
 0x2da   : > { %6980 = vmatpush1.bf16.msra.mxu1 %v22858_v38  ;;  %v22927_v38 = vld [vmem:[%s26902_s20 + $0x18f0] ss:$28 sps:$4 sm:$0xff]  }
 0x2db   : > { %6808 = vmatpush1.bf16.msra.mxu0 %v22855_v36  ;;  %6981 = vmatprep.subr.bf16.mxu1 %v22866_v41  ;;  %v22932_v36 = vld [vmem:[%s26902_s20 + $0xafc] ss:$28 sps:$4 sm:$0xff]   ;;  %v22935_v41 = vld [vmem:[%s26902_s20 + $0x192c] ss:$28 sps:$4 sm:$0xff]  }
 0x2dc   : > { %6809 = vmatprep.subr.bf16.mxu0 %v22863_v39  ;;  %v22930_v39 = vld [vmem:[%s26902_s20 + $0xaf8] ss:$28 sps:$4 sm:$0xff]  }
 0x2de   : > { %6982 = vmatpush1.bf16.msra.mxu1 %v22864_v45  ;;  %v22933_v45 = vld [vmem:[%s26902_s20 + $0x1928] ss:$28 sps:$4 sm:$0xff]  }
 0x2df   : > { %6810 = vmatpush1.bf16.msra.mxu0 %v22861_v42  ;;  %6983 = vmatprep.subr.bf16.mxu1 %v22872_v48  ;;  %v22938_v42 = vld [vmem:[%s26902_s20 + $0xb34] ss:$28 sps:$4 sm:$0xff]   ;;  %v22941_v48 = vld [vmem:[%s26902_s20 + $0x1964] ss:$28 sps:$4 sm:$0xff]  }
 0x2e0   : > { %6811 = vmatprep.subr.bf16.mxu0 %v22869_v46  ;;  %v22936_v46 = vld [vmem:[%s26902_s20 + $0xb30] ss:$28 sps:$4 sm:$0xff]  }
 0x2e2   : > { %6984 = vmatpush1.bf16.msra.mxu1 %v22870_v50  ;;  %v22939_v50 = vld [vmem:[%s26902_s20 + $0x1960] ss:$28 sps:$4 sm:$0xff]  }
 0x2e3   : > { %6812 = vmatpush1.bf16.msra.mxu0 %v22867_v49  ;;  %6985 = vmatprep.subr.bf16.mxu1 %v22878_v52  ;;  %v22944_v49 = vld [vmem:[%s26902_s20 + $0xb6c] ss:$28 sps:$4 sm:$0xff]   ;;  %v22947_v52 = vld [vmem:[%s26902_s20 + $0x199c] ss:$28 sps:$4 sm:$0xff]  }
 0x2e4   : > { %6813 = vmatprep.subr.bf16.mxu0 %v22875_v51  ;;  %v22942_v51 = vld [vmem:[%s26902_s20 + $0xb68] ss:$28 sps:$4 sm:$0xff]  }
 0x2e6   : > { %6986 = vmatpush1.bf16.msra.mxu1 %v22876_v54  ;;  %v22945_v54 = vld [vmem:[%s26902_s20 + $0x1998] ss:$28 sps:$4 sm:$0xff]  }
 0x2e7   : > { %6814 = vmatpush1.bf16.msra.mxu0 %v22873_v53  ;;  %6987 = vmatprep.subr.bf16.mxu1 %v22884_v61  ;;  %v22950_v53 = vld [vmem:[%s26902_s20 + $0xba4] ss:$28 sps:$4 sm:$0xff]   ;;  %v22953_v61 = vld [vmem:[%s26902_s20 + $0x19d4] ss:$28 sps:$4 sm:$0xff]  }
 0x2e8   : > { %6815 = vmatprep.subr.bf16.mxu0 %v22881_v60  ;;  %v22948_v60 = vld [vmem:[%s26902_s20 + $0xba0] ss:$28 sps:$4 sm:$0xff]  }
 0x2ea   : > { %6988 = vmatpush1.bf16.msra.mxu1 %v22882_v44 }
 0x2eb   : > { %6816 = vmatpush1.bf16.msra.mxu0 %v22879_v43  ;;  %6989 = vmatprep.subr.bf16.mxu1 %v22890_v0  ;;  %v22956_v43 = vld [vmem:[%s26902_s20 + $0xbdc] ss:$28 sps:$4 sm:$0xff]  }
 0x2ec   : > { %6817 = vmatprep.subr.bf16.mxu0 %v22887_v63 }
 0x2ee   : > { %6990 = vmatpush1.bf16.msra.mxu1 %v22888_v2  ;;  %v22954_v2 = vld [vmem:[%s26902_s20 + $0xbd8] ss:$28 sps:$4 sm:$0xff]  }
 0x2ef   : > { %6818 = vmatpush1.bf16.msra.mxu0 %v22885_v1  ;;  %6991 = vmatprep.subr.bf16.mxu1 %v22896_v4  ;;  %v22951_v1 = vld [vmem:[%s26902_s20 + $0x19d0] ss:$28 sps:$4 sm:$0xff]  }
 0x2f0   : > { %6819 = vmatprep.subr.bf16.mxu0 %v22893_v3  ;;  %v22959_v4 = vld [vmem:[%s26902_s20 + $0x1a0c] ss:$28 sps:$4 sm:$0xff]  }
 0x2f2   : > { %6992 = vmatpush1.bf16.msra.mxu1 %v22894_v11  ;;  %v22957_v11 = vld [vmem:[%s26902_s20 + $0x1a08] ss:$28 sps:$4 sm:$0xff]  }
 0x2f3   : > { %6820 = vmatpush1.bf16.msra.mxu0 %v22891_v6  ;;  %6993 = vmatprep.subr.bf16.mxu1 %v22902_v13  ;;  %v22962_v6 = vld [vmem:[%s26902_s20 + $0xc14] ss:$28 sps:$4 sm:$0xff]   ;;  %v22965_v13 = vld [vmem:[%s26902_s20 + $0x1a44] ss:$28 sps:$4 sm:$0xff]  }
 0x2f4   : > { %6821 = vmatprep.subr.bf16.mxu0 %v22899_v12  ;;  %v22960_v12 = vld [vmem:[%s26902_s20 + $0xc10] ss:$28 sps:$4 sm:$0xff]  }
 0x2f6   : > { %6994 = vmatpush1.bf16.msra.mxu1 %v22900_v56  ;;  %v22963_v56 = vld [vmem:[%s26902_s20 + $0x1a40] ss:$28 sps:$4 sm:$0xff]  }
 0x2f7   : > { %6822 = vmatpush1.bf16.msra.mxu0 %v22897_v14  ;;  %6995 = vmatprep.subr.bf16.mxu1 %v22908_v16  ;;  %v22968_v14 = vld [vmem:[%s26902_s20 + $0xc4c] ss:$28 sps:$4 sm:$0xff]   ;;  %v22971_v16 = vld [vmem:[%s26902_s20 + $0x1a7c] ss:$28 sps:$4 sm:$0xff]  }
 0x2f8   : > { %6823 = vmatprep.subr.bf16.mxu0 %v22905_v57  ;;  %v22966_v57 = vld [vmem:[%s26902_s20 + $0xc48] ss:$28 sps:$4 sm:$0xff]  }
 0x2fa   : > { %6996 = vmatpush1.bf16.msra.mxu1 %v22906_v18  ;;  %v22969_v18 = vld [vmem:[%s26902_s20 + $0x1a78] ss:$28 sps:$4 sm:$0xff]  }
 0x2fb   : > { %6824 = vmatpush1.bf16.msra.mxu0 %v22903_v17  ;;  %6997 = vmatprep.subr.bf16.mxu1 %v22914_v20  ;;  %v22974_v17 = vld [vmem:[%s26902_s20 + $0xc84] ss:$28 sps:$4 sm:$0xff]   ;;  %v22977_v20 = vld [vmem:[%s26902_s20 + $0x1ab4] ss:$28 sps:$4 sm:$0xff]  }
 0x2fc   : > { %6825 = vmatprep.subr.bf16.mxu0 %v22911_v19  ;;  %v22972_v19 = vld [vmem:[%s26902_s20 + $0xc80] ss:$28 sps:$4 sm:$0xff]  }
 0x2fe   : > { %6998 = vmatpush1.bf16.msra.mxu1 %v22912_v22  ;;  %v22975_v22 = vld [vmem:[%s26902_s20 + $0x1ab0] ss:$28 sps:$4 sm:$0xff]  }
 0x2ff   : > { %6826 = vmatpush1.bf16.msra.mxu0 %v22909_v21  ;;  %7010 = vmatprep.subr.bf16.mxu1 %v22920_v24  ;;  %v22980_v21 = vld [vmem:[%s26902_s20 + $0xcbc] ss:$28 sps:$4 sm:$0xff]   ;;  %v22983_v24 = vld [vmem:[%s26902_s20 + $0x1aec] ss:$28 sps:$4 sm:$0xff]  }
 0x300   : > { %6838 = vmatprep.subr.bf16.mxu0 %v22917_v23  ;;  %v22978_v23 = vld [vmem:[%s26902_s20 + $0xcb8] ss:$28 sps:$4 sm:$0xff]  }
 0x301   : > { %7000 = vmatmul.mubr.bf16.vlgmr.msra.gmra.mrb[4].mxu1 %v27022_v28 }
 0x302   : > { %6828 = vmatmul.mubr.bf16.vlgmr.msra.gmra.mrb[0].mxu0 %v27368_v29  ;;  %7011 = vmatpush1.bf16.msra.mxu1 %v22918_v31  ;;  %v22981_v31 = vld [vmem:[%s26902_s20 + $0x1ae8] ss:$28 sps:$4 sm:$0xff]  }
 0x303   : > { %6839 = vmatpush1.bf16.msra.mxu0 %v22915_v30  ;;  %7012 = vmatprep.subr.bf16.mxu1 %v22926_v33  ;;  %v22986_v30 = vld [vmem:[%s26902_s20 + $0xcf4] ss:$28 sps:$4 sm:$0xff]   ;;  %v22989_v33 = vld [vmem:[%s26902_s20 + $0x1b24] ss:$28 sps:$4 sm:$0xff]  }
 0x304   : > { %6840 = vmatprep.subr.bf16.mxu0 %v22923_v32  ;;  %6870 = vmatprep.mubr.bf16.mxu0 %v27376_v34  ;;  %v22984_v32 = vld [vmem:[%s26902_s20 + $0xcf0] ss:$28 sps:$4 sm:$0xff]  }
 0x305   : > { %7042 = vmatprep.mubr.bf16.mxu1 %v27069_v59 }
 0x306   : > { %7013 = vmatpush1.bf16.msra.mxu1 %v22924_v10  ;;  %v22987_v10 = vld [vmem:[%s26902_s20 + $0x1b20] ss:$28 sps:$4 sm:$0xff]  }
 0x307   : > { %6841 = vmatpush1.bf16.msra.mxu0 %v22921_v7  ;;  %7014 = vmatprep.subr.bf16.mxu1 %v22932_v36  ;;  %v22992_v7 = vld [vmem:[%s26902_s20 + $0xd2c] ss:$28 sps:$4 sm:$0xff]   ;;  %v22995_v36 = vld [vmem:[%s26902_s20 + $0x1b5c] ss:$28 sps:$4 sm:$0xff]  }
 0x308   : > { %6842 = vmatprep.subr.bf16.mxu0 %v22929_v35  ;;  %v22990_v35 = vld [vmem:[%s26902_s20 + $0xd28] ss:$28 sps:$4 sm:$0xff]  }
 0x30a   : > { %7015 = vmatpush1.bf16.msra.mxu1 %v22930_v39  ;;  %v22993_v39 = vld [vmem:[%s26902_s20 + $0x1b58] ss:$28 sps:$4 sm:$0xff]  }
 0x30b   : > { %6843 = vmatpush1.bf16.msra.mxu0 %v22927_v38  ;;  %7016 = vmatprep.subr.bf16.mxu1 %v22938_v42  ;;  %v22998_v38 = vld [vmem:[%s26902_s20 + $0xd64] ss:$28 sps:$4 sm:$0xff]   ;;  %v23001_v42 = vld [vmem:[%s26902_s20 + $0x1b94] ss:$28 sps:$4 sm:$0xff]  }
 0x30c   : > { %6844 = vmatprep.subr.bf16.mxu0 %v22935_v41  ;;  %v22996_v41 = vld [vmem:[%s26902_s20 + $0xd60] ss:$28 sps:$4 sm:$0xff]  }
 0x30e   : > { %7017 = vmatpush1.bf16.msra.mxu1 %v22936_v46  ;;  %v22999_v46 = vld [vmem:[%s26902_s20 + $0x1b90] ss:$28 sps:$4 sm:$0xff]  }
 0x30f   : > { %6845 = vmatpush1.bf16.msra.mxu0 %v22933_v45  ;;  %7018 = vmatprep.subr.bf16.mxu1 %v22944_v49  ;;  %v23004_v45 = vld [vmem:[%s26902_s20 + $0xd9c] ss:$28 sps:$4 sm:$0xff]   ;;  %v23007_v49 = vld [vmem:[%s26902_s20 + $0x1bcc] ss:$28 sps:$4 sm:$0xff]  }
 0x310   : > { %6846 = vmatprep.subr.bf16.mxu0 %v22941_v48  ;;  %v23002_v48 = vld [vmem:[%s26902_s20 + $0xd98] ss:$28 sps:$4 sm:$0xff]  }
 0x312   : > { %7019 = vmatpush1.bf16.msra.mxu1 %v22942_v51  ;;  %v23005_v51 = vld [vmem:[%s26902_s20 + $0x1bc8] ss:$28 sps:$4 sm:$0xff]  }
 0x313   : > { %6847 = vmatpush1.bf16.msra.mxu0 %v22939_v50  ;;  %7020 = vmatprep.subr.bf16.mxu1 %v22950_v53  ;;  %v23010_v50 = vld [vmem:[%s26902_s20 + $0xdd4] ss:$28 sps:$4 sm:$0xff]   ;;  %v23013_v53 = vld [vmem:[%s26902_s20 + $0xe0c] ss:$28 sps:$4 sm:$0xff]  }
 0x314   : > { %6848 = vmatprep.subr.bf16.mxu0 %v22947_v52  ;;  %v27402_v44 = vpop.f32.mrb[0].mxu1  ;;  %v23008_v52 = vld [vmem:[%s26902_s20 + $0xdd0] ss:$28 sps:$4 sm:$0xff]  }
 0x315   : > { %v27404_v63 = vpop.f32.mrb[1].mxu1 }
 0x316   : > { %v27406_v0 = vpop.f32.mrb[2].mxu1  ;;  %7021 = vmatpush1.bf16.msra.mxu1 %v22948_v60  ;;  %v27452_v60 = vcombine.low %v27361_v25, %v27364_v26  ;;  %v23017_v25 = vld [vmem:[%s26902_s20 + $0xe40] ss:$28 sps:$4 sm:$0xff]   ;;  %v23020_v26 = vld [vmem:[%s26902_s20 + $0x48] ss:$28 sps:$4 sm:$0xff]  }
 0x317   : > { %6849 = vmatpush1.bf16.msra.mxu0 %v22945_v54  ;;  %v27410_v3 = vpop.f32.mrb[3].mxu1  ;;  %7022 = vmatprep.subr.bf16.mxu1 %v22956_v43  ;;  %v23016_v54 = vld [vmem:[%s26902_s20 + $0x14] ss:$28 sps:$4 sm:$0xff]  }
 0x318   : > { %6850 = vmatprep.subr.bf16.mxu0 %v22953_v61  ;;  %v23011_v61 = vld [vmem:[%s26902_s20 + $0xe08] ss:$28 sps:$4 sm:$0xff]   ;;  %v23014_v43 = vld [vmem:[%s26902_s20 + $0x10] ss:$28 sps:$4 sm:$0xff]  }
 0x31a   : > { %7023 = vmatpush1.bf16.msra.mxu1 %v22954_v2  ;;  %v23022_v2 = vld [vmem:[%s26902_s20 + $0x4c] ss:$28 sps:$4 sm:$0xff]  }
 0x31b   : > { %6851 = vmatpush1.bf16.msra.mxu0 %v22951_v1  ;;  %7024 = vmatprep.subr.bf16.mxu1 %v22962_v6  ;;  %v23019_v1 = vld [vmem:[%s26902_s20 + $0xe44] ss:$28 sps:$4 sm:$0xff]  }
 0x31c   : > { %6852 = vmatprep.subr.bf16.mxu0 %v22959_v4  ;;  %v23025_v4 = vld [vmem:[%s26902_s20 + $0xe7c] ss:$28 sps:$4 sm:$0xff]   ;;  %v23028_v6 = vld [vmem:[%s26902_s20 + $0x84] ss:$28 sps:$4 sm:$0xff]  }
 0x31e   : > { %7025 = vmatpush1.bf16.msra.mxu1 %v22960_v12  ;;  %v23026_v12 = vld [vmem:[%s26902_s20 + $0x80] ss:$28 sps:$4 sm:$0xff]  }
 0x31f   : > { %6853 = vmatpush1.bf16.msra.mxu0 %v22957_v11  ;;  %7026 = vmatprep.subr.bf16.mxu1 %v22968_v14  ;;  %v23023_v11 = vld [vmem:[%s26902_s20 + $0xe78] ss:$28 sps:$4 sm:$0xff]  }
 0x320   : > { %6854 = vmatprep.subr.bf16.mxu0 %v22965_v13  ;;  %v23031_v13 = vld [vmem:[%s26902_s20 + $0xeb4] ss:$28 sps:$4 sm:$0xff]   ;;  %v23034_v14 = vld [vmem:[%s26902_s20 + $0xbc] ss:$28 sps:$4 sm:$0xff]  }
 0x322   : > { %7027 = vmatpush1.bf16.msra.mxu1 %v22966_v57  ;;  %v23032_v57 = vld [vmem:[%s26902_s20 + $0xb8] ss:$28 sps:$4 sm:$0xff]  }
 0x323   : > { %6855 = vmatpush1.bf16.msra.mxu0 %v22963_v56  ;;  %7028 = vmatprep.subr.bf16.mxu1 %v22974_v17  ;;  %v23029_v56 = vld [vmem:[%s26902_s20 + $0xeb0] ss:$28 sps:$4 sm:$0xff]  }
 0x324   : > { %6856 = vmatprep.subr.bf16.mxu0 %v22971_v16  ;;  %v23037_v16 = vld [vmem:[%s26902_s20 + $0xeec] ss:$28 sps:$4 sm:$0xff]   ;;  %v23040_v17 = vld [vmem:[%s26902_s20 + $0xf4] ss:$28 sps:$4 sm:$0xff]  }
 0x326   : > { %7029 = vmatpush1.bf16.msra.mxu1 %v22972_v19  ;;  %v23038_v19 = vld [vmem:[%s26902_s20 + $0xf0] ss:$28 sps:$4 sm:$0xff]  }
 0x327   : > { %6857 = vmatpush1.bf16.msra.mxu0 %v22969_v18  ;;  %7030 = vmatprep.subr.bf16.mxu1 %v22980_v21  ;;  %v23035_v18 = vld [vmem:[%s26902_s20 + $0xee8] ss:$28 sps:$4 sm:$0xff]  }
 0x328   : > { %6858 = vmatprep.subr.bf16.mxu0 %v22977_v20  ;;  %v23043_v20 = vld [vmem:[%s26902_s20 + $0xf24] ss:$28 sps:$4 sm:$0xff]   ;;  %v23046_v21 = vld [vmem:[%s26902_s20 + $0x12c] ss:$28 sps:$4 sm:$0xff]  }
 0x32a   : > { %7031 = vmatpush1.bf16.msra.mxu1 %v22978_v23  ;;  %v23044_v23 = vld [vmem:[%s26902_s20 + $0x128] ss:$28 sps:$4 sm:$0xff]  }
 0x32b   : > { %6859 = vmatpush1.bf16.msra.mxu0 %v22975_v22  ;;  %7032 = vmatprep.subr.bf16.mxu1 %v22986_v30  ;;  %v23041_v22 = vld [vmem:[%s26902_s20 + $0xf20] ss:$28 sps:$4 sm:$0xff]  }
 0x32c   : > { %6860 = vmatprep.subr.bf16.mxu0 %v22983_v24  ;;  %v23049_v24 = vld [vmem:[%s26902_s20 + $0xf5c] ss:$28 sps:$4 sm:$0xff]   ;;  %v23052_v30 = vld [vmem:[%s26902_s20 + $0x164] ss:$28 sps:$4 sm:$0xff]  }
 0x32e   : > { %7033 = vmatpush1.bf16.msra.mxu1 %v22984_v32  ;;  %v23050_v32 = vld [vmem:[%s26902_s20 + $0x160] ss:$28 sps:$4 sm:$0xff]  }
 0x32f   : > { %6861 = vmatpush1.bf16.msra.mxu0 %v22981_v31  ;;  %7034 = vmatprep.subr.bf16.mxu1 %v22992_v7  ;;  %v23047_v31 = vld [vmem:[%s26902_s20 + $0xf58] ss:$28 sps:$4 sm:$0xff]  }
 0x330   : > { %6862 = vmatprep.subr.bf16.mxu0 %v22989_v33  ;;  %v23055_v33 = vld [vmem:[%s26902_s20 + $0xf94] ss:$28 sps:$4 sm:$0xff]   ;;  %v23058_v7 = vld [vmem:[%s26902_s20 + $0x19c] ss:$28 sps:$4 sm:$0xff]  }
 0x332   : > { %7035 = vmatpush1.bf16.msra.mxu1 %v22990_v35  ;;  %v23056_v35 = vld [vmem:[%s26902_s20 + $0x198] ss:$28 sps:$4 sm:$0xff]  }
 0x333   : > { %6863 = vmatpush1.bf16.msra.mxu0 %v22987_v10  ;;  %7036 = vmatprep.subr.bf16.mxu1 %v22998_v38  ;;  %v23053_v10 = vld [vmem:[%s26902_s20 + $0xf90] ss:$28 sps:$4 sm:$0xff]  }
 0x334   : > { %6864 = vmatprep.subr.bf16.mxu0 %v22995_v36  ;;  %v23061_v36 = vld [vmem:[%s26902_s20 + $0xfcc] ss:$28 sps:$4 sm:$0xff]   ;;  %v23064_v38 = vld [vmem:[%s26902_s20 + $0x1d4] ss:$28 sps:$4 sm:$0xff]  }
 0x336   : > { %7037 = vmatpush1.bf16.msra.mxu1 %v22996_v41  ;;  %v23062_v41 = vld [vmem:[%s26902_s20 + $0x1d0] ss:$28 sps:$4 sm:$0xff]  }
 0x337   : > { %6865 = vmatpush1.bf16.msra.mxu0 %v22993_v39  ;;  %7038 = vmatprep.subr.bf16.mxu1 %v23004_v45  ;;  %v23059_v39 = vld [vmem:[%s26902_s20 + $0xfc8] ss:$28 sps:$4 sm:$0xff]  }
 0x338   : > { %6866 = vmatprep.subr.bf16.mxu0 %v23001_v42  ;;  %v23067_v42 = vld [vmem:[%s26902_s20 + $0x1004] ss:$28 sps:$4 sm:$0xff]   ;;  %v23070_v45 = vld [vmem:[%s26902_s20 + $0x20c] ss:$28 sps:$4 sm:$0xff]  }
 0x33a   : > { %7039 = vmatpush1.bf16.msra.mxu1 %v23002_v48  ;;  %v23068_v48 = vld [vmem:[%s26902_s20 + $0x208] ss:$28 sps:$4 sm:$0xff]  }
 0x33b   : > { %6867 = vmatpush1.bf16.msra.mxu0 %v22999_v46  ;;  %7040 = vmatprep.subr.bf16.mxu1 %v23010_v50  ;;  %v23065_v46 = vld [vmem:[%s26902_s20 + $0x1000] ss:$28 sps:$4 sm:$0xff]  }
 0x33c   : > { %6868 = vmatprep.subr.bf16.mxu0 %v23007_v49  ;;  %v23073_v49 = vld [vmem:[%s26902_s20 + $0x103c] ss:$28 sps:$4 sm:$0xff]   ;;  %v23076_v50 = vld [vmem:[%s26902_s20 + $0x244] ss:$28 sps:$4 sm:$0xff]  }
 0x33e   : > { %7041 = vmatpush1.bf16.msra.mxu1 %v23008_v52  ;;  %v23074_v52 = vld [vmem:[%s26902_s20 + $0x240] ss:$28 sps:$4 sm:$0xff]  }
 0x33f   : > { %6869 = vmatpush1.bf16.msra.mxu0 %v23005_v51  ;;  %7053 = vmatprep.subr.bf16.mxu1 %v23013_v53  ;;  %v23071_v51 = vld [vmem:[%s26902_s20 + $0x1038] ss:$28 sps:$4 sm:$0xff]  }
 0x340   : > { %7225 = vmatprep.subr.bf16.mxu0 %v23016_v54  ;;  %v23079_v53 = vld [vmem:[%s26902_s20 + $0x1074] ss:$28 sps:$4 sm:$0xff]   ;;  %v23082_v54 = vld [vmem:[%s26902_s20 + $0x27c] ss:$28 sps:$4 sm:$0xff]  }
 0x341   : > { %7043 = vmatmul.mubr.bf16.vlgmr.msra.gmra.mrb[4].mxu1 %v27118_v40 }
 0x342   : > { %6871 = vmatmul.mubr.bf16.vlgmr.msra.gmra.mrb[0].mxu0 %v27452_v60  ;;  %7054 = vmatpush1.bf16.msra.mxu1 %v23011_v61  ;;  %v23077_v61 = vld [vmem:[%s26902_s20 + $0x1070] ss:$28 sps:$4 sm:$0xff]  }
 0x343   : > { %7226 = vmatpush1.bf16.msra.mxu0 %v23014_v43  ;;  %7055 = vmatprep.subr.bf16.mxu1 %v23019_v1  ;;  %v23080_v43 = vld [vmem:[%s26902_s20 + $0x278] ss:$28 sps:$4 sm:$0xff]   ;;  %v23085_v1 = vld [vmem:[%s26902_s20 + $0x10ac] ss:$28 sps:$4 sm:$0xff]  }
 0x344   : > { %7227 = vmatprep.subr.bf16.mxu0 %v23022_v2  ;;  %7085 = vmatprep.mubr.bf16.mxu1 %v27134_v47  ;;  %v23088_v2 = vld [vmem:[%s26902_s20 + $0x2b4] ss:$28 sps:$4 sm:$0xff]  }
 0x345   : > { %7257 = vmatprep.mubr.bf16.mxu0 %v26994_v5 }
 0x346   : > { %7056 = vmatpush1.bf16.msra.mxu1 %v23017_v25  ;;  %v23083_v25 = vld [vmem:[%s26902_s20 + $0x10a8] ss:$28 sps:$4 sm:$0xff]  }
 0x347   : > { %7228 = vmatpush1.bf16.msra.mxu0 %v23020_v26  ;;  %7057 = vmatprep.subr.bf16.mxu1 %v23025_v4  ;;  %v23086_v26 = vld [vmem:[%s26902_s20 + $0x2b0] ss:$28 sps:$4 sm:$0xff]   ;;  %v23091_v4 = vld [vmem:[%s26902_s20 + $0x10e4] ss:$28 sps:$4 sm:$0xff]  }
 0x348   : > { %7229 = vmatprep.subr.bf16.mxu0 %v23028_v6  ;;  %v23094_v6 = vld [vmem:[%s26902_s20 + $0x2ec] ss:$28 sps:$4 sm:$0xff]  }
 0x34a   : > { %7058 = vmatpush1.bf16.msra.mxu1 %v23023_v11  ;;  %v23089_v11 = vld [vmem:[%s26902_s20 + $0x10e0] ss:$28 sps:$4 sm:$0xff]  }
 0x34b   : > { %7230 = vmatpush1.bf16.msra.mxu0 %v23026_v12  ;;  %7059 = vmatprep.subr.bf16.mxu1 %v23031_v13  ;;  %v23092_v12 = vld [vmem:[%s26902_s20 + $0x2e8] ss:$28 sps:$4 sm:$0xff]   ;;  %v23097_v13 = vld [vmem:[%s26902_s20 + $0x111c] ss:$28 sps:$4 sm:$0xff]  }
 0x34c   : > { %7231 = vmatprep.subr.bf16.mxu0 %v23034_v14  ;;  %v23100_v14 = vld [vmem:[%s26902_s20 + $0x324] ss:$28 sps:$4 sm:$0xff]  }
 0x34e   : > { %7060 = vmatpush1.bf16.msra.mxu1 %v23029_v56  ;;  %v23095_v56 = vld [vmem:[%s26902_s20 + $0x1118] ss:$28 sps:$4 sm:$0xff]  }
 0x34f   : > { %7232 = vmatpush1.bf16.msra.mxu0 %v23032_v57  ;;  %7061 = vmatprep.subr.bf16.mxu1 %v23037_v16  ;;  %v23098_v57 = vld [vmem:[%s26902_s20 + $0x320] ss:$28 sps:$4 sm:$0xff]   ;;  %v23103_v16 = vld [vmem:[%s26902_s20 + $0x1154] ss:$28 sps:$4 sm:$0xff]  }
 0x350   : > { %7233 = vmatprep.subr.bf16.mxu0 %v23040_v17  ;;  %v23106_v17 = vld [vmem:[%s26902_s20 + $0x35c] ss:$28 sps:$4 sm:$0xff]  }
 0x352   : > { %7062 = vmatpush1.bf16.msra.mxu1 %v23035_v18  ;;  %v23101_v18 = vld [vmem:[%s26902_s20 + $0x1150] ss:$28 sps:$4 sm:$0xff]  }
 0x353   : > { %7234 = vmatpush1.bf16.msra.mxu0 %v23038_v19  ;;  %7063 = vmatprep.subr.bf16.mxu1 %v23043_v20  ;;  %v23104_v19 = vld [vmem:[%s26902_s20 + $0x358] ss:$28 sps:$4 sm:$0xff]   ;;  %v23109_v20 = vld [vmem:[%s26902_s20 + $0x118c] ss:$28 sps:$4 sm:$0xff]  }
 0x354   : > { %7235 = vmatprep.subr.bf16.mxu0 %v23046_v21  ;;  %v23112_v21 = vld [vmem:[%s26902_s20 + $0x394] ss:$28 sps:$4 sm:$0xff]  }
 0x356   : > { %7064 = vmatpush1.bf16.msra.mxu1 %v23041_v22  ;;  %v23107_v22 = vld [vmem:[%s26902_s20 + $0x1188] ss:$28 sps:$4 sm:$0xff]  }
 0x357   : > { %7236 = vmatpush1.bf16.msra.mxu0 %v23044_v23  ;;  %7065 = vmatprep.subr.bf16.mxu1 %v23049_v24  ;;  %v23110_v23 = vld [vmem:[%s26902_s20 + $0x390] ss:$28 sps:$4 sm:$0xff]   ;;  %v23115_v24 = vld [vmem:[%s26902_s20 + $0x11c4] ss:$28 sps:$4 sm:$0xff]  }
 0x358   : > { %7237 = vmatprep.subr.bf16.mxu0 %v23052_v30  ;;  %v23118_v30 = vld [vmem:[%s26902_s20 + $0x3cc] ss:$28 sps:$4 sm:$0xff]  }
 0x35a   : > { %7066 = vmatpush1.bf16.msra.mxu1 %v23047_v31  ;;  %v23113_v31 = vld [vmem:[%s26902_s20 + $0x11c0] ss:$28 sps:$4 sm:$0xff]  }
 0x35b   : > { %7238 = vmatpush1.bf16.msra.mxu0 %v23050_v32  ;;  %7067 = vmatprep.subr.bf16.mxu1 %v23055_v33  ;;  %v23116_v32 = vld [vmem:[%s26902_s20 + $0x3c8] ss:$28 sps:$4 sm:$0xff]   ;;  %v23121_v33 = vld [vmem:[%s26902_s20 + $0x11fc] ss:$28 sps:$4 sm:$0xff]  }
 0x35c   : > { %7239 = vmatprep.subr.bf16.mxu0 %v23058_v7  ;;  %v23124_v7 = vld [vmem:[%s26902_s20 + $0x404] ss:$28 sps:$4 sm:$0xff]  }
 0x35e   : > { %7068 = vmatpush1.bf16.msra.mxu1 %v23053_v10  ;;  %v23119_v10 = vld [vmem:[%s26902_s20 + $0x11f8] ss:$28 sps:$4 sm:$0xff]  }
 0x35f   : > { %7240 = vmatpush1.bf16.msra.mxu0 %v23056_v35  ;;  %7069 = vmatprep.subr.bf16.mxu1 %v23061_v36  ;;  %v23122_v35 = vld [vmem:[%s26902_s20 + $0x400] ss:$28 sps:$4 sm:$0xff]   ;;  %v23127_v36 = vld [vmem:[%s26902_s20 + $0x1234] ss:$28 sps:$4 sm:$0xff]  }
 0x360   : > { %7241 = vmatprep.subr.bf16.mxu0 %v23064_v38  ;;  %v23130_v38 = vld [vmem:[%s26902_s20 + $0x43c] ss:$28 sps:$4 sm:$0xff]  }
 0x362   : > { %7070 = vmatpush1.bf16.msra.mxu1 %v23059_v39  ;;  %v23125_v39 = vld [vmem:[%s26902_s20 + $0x1230] ss:$28 sps:$4 sm:$0xff]  }
 0x363   : > { %7242 = vmatpush1.bf16.msra.mxu0 %v23062_v41  ;;  %7071 = vmatprep.subr.bf16.mxu1 %v23067_v42  ;;  %v23128_v41 = vld [vmem:[%s26902_s20 + $0x438] ss:$28 sps:$4 sm:$0xff]   ;;  %v23133_v42 = vld [vmem:[%s26902_s20 + $0x126c] ss:$28 sps:$4 sm:$0xff]  }
 0x364   : > { %7243 = vmatprep.subr.bf16.mxu0 %v23070_v45  ;;  %v23136_v45 = vld [vmem:[%s26902_s20 + $0x474] ss:$28 sps:$4 sm:$0xff]  }
 0x366   : > { %7072 = vmatpush1.bf16.msra.mxu1 %v23065_v46  ;;  %v23131_v46 = vld [vmem:[%s26902_s20 + $0x1268] ss:$28 sps:$4 sm:$0xff]  }
 0x367   : > { %7244 = vmatpush1.bf16.msra.mxu0 %v23068_v48  ;;  %7073 = vmatprep.subr.bf16.mxu1 %v23073_v49  ;;  %v23134_v48 = vld [vmem:[%s26902_s20 + $0x470] ss:$28 sps:$4 sm:$0xff]   ;;  %v23139_v49 = vld [vmem:[%s26902_s20 + $0x12a4] ss:$28 sps:$4 sm:$0xff]  }
 0x368   : > { %7245 = vmatprep.subr.bf16.mxu0 %v23076_v50  ;;  %v23142_v50 = vld [vmem:[%s26902_s20 + $0x4ac] ss:$28 sps:$4 sm:$0xff]  }
 0x36a   : > { %7074 = vmatpush1.bf16.msra.mxu1 %v23071_v51  ;;  %v23137_v51 = vld [vmem:[%s26902_s20 + $0x12a0] ss:$28 sps:$4 sm:$0xff]  }
 0x36b   : > { %7246 = vmatpush1.bf16.msra.mxu0 %v23074_v52  ;;  %7075 = vmatprep.subr.bf16.mxu1 %v23079_v53  ;;  %v23140_v52 = vld [vmem:[%s26902_s20 + $0x4a8] ss:$28 sps:$4 sm:$0xff]   ;;  %v23145_v53 = vld [vmem:[%s26902_s20 + $0x12dc] ss:$28 sps:$4 sm:$0xff]  }
 0x36c   : > { %7247 = vmatprep.subr.bf16.mxu0 %v23082_v54  ;;  %v23148_v54 = vld [vmem:[%s26902_s20 + $0x4e4] ss:$28 sps:$4 sm:$0xff]  }
 0x36e   : > { %7076 = vmatpush1.bf16.msra.mxu1 %v23077_v61  ;;  %v23143_v61 = vld [vmem:[%s26902_s20 + $0x12d8] ss:$28 sps:$4 sm:$0xff]  }
 0x36f   : > { %7248 = vmatpush1.bf16.msra.mxu0 %v23080_v43  ;;  %7077 = vmatprep.subr.bf16.mxu1 %v23085_v1  ;;  %v23146_v43 = vld [vmem:[%s26902_s20 + $0x4e0] ss:$28 sps:$4 sm:$0xff]   ;;  %v23151_v1 = vld [vmem:[%s26902_s20 + $0x1314] ss:$28 sps:$4 sm:$0xff]  }
 0x370   : > { %7249 = vmatprep.subr.bf16.mxu0 %v23088_v2  ;;  %v23154_v2 = vld [vmem:[%s26902_s20 + $0x51c] ss:$28 sps:$4 sm:$0xff]  }
 0x372   : > { %7078 = vmatpush1.bf16.msra.mxu1 %v23083_v25  ;;  %v23149_v25 = vld [vmem:[%s26902_s20 + $0x1310] ss:$28 sps:$4 sm:$0xff]  }
 0x373   : > { %7250 = vmatpush1.bf16.msra.mxu0 %v23086_v26  ;;  %7079 = vmatprep.subr.bf16.mxu1 %v23091_v4  ;;  %v23152_v26 = vld [vmem:[%s26902_s20 + $0x518] ss:$28 sps:$4 sm:$0xff]   ;;  %v23157_v4 = vld [vmem:[%s26902_s20 + $0x134c] ss:$28 sps:$4 sm:$0xff]  }
 0x374   : > { %7251 = vmatprep.subr.bf16.mxu0 %v23094_v6  ;;  %v23160_v6 = vld [vmem:[%s26902_s20 + $0x554] ss:$28 sps:$4 sm:$0xff]  }
 0x376   : > { %7080 = vmatpush1.bf16.msra.mxu1 %v23089_v11  ;;  %v23155_v11 = vld [vmem:[%s26902_s20 + $0x1348] ss:$28 sps:$4 sm:$0xff]  }
 0x377   : > { %7252 = vmatpush1.bf16.msra.mxu0 %v23092_v12  ;;  %7081 = vmatprep.subr.bf16.mxu1 %v23097_v13  ;;  %v23158_v12 = vld [vmem:[%s26902_s20 + $0x550] ss:$28 sps:$4 sm:$0xff]   ;;  %v23163_v13 = vld [vmem:[%s26902_s20 + $0x1384] ss:$28 sps:$4 sm:$0xff]  }
 0x378   : > { %7253 = vmatprep.subr.bf16.mxu0 %v23100_v14  ;;  %v23166_v14 = vld [vmem:[%s26902_s20 + $0x58c] ss:$28 sps:$4 sm:$0xff]  }
 0x37a   : > { %7082 = vmatpush1.bf16.msra.mxu1 %v23095_v56  ;;  %v23161_v56 = vld [vmem:[%s26902_s20 + $0x1380] ss:$28 sps:$4 sm:$0xff]  }
 0x37b   : > { %7254 = vmatpush1.bf16.msra.mxu0 %v23098_v57  ;;  %7083 = vmatprep.subr.bf16.mxu1 %v23103_v16  ;;  %v23164_v57 = vld [vmem:[%s26902_s20 + $0x588] ss:$28 sps:$4 sm:$0xff]   ;;  %v23169_v16 = vld [vmem:[%s26902_s20 + $0x13bc] ss:$28 sps:$4 sm:$0xff]  }
 0x37c   : > { %7255 = vmatprep.subr.bf16.mxu0 %v23106_v17  ;;  %v23172_v17 = vld [vmem:[%s26902_s20 + $0x5c4] ss:$28 sps:$4 sm:$0xff]  }
 0x37e   : > { %7084 = vmatpush1.bf16.msra.mxu1 %v23101_v18  ;;  %v23167_v18 = vld [vmem:[%s26902_s20 + $0x13b8] ss:$28 sps:$4 sm:$0xff]  }
 0x37f   : > { %7256 = vmatpush1.bf16.msra.mxu0 %v23104_v19  ;;  %7096 = vmatprep.subr.bf16.mxu1 %v23109_v20  ;;  %v23170_v19 = vld [vmem:[%s26902_s20 + $0x5c0] ss:$28 sps:$4 sm:$0xff]   ;;  %v23175_v20 = vld [vmem:[%s26902_s20 + $0x13f4] ss:$28 sps:$4 sm:$0xff]  }
 0x380   : > { %7268 = vmatprep.subr.bf16.mxu0 %v23112_v21  ;;  %v23178_v21 = vld [vmem:[%s26902_s20 + $0x5fc] ss:$28 sps:$4 sm:$0xff]  }
 0x381   : > { %7086 = vmatmul.mubr.bf16.vlgmr.msra.gmra.mrb[4].mxu1 %v27200_v55 }
 0x382   : > { %7258 = vmatmul.mubr.bf16.vlgmr.msra.gmra.mrb[4].mxu0 %v27020_v27  ;;  %7097 = vmatpush1.bf16.msra.mxu1 %v23107_v22  ;;  %v23173_v22 = vld [vmem:[%s26902_s20 + $0x13f0] ss:$28 sps:$4 sm:$0xff]  }
 0x383   : > { %7269 = vmatpush1.bf16.msra.mxu0 %v23110_v23  ;;  %7098 = vmatprep.subr.bf16.mxu1 %v23115_v24  ;;  %v23176_v23 = vld [vmem:[%s26902_s20 + $0x5f8] ss:$28 sps:$4 sm:$0xff]   ;;  %v23181_v24 = vld [vmem:[%s26902_s20 + $0x142c] ss:$28 sps:$4 sm:$0xff]  }
 0x384   : > { %7270 = vmatprep.subr.bf16.mxu0 %v23118_v30  ;;  %7128 = vmatprep.mubr.bf16.mxu1 %v27212_v62  ;;  %v23184_v30 = vld [vmem:[%s26902_s20 + $0x634] ss:$28 sps:$4 sm:$0xff]  }
 0x385   : > { %7300 = vmatprep.mubr.bf16.mxu0 %v27065_v58 }
 0x386   : > { %7099 = vmatpush1.bf16.msra.mxu1 %v23113_v31  ;;  %v23179_v31 = vld [vmem:[%s26902_s20 + $0x1428] ss:$28 sps:$4 sm:$0xff]  }
 0x387   : > { %7271 = vmatpush1.bf16.msra.mxu0 %v23116_v32  ;;  %7100 = vmatprep.subr.bf16.mxu1 %v23121_v33  ;;  %v23182_v32 = vld [vmem:[%s26902_s20 + $0x630] ss:$28 sps:$4 sm:$0xff]   ;;  %v23187_v33 = vld [vmem:[%s26902_s20 + $0x1464] ss:$28 sps:$4 sm:$0xff]  }
 0x388   : > { %7272 = vmatprep.subr.bf16.mxu0 %v23124_v7  ;;  %v23190_v7 = vld [vmem:[%s26902_s20 + $0x66c] ss:$28 sps:$4 sm:$0xff]  }
 0x38a   : > { %7101 = vmatpush1.bf16.msra.mxu1 %v23119_v10  ;;  %v23185_v10 = vld [vmem:[%s26902_s20 + $0x1460] ss:$28 sps:$4 sm:$0xff]  }
 0x38b   : > { %7273 = vmatpush1.bf16.msra.mxu0 %v23122_v35  ;;  %7102 = vmatprep.subr.bf16.mxu1 %v23127_v36  ;;  %v23188_v35 = vld [vmem:[%s26902_s20 + $0x668] ss:$28 sps:$4 sm:$0xff]   ;;  %v23193_v36 = vld [vmem:[%s26902_s20 + $0x149c] ss:$28 sps:$4 sm:$0xff]  }
 0x38c   : > { %7274 = vmatprep.subr.bf16.mxu0 %v23130_v38  ;;  %v23196_v38 = vld [vmem:[%s26902_s20 + $0x6a4] ss:$28 sps:$4 sm:$0xff]  }
 0x38e   : > { %7103 = vmatpush1.bf16.msra.mxu1 %v23125_v39  ;;  %v23191_v39 = vld [vmem:[%s26902_s20 + $0x1498] ss:$28 sps:$4 sm:$0xff]  }
 0x38f   : > { %7275 = vmatpush1.bf16.msra.mxu0 %v23128_v41  ;;  %7104 = vmatprep.subr.bf16.mxu1 %v23133_v42  ;;  %v23194_v41 = vld [vmem:[%s26902_s20 + $0x6a0] ss:$28 sps:$4 sm:$0xff]   ;;  %v23199_v42 = vld [vmem:[%s26902_s20 + $0x14d4] ss:$28 sps:$4 sm:$0xff]  }
 0x390   : > { %7276 = vmatprep.subr.bf16.mxu0 %v23136_v45  ;;  %v23202_v45 = vld [vmem:[%s26902_s20 + $0x6dc] ss:$28 sps:$4 sm:$0xff]  }
 0x392   : > { %7105 = vmatpush1.bf16.msra.mxu1 %v23131_v46  ;;  %v23197_v46 = vld [vmem:[%s26902_s20 + $0x14d0] ss:$28 sps:$4 sm:$0xff]  }
 0x393   : > { %7277 = vmatpush1.bf16.msra.mxu0 %v23134_v48  ;;  %7106 = vmatprep.subr.bf16.mxu1 %v23139_v49  ;;  %v23200_v48 = vld [vmem:[%s26902_s20 + $0x6d8] ss:$28 sps:$4 sm:$0xff]   ;;  %v23205_v49 = vld [vmem:[%s26902_s20 + $0x150c] ss:$28 sps:$4 sm:$0xff]  }
 0x394   : > { %7278 = vmatprep.subr.bf16.mxu0 %v23142_v50  ;;  %v23208_v50 = vld [vmem:[%s26902_s20 + $0x714] ss:$28 sps:$4 sm:$0xff]  }
 0x396   : > { %7107 = vmatpush1.bf16.msra.mxu1 %v23137_v51  ;;  %v23203_v51 = vld [vmem:[%s26902_s20 + $0x1508] ss:$28 sps:$4 sm:$0xff]  }
 0x397   : > { %7279 = vmatpush1.bf16.msra.mxu0 %v23140_v52  ;;  %7108 = vmatprep.subr.bf16.mxu1 %v23145_v53  ;;  %v23206_v52 = vld [vmem:[%s26902_s20 + $0x710] ss:$28 sps:$4 sm:$0xff]   ;;  %v23211_v53 = vld [vmem:[%s26902_s20 + $0x1544] ss:$28 sps:$4 sm:$0xff]  }
 0x398   : > { %7280 = vmatprep.subr.bf16.mxu0 %v23148_v54  ;;  %v23214_v54 = vld [vmem:[%s26902_s20 + $0x74c] ss:$28 sps:$4 sm:$0xff]  }
 0x39a   : > { %7109 = vmatpush1.bf16.msra.mxu1 %v23143_v61  ;;  %v23209_v61 = vld [vmem:[%s26902_s20 + $0x1540] ss:$28 sps:$4 sm:$0xff]  }
 0x39b   : > { %7281 = vmatpush1.bf16.msra.mxu0 %v23146_v43  ;;  %7110 = vmatprep.subr.bf16.mxu1 %v23151_v1  ;;  %v23212_v43 = vld [vmem:[%s26902_s20 + $0x748] ss:$28 sps:$4 sm:$0xff]   ;;  %v23217_v1 = vld [vmem:[%s26902_s20 + $0x157c] ss:$28 sps:$4 sm:$0xff]  }
 0x39c   : > { %7282 = vmatprep.subr.bf16.mxu0 %v23154_v2  ;;  %v23220_v2 = vld [vmem:[%s26902_s20 + $0x784] ss:$28 sps:$4 sm:$0xff]  }
 0x39e   : > { %7111 = vmatpush1.bf16.msra.mxu1 %v23149_v25  ;;  %v23215_v25 = vld [vmem:[%s26902_s20 + $0x1578] ss:$28 sps:$4 sm:$0xff]  }
 0x39f   : > { %7283 = vmatpush1.bf16.msra.mxu0 %v23152_v26  ;;  %7112 = vmatprep.subr.bf16.mxu1 %v23157_v4  ;;  %v23218_v26 = vld [vmem:[%s26902_s20 + $0x780] ss:$28 sps:$4 sm:$0xff]   ;;  %v23223_v4 = vld [vmem:[%s26902_s20 + $0x15b4] ss:$28 sps:$4 sm:$0xff]  }
 0x3a0   : > { %7284 = vmatprep.subr.bf16.mxu0 %v23160_v6  ;;  %v23226_v6 = vld [vmem:[%s26902_s20 + $0x7bc] ss:$28 sps:$4 sm:$0xff]  }
 0x3a2   : > { %7113 = vmatpush1.bf16.msra.mxu1 %v23155_v11  ;;  %v23221_v11 = vld [vmem:[%s26902_s20 + $0x15b0] ss:$28 sps:$4 sm:$0xff]  }
 0x3a3   : > { %7285 = vmatpush1.bf16.msra.mxu0 %v23158_v12  ;;  %7114 = vmatprep.subr.bf16.mxu1 %v23163_v13  ;;  %v23224_v12 = vld [vmem:[%s26902_s20 + $0x7b8] ss:$28 sps:$4 sm:$0xff]   ;;  %v23229_v13 = vld [vmem:[%s26902_s20 + $0x15ec] ss:$28 sps:$4 sm:$0xff]  }
 0x3a4   : > { %7286 = vmatprep.subr.bf16.mxu0 %v23166_v14  ;;  %v23232_v14 = vld [vmem:[%s26902_s20 + $0x7f4] ss:$28 sps:$4 sm:$0xff]  }
 0x3a6   : > { %7115 = vmatpush1.bf16.msra.mxu1 %v23161_v56  ;;  %v23227_v56 = vld [vmem:[%s26902_s20 + $0x15e8] ss:$28 sps:$4 sm:$0xff]  }
 0x3a7   : > { %7287 = vmatpush1.bf16.msra.mxu0 %v23164_v57  ;;  %7116 = vmatprep.subr.bf16.mxu1 %v23169_v16  ;;  %v23230_v57 = vld [vmem:[%s26902_s20 + $0x7f0] ss:$28 sps:$4 sm:$0xff]   ;;  %v23235_v16 = vld [vmem:[%s26902_s20 + $0x1624] ss:$28 sps:$4 sm:$0xff]  }
 0x3a8   : > { %7288 = vmatprep.subr.bf16.mxu0 %v23172_v17  ;;  %v23238_v17 = vld [vmem:[%s26902_s20 + $0x82c] ss:$28 sps:$4 sm:$0xff]  }
 0x3aa   : > { %7117 = vmatpush1.bf16.msra.mxu1 %v23167_v18  ;;  %v23233_v18 = vld [vmem:[%s26902_s20 + $0x1620] ss:$28 sps:$4 sm:$0xff]  }
 0x3ab   : > { %7289 = vmatpush1.bf16.msra.mxu0 %v23170_v19  ;;  %7118 = vmatprep.subr.bf16.mxu1 %v23175_v20  ;;  %v23236_v19 = vld [vmem:[%s26902_s20 + $0x828] ss:$28 sps:$4 sm:$0xff]   ;;  %v23241_v20 = vld [vmem:[%s26902_s20 + $0x165c] ss:$28 sps:$4 sm:$0xff]  }
 0x3ac   : > { %7290 = vmatprep.subr.bf16.mxu0 %v23178_v21  ;;  %v23244_v21 = vld [vmem:[%s26902_s20 + $0x864] ss:$28 sps:$4 sm:$0xff]  }
 0x3ae   : > { %7119 = vmatpush1.bf16.msra.mxu1 %v23173_v22  ;;  %v23239_v22 = vld [vmem:[%s26902_s20 + $0x1658] ss:$28 sps:$4 sm:$0xff]  }
 0x3af   : > { %7291 = vmatpush1.bf16.msra.mxu0 %v23176_v23  ;;  %7120 = vmatprep.subr.bf16.mxu1 %v23181_v24  ;;  %v23242_v23 = vld [vmem:[%s26902_s20 + $0x860] ss:$28 sps:$4 sm:$0xff]   ;;  %v23247_v24 = vld [vmem:[%s26902_s20 + $0x1694] ss:$28 sps:$4 sm:$0xff]  }
 0x3b0   : > { %7292 = vmatprep.subr.bf16.mxu0 %v23184_v30  ;;  %v23250_v30 = vld [vmem:[%s26902_s20 + $0x89c] ss:$28 sps:$4 sm:$0xff]  }
 0x3b2   : > { %7121 = vmatpush1.bf16.msra.mxu1 %v23179_v31  ;;  %v23245_v31 = vld [vmem:[%s26902_s20 + $0x1690] ss:$28 sps:$4 sm:$0xff]  }
 0x3b3   : > { %7293 = vmatpush1.bf16.msra.mxu0 %v23182_v32  ;;  %7122 = vmatprep.subr.bf16.mxu1 %v23187_v33  ;;  %v23248_v32 = vld [vmem:[%s26902_s20 + $0x898] ss:$28 sps:$4 sm:$0xff]   ;;  %v23253_v33 = vld [vmem:[%s26902_s20 + $0x16cc] ss:$28 sps:$4 sm:$0xff]  }
 0x3b4   : > { %7294 = vmatprep.subr.bf16.mxu0 %v23190_v7  ;;  %v23256_v7 = vld [vmem:[%s26902_s20 + $0x8d4] ss:$28 sps:$4 sm:$0xff]  }
 0x3b6   : > { %7123 = vmatpush1.bf16.msra.mxu1 %v23185_v10  ;;  %v23251_v10 = vld [vmem:[%s26902_s20 + $0x16c8] ss:$28 sps:$4 sm:$0xff]  }
 0x3b7   : > { %7295 = vmatpush1.bf16.msra.mxu0 %v23188_v35  ;;  %7124 = vmatprep.subr.bf16.mxu1 %v23193_v36  ;;  %v23254_v35 = vld [vmem:[%s26902_s20 + $0x8d0] ss:$28 sps:$4 sm:$0xff]   ;;  %v23259_v36 = vld [vmem:[%s26902_s20 + $0x1704] ss:$28 sps:$4 sm:$0xff]  }
 0x3b8   : > { %7296 = vmatprep.subr.bf16.mxu0 %v23196_v38  ;;  %v23262_v38 = vld [vmem:[%s26902_s20 + $0x90c] ss:$28 sps:$4 sm:$0xff]  }
 0x3ba   : > { %7125 = vmatpush1.bf16.msra.mxu1 %v23191_v39  ;;  %v23257_v39 = vld [vmem:[%s26902_s20 + $0x1700] ss:$28 sps:$4 sm:$0xff]  }
 0x3bb   : > { %7297 = vmatpush1.bf16.msra.mxu0 %v23194_v41  ;;  %7126 = vmatprep.subr.bf16.mxu1 %v23199_v42  ;;  %v23260_v41 = vld [vmem:[%s26902_s20 + $0x908] ss:$28 sps:$4 sm:$0xff]   ;;  %v23265_v42 = vld [vmem:[%s26902_s20 + $0x173c] ss:$28 sps:$4 sm:$0xff]  }
 0x3bc   : > { %7298 = vmatprep.subr.bf16.mxu0 %v23202_v45  ;;  %v23268_v45 = vld [vmem:[%s26902_s20 + $0x944] ss:$28 sps:$4 sm:$0xff]  }
 0x3be   : > { %7127 = vmatpush1.bf16.msra.mxu1 %v23197_v46  ;;  %v23263_v46 = vld [vmem:[%s26902_s20 + $0x1738] ss:$28 sps:$4 sm:$0xff]  }
 0x3bf   : > { %7299 = vmatpush1.bf16.msra.mxu0 %v23200_v48  ;;  %7139 = vmatprep.subr.bf16.mxu1 %v23205_v49  ;;  %v23266_v48 = vld [vmem:[%s26902_s20 + $0x940] ss:$28 sps:$4 sm:$0xff]   ;;  %v23271_v49 = vld [vmem:[%s26902_s20 + $0x1774] ss:$28 sps:$4 sm:$0xff]  }
 0x3c0   : > { %7311 = vmatprep.subr.bf16.mxu0 %v23208_v50  ;;  %v23274_v50 = vld [vmem:[%s26902_s20 + $0x97c] ss:$28 sps:$4 sm:$0xff]  }
 0x3c1   : > { %7129 = vmatmul.mubr.bf16.vlgmr.msra.gmra.mrb[4].mxu1 %v27283_v9 }
 0x3c2   : > { %7301 = vmatmul.mubr.bf16.vlgmr.msra.gmra.mrb[4].mxu0 %v27112_v37  ;;  %7140 = vmatpush1.bf16.msra.mxu1 %v23203_v51  ;;  %v23269_v51 = vld [vmem:[%s26902_s20 + $0x1770] ss:$28 sps:$4 sm:$0xff]  }
 0x3c3   : > { %7312 = vmatpush1.bf16.msra.mxu0 %v23206_v52  ;;  %7141 = vmatprep.subr.bf16.mxu1 %v23211_v53  ;;  %v23272_v52 = vld [vmem:[%s26902_s20 + $0x978] ss:$28 sps:$4 sm:$0xff]   ;;  %v23277_v53 = vld [vmem:[%s26902_s20 + $0x17ac] ss:$28 sps:$4 sm:$0xff]  }
 0x3c4   : > { %7313 = vmatprep.subr.bf16.mxu0 %v23214_v54  ;;  %7171 = vmatprep.mubr.bf16.mxu1 %v27294_v15  ;;  %v23280_v54 = vld [vmem:[%s26902_s20 + $0x9b4] ss:$28 sps:$4 sm:$0xff]  }
 0x3c5   : > { %7343 = vmatprep.mubr.bf16.mxu0 %v26999_v8 }
 0x3c6   : > { %7142 = vmatpush1.bf16.msra.mxu1 %v23209_v61  ;;  %v23275_v61 = vld [vmem:[%s26902_s20 + $0x17a8] ss:$28 sps:$4 sm:$0xff]  }
 0x3c7   : > { %7314 = vmatpush1.bf16.msra.mxu0 %v23212_v43  ;;  %7143 = vmatprep.subr.bf16.mxu1 %v23217_v1  ;;  %v23278_v43 = vld [vmem:[%s26902_s20 + $0x9b0] ss:$28 sps:$4 sm:$0xff]   ;;  %v23283_v1 = vld [vmem:[%s26902_s20 + $0x17e4] ss:$28 sps:$4 sm:$0xff]  }
 0x3c8   : > { %7315 = vmatprep.subr.bf16.mxu0 %v23220_v2  ;;  %v23286_v2 = vld [vmem:[%s26902_s20 + $0x9ec] ss:$28 sps:$4 sm:$0xff]  }
 0x3ca   : > { %7144 = vmatpush1.bf16.msra.mxu1 %v23215_v25  ;;  %v23281_v25 = vld [vmem:[%s26902_s20 + $0x17e0] ss:$28 sps:$4 sm:$0xff]  }
 0x3cb   : > { %7316 = vmatpush1.bf16.msra.mxu0 %v23218_v26  ;;  %7145 = vmatprep.subr.bf16.mxu1 %v23223_v4  ;;  %v23284_v26 = vld [vmem:[%s26902_s20 + $0x9e8] ss:$28 sps:$4 sm:$0xff]   ;;  %v23289_v4 = vld [vmem:[%s26902_s20 + $0x181c] ss:$28 sps:$4 sm:$0xff]  }
 0x3cc   : > { %7317 = vmatprep.subr.bf16.mxu0 %v23226_v6  ;;  %v23292_v6 = vld [vmem:[%s26902_s20 + $0xa24] ss:$28 sps:$4 sm:$0xff]  }
 0x3ce   : > { %7146 = vmatpush1.bf16.msra.mxu1 %v23221_v11  ;;  %v23287_v11 = vld [vmem:[%s26902_s20 + $0x1818] ss:$28 sps:$4 sm:$0xff]  }
 0x3cf   : > { %7318 = vmatpush1.bf16.msra.mxu0 %v23224_v12  ;;  %7147 = vmatprep.subr.bf16.mxu1 %v23229_v13  ;;  %v23290_v12 = vld [vmem:[%s26902_s20 + $0xa20] ss:$28 sps:$4 sm:$0xff]   ;;  %v23295_v13 = vld [vmem:[%s26902_s20 + $0x1854] ss:$28 sps:$4 sm:$0xff]  }
 0x3d0   : > { %7319 = vmatprep.subr.bf16.mxu0 %v23232_v14  ;;  %v23298_v14 = vld [vmem:[%s26902_s20 + $0xa5c] ss:$28 sps:$4 sm:$0xff]  }
 0x3d2   : > { %7148 = vmatpush1.bf16.msra.mxu1 %v23227_v56  ;;  %v23293_v56 = vld [vmem:[%s26902_s20 + $0x1850] ss:$28 sps:$4 sm:$0xff]  }
 0x3d3   : > { %7320 = vmatpush1.bf16.msra.mxu0 %v23230_v57  ;;  %7149 = vmatprep.subr.bf16.mxu1 %v23235_v16  ;;  %v23296_v57 = vld [vmem:[%s26902_s20 + $0xa58] ss:$28 sps:$4 sm:$0xff]   ;;  %v23301_v16 = vld [vmem:[%s26902_s20 + $0x188c] ss:$28 sps:$4 sm:$0xff]  }
 0x3d4   : > { %7321 = vmatprep.subr.bf16.mxu0 %v23238_v17  ;;  %v23304_v17 = vld [vmem:[%s26902_s20 + $0xa94] ss:$28 sps:$4 sm:$0xff]  }
 0x3d6   : > { %7150 = vmatpush1.bf16.msra.mxu1 %v23233_v18  ;;  %v23299_v18 = vld [vmem:[%s26902_s20 + $0x1888] ss:$28 sps:$4 sm:$0xff]  }
 0x3d7   : > { %7322 = vmatpush1.bf16.msra.mxu0 %v23236_v19  ;;  %7151 = vmatprep.subr.bf16.mxu1 %v23241_v20  ;;  %v23302_v19 = vld [vmem:[%s26902_s20 + $0xa90] ss:$28 sps:$4 sm:$0xff]   ;;  %v23307_v20 = vld [vmem:[%s26902_s20 + $0x18c4] ss:$28 sps:$4 sm:$0xff]  }
 0x3d8   : > { %7323 = vmatprep.subr.bf16.mxu0 %v23244_v21  ;;  %v23310_v21 = vld [vmem:[%s26902_s20 + $0xacc] ss:$28 sps:$4 sm:$0xff]  }
 0x3da   : > { %7152 = vmatpush1.bf16.msra.mxu1 %v23239_v22  ;;  %v23305_v22 = vld [vmem:[%s26902_s20 + $0x18c0] ss:$28 sps:$4 sm:$0xff]  }
 0x3db   : > { %7324 = vmatpush1.bf16.msra.mxu0 %v23242_v23  ;;  %7153 = vmatprep.subr.bf16.mxu1 %v23247_v24  ;;  %v23308_v23 = vld [vmem:[%s26902_s20 + $0xac8] ss:$28 sps:$4 sm:$0xff]   ;;  %v23313_v24 = vld [vmem:[%s26902_s20 + $0x18fc] ss:$28 sps:$4 sm:$0xff]  }
 0x3dc   : > { %7325 = vmatprep.subr.bf16.mxu0 %v23250_v30  ;;  %v23316_v30 = vld [vmem:[%s26902_s20 + $0xb04] ss:$28 sps:$4 sm:$0xff]  }
 0x3de   : > { %7154 = vmatpush1.bf16.msra.mxu1 %v23245_v31  ;;  %v23311_v31 = vld [vmem:[%s26902_s20 + $0x18f8] ss:$28 sps:$4 sm:$0xff]  }
 0x3df   : > { %7326 = vmatpush1.bf16.msra.mxu0 %v23248_v32  ;;  %7155 = vmatprep.subr.bf16.mxu1 %v23253_v33  ;;  %v23314_v32 = vld [vmem:[%s26902_s20 + $0xb00] ss:$28 sps:$4 sm:$0xff]   ;;  %v23319_v33 = vld [vmem:[%s26902_s20 + $0x1934] ss:$28 sps:$4 sm:$0xff]  }
 0x3e0   : > { %7327 = vmatprep.subr.bf16.mxu0 %v23256_v7  ;;  %v23322_v7 = vld [vmem:[%s26902_s20 + $0xb3c] ss:$28 sps:$4 sm:$0xff]  }
 0x3e2   : > { %7156 = vmatpush1.bf16.msra.mxu1 %v23251_v10  ;;  %v23317_v10 = vld [vmem:[%s26902_s20 + $0x1930] ss:$28 sps:$4 sm:$0xff]  }
 0x3e3   : > { %7328 = vmatpush1.bf16.msra.mxu0 %v23254_v35  ;;  %7157 = vmatprep.subr.bf16.mxu1 %v23259_v36  ;;  %v23320_v35 = vld [vmem:[%s26902_s20 + $0xb38] ss:$28 sps:$4 sm:$0xff]   ;;  %v23325_v36 = vld [vmem:[%s26902_s20 + $0x196c] ss:$28 sps:$4 sm:$0xff]  }
 0x3e4   : > { %7329 = vmatprep.subr.bf16.mxu0 %v23262_v38  ;;  %v23328_v38 = vld [vmem:[%s26902_s20 + $0xb74] ss:$28 sps:$4 sm:$0xff]  }
 0x3e6   : > { %7158 = vmatpush1.bf16.msra.mxu1 %v23257_v39  ;;  %v23323_v39 = vld [vmem:[%s26902_s20 + $0x1968] ss:$28 sps:$4 sm:$0xff]  }
 0x3e7   : > { %7330 = vmatpush1.bf16.msra.mxu0 %v23260_v41  ;;  %7159 = vmatprep.subr.bf16.mxu1 %v23265_v42  ;;  %v23326_v41 = vld [vmem:[%s26902_s20 + $0xb70] ss:$28 sps:$4 sm:$0xff]   ;;  %v23331_v42 = vld [vmem:[%s26902_s20 + $0x19a4] ss:$28 sps:$4 sm:$0xff]  }
 0x3e8   : > { %7331 = vmatprep.subr.bf16.mxu0 %v23268_v45  ;;  %v23334_v45 = vld [vmem:[%s26902_s20 + $0xbac] ss:$28 sps:$4 sm:$0xff]  }
 0x3ea   : > { %7160 = vmatpush1.bf16.msra.mxu1 %v23263_v46  ;;  %v23329_v46 = vld [vmem:[%s26902_s20 + $0x19a0] ss:$28 sps:$4 sm:$0xff]  }
 0x3eb   : > { %7332 = vmatpush1.bf16.msra.mxu0 %v23266_v48  ;;  %7161 = vmatprep.subr.bf16.mxu1 %v23271_v49  ;;  %v23332_v48 = vld [vmem:[%s26902_s20 + $0xba8] ss:$28 sps:$4 sm:$0xff]   ;;  %v23337_v49 = vld [vmem:[%s26902_s20 + $0x19dc] ss:$28 sps:$4 sm:$0xff]  }
 0x3ec   : > { %7333 = vmatprep.subr.bf16.mxu0 %v23274_v50  ;;  %v23340_v50 = vld [vmem:[%s26902_s20 + $0xbe4] ss:$28 sps:$4 sm:$0xff]  }
 0x3ee   : > { %7162 = vmatpush1.bf16.msra.mxu1 %v23269_v51  ;;  %v795_v51 = vld [vmem:[#allocation2] sm:$0xff] }
 0x3ef   : > { %7334 = vmatpush1.bf16.msra.mxu0 %v23272_v52  ;;  %7163 = vmatprep.subr.bf16.mxu1 %v23277_v53 }
 0x3f0   : > { %7335 = vmatprep.subr.bf16.mxu0 %v23280_v54  ;;  %v796_v54 = vld [vmem:[#allocation2 + $0x8] sm:$0xff] }
 0x3f2   : > { %7164 = vmatpush1.bf16.msra.mxu1 %v23275_v61 }
 0x3f3   : > { %7336 = vmatpush1.bf16.msra.mxu0 %v23278_v43  ;;  %7165 = vmatprep.subr.bf16.mxu1 %v23283_v1  ;;  %v802_v1 = vld [vmem:[#allocation2 + $0x38] sm:$0xff] }
 0x3f4   : > { %7337 = vmatprep.subr.bf16.mxu0 %v23286_v2 }
 0x3f6   : > { %7166 = vmatpush1.bf16.msra.mxu1 %v23281_v25  ;;  %v23335_v25 = vld [vmem:[%s26902_s20 + $0x19d8] ss:$28 sps:$4 sm:$0xff]  }
 0x3f7   : > { %7338 = vmatpush1.bf16.msra.mxu0 %v23284_v26  ;;  %7167 = vmatprep.subr.bf16.mxu1 %v23289_v4  ;;  %v23338_v26 = vld [vmem:[%s26902_s20 + $0xbe0] ss:$28 sps:$4 sm:$0xff]  }
 0x3f8   : > { %7339 = vmatprep.subr.bf16.mxu0 %v23292_v6 }
 0x3fa   : > { %7168 = vmatpush1.bf16.msra.mxu1 %v23287_v11  ;;  %v803_v11 = vld [vmem:[#allocation2 + $0x40] sm:$0xff] }
 0x3fb   : > { %7340 = vmatpush1.bf16.msra.mxu0 %v23290_v12  ;;  %7169 = vmatprep.subr.bf16.mxu1 %v23295_v13  ;;  %v23346_v13 = vld [vmem:[%s26902_s20 + $0xc1c] ss:$28 sps:$4 sm:$0xff]  }
 0x3fc   : > { %7341 = vmatprep.subr.bf16.mxu0 %v23298_v14 }
 0x3fe   : > { %7170 = vmatpush1.bf16.msra.mxu1 %v23293_v56 }
 0x3ff   : > { %7342 = vmatpush1.bf16.msra.mxu0 %v23296_v57  ;;  %7182 = vmatprep.subr.bf16.mxu1 %v23301_v16  ;;  %v23344_v16 = vld [vmem:[%s26902_s20 + $0xc18] ss:$28 sps:$4 sm:$0xff]  }
 0x400   : > { %7354 = vmatprep.subr.bf16.mxu0 %v23304_v17  ;;  %v23349_v17 = vld [vmem:[%s26902_s20 + $0x1a4c] ss:$28 sps:$4 sm:$0xff]  }
 0x401   : > { %7172 = vmatmul.mubr.bf16.vlgmr.msra.gmra.mrb[4].mxu1 %v27368_v29 }
 0x402   : > { %7344 = vmatmul.mubr.bf16.vlgmr.msra.gmra.mrb[4].mxu0 %v27022_v28  ;;  %7183 = vmatpush1.bf16.msra.mxu1 %v23299_v18  ;;  %v23352_v18 = vld [vmem:[%s26902_s20 + $0xc54] ss:$28 sps:$4 sm:$0xff]  }
 0x403   : > { %7355 = vmatpush1.bf16.msra.mxu0 %v23302_v19  ;;  %7184 = vmatprep.subr.bf16.mxu1 %v23307_v20  ;;  %v23350_v19 = vld [vmem:[%s26902_s20 + $0xc50] ss:$28 sps:$4 sm:$0xff]   ;;  %v23355_v20 = vld [vmem:[%s26902_s20 + $0x1a84] ss:$28 sps:$4 sm:$0xff]  }
 0x404   : > { %7356 = vmatprep.subr.bf16.mxu0 %v23310_v21  ;;  %7214 = vmatprep.mubr.bf16.mxu1 %v27376_v34  ;;  %v23358_v21 = vld [vmem:[%s26902_s20 + $0xc8c] ss:$28 sps:$4 sm:$0xff]  }
 0x405   : > { %7386 = vmatprep.mubr.bf16.mxu0 %v27069_v59 }
 0x406   : > { %7185 = vmatpush1.bf16.msra.mxu1 %v23305_v22  ;;  %v23353_v22 = vld [vmem:[%s26902_s20 + $0x1a80] ss:$28 sps:$4 sm:$0xff]  }
 0x407   : > { %7357 = vmatpush1.bf16.msra.mxu0 %v23308_v23  ;;  %7186 = vmatprep.subr.bf16.mxu1 %v23313_v24  ;;  %v23356_v23 = vld [vmem:[%s26902_s20 + $0xc88] ss:$28 sps:$4 sm:$0xff]   ;;  %v23361_v24 = vld [vmem:[%s26902_s20 + $0x1abc] ss:$28 sps:$4 sm:$0xff]  }
 0x408   : > { %7358 = vmatprep.subr.bf16.mxu0 %v23316_v30  ;;  %v23364_v30 = vld [vmem:[%s26902_s20 + $0xcc4] ss:$28 sps:$4 sm:$0xff]  }
 0x40a   : > { %7187 = vmatpush1.bf16.msra.mxu1 %v23311_v31  ;;  %v23359_v31 = vld [vmem:[%s26902_s20 + $0x1ab8] ss:$28 sps:$4 sm:$0xff]  }
 0x40b   : > { %7359 = vmatpush1.bf16.msra.mxu0 %v23314_v32  ;;  %7188 = vmatprep.subr.bf16.mxu1 %v23319_v33  ;;  %v23362_v32 = vld [vmem:[%s26902_s20 + $0xcc0] ss:$28 sps:$4 sm:$0xff]   ;;  %v23367_v33 = vld [vmem:[%s26902_s20 + $0x1af4] ss:$28 sps:$4 sm:$0xff]  }
 0x40c   : > { %7360 = vmatprep.subr.bf16.mxu0 %v23322_v7  ;;  %v23370_v7 = vld [vmem:[%s26902_s20 + $0xcfc] ss:$28 sps:$4 sm:$0xff]  }
 0x40e   : > { %7189 = vmatpush1.bf16.msra.mxu1 %v23317_v10  ;;  %v23365_v10 = vld [vmem:[%s26902_s20 + $0x1af0] ss:$28 sps:$4 sm:$0xff]  }
 0x40f   : > { %7361 = vmatpush1.bf16.msra.mxu0 %v23320_v35  ;;  %7190 = vmatprep.subr.bf16.mxu1 %v23325_v36  ;;  %v23368_v35 = vld [vmem:[%s26902_s20 + $0xcf8] ss:$28 sps:$4 sm:$0xff]   ;;  %v23373_v36 = vld [vmem:[%s26902_s20 + $0x1b2c] ss:$28 sps:$4 sm:$0xff]  }
 0x410   : > { %7362 = vmatprep.subr.bf16.mxu0 %v23328_v38  ;;  %v23376_v38 = vld [vmem:[%s26902_s20 + $0xd34] ss:$28 sps:$4 sm:$0xff]  }
 0x412   : > { %7191 = vmatpush1.bf16.msra.mxu1 %v23323_v39  ;;  %v23371_v39 = vld [vmem:[%s26902_s20 + $0x1b28] ss:$28 sps:$4 sm:$0xff]  }
 0x413   : > { %7363 = vmatpush1.bf16.msra.mxu0 %v23326_v41  ;;  %7192 = vmatprep.subr.bf16.mxu1 %v23331_v42  ;;  %v23374_v41 = vld [vmem:[%s26902_s20 + $0xd30] ss:$28 sps:$4 sm:$0xff]   ;;  %v23379_v42 = vld [vmem:[%s26902_s20 + $0x1b64] ss:$28 sps:$4 sm:$0xff]  }
 0x414   : > { %7364 = vmatprep.subr.bf16.mxu0 %v23334_v45  ;;  %v23382_v45 = vld [vmem:[%s26902_s20 + $0xd6c] ss:$28 sps:$4 sm:$0xff]  }
 0x415   : > { %v6872_v52 = vpop.f32.mrb[0].mxu0 }
 0x416   : > { %v22000_v53 = vadd.f32 %v6872_v52, %v27402_v44  ;;  %v6874_v61 = vpop.f32.mrb[1].mxu0  ;;  %7193 = vmatpush1.bf16.msra.mxu1 %v23329_v46  ;;  %v23343_v44 = vld [vmem:[%s26902_s20 + $0x1a14] ss:$28 sps:$4 sm:$0xff]   ;;  %v23377_v46 = vld [vmem:[%s26902_s20 + $0x1b60] ss:$28 sps:$4 sm:$0xff]  }
 0x417   : > { %v22001_v43 = vadd.f32 %v6874_v61, %v27404_v63  ;;  %v6876_v2 = vpop.f32.mrb[2].mxu0  ;;  %7365 = vmatpush1.bf16.msra.mxu0 %v23332_v48  ;;  %7194 = vmatprep.subr.bf16.mxu1 %v23337_v49  ;;  %v23380_v48 = vld [vmem:[%s26902_s20 + $0xd68] ss:$28 sps:$4 sm:$0xff]   ;;  %v23385_v49 = vld [vmem:[%s26902_s20 + $0x1b9c] ss:$28 sps:$4 sm:$0xff]  }
 0x418   : > { %v7897_v4 = vadd.f32 %v22000_v53, %v795_v51  ;;  %v22002_v6 = vadd.f32 %v6876_v2, %v27406_v0  ;;  %v6878_v12 = vpop.f32.mrb[3].mxu0  ;;  %7366 = vmatprep.subr.bf16.mxu0 %v23340_v50  ;;  %v23341_v0 = vld [vmem:[%s26902_s20 + $0x1a10] ss:$28 sps:$4 sm:$0xff]   ;;  %v23388_v50 = vld [vmem:[%s26902_s20 + $0xda4] ss:$28 sps:$4 sm:$0xff]  }
 0x419   : > { %v7898_v63 = vadd.f32 %v22001_v43, %v796_v54  ;;  %v22003_v14 = vadd.f32 %v6878_v12, %v27410_v3  ;;  %v23347_v3 = vld [vmem:[%s26902_s20 + $0x1a48] ss:$28 sps:$4 sm:$0xff]   ;;  %v23383_v51 = vld [vmem:[%s26902_s20 + $0x1b98] ss:$28 sps:$4 sm:$0xff]   ;;  %v23386_v52 = vld [vmem:[%s26902_s20 + $0xda0] ss:$28 sps:$4 sm:$0xff]  }
 0x41a   : > { %7911 = vst [vmem:[#allocation2] sm:$0xff] %v7897_v4  ;;  %v7904_v56 = vadd.f32 %v22002_v6, %v802_v1  ;;  %7195 = vmatpush1.bf16.msra.mxu1 %v23335_v25  ;;  %v23391_v53 = vld [vmem:[%s26902_s20 + $0x1bd4] ss:$28 sps:$4 sm:$0xff]   ;;  %v23394_v54 = vld [vmem:[%s26902_s20 + $0xddc] ss:$28 sps:$4 sm:$0xff]  }
 0x41b   : > { %7912 = vst [vmem:[#allocation2 + $0x8] sm:$0xff] %v7898_v63  ;;  %v7905_v57 = vadd.f32 %v22003_v14, %v803_v11  ;;  %7367 = vmatpush1.bf16.msra.mxu0 %v23338_v26  ;;  %7196 = vmatprep.subr.bf16.mxu1 %v23343_v44  ;;  %v23389_v61 = vld [vmem:[%s26902_s20 + $0x1bd0] ss:$28 sps:$4 sm:$0xff]   ;;  %v23392_v43 = vld [vmem:[%s26902_s20 + $0xdd8] ss:$28 sps:$4 sm:$0xff]  }
 0x41c   : > { %7918 = vst [vmem:[#allocation2 + $0x38] sm:$0xff] %v7904_v56  ;;  %7368 = vmatprep.subr.bf16.mxu0 %v23346_v13  ;;  %v23397_v1 = vld [vmem:[%s26902_s20 + $0xe14] ss:$28 sps:$4 sm:$0xff]   ;;  %v23402_v4 = vld [vmem:[%s26902_s20 + $0xe4c] ss:$28 sps:$4 sm:$0xff]  }
 0x41d   : > { %7919 = vst [vmem:[#allocation2 + $0x40] sm:$0xff] %v7905_v57  ;;  %v23398_v2 = vld [vmem:[%s26902_s20 + $0x1d8] ss:$28 sps:$4 sm:$0xff]   ;;  %v23395_v25 = vld [vmem:[%s26902_s20 + $0xe10] ss:$28 sps:$4 sm:$0xff]  }
 0x41e   : > { %7197 = vmatpush1.bf16.msra.mxu1 %v23341_v0  ;;  %v23399_v26 = vld [vmem:[%s26902_s20 + $0x18] ss:$28 sps:$4 sm:$0xff]   ;;  %v23403_v6 = vld [vmem:[%s26902_s20 + $0x210] ss:$28 sps:$4 sm:$0xff]   ;;  %v23400_v11 = vld [vmem:[%s26902_s20 + $0xe48] ss:$28 sps:$4 sm:$0xff]  }
 0x41f   : > { %7369 = vmatpush1.bf16.msra.mxu0 %v23344_v16  ;;  %7198 = vmatprep.subr.bf16.mxu1 %v23349_v17  ;;  %v23404_v12 = vld [vmem:[%s26902_s20 + $0x50] ss:$28 sps:$4 sm:$0xff]   ;;  %v23407_v44 = vld [vmem:[%s26902_s20 + $0xe84] ss:$28 sps:$4 sm:$0xff]   ;;  %v23412_v56 = vld [vmem:[%s26902_s20 + $0xebc] ss:$28 sps:$4 sm:$0xff]  }
 0x420   : > { %7370 = vmatprep.subr.bf16.mxu0 %v23352_v18  ;;  %v23408_v13 = vld [vmem:[%s26902_s20 + $0x248] ss:$28 sps:$4 sm:$0xff]   ;;  %v23405_v63 = vld [vmem:[%s26902_s20 + $0xe80] ss:$28 sps:$4 sm:$0xff]   ;;  %v23410_v0 = vld [vmem:[%s26902_s20 + $0xeb8] ss:$28 sps:$4 sm:$0xff]  }
 0x421   : > { %v23409_v14 = vld [vmem:[%s26902_s20 + $0x88] ss:$28 sps:$4 sm:$0xff]   ;;  %v23413_v57 = vld [vmem:[%s26902_s20 + $0x280] ss:$28 sps:$4 sm:$0xff]   ;;  %v23417_v16 = vld [vmem:[%s26902_s20 + $0xef4] ss:$28 sps:$4 sm:$0xff]  }
 0x422   : > { %7199 = vmatpush1.bf16.msra.mxu1 %v23347_v3  ;;  %v23418_v17 = vld [vmem:[%s26902_s20 + $0x2b8] ss:$28 sps:$4 sm:$0xff]   ;;  %v23415_v18 = vld [vmem:[%s26902_s20 + $0xef0] ss:$28 sps:$4 sm:$0xff]  }
 0x423   : > { %7371 = vmatpush1.bf16.msra.mxu0 %v23350_v19  ;;  %7200 = vmatprep.subr.bf16.mxu1 %v23355_v20  ;;  %v23419_v3 = vld [vmem:[%s26902_s20 + $0xf8] ss:$28 sps:$4 sm:$0xff]   ;;  %v23422_v19 = vld [vmem:[%s26902_s20 + $0xf2c] ss:$28 sps:$4 sm:$0xff]  }
 0x424   : > { %7372 = vmatprep.subr.bf16.mxu0 %v23358_v21  ;;  %v23423_v20 = vld [vmem:[%s26902_s20 + $0x2f0] ss:$28 sps:$4 sm:$0xff]   ;;  %v23420_v21 = vld [vmem:[%s26902_s20 + $0xf28] ss:$28 sps:$4 sm:$0xff]  }
 0x426   : > { %7201 = vmatpush1.bf16.msra.mxu1 %v23353_v22  ;;  %v23424_v22 = vld [vmem:[%s26902_s20 + $0x130] ss:$28 sps:$4 sm:$0xff]  }
 0x427   : > { %7373 = vmatpush1.bf16.msra.mxu0 %v23356_v23  ;;  %7202 = vmatprep.subr.bf16.mxu1 %v23361_v24  ;;  %v23427_v23 = vld [vmem:[%s26902_s20 + $0xf64] ss:$28 sps:$4 sm:$0xff]  }
 0x428   : > { %7374 = vmatprep.subr.bf16.mxu0 %v23364_v30  ;;  %v23428_v24 = vld [vmem:[%s26902_s20 + $0x328] ss:$28 sps:$4 sm:$0xff]   ;;  %v23425_v30 = vld [vmem:[%s26902_s20 + $0xf60] ss:$28 sps:$4 sm:$0xff]  }
 0x42a   : > { %7203 = vmatpush1.bf16.msra.mxu1 %v23359_v31  ;;  %v23429_v31 = vld [vmem:[%s26902_s20 + $0x168] ss:$28 sps:$4 sm:$0xff]  }
 0x42b   : > { %7375 = vmatpush1.bf16.msra.mxu0 %v23362_v32  ;;  %7204 = vmatprep.subr.bf16.mxu1 %v23367_v33  ;;  %v23432_v32 = vld [vmem:[%s26902_s20 + $0xf9c] ss:$28 sps:$4 sm:$0xff]  }
 0x42c   : > { %7376 = vmatprep.subr.bf16.mxu0 %v23370_v7  ;;  %v23433_v33 = vld [vmem:[%s26902_s20 + $0x360] ss:$28 sps:$4 sm:$0xff]   ;;  %v23430_v7 = vld [vmem:[%s26902_s20 + $0xf98] ss:$28 sps:$4 sm:$0xff]  }
 0x42e   : > { %7205 = vmatpush1.bf16.msra.mxu1 %v23365_v10  ;;  %v23434_v10 = vld [vmem:[%s26902_s20 + $0x1a0] ss:$28 sps:$4 sm:$0xff]  }
 0x42f   : > { %7377 = vmatpush1.bf16.msra.mxu0 %v23368_v35  ;;  %7206 = vmatprep.subr.bf16.mxu1 %v23373_v36  ;;  %v23437_v35 = vld [vmem:[%s26902_s20 + $0xfd4] ss:$28 sps:$4 sm:$0xff]  }
 0x430   : > { %7378 = vmatprep.subr.bf16.mxu0 %v23376_v38  ;;  %v23438_v36 = vld [vmem:[%s26902_s20 + $0x558] ss:$28 sps:$4 sm:$0xff]   ;;  %v23435_v38 = vld [vmem:[%s26902_s20 + $0xfd0] ss:$28 sps:$4 sm:$0xff]  }
 0x432   : > { %7207 = vmatpush1.bf16.msra.mxu1 %v23371_v39  ;;  %v23439_v39 = vld [vmem:[%s26902_s20 + $0x398] ss:$28 sps:$4 sm:$0xff]  }
 0x433   : > { %7379 = vmatpush1.bf16.msra.mxu0 %v23374_v41  ;;  %7208 = vmatprep.subr.bf16.mxu1 %v23379_v42  ;;  %v23442_v41 = vld [vmem:[%s26902_s20 + $0x100c] ss:$28 sps:$4 sm:$0xff]  }
 0x434   : > { %7380 = vmatprep.subr.bf16.mxu0 %v23382_v45  ;;  %v23443_v42 = vld [vmem:[%s26902_s20 + $0x590] ss:$28 sps:$4 sm:$0xff]   ;;  %v23440_v45 = vld [vmem:[%s26902_s20 + $0x1008] ss:$28 sps:$4 sm:$0xff]  }
 0x436   : > { %7209 = vmatpush1.bf16.msra.mxu1 %v23377_v46  ;;  %v23444_v46 = vld [vmem:[%s26902_s20 + $0x3d0] ss:$28 sps:$4 sm:$0xff]  }
 0x437   : > { %7381 = vmatpush1.bf16.msra.mxu0 %v23380_v48  ;;  %7210 = vmatprep.subr.bf16.mxu1 %v23385_v49  ;;  %v23447_v48 = vld [vmem:[%s26902_s20 + $0x1044] ss:$28 sps:$4 sm:$0xff]  }
 0x438   : > { %7382 = vmatprep.subr.bf16.mxu0 %v23388_v50  ;;  %v23448_v49 = vld [vmem:[%s26902_s20 + $0x5c8] ss:$28 sps:$4 sm:$0xff]   ;;  %v23445_v50 = vld [vmem:[%s26902_s20 + $0x1040] ss:$28 sps:$4 sm:$0xff]  }
 0x43a   : > { %7211 = vmatpush1.bf16.msra.mxu1 %v23383_v51  ;;  %v23452_v51 = vld [vmem:[%s26902_s20 + $0x107c] ss:$28 sps:$4 sm:$0xff]  }
 0x43b   : > { %7383 = vmatpush1.bf16.msra.mxu0 %v23386_v52  ;;  %7212 = vmatprep.subr.bf16.mxu1 %v23391_v53  ;;  %v23453_v52 = vld [vmem:[%s26902_s20 + $0x600] ss:$28 sps:$4 sm:$0xff]   ;;  %v23450_v53 = vld [vmem:[%s26902_s20 + $0x1078] ss:$28 sps:$4 sm:$0xff]  }
 0x43c   : > { %7384 = vmatprep.subr.bf16.mxu0 %v23394_v54  ;;  %v23454_v54 = vld [vmem:[%s26902_s20 + $0x440] ss:$28 sps:$4 sm:$0xff]  }
 0x43e   : > { %7213 = vmatpush1.bf16.msra.mxu1 %v23389_v61  ;;  %v23458_v61 = vld [vmem:[%s26902_s20 + $0x638] ss:$28 sps:$4 sm:$0xff]  }
 0x43f   : > { %7385 = vmatpush1.bf16.msra.mxu0 %v23392_v43  ;;  %21780 = vmatprep.subr.bf16.mxu1 %v23398_v2  ;;  %v23455_v43 = vld [vmem:[%s26902_s20 + $0x10b0] ss:$28 sps:$4 sm:$0xff]  }
 0x440   : > { %7397 = vmatprep.subr.bf16.mxu0 %v23397_v1  ;;  %v23459_v1 = vld [vmem:[%s26902_s20 + $0x478] ss:$28 sps:$4 sm:$0xff]   ;;  %v23462_v2 = vld [vmem:[%s26902_s20 + $0x10ec] ss:$28 sps:$4 sm:$0xff]  }
 0x441   : > { %7215 = vmatmul.mubr.bf16.vlgmr.msra.gmra.mrb[4].mxu1 %v27452_v60 }
 0x442   : > { %7387 = vmatmul.mubr.bf16.vlgmr.msra.gmra.mrb[4].mxu0 %v27118_v40  ;;  %21781 = vmatpush3.bf16.msra.mxu1 %v23399_v26  ;;  %v23460_v26 = vld [vmem:[%s26902_s20 + $0x10e8] ss:$28 sps:$4 sm:$0xff]  }
 0x443   : > { %7398 = vmatpush1.bf16.msra.mxu0 %v23395_v25  ;;  %21782 = vmatprep.subr.bf16.mxu1 %v23403_v6  ;;  %v23463_v25 = vld [vmem:[%s26902_s20 + $0x670] ss:$28 sps:$4 sm:$0xff]   ;;  %v23467_v6 = vld [vmem:[%s26902_s20 + $0x1124] ss:$28 sps:$4 sm:$0xff]  }
 0x444   : > { %7399 = vmatprep.subr.bf16.mxu0 %v23402_v4  ;;  %7601 = vmatprep.mubr.bf16.mxu1 %v26994_v5  ;;  %v23414_v5 = vld [vmem:[%s26902_s20 + $0xc0] ss:$28 sps:$4 sm:$0xff]   ;;  %v23464_v4 = vld [vmem:[%s26902_s20 + $0x4b0] ss:$28 sps:$4 sm:$0xff]  }
 0x445   : > { %7429 = vmatprep.mubr.bf16.mxu0 %v27134_v47 }
 0x446   : > { %21783 = vmatpush3.bf16.msra.mxu1 %v23404_v12  ;;  %v23465_v12 = vld [vmem:[%s26902_s20 + $0x1120] ss:$28 sps:$4 sm:$0xff]  }
 0x447   : > { %7400 = vmatpush1.bf16.msra.mxu0 %v23400_v11  ;;  %21784 = vmatprep.subr.bf16.mxu1 %v23408_v13  ;;  %v23468_v11 = vld [vmem:[%s26902_s20 + $0x6a8] ss:$28 sps:$4 sm:$0xff]   ;;  %v23472_v13 = vld [vmem:[%s26902_s20 + $0x115c] ss:$28 sps:$4 sm:$0xff]  }
 0x448   : > { %7401 = vmatprep.subr.bf16.mxu0 %v23407_v44  ;;  %v23469_v44 = vld [vmem:[%s26902_s20 + $0x4e8] ss:$28 sps:$4 sm:$0xff]  }
 0x44a   : > { %21785 = vmatpush3.bf16.msra.mxu1 %v23409_v14  ;;  %v23470_v14 = vld [vmem:[%s26902_s20 + $0x1158] ss:$28 sps:$4 sm:$0xff]  }
 0x44b   : > { %7402 = vmatpush1.bf16.msra.mxu0 %v23405_v63  ;;  %21786 = vmatprep.subr.bf16.mxu1 %v23413_v57  ;;  %v23473_v63 = vld [vmem:[%s26902_s20 + $0x6e0] ss:$28 sps:$4 sm:$0xff]   ;;  %v23477_v57 = vld [vmem:[%s26902_s20 + $0x1194] ss:$28 sps:$4 sm:$0xff]  }
 0x44c   : > { %7403 = vmatprep.subr.bf16.mxu0 %v23412_v56  ;;  %v23474_v56 = vld [vmem:[%s26902_s20 + $0x520] ss:$28 sps:$4 sm:$0xff]  }
 0x44e   : > { %21787 = vmatpush3.bf16.msra.mxu1 %v23414_v5  ;;  %v23475_v5 = vld [vmem:[%s26902_s20 + $0x1190] ss:$28 sps:$4 sm:$0xff]  }
 0x44f   : > { %7404 = vmatpush1.bf16.msra.mxu0 %v23410_v0  ;;  %21788 = vmatprep.subr.bf16.mxu1 %v23418_v17  ;;  %v23478_v0 = vld [vmem:[%s26902_s20 + $0x8d8] ss:$28 sps:$4 sm:$0xff]   ;;  %v23482_v17 = vld [vmem:[%s26902_s20 + $0x11cc] ss:$28 sps:$4 sm:$0xff]  }
 0x450   : > { %7405 = vmatprep.subr.bf16.mxu0 %v23417_v16  ;;  %v23479_v16 = vld [vmem:[%s26902_s20 + $0x718] ss:$28 sps:$4 sm:$0xff]  }
 0x452   : > { %21789 = vmatpush3.bf16.msra.mxu1 %v23419_v3  ;;  %v23480_v3 = vld [vmem:[%s26902_s20 + $0x11c8] ss:$28 sps:$4 sm:$0xff]  }
 0x453   : > { %7406 = vmatpush1.bf16.msra.mxu0 %v23415_v18  ;;  %21790 = vmatprep.subr.bf16.mxu1 %v23423_v20  ;;  %v23483_v18 = vld [vmem:[%s26902_s20 + $0x910] ss:$28 sps:$4 sm:$0xff]   ;;  %v23487_v20 = vld [vmem:[%s26902_s20 + $0x1204] ss:$28 sps:$4 sm:$0xff]  }
 0x454   : > { %7407 = vmatprep.subr.bf16.mxu0 %v23422_v19  ;;  %v23484_v19 = vld [vmem:[%s26902_s20 + $0x750] ss:$28 sps:$4 sm:$0xff]  }
 0x456   : > { %21791 = vmatpush3.bf16.msra.mxu1 %v23424_v22  ;;  %v23489_v22 = vld [vmem:[%s26902_s20 + $0x788] ss:$28 sps:$4 sm:$0xff]  }
 0x457   : > { %7408 = vmatpush1.bf16.msra.mxu0 %v23420_v21  ;;  %21792 = vmatprep.subr.bf16.mxu1 %v23428_v24  ;;  %v23488_v21 = vld [vmem:[%s26902_s20 + $0x948] ss:$28 sps:$4 sm:$0xff]   ;;  %v23493_v24 = vld [vmem:[%s26902_s20 + $0x980] ss:$28 sps:$4 sm:$0xff]  }
 0x458   : > { %7409 = vmatprep.subr.bf16.mxu0 %v23427_v23  ;;  %v23492_v23 = vld [vmem:[%s26902_s20 + $0x123c] ss:$28 sps:$4 sm:$0xff]  }
 0x45a   : > { %21793 = vmatpush3.bf16.msra.mxu1 %v23429_v31  ;;  %v23497_v31 = vld [vmem:[%s26902_s20 + $0x1274] ss:$28 sps:$4 sm:$0xff]  }
 0x45b   : > { %7410 = vmatpush1.bf16.msra.mxu0 %v23425_v30  ;;  %21794 = vmatprep.subr.bf16.mxu1 %v23433_v33  ;;  %v23490_v30 = vld [vmem:[%s26902_s20 + $0x1238] ss:$28 sps:$4 sm:$0xff]   ;;  %v23495_v33 = vld [vmem:[%s26902_s20 + $0x1270] ss:$28 sps:$4 sm:$0xff]  }
 0x45c   : > { %7411 = vmatprep.subr.bf16.mxu0 %v23432_v32  ;;  %v23498_v32 = vld [vmem:[%s26902_s20 + $0x9b8] ss:$28 sps:$4 sm:$0xff]  }
 0x45e   : > { %21795 = vmatpush3.bf16.msra.mxu1 %v23434_v10  ;;  %v23502_v10 = vld [vmem:[%s26902_s20 + $0x12ac] ss:$28 sps:$4 sm:$0xff]  }
 0x45f   : > { %7412 = vmatpush1.bf16.msra.mxu0 %v23430_v7  ;;  %21802 = vmatprep.subr.bf16.mxu1 %v23438_v36  ;;  %v23499_v7 = vld [vmem:[%s26902_s20 + $0x7f8] ss:$28 sps:$4 sm:$0xff]   ;;  %v23500_v36 = vld [vmem:[%s26902_s20 + $0x12a8] ss:$28 sps:$4 sm:$0xff]  }
 0x460   : > { %7413 = vmatprep.subr.bf16.mxu0 %v23437_v35  ;;  %v23503_v35 = vld [vmem:[%s26902_s20 + $0x9f0] ss:$28 sps:$4 sm:$0xff]  }
 0x461   : > { %7602 = vmatmul.mubr.bf16.vlgmr.msra.gmra.mrb[8].mxu1 %v27020_v27  ;;  %v23449_v27 = vld [vmem:[%s26902_s20 + $0x408] ss:$28 sps:$4 sm:$0xff]  }
 0x462   : > { %21803 = vmatpush3.bf16.msra.mxu1 %v23439_v39  ;;  %7642 = vmatprep.mubr.bf16.mxu1 %v27065_v58  ;;  %v23457_v58 = vld [vmem:[%s26902_s20 + $0x10b4] ss:$28 sps:$4 sm:$0xff]   ;;  %v23507_v39 = vld [vmem:[%s26902_s20 + $0x12e4] ss:$28 sps:$4 sm:$0xff]  }
 0x463   : > { %7414 = vmatpush1.bf16.msra.mxu0 %v23435_v38  ;;  %21804 = vmatprep.subr.bf16.mxu1 %v23443_v42  ;;  %v23504_v38 = vld [vmem:[%s26902_s20 + $0x830] ss:$28 sps:$4 sm:$0xff]   ;;  %v23505_v42 = vld [vmem:[%s26902_s20 + $0x12e0] ss:$28 sps:$4 sm:$0xff]  }
 0x464   : > { %7415 = vmatprep.subr.bf16.mxu0 %v23442_v41  ;;  %v23508_v41 = vld [vmem:[%s26902_s20 + $0xa28] ss:$28 sps:$4 sm:$0xff]  }
 0x466   : > { %21805 = vmatpush3.bf16.msra.mxu1 %v23444_v46  ;;  %v23512_v46 = vld [vmem:[%s26902_s20 + $0x131c] ss:$28 sps:$4 sm:$0xff]  }
 0x467   : > { %7416 = vmatpush1.bf16.msra.mxu0 %v23440_v45  ;;  %21806 = vmatprep.subr.bf16.mxu1 %v23448_v49  ;;  %v23509_v45 = vld [vmem:[%s26902_s20 + $0x868] ss:$28 sps:$4 sm:$0xff]   ;;  %v23510_v49 = vld [vmem:[%s26902_s20 + $0x1318] ss:$28 sps:$4 sm:$0xff]  }
 0x468   : > { %7417 = vmatprep.subr.bf16.mxu0 %v23447_v48  ;;  %v23513_v48 = vld [vmem:[%s26902_s20 + $0xa60] ss:$28 sps:$4 sm:$0xff]  }
 0x46a   : > { %21807 = vmatpush3.bf16.msra.mxu1 %v23449_v27  ;;  %v23517_v27 = vld [vmem:[%s26902_s20 + $0x1354] ss:$28 sps:$4 sm:$0xff]  }
 0x46b   : > { %7418 = vmatpush1.bf16.msra.mxu0 %v23445_v50  ;;  %21808 = vmatprep.subr.bf16.mxu1 %v23453_v52  ;;  %v23514_v50 = vld [vmem:[%s26902_s20 + $0x8a0] ss:$28 sps:$4 sm:$0xff]   ;;  %v23515_v52 = vld [vmem:[%s26902_s20 + $0x1350] ss:$28 sps:$4 sm:$0xff]  }
 0x46c   : > { %7419 = vmatprep.subr.bf16.mxu0 %v23452_v51  ;;  %v23518_v51 = vld [vmem:[%s26902_s20 + $0xc58] ss:$28 sps:$4 sm:$0xff]  }
 0x46e   : > { %21809 = vmatpush3.bf16.msra.mxu1 %v23454_v54  ;;  %v23522_v54 = vld [vmem:[%s26902_s20 + $0x138c] ss:$28 sps:$4 sm:$0xff]  }
 0x46f   : > { %7420 = vmatpush1.bf16.msra.mxu0 %v23450_v53  ;;  %21810 = vmatprep.subr.bf16.mxu1 %v23458_v61  ;;  %v23519_v53 = vld [vmem:[%s26902_s20 + $0xa98] ss:$28 sps:$4 sm:$0xff]   ;;  %v23520_v61 = vld [vmem:[%s26902_s20 + $0x1388] ss:$28 sps:$4 sm:$0xff]  }
 0x470   : > { %7421 = vmatprep.subr.bf16.mxu0 %v23457_v58  ;;  %v23523_v58 = vld [vmem:[%s26902_s20 + $0xc90] ss:$28 sps:$4 sm:$0xff]  }
 0x472   : > { %21811 = vmatpush3.bf16.msra.mxu1 %v23459_v1  ;;  %v23527_v1 = vld [vmem:[%s26902_s20 + $0x13c4] ss:$28 sps:$4 sm:$0xff]  }
 0x473   : > { %7422 = vmatpush1.bf16.msra.mxu0 %v23455_v43  ;;  %21812 = vmatprep.subr.bf16.mxu1 %v23463_v25  ;;  %v23524_v43 = vld [vmem:[%s26902_s20 + $0xad0] ss:$28 sps:$4 sm:$0xff]   ;;  %v23525_v25 = vld [vmem:[%s26902_s20 + $0x13c0] ss:$28 sps:$4 sm:$0xff]  }
 0x474   : > { %7423 = vmatprep.subr.bf16.mxu0 %v23462_v2  ;;  %v23528_v2 = vld [vmem:[%s26902_s20 + $0xcc8] ss:$28 sps:$4 sm:$0xff]  }
 0x476   : > { %21813 = vmatpush3.bf16.msra.mxu1 %v23464_v4  ;;  %v23533_v4 = vld [vmem:[%s26902_s20 + $0xd00] ss:$28 sps:$4 sm:$0xff]  }
 0x477   : > { %7424 = vmatpush1.bf16.msra.mxu0 %v23460_v26  ;;  %21814 = vmatprep.subr.bf16.mxu1 %v23468_v11  ;;  %v23532_v26 = vld [vmem:[%s26902_s20 + $0x13fc] ss:$28 sps:$4 sm:$0xff]  }
 0x478   : > { %7425 = vmatprep.subr.bf16.mxu0 %v23467_v6  ;;  %v23530_v6 = vld [vmem:[%s26902_s20 + $0x13f8] ss:$28 sps:$4 sm:$0xff]   ;;  %v23534_v11 = vld [vmem:[%s26902_s20 + $0xb40] ss:$28 sps:$4 sm:$0xff]  }
 0x47a   : > { %21815 = vmatpush3.bf16.msra.mxu1 %v23469_v44  ;;  %v23535_v44 = vld [vmem:[%s26902_s20 + $0x1430] ss:$28 sps:$4 sm:$0xff]  }
 0x47b   : > { %7426 = vmatpush1.bf16.msra.mxu0 %v23465_v12  ;;  %21816 = vmatprep.subr.bf16.mxu1 %v23473_v63  ;;  %v23538_v12 = vld [vmem:[%s26902_s20 + $0xd38] ss:$28 sps:$4 sm:$0xff]   ;;  %v23542_v63 = vld [vmem:[%s26902_s20 + $0x146c] ss:$28 sps:$4 sm:$0xff]  }
 0x47c   : > { %7427 = vmatprep.subr.bf16.mxu0 %v23472_v13  ;;  %v23539_v13 = vld [vmem:[%s26902_s20 + $0xb78] ss:$28 sps:$4 sm:$0xff]  }
 0x47e   : > { %21817 = vmatpush3.bf16.msra.mxu1 %v23474_v56  ;;  %v23540_v56 = vld [vmem:[%s26902_s20 + $0x1468] ss:$28 sps:$4 sm:$0xff]  }
 0x47f   : > { %7428 = vmatpush1.bf16.msra.mxu0 %v23470_v14  ;;  %21824 = vmatprep.subr.bf16.mxu1 %v23478_v0  ;;  %v23543_v14 = vld [vmem:[%s26902_s20 + $0xd70] ss:$28 sps:$4 sm:$0xff]   ;;  %v23547_v0 = vld [vmem:[%s26902_s20 + $0x14a4] ss:$28 sps:$4 sm:$0xff]  }
 0x480   : > { %7440 = vmatprep.subr.bf16.mxu0 %v23477_v57  ;;  %v23544_v57 = vld [vmem:[%s26902_s20 + $0xbb0] ss:$28 sps:$4 sm:$0xff]  }
 0x481   : > { %7643 = vmatmul.mubr.bf16.vlgmr.msra.gmra.mrb[12].mxu1 %v27112_v37  ;;  %v23485_v37 = vld [vmem:[%s26902_s20 + $0x1200] ss:$28 sps:$4 sm:$0xff]  }
 0x482   : > { %7430 = vmatmul.mubr.bf16.vlgmr.msra.gmra.mrb[4].mxu0 %v27200_v55  ;;  %21825 = vmatpush3.bf16.msra.mxu1 %v23479_v16  ;;  %v23545_v16 = vld [vmem:[%s26902_s20 + $0x14a0] ss:$28 sps:$4 sm:$0xff]  }
 0x483   : > { %7441 = vmatpush1.bf16.msra.mxu0 %v23475_v5  ;;  %21826 = vmatprep.subr.bf16.mxu1 %v23483_v18  ;;  %v23548_v5 = vld [vmem:[%s26902_s20 + $0xda8] ss:$28 sps:$4 sm:$0xff]   ;;  %v23552_v18 = vld [vmem:[%s26902_s20 + $0x14dc] ss:$28 sps:$4 sm:$0xff]  }
 0x484   : > { %7442 = vmatprep.subr.bf16.mxu0 %v23482_v17  ;;  %7683 = vmatprep.mubr.bf16.mxu1 %v26999_v8  ;;  %v23494_v8 = vld [vmem:[%s26902_s20 + $0x7c0] ss:$28 sps:$4 sm:$0xff]   ;;  %v23549_v17 = vld [vmem:[%s26902_s20 + $0xbe8] ss:$28 sps:$4 sm:$0xff]  }
 0x485   : > { %7472 = vmatprep.mubr.bf16.mxu0 %v27212_v62 }
 0x486   : > { %21827 = vmatpush3.bf16.msra.mxu1 %v23484_v19  ;;  %v23550_v19 = vld [vmem:[%s26902_s20 + $0x14d8] ss:$28 sps:$4 sm:$0xff]  }
 0x487   : > { %7443 = vmatpush1.bf16.msra.mxu0 %v23480_v3  ;;  %21828 = vmatprep.subr.bf16.mxu1 %v23488_v21  ;;  %v23553_v3 = vld [vmem:[%s26902_s20 + $0xde0] ss:$28 sps:$4 sm:$0xff]   ;;  %v23557_v21 = vld [vmem:[%s26902_s20 + $0x1514] ss:$28 sps:$4 sm:$0xff]  }
 0x488   : > { %7444 = vmatprep.subr.bf16.mxu0 %v23487_v20  ;;  %v23554_v20 = vld [vmem:[%s26902_s20 + $0xc20] ss:$28 sps:$4 sm:$0xff]  }
 0x48a   : > { %21829 = vmatpush3.bf16.msra.mxu1 %v23489_v22  ;;  %v23555_v22 = vld [vmem:[%s26902_s20 + $0x1510] ss:$28 sps:$4 sm:$0xff]  }
 0x48b   : > { %7445 = vmatpush1.bf16.msra.mxu0 %v23485_v37  ;;  %21830 = vmatprep.subr.bf16.mxu1 %v23493_v24  ;;  %v23558_v37 = vld [vmem:[%s26902_s20 + $0xfd8] ss:$28 sps:$4 sm:$0xff]   ;;  %v23562_v24 = vld [vmem:[%s26902_s20 + $0x154c] ss:$28 sps:$4 sm:$0xff]  }
 0x48c   : > { %7446 = vmatprep.subr.bf16.mxu0 %v23492_v23  ;;  %v23559_v23 = vld [vmem:[%s26902_s20 + $0xe18] ss:$28 sps:$4 sm:$0xff]  }
 0x48e   : > { %21831 = vmatpush3.bf16.msra.mxu1 %v23494_v8  ;;  %v23560_v8 = vld [vmem:[%s26902_s20 + $0x1548] ss:$28 sps:$4 sm:$0xff]  }
 0x48f   : > { %7447 = vmatpush1.bf16.msra.mxu0 %v23490_v30  ;;  %21832 = vmatprep.subr.bf16.mxu1 %v23498_v32  ;;  %v23563_v30 = vld [vmem:[%s26902_s20 + $0x1010] ss:$28 sps:$4 sm:$0xff]   ;;  %v23567_v32 = vld [vmem:[%s26902_s20 + $0x1584] ss:$28 sps:$4 sm:$0xff]  }
 0x490   : > { %7448 = vmatprep.subr.bf16.mxu0 %v23497_v31  ;;  %v23564_v31 = vld [vmem:[%s26902_s20 + $0xe50] ss:$28 sps:$4 sm:$0xff]  }
 0x492   : > { %21833 = vmatpush3.bf16.msra.mxu1 %v23499_v7  ;;  %v23569_v7 = vld [vmem:[%s26902_s20 + $0xe88] ss:$28 sps:$4 sm:$0xff]  }
 0x493   : > { %7449 = vmatpush1.bf16.msra.mxu0 %v23495_v33  ;;  %21834 = vmatprep.subr.bf16.mxu1 %v23503_v35  ;;  %v23568_v33 = vld [vmem:[%s26902_s20 + $0x1048] ss:$28 sps:$4 sm:$0xff]   ;;  %v23573_v35 = vld [vmem:[%s26902_s20 + $0x1080] ss:$28 sps:$4 sm:$0xff]  }
 0x494   : > { %7450 = vmatprep.subr.bf16.mxu0 %v23502_v10  ;;  %v23572_v10 = vld [vmem:[%s26902_s20 + $0x15bc] ss:$28 sps:$4 sm:$0xff]  }
 0x496   : > { %21835 = vmatpush3.bf16.msra.mxu1 %v23504_v38  ;;  %v23577_v38 = vld [vmem:[%s26902_s20 + $0x15f4] ss:$28 sps:$4 sm:$0xff]  }
 0x497   : > { %7451 = vmatpush1.bf16.msra.mxu0 %v23500_v36  ;;  %21836 = vmatprep.subr.bf16.mxu1 %v23508_v41  ;;  %v23570_v36 = vld [vmem:[%s26902_s20 + $0x15b8] ss:$28 sps:$4 sm:$0xff]   ;;  %v23575_v41 = vld [vmem:[%s26902_s20 + $0x15f0] ss:$28 sps:$4 sm:$0xff]  }
 0x498   : > { %7452 = vmatprep.subr.bf16.mxu0 %v23507_v39  ;;  %v23578_v39 = vld [vmem:[%s26902_s20 + $0x10b8] ss:$28 sps:$4 sm:$0xff]  }
 0x49a   : > { %21837 = vmatpush3.bf16.msra.mxu1 %v23509_v45  ;;  %v23582_v45 = vld [vmem:[%s26902_s20 + $0x162c] ss:$28 sps:$4 sm:$0xff]  }
 0x49b   : > { %7453 = vmatpush1.bf16.msra.mxu0 %v23505_v42  ;;  %21838 = vmatprep.subr.bf16.mxu1 %v23513_v48  ;;  %v23579_v42 = vld [vmem:[%s26902_s20 + $0xef8] ss:$28 sps:$4 sm:$0xff]   ;;  %v23580_v48 = vld [vmem:[%s26902_s20 + $0x1628] ss:$28 sps:$4 sm:$0xff]  }
 0x49c   : > { %7454 = vmatprep.subr.bf16.mxu0 %v23512_v46  ;;  %v23583_v46 = vld [vmem:[%s26902_s20 + $0x10f0] ss:$28 sps:$4 sm:$0xff]  }
 0x49e   : > { %21839 = vmatpush3.bf16.msra.mxu1 %v23514_v50  ;;  %v23587_v50 = vld [vmem:[%s26902_s20 + $0x1664] ss:$28 sps:$4 sm:$0xff]  }
 0x49f   : > { %7455 = vmatpush1.bf16.msra.mxu0 %v23510_v49  ;;  %21846 = vmatprep.subr.bf16.mxu1 %v23518_v51  ;;  %v23584_v49 = vld [vmem:[%s26902_s20 + $0xf30] ss:$28 sps:$4 sm:$0xff]   ;;  %v23585_v51 = vld [vmem:[%s26902_s20 + $0x1660] ss:$28 sps:$4 sm:$0xff]  }
 0x4a0   : > { %7456 = vmatprep.subr.bf16.mxu0 %v23517_v27  ;;  %v23588_v27 = vld [vmem:[%s26902_s20 + $0x1128] ss:$28 sps:$4 sm:$0xff]  }
 0x4a1   : > { %7684 = vmatmul.mubr.bf16.vlgmr.msra.gmra.mrb[16].mxu1 %v27022_v28  ;;  %v23529_v28 = vld [vmem:[%s26902_s20 + $0xb08] ss:$28 sps:$4 sm:$0xff]  }
 0x4a2   : > { %21847 = vmatpush3.bf16.msra.mxu1 %v23519_v53  ;;  %7724 = vmatprep.mubr.bf16.mxu1 %v27069_v59  ;;  %v23537_v59 = vld [vmem:[%s26902_s20 + $0x1434] ss:$28 sps:$4 sm:$0xff]   ;;  %v23592_v53 = vld [vmem:[%s26902_s20 + $0x169c] ss:$28 sps:$4 sm:$0xff]  }
 0x4a3   : > { %7457 = vmatpush1.bf16.msra.mxu0 %v23515_v52  ;;  %21848 = vmatprep.subr.bf16.mxu1 %v23523_v58  ;;  %v23589_v52 = vld [vmem:[%s26902_s20 + $0xf68] ss:$28 sps:$4 sm:$0xff]   ;;  %v23590_v58 = vld [vmem:[%s26902_s20 + $0x1698] ss:$28 sps:$4 sm:$0xff]  }
 0x4a4   : > { %7458 = vmatprep.subr.bf16.mxu0 %v23522_v54  ;;  %v23593_v54 = vld [vmem:[%s26902_s20 + $0x1160] ss:$28 sps:$4 sm:$0xff]  }
 0x4a6   : > { %21849 = vmatpush3.bf16.msra.mxu1 %v23524_v43  ;;  %v23597_v43 = vld [vmem:[%s26902_s20 + $0x16d4] ss:$28 sps:$4 sm:$0xff]  }
 0x4a7   : > { %7459 = vmatpush1.bf16.msra.mxu0 %v23520_v61  ;;  %21850 = vmatprep.subr.bf16.mxu1 %v23528_v2  ;;  %v23594_v61 = vld [vmem:[%s26902_s20 + $0xfa0] ss:$28 sps:$4 sm:$0xff]   ;;  %v23595_v2 = vld [vmem:[%s26902_s20 + $0x16d0] ss:$28 sps:$4 sm:$0xff]  }
 0x4a8   : > { %7460 = vmatprep.subr.bf16.mxu0 %v23527_v1  ;;  %v23598_v1 = vld [vmem:[%s26902_s20 + $0x1358] ss:$28 sps:$4 sm:$0xff]  }
 0x4aa   : > { %21851 = vmatpush3.bf16.msra.mxu1 %v23529_v28  ;;  %v23602_v28 = vld [vmem:[%s26902_s20 + $0x170c] ss:$28 sps:$4 sm:$0xff]  }
 0x4ab   : > { %7461 = vmatpush1.bf16.msra.mxu0 %v23525_v25  ;;  %21852 = vmatprep.subr.bf16.mxu1 %v23533_v4  ;;  %v23599_v25 = vld [vmem:[%s26902_s20 + $0x1198] ss:$28 sps:$4 sm:$0xff]   ;;  %v23600_v4 = vld [vmem:[%s26902_s20 + $0x1708] ss:$28 sps:$4 sm:$0xff]  }
 0x4ac   : > { %7462 = vmatprep.subr.bf16.mxu0 %v23532_v26  ;;  %v23603_v26 = vld [vmem:[%s26902_s20 + $0x1390] ss:$28 sps:$4 sm:$0xff]  }
 0x4ae   : > { %21853 = vmatpush3.bf16.msra.mxu1 %v23534_v11  ;;  %v23607_v11 = vld [vmem:[%s26902_s20 + $0x1744] ss:$28 sps:$4 sm:$0xff]  }
 0x4af   : > { %7463 = vmatpush1.bf16.msra.mxu0 %v23530_v6  ;;  %21854 = vmatprep.subr.bf16.mxu1 %v23538_v12  ;;  %v23604_v6 = vld [vmem:[%s26902_s20 + $0x11d0] ss:$28 sps:$4 sm:$0xff]   ;;  %v23605_v12 = vld [vmem:[%s26902_s20 + $0x1740] ss:$28 sps:$4 sm:$0xff]  }
 0x4b0   : > { %7464 = vmatprep.subr.bf16.mxu0 %v23537_v59  ;;  %v23608_v59 = vld [vmem:[%s26902_s20 + $0x13c8] ss:$28 sps:$4 sm:$0xff]  }
 0x4b2   : > { %21855 = vmatpush3.bf16.msra.mxu1 %v23539_v13  ;;  %v23613_v13 = vld [vmem:[%s26902_s20 + $0x1400] ss:$28 sps:$4 sm:$0xff]  }
 0x4b3   : > { %7465 = vmatpush1.bf16.msra.mxu0 %v23535_v44  ;;  %21856 = vmatprep.subr.bf16.mxu1 %v23543_v14  ;;  %v23612_v44 = vld [vmem:[%s26902_s20 + $0x177c] ss:$28 sps:$4 sm:$0xff]  }
 0x4b4   : > { %7466 = vmatprep.subr.bf16.mxu0 %v23542_v63  ;;  %v23610_v63 = vld [vmem:[%s26902_s20 + $0x1778] ss:$28 sps:$4 sm:$0xff]   ;;  %v23614_v14 = vld [vmem:[%s26902_s20 + $0x1240] ss:$28 sps:$4 sm:$0xff]  }
 0x4b6   : > { %21857 = vmatpush3.bf16.msra.mxu1 %v23544_v57  ;;  %v23615_v57 = vld [vmem:[%s26902_s20 + $0x17b0] ss:$28 sps:$4 sm:$0xff]  }
 0x4b7   : > { %7467 = vmatpush1.bf16.msra.mxu0 %v23540_v56  ;;  %21858 = vmatprep.subr.bf16.mxu1 %v23548_v5  ;;  %v23618_v56 = vld [vmem:[%s26902_s20 + $0x1438] ss:$28 sps:$4 sm:$0xff]   ;;  %v23622_v5 = vld [vmem:[%s26902_s20 + $0x17ec] ss:$28 sps:$4 sm:$0xff]  }
 0x4b8   : > { %7468 = vmatprep.subr.bf16.mxu0 %v23547_v0  ;;  %v23619_v0 = vld [vmem:[%s26902_s20 + $0x1278] ss:$28 sps:$4 sm:$0xff]  }
 0x4ba   : > { %21859 = vmatpush3.bf16.msra.mxu1 %v23549_v17  ;;  %v23620_v17 = vld [vmem:[%s26902_s20 + $0x17e8] ss:$28 sps:$4 sm:$0xff]  }
 0x4bb   : > { %7469 = vmatpush1.bf16.msra.mxu0 %v23545_v16  ;;  %21860 = vmatprep.subr.bf16.mxu1 %v23553_v3  ;;  %v23623_v16 = vld [vmem:[%s26902_s20 + $0x1470] ss:$28 sps:$4 sm:$0xff]   ;;  %v23627_v3 = vld [vmem:[%s26902_s20 + $0x1824] ss:$28 sps:$4 sm:$0xff]  }
 0x4bc   : > { %7470 = vmatprep.subr.bf16.mxu0 %v23552_v18  ;;  %v23624_v18 = vld [vmem:[%s26902_s20 + $0x12b0] ss:$28 sps:$4 sm:$0xff]  }
 0x4be   : > { %21861 = vmatpush3.bf16.msra.mxu1 %v23554_v20  ;;  %v23625_v20 = vld [vmem:[%s26902_s20 + $0x1820] ss:$28 sps:$4 sm:$0xff]  }
 0x4bf   : > { %7471 = vmatpush1.bf16.msra.mxu0 %v23550_v19  ;;  %21868 = vmatprep.subr.bf16.mxu1 %v23558_v37  ;;  %v23628_v19 = vld [vmem:[%s26902_s20 + $0x14a8] ss:$28 sps:$4 sm:$0xff]   ;;  %v23632_v37 = vld [vmem:[%s26902_s20 + $0x185c] ss:$28 sps:$4 sm:$0xff]  }
 0x4c0   : > { %7483 = vmatprep.subr.bf16.mxu0 %v23557_v21  ;;  %v23629_v21 = vld [vmem:[%s26902_s20 + $0x12e8] ss:$28 sps:$4 sm:$0xff]  }
 0x4c1   : > { %7725 = vmatmul.mubr.bf16.vlgmr.msra.gmra.mrb[20].mxu1 %v27118_v40  ;;  %v23565_v40 = vld [vmem:[%s26902_s20 + $0x1580] ss:$28 sps:$4 sm:$0xff]  }
 0x4c2   : > { %7473 = vmatmul.mubr.bf16.vlgmr.msra.gmra.mrb[4].mxu0 %v27283_v9  ;;  %21869 = vmatpush3.bf16.msra.mxu1 %v23559_v23  ;;  %v23630_v23 = vld [vmem:[%s26902_s20 + $0x1858] ss:$28 sps:$4 sm:$0xff]  }
 0x4c3   : > { %7484 = vmatpush1.bf16.msra.mxu0 %v23555_v22  ;;  %21870 = vmatprep.subr.bf16.mxu1 %v23563_v30  ;;  %v23633_v22 = vld [vmem:[%s26902_s20 + $0x14e0] ss:$28 sps:$4 sm:$0xff]   ;;  %v23637_v30 = vld [vmem:[%s26902_s20 + $0x1894] ss:$28 sps:$4 sm:$0xff]  }
 0x4c4   : > { %7485 = vmatprep.subr.bf16.mxu0 %v23562_v24  ;;  %7765 = vmatprep.mubr.bf16.mxu1 %v27134_v47  ;;  %v23574_v47 = vld [vmem:[%s26902_s20 + $0xec0] ss:$28 sps:$4 sm:$0xff]  }
 0x4c5   : > { %7515 = vmatprep.mubr.bf16.mxu0 %v27294_v15  ;;  %v23634_v24 = vld [vmem:[%s26902_s20 + $0x1320] ss:$28 sps:$4 sm:$0xff]  }
 0x4c6   : > { %21871 = vmatpush3.bf16.msra.mxu1 %v23564_v31  ;;  %v23635_v31 = vld [vmem:[%s26902_s20 + $0x1890] ss:$28 sps:$4 sm:$0xff]  }
 0x4c7   : > { %7486 = vmatpush1.bf16.msra.mxu0 %v23560_v8  ;;  %21872 = vmatprep.subr.bf16.mxu1 %v23568_v33  ;;  %v23638_v8 = vld [vmem:[%s26902_s20 + $0x16d8] ss:$28 sps:$4 sm:$0xff]   ;;  %v23642_v33 = vld [vmem:[%s26902_s20 + $0x18cc] ss:$28 sps:$4 sm:$0xff]  }
 0x4c8   : > { %7487 = vmatprep.subr.bf16.mxu0 %v23567_v32  ;;  %v23639_v32 = vld [vmem:[%s26902_s20 + $0x1518] ss:$28 sps:$4 sm:$0xff]  }
 0x4ca   : > { %21873 = vmatpush3.bf16.msra.mxu1 %v23569_v7  ;;  %v23640_v7 = vld [vmem:[%s26902_s20 + $0x18c8] ss:$28 sps:$4 sm:$0xff]  }
 0x4cb   : > { %7488 = vmatpush1.bf16.msra.mxu0 %v23565_v40  ;;  %21874 = vmatprep.subr.bf16.mxu1 %v23573_v35  ;;  %v23643_v40 = vld [vmem:[%s26902_s20 + $0x1710] ss:$28 sps:$4 sm:$0xff]   ;;  %v23647_v35 = vld [vmem:[%s26902_s20 + $0x1904] ss:$28 sps:$4 sm:$0xff]  }
 0x4cc   : > { %7489 = vmatprep.subr.bf16.mxu0 %v23572_v10  ;;  %v23644_v10 = vld [vmem:[%s26902_s20 + $0x1550] ss:$28 sps:$4 sm:$0xff]  }
 0x4ce   : > { %21875 = vmatpush3.bf16.msra.mxu1 %v23574_v47  ;;  %v23649_v47 = vld [vmem:[%s26902_s20 + $0x1588] ss:$28 sps:$4 sm:$0xff]  }
 0x4cf   : > { %7490 = vmatpush1.bf16.msra.mxu0 %v23570_v36  ;;  %21876 = vmatprep.subr.bf16.mxu1 %v23578_v39  ;;  %v23648_v36 = vld [vmem:[%s26902_s20 + $0x1748] ss:$28 sps:$4 sm:$0xff]   ;;  %v23653_v39 = vld [vmem:[%s26902_s20 + $0x1780] ss:$28 sps:$4 sm:$0xff]  }
 0x4d0   : > { %7491 = vmatprep.subr.bf16.mxu0 %v23577_v38  ;;  %v23652_v38 = vld [vmem:[%s26902_s20 + $0x193c] ss:$28 sps:$4 sm:$0xff]  }
 0x4d2   : > { %21877 = vmatpush3.bf16.msra.mxu1 %v23579_v42  ;;  %v23657_v42 = vld [vmem:[%s26902_s20 + $0x1974] ss:$28 sps:$4 sm:$0xff]  }
 0x4d3   : > { %7492 = vmatpush1.bf16.msra.mxu0 %v23575_v41  ;;  %21878 = vmatprep.subr.bf16.mxu1 %v23583_v46  ;;  %v23650_v41 = vld [vmem:[%s26902_s20 + $0x1938] ss:$28 sps:$4 sm:$0xff]   ;;  %v23655_v46 = vld [vmem:[%s26902_s20 + $0x1970] ss:$28 sps:$4 sm:$0xff]  }
 0x4d4   : > { %7493 = vmatprep.subr.bf16.mxu0 %v23582_v45  ;;  %v23658_v45 = vld [vmem:[%s26902_s20 + $0x17b8] ss:$28 sps:$4 sm:$0xff]  }
 0x4d6   : > { %21879 = vmatpush3.bf16.msra.mxu1 %v23584_v49  ;;  %v23662_v49 = vld [vmem:[%s26902_s20 + $0x19ac] ss:$28 sps:$4 sm:$0xff]  }
 0x4d7   : > { %7494 = vmatpush1.bf16.msra.mxu0 %v23580_v48  ;;  %21880 = vmatprep.subr.bf16.mxu1 %v23588_v27  ;;  %v23659_v48 = vld [vmem:[%s26902_s20 + $0x15f8] ss:$28 sps:$4 sm:$0xff]   ;;  %v797_v27 = vld [vmem:[#allocation2 + $0x10] sm:$0xff] }
 0x4d8   : > { %7495 = vmatprep.subr.bf16.mxu0 %v23587_v50  ;;  %v23663_v50 = vld [vmem:[%s26902_s20 + $0x17f0] ss:$28 sps:$4 sm:$0xff]  }
 0x4da   : > { %21881 = vmatpush3.bf16.msra.mxu1 %v23589_v52  ;;  %v23664_v52 = vld [vmem:[%s26902_s20 + $0x1630] ss:$28 sps:$4 sm:$0xff]  }
 0x4db   : > { %7496 = vmatpush1.bf16.msra.mxu0 %v23585_v51  ;;  %21882 = vmatprep.subr.bf16.mxu1 %v23593_v54  ;;  %v23660_v51 = vld [vmem:[%s26902_s20 + $0x19a8] ss:$28 sps:$4 sm:$0xff]  }
 0x4dc   : > { %7497 = vmatprep.subr.bf16.mxu0 %v23592_v53  ;;  %v798_v53 = vld [vmem:[#allocation2 + $0x18] sm:$0xff]  ;;  %v23667_v54 = vld [vmem:[%s26902_s20 + $0x19e4] ss:$28 sps:$4 sm:$0xff]  }
 0x4de   : > { %21883 = vmatpush3.bf16.msra.mxu1 %v23594_v61 }
 0x4df   : > { %7498 = vmatpush1.bf16.msra.mxu0 %v23590_v58  ;;  %21890 = vmatprep.subr.bf16.mxu1 %v23598_v1  ;;  %v23668_v58 = vld [vmem:[%s26902_s20 + $0x1828] ss:$28 sps:$4 sm:$0xff]  }
 0x4e0   : > { %7499 = vmatprep.subr.bf16.mxu0 %v23597_v43  ;;  %v804_v43 = vld [vmem:[#allocation2 + $0x48] sm:$0xff] }
 0x4e1   : > { %7766 = vmatmul.mubr.bf16.vlgmr.msra.gmra.mrb[24].mxu1 %v27200_v55  ;;  %v23609_v55 = vld [vmem:[%s26902_s20 + $0x1208] ss:$28 sps:$4 sm:$0xff]  }
 0x4e2   : > { %21891 = vmatpush3.bf16.msra.mxu1 %v23599_v25  ;;  %7806 = vmatprep.mubr.bf16.mxu1 %v27212_v62  ;;  %v23617_v62 = vld [vmem:[%s26902_s20 + $0x17b4] ss:$28 sps:$4 sm:$0xff]   ;;  %v805_v25 = vld [vmem:[#allocation2 + $0x50] sm:$0xff] }
 0x4e3   : > { %7500 = vmatpush1.bf16.msra.mxu0 %v23595_v2  ;;  %21892 = vmatprep.subr.bf16.mxu1 %v23603_v26 }
 0x4e4   : > { %7501 = vmatprep.subr.bf16.mxu0 %v23602_v28 }
 0x4e6   : > { %21893 = vmatpush3.bf16.msra.mxu1 %v23604_v6  ;;  %v23669_v6 = vld [vmem:[%s26902_s20 + $0x1668] ss:$28 sps:$4 sm:$0xff]  }
 0x4e7   : > { %7502 = vmatpush1.bf16.msra.mxu0 %v23600_v4  ;;  %21894 = vmatprep.subr.bf16.mxu1 %v23608_v59  ;;  %v23665_v4 = vld [vmem:[%s26902_s20 + $0x19e0] ss:$28 sps:$4 sm:$0xff]  }
 0x4e8   : > { %7503 = vmatprep.subr.bf16.mxu0 %v23607_v11 }
 0x4ea   : > { %21895 = vmatpush3.bf16.msra.mxu1 %v23609_v55  ;;  %v23673_v55 = vld [vmem:[%s26902_s20 + $0x1860] ss:$28 sps:$4 sm:$0xff]  }
 0x4eb   : > { %7504 = vmatpush1.bf16.msra.mxu0 %v23605_v12  ;;  %21896 = vmatprep.subr.bf16.mxu1 %v23613_v13  ;;  %v23672_v12 = vld [vmem:[%s26902_s20 + $0x1a1c] ss:$28 sps:$4 sm:$0xff]  }
 0x4ec   : > { %7505 = vmatprep.subr.bf16.mxu0 %v23612_v44  ;;  %v23670_v13 = vld [vmem:[%s26902_s20 + $0x1a18] ss:$28 sps:$4 sm:$0xff]  }
 0x4ee   : > { %21897 = vmatpush3.bf16.msra.mxu1 %v23614_v14  ;;  %v23677_v14 = vld [vmem:[%s26902_s20 + $0x1a54] ss:$28 sps:$4 sm:$0xff]  }
 0x4ef   : > { %7506 = vmatpush1.bf16.msra.mxu0 %v23610_v63  ;;  %21898 = vmatprep.subr.bf16.mxu1 %v23618_v56  ;;  %v23674_v63 = vld [vmem:[%s26902_s20 + $0x16a0] ss:$28 sps:$4 sm:$0xff]   ;;  %v23675_v56 = vld [vmem:[%s26902_s20 + $0x1a50] ss:$28 sps:$4 sm:$0xff]  }
 0x4f0   : > { %7507 = vmatprep.subr.bf16.mxu0 %v23617_v62  ;;  %v23678_v62 = vld [vmem:[%s26902_s20 + $0x1a58] ss:$28 sps:$4 sm:$0xff]  }
 0x4f2   : > { %21899 = vmatpush3.bf16.msra.mxu1 %v23619_v0  ;;  %v23682_v0 = vld [vmem:[%s26902_s20 + $0x1a8c] ss:$28 sps:$4 sm:$0xff]  }
 0x4f3   : > { %7508 = vmatpush1.bf16.msra.mxu0 %v23615_v57  ;;  %21900 = vmatprep.subr.bf16.mxu1 %v23623_v16  ;;  %v23679_v57 = vld [vmem:[%s26902_s20 + $0x1898] ss:$28 sps:$4 sm:$0xff]   ;;  %v23680_v16 = vld [vmem:[%s26902_s20 + $0x1a88] ss:$28 sps:$4 sm:$0xff]  }
 0x4f4   : > { %7509 = vmatprep.subr.bf16.mxu0 %v23622_v5  ;;  %v23683_v5 = vld [vmem:[%s26902_s20 + $0x1a90] ss:$28 sps:$4 sm:$0xff]  }
 0x4f6   : > { %21901 = vmatpush3.bf16.msra.mxu1 %v23624_v18  ;;  %v23687_v18 = vld [vmem:[%s26902_s20 + $0x1ac4] ss:$28 sps:$4 sm:$0xff]  }
 0x4f7   : > { %7510 = vmatpush1.bf16.msra.mxu0 %v23620_v17  ;;  %21902 = vmatprep.subr.bf16.mxu1 %v23628_v19  ;;  %v23684_v17 = vld [vmem:[%s26902_s20 + $0x18d0] ss:$28 sps:$4 sm:$0xff]   ;;  %v23685_v19 = vld [vmem:[%s26902_s20 + $0x1ac0] ss:$28 sps:$4 sm:$0xff]  }
 0x4f8   : > { %7511 = vmatprep.subr.bf16.mxu0 %v23627_v3  ;;  %v23688_v3 = vld [vmem:[%s26902_s20 + $0x1ac8] ss:$28 sps:$4 sm:$0xff]  }
 0x4fa   : > { %21903 = vmatpush3.bf16.msra.mxu1 %v23629_v21  ;;  %v23693_v21 = vld [vmem:[%s26902_s20 + $0x1b00] ss:$28 sps:$4 sm:$0xff]  }
 0x4fb   : > { %7512 = vmatpush1.bf16.msra.mxu0 %v23625_v20  ;;  %21904 = vmatprep.subr.bf16.mxu1 %v23633_v22  ;;  %v23692_v20 = vld [vmem:[%s26902_s20 + $0x1afc] ss:$28 sps:$4 sm:$0xff]  }
 0x4fc   : > { %7513 = vmatprep.subr.bf16.mxu0 %v23632_v37  ;;  %v23690_v37 = vld [vmem:[%s26902_s20 + $0x1af8] ss:$28 sps:$4 sm:$0xff]   ;;  %v23694_v22 = vld [vmem:[%s26902_s20 + $0x1940] ss:$28 sps:$4 sm:$0xff]  }
 0x4fe   : > { %21905 = vmatpush3.bf16.msra.mxu1 %v23634_v24  ;;  %v23695_v24 = vld [vmem:[%s26902_s20 + $0x1b30] ss:$28 sps:$4 sm:$0xff]  }
 0x4ff   : > { %7514 = vmatpush1.bf16.msra.mxu0 %v23630_v23  ;;  %21912 = vmatprep.subr.bf16.mxu1 %v23638_v8  ;;  %v23698_v23 = vld [vmem:[%s26902_s20 + $0x1b38] ss:$28 sps:$4 sm:$0xff]   ;;  %v23702_v8 = vld [vmem:[%s26902_s20 + $0x1b6c] ss:$28 sps:$4 sm:$0xff]  }
 0x500   : > { %7526 = vmatprep.subr.bf16.mxu0 %v23637_v30  ;;  %v23699_v30 = vld [vmem:[%s26902_s20 + $0x1978] ss:$28 sps:$4 sm:$0xff]  }
 0x501   : > { %7807 = vmatmul.mubr.bf16.vlgmr.msra.gmra.mrb[28].mxu1 %v27283_v9  ;;  %v23645_v9 = vld [vmem:[%s26902_s20 + $0x1900] ss:$28 sps:$4 sm:$0xff]  }
 0x502   : > { %7516 = vmatmul.mubr.bf16.vlgmr.msra.gmra.mrb[4].mxu0 %v27368_v29  ;;  %21913 = vmatpush3.bf16.msra.mxu1 %v23639_v32  ;;  %v23700_v32 = vld [vmem:[%s26902_s20 + $0x1b68] ss:$28 sps:$4 sm:$0xff]  }
 0x503   : > { %7527 = vmatpush1.bf16.msra.mxu0 %v23635_v31  ;;  %21914 = vmatprep.subr.bf16.mxu1 %v23643_v40  ;;  %v23703_v31 = vld [vmem:[%s26902_s20 + $0x1b70] ss:$28 sps:$4 sm:$0xff]   ;;  %v23707_v40 = vld [vmem:[%s26902_s20 + $0x1ba4] ss:$28 sps:$4 sm:$0xff]  }
 0x504   : > { %7528 = vmatprep.subr.bf16.mxu0 %v23642_v33  ;;  %7847 = vmatprep.mubr.bf16.mxu1 %v27294_v15  ;;  %v23654_v15 = vld [vmem:[%s26902_s20 + $0x15c0] ss:$28 sps:$4 sm:$0xff]   ;;  %v23704_v33 = vld [vmem:[%s26902_s20 + $0x19b0] ss:$28 sps:$4 sm:$0xff]  }
 0x505   : > { %7558 = vmatprep.mubr.bf16.mxu0 %v27376_v34 }
 0x506   : > { %21915 = vmatpush3.bf16.msra.mxu1 %v23644_v10 }
 0x507   : > { %7529 = vmatpush1.bf16.msra.mxu0 %v23640_v7  ;;  %21916 = vmatprep.subr.bf16.mxu1 %v23648_v36  ;;  %v23708_v7 = vld [vmem:[%s26902_s20 + $0x1ba8] ss:$28 sps:$4 sm:$0xff]  }
 0x508   : > { %7530 = vmatprep.subr.bf16.mxu0 %v23647_v35 }
 0x50a   : > { %21917 = vmatpush3.bf16.msra.mxu1 %v23649_v47  ;;  %v23705_v47 = vld [vmem:[%s26902_s20 + $0x1ba0] ss:$28 sps:$4 sm:$0xff]  }
 0x50b   : > { %7531 = vmatpush1.bf16.msra.mxu0 %v23645_v9  ;;  %21918 = vmatprep.subr.bf16.mxu1 %v23653_v39 }
 0x50c   : > { %7532 = vmatprep.subr.bf16.mxu0 %v23652_v38  ;;  %v23709_v38 = vld [vmem:[%s26902_s20 + $0x19e8] ss:$28 sps:$4 sm:$0xff]  }
 0x50e   : > { %21919 = vmatpush3.bf16.msra.mxu1 %v23654_v15  ;;  %v23713_v15 = vld [vmem:[%s26902_s20 + $0x1be0] ss:$28 sps:$4 sm:$0xff]  }
 0x50f   : > { %7533 = vmatpush1.bf16.msra.mxu0 %v23650_v41  ;;  %21920 = vmatprep.subr.bf16.mxu1 %v23658_v45  ;;  %v23712_v41 = vld [vmem:[%s26902_s20 + $0x1bdc] ss:$28 sps:$4 sm:$0xff]  }
 0x510   : > { %7534 = vmatprep.subr.bf16.mxu0 %v23657_v42  ;;  %v23710_v45 = vld [vmem:[%s26902_s20 + $0x1bd8] ss:$28 sps:$4 sm:$0xff]  }
 0x512   : > { %21921 = vmatpush3.bf16.msra.mxu1 %v23659_v48 }
 0x513   : > { %7535 = vmatpush1.bf16.msra.mxu0 %v23655_v46  ;;  %21922 = vmatprep.subr.bf16.mxu1 %v23663_v50  ;;  %v23714_v46 = vld [vmem:[%s26902_s20 + $0x1a20] ss:$28 sps:$4 sm:$0xff]  }
 0x514   : > { %7536 = vmatprep.subr.bf16.mxu0 %v23662_v49  ;;  %v7216_v61 = vpop.f32.mrb[4].mxu1 }
 0x515   : > { %v7899_v1 = vadd.f32 %v7216_v61, %v797_v27  ;;  %v7218_v2 = vpop.f32.mrb[5].mxu1 }
 0x516   : > { %v7900_v28 = vadd.f32 %v7218_v2, %v798_v53  ;;  %v7220_v26 = vpop.f32.mrb[6].mxu1  ;;  %21923 = vmatpush3.bf16.msra.mxu1 %v23664_v52 }
 0x517   : > { %7537 = vmatpush1.bf16.msra.mxu0 %v23660_v51  ;;  %7913 = vst [vmem:[#allocation2 + $0x10] sm:$0xff] %v7899_v1  ;;  %v7906_v11 = vadd.f32 %v7220_v26, %v804_v43  ;;  %v7222_v59 = vpop.f32.mrb[7].mxu1  ;;  %21924 = vmatprep.subr.bf16.mxu1 %v23668_v58 }
 0x518   : > { %7538 = vmatprep.subr.bf16.mxu0 %v23667_v54  ;;  %7914 = vst [vmem:[#allocation2 + $0x18] sm:$0xff] %v7900_v28  ;;  %v7907_v44 = vadd.f32 %v7222_v59, %v805_v25 }
 0x519   : > { %7920 = vst [vmem:[#allocation2 + $0x48] sm:$0xff] %v7906_v11 }
 0x51a   : > { %7921 = vst [vmem:[#allocation2 + $0x50] sm:$0xff] %v7907_v44  ;;  %21925 = vmatpush3.bf16.msra.mxu1 %v23669_v6 }
 0x51b   : > { %7539 = vmatpush1.bf16.msra.mxu0 %v23665_v4  ;;  %21926 = vmatprep.subr.bf16.mxu1 %v23673_v55 }
 0x51c   : > { %7540 = vmatprep.subr.bf16.mxu0 %v23672_v12 }
 0x51e   : > { %21927 = vmatpush3.bf16.msra.mxu1 %v23674_v63 }
 0x51f   : > { %7541 = vmatpush1.bf16.msra.mxu0 %v23670_v13  ;;  %21934 = vmatprep.subr.bf16.mxu1 %v23678_v62 }
 0x520   : > { %7542 = vmatprep.subr.bf16.mxu0 %v23677_v14 }
 0x521   : > { %7848 = vmatmul.mubr.bf16.vlgmr.msra.gmra.mrb[32].mxu1 %v27368_v29  ;;  %v23689_v29 = vld [vmem:[%s26902_s20 + $0x1908] ss:$28 sps:$4 sm:$0xff]  }
 0x522   : > { %21935 = vmatpush3.bf16.msra.mxu1 %v23679_v57  ;;  %7888 = vmatprep.mubr.bf16.mxu1 %v27376_v34  ;;  %v23697_v34 = vld [vmem:[%s26902_s20 + $0x1b34] ss:$28 sps:$4 sm:$0xff]  }
 0x523   : > { %7543 = vmatpush1.bf16.msra.mxu0 %v23675_v56  ;;  %21936 = vmatprep.subr.bf16.mxu1 %v23683_v5 }
 0x524   : > { %7544 = vmatprep.subr.bf16.mxu0 %v23682_v0 }
 0x526   : > { %21937 = vmatpush3.bf16.msra.mxu1 %v23684_v17 }
 0x527   : > { %7545 = vmatpush1.bf16.msra.mxu0 %v23680_v16  ;;  %21938 = vmatprep.subr.bf16.mxu1 %v23688_v3 }
 0x528   : > { %7546 = vmatprep.subr.bf16.mxu0 %v23687_v18 }
 0x52a   : > { %21939 = vmatpush3.bf16.msra.mxu1 %v23689_v29 }
 0x52b   : > { %7547 = vmatpush1.bf16.msra.mxu0 %v23685_v19  ;;  %21940 = vmatprep.subr.bf16.mxu1 %v23693_v21 }
 0x52c   : > { %7548 = vmatprep.subr.bf16.mxu0 %v23692_v20 }
 0x52e   : > { %21941 = vmatpush3.bf16.msra.mxu1 %v23694_v22 }
 0x52f   : > { %7549 = vmatpush1.bf16.msra.mxu0 %v23690_v37  ;;  %21942 = vmatprep.subr.bf16.mxu1 %v23698_v23 }
 0x530   : > { %7550 = vmatprep.subr.bf16.mxu0 %v23697_v34 }
 0x532   : > { %21943 = vmatpush3.bf16.msra.mxu1 %v23699_v30 }
 0x533   : > { %7551 = vmatpush1.bf16.msra.mxu0 %v23695_v24  ;;  %21944 = vmatprep.subr.bf16.mxu1 %v23703_v31 }
 0x534   : > { %7552 = vmatprep.subr.bf16.mxu0 %v23702_v8  ;;  %v21796_v10 = vpop.f32.mrb[8].mxu1 }
 0x535   : > { %v21797_v35 = vpop.f32.mrb[9].mxu1 }
 0x536   : > { %v21798_v36 = vadd.f32 %v21797_v35, %v21796_v10  ;;  %v21799_v9 = vpop.f32.mrb[10].mxu1  ;;  %21945 = vmatpush3.bf16.msra.mxu1 %v23704_v33  ;;  %v800_v33 = vld [vmem:[#allocation2 + $0x28] sm:$0xff]  ;;  %v806_v10 = vld [vmem:[#allocation2 + $0x58] sm:$0xff] }
 0x537   : > { %7553 = vmatpush1.bf16.msra.mxu0 %v23700_v32  ;;  %v21800_v39 = vpop.f32.mrb[11].mxu1  ;;  %21946 = vmatprep.subr.bf16.mxu1 %v23708_v7  ;;  %v799_v32 = vld [vmem:[#allocation2 + $0x20] sm:$0xff] }
 0x538   : > { %7554 = vmatprep.subr.bf16.mxu0 %v23707_v40  ;;  %v21801_v42 = vadd.f32 %v21800_v39, %v21799_v9 }
 0x53a   : > { %21947 = vmatpush3.bf16.msra.mxu1 %v23709_v38 }
 0x53b   : > { %7555 = vmatpush1.bf16.msra.mxu0 %v23705_v47  ;;  %21948 = vmatprep.subr.bf16.mxu1 %v23713_v15  ;;  %v807_v47 = vld [vmem:[#allocation2 + $0x60] sm:$0xff] }
 0x53c   : > { %7556 = vmatprep.subr.bf16.mxu0 %v23712_v41 }
 0x53e   : > { %21949 = vmatpush3.bf16.msra.mxu1 %v23714_v46 }
 0x53f   : > { %7557 = vmatpush1.bf16.msra.mxu0 %v23710_v45 }
 0x541   : > { %7889 = vmatmul.mubr.bf16.vlgmr.msra.gmra.mrb[36].mxu1 %v27452_v60 }
 0x542   : > { %7559 = vmatmul.mubr.bf16.vlgmr.msra.gmra.mrb[4].mxu0 %v27452_v60 }
 0x554   : > { %v21818_v48 = vpop.f32.mrb[12].mxu1 }
 0x555   : > { %v21819_v49 = vpop.f32.mrb[13].mxu1 }
 0x556   : > { %v21820_v50 = vadd.f32 %v21819_v49, %v21818_v48  ;;  %v21821_v27 = vpop.f32.mrb[14].mxu1 }
 0x557   : > { %v21822_v51 = vpop.f32.mrb[15].mxu1 }
 0x558   : > { %v7645_v52 = vadd.f32 %v21820_v50, %v21798_v36  ;;  %v21823_v53 = vadd.f32 %v21822_v51, %v21821_v27  ;;  %v808_v51 = vld [vmem:[#allocation2 + $0x68] sm:$0xff] }
 0x55a   : > { %v7648_v54 = vadd.f32 %v21823_v53, %v21801_v42  ;;  %v801_v42 = vld [vmem:[#allocation2 + $0x30] sm:$0xff] }
 0x574   : > { %v21840_v58 = vpop.f32.mrb[16].mxu1 }
 0x575   : > { %v21841_v61 = vpop.f32.mrb[17].mxu1 }
 0x576   : > { %v21842_v43 = vadd.f32 %v21841_v61, %v21840_v58  ;;  %v21843_v1 = vpop.f32.mrb[18].mxu1 }
 0x577   : > { %v21844_v2 = vpop.f32.mrb[19].mxu1 }
 0x578   : > { %v7686_v25 = vadd.f32 %v21842_v43, %v7645_v52  ;;  %v21845_v28 = vadd.f32 %v21844_v2, %v21843_v1 }
 0x57a   : > { %v7689_v26 = vadd.f32 %v21845_v28, %v7648_v54 }
 0x594   : > { %v21862_v4 = vpop.f32.mrb[20].mxu1 }
 0x595   : > { %v21863_v6 = vpop.f32.mrb[21].mxu1 }
 0x596   : > { %v21864_v11 = vadd.f32 %v21863_v6, %v21862_v4  ;;  %v21865_v60 = vpop.f32.mrb[22].mxu1 }
 0x597   : > { %v21866_v59 = vpop.f32.mrb[23].mxu1 }
 0x598   : > { %v7727_v12 = vadd.f32 %v21864_v11, %v7686_v25  ;;  %v21867_v55 = vadd.f32 %v21866_v59, %v21865_v60 }
 0x59a   : > { %v7730_v44 = vadd.f32 %v21867_v55, %v7689_v26 }
 0x5b4   : > { %v21884_v13 = vpop.f32.mrb[24].mxu1 }
 0x5b5   : > { %v21885_v63 = vpop.f32.mrb[25].mxu1 }
 0x5b6   : > { %v21886_v14 = vadd.f32 %v21885_v63, %v21884_v13  ;;  %v21887_v62 = vpop.f32.mrb[26].mxu1 }
 0x5b7   : > { %v21888_v56 = vpop.f32.mrb[27].mxu1 }
 0x5b8   : > { %v7768_v57 = vadd.f32 %v21886_v14, %v7727_v12  ;;  %v21889_v0 = vadd.f32 %v21888_v56, %v21887_v62 }
 0x5ba   : > { %v7771_v5 = vadd.f32 %v21889_v0, %v7730_v44 }
 0x5d4   : > { %v21906_v16 = vpop.f32.mrb[28].mxu1 }
 0x5d5   : > { %v21907_v17 = vpop.f32.mrb[29].mxu1 }
 0x5d6   : > { %v21908_v18 = vadd.f32 %v21907_v17, %v21906_v16  ;;  %v21909_v3 = vpop.f32.mrb[30].mxu1 }
 0x5d7   : > { %v21910_v19 = vpop.f32.mrb[31].mxu1 }
 0x5d8   : > { %v7809_v29 = vadd.f32 %v21908_v18, %v7768_v57  ;;  %v21911_v20 = vadd.f32 %v21910_v19, %v21909_v3 }
 0x5da   : > { %v7812_v21 = vadd.f32 %v21911_v20, %v7771_v5 }
 0x5f4   : > { %v21928_v37 = vpop.f32.mrb[32].mxu1 }
 0x5f5   : > { %v21929_v22 = vpop.f32.mrb[33].mxu1 }
 0x5f6   : > { %v21930_v34 = vadd.f32 %v21929_v22, %v21928_v37  ;;  %v21931_v23 = vpop.f32.mrb[34].mxu1 }
 0x5f7   : > { %v21932_v24 = vpop.f32.mrb[35].mxu1 }
 0x5f8   : > { %v7850_v30 = vadd.f32 %v21930_v34, %v7809_v29  ;;  %v21933_v8 = vadd.f32 %v21932_v24, %v21931_v23 }
 0x5fa   : > { %v7853_v31 = vadd.f32 %v21933_v8, %v7812_v21 }
 0x614   : > { %v21950_v7 = vpop.f32.mrb[36].mxu1 }
 0x615   : > { %v7560_v40 = vpop.f32.mrb[4].mxu0  ;;  %v21951_v9 = vpop.f32.mrb[37].mxu1 }
 0x616   : > { %v7901_v35 = vadd.f32 %v7560_v40, %v799_v32  ;;  %v7562_v36 = vpop.f32.mrb[5].mxu0  ;;  %v21952_v39 = vadd.f32 %v21951_v9, %v21950_v7  ;;  %v21953_v15 = vpop.f32.mrb[38].mxu1 }
 0x617   : > { %v7902_v38 = vadd.f32 %v7562_v36, %v800_v33  ;;  %v7564_v41 = vpop.f32.mrb[6].mxu0  ;;  %v21954_v48 = vpop.f32.mrb[39].mxu1 }
 0x618   : > { %7915 = vst [vmem:[#allocation2 + $0x20] sm:$0xff] %v7901_v35  ;;  %v7908_v45 = vadd.f32 %v7564_v41, %v806_v10  ;;  %v7566_v46 = vpop.f32.mrb[7].mxu0  ;;  %v7891_v49 = vadd.f32 %v21952_v39, %v7850_v30  ;;  %v21955_v27 = vadd.f32 %v21954_v48, %v21953_v15 }
 0x619   : > { %7916 = vst [vmem:[#allocation2 + $0x28] sm:$0xff] %v7902_v38  ;;  %v7909_v50 = vadd.f32 %v7566_v46, %v807_v47 }
 0x61a   : > { %7922 = vst [vmem:[#allocation2 + $0x58] sm:$0xff] %v7908_v45  ;;  %v7903_v52 = vadd.f32 %v7891_v49, %v801_v42  ;;  %v7894_v53 = vadd.f32 %v21955_v27, %v7853_v31 }
 0x61b   : > { %7923 = vst [vmem:[#allocation2 + $0x60] sm:$0xff] %v7909_v50 }
 0x61c   : > { %7917 = vst [vmem:[#allocation2 + $0x30] sm:$0xff] %v7903_v52  ;;  %v7910_v54 = vadd.f32 %v7894_v53, %v808_v51 }
 0x61e   : > { %7924 = vst [vmem:[#allocation2 + $0x68] sm:$0xff] %v7910_v54 }
 0x61f PF: > { %s29428_s0 = sld [smem:[#allocation33_spill]] }
 0x625   : > { %p20314_p8 = scmp.ne.s32.totalorder %s29428_s0, 4 }
 0x626   : > { %v23715_v58 = vld [vmem:[#allocation9 + $0x4] ss:$8 sps:$4 sm:$0xff] (!%p20314_p8)   ;;  %v23717_v61 = vld [vmem:[#allocation9] ss:$8 sps:$4 sm:$0xff] (!%p20314_p8)   ;;  %v23718_v43 = vld [vmem:[#allocation9 + $0x14] ss:$8 sps:$4 sm:$0xff] (!%p20314_p8)   ;;  %v7945_v4 = vlaneseq (!%p20314_p8) }
 0x627   : > { %7928 = sbr.rel (%p20314_p8) target bundleno = 2814 (0xafe), region = 155  ;;  %8699 = vmatprep.subr.bf16.mxu0 (!%p20314_p8), %v23715_v58  ;;  %v23720_v1 = vld [vmem:[#allocation9 + $0x10] ss:$8 sps:$4 sm:$0xff] (!%p20314_p8)   ;;  %v23721_v2 = vld [vmem:[#allocation9 + $0x24] ss:$8 sps:$4 sm:$0xff] (!%p20314_p8)  }
 0x628   : > { %8700 = vmatpush1.bf16.msra.mxu0 (!%p20314_p8), %v23717_v61  ;;  %v23723_v25 = vld [vmem:[#allocation9 + $0x20] ss:$8 sps:$4 sm:$0xff] (!%p20314_p8)   ;;  %v23724_v28 = vld [vmem:[#allocation9 + $0x34] ss:$8 sps:$4 sm:$0xff] (!%p20314_p8)   ;;  %v23726_v26 = vld [vmem:[#allocation9 + $0x30] ss:$8 sps:$4 sm:$0xff] (!%p20314_p8)  }
 0x629   : > { %8701 = vmatprep.subr.bf16.mxu0 (!%p20314_p8), %v23718_v43  ;;  %v23727_v6 = vld [vmem:[#allocation9 + $0x44] ss:$8 sps:$4 sm:$0xff] (!%p20314_p8)   ;;  %v23729_v11 = vld [vmem:[#allocation9 + $0x40] ss:$8 sps:$4 sm:$0xff] (!%p20314_p8)   ;;  %v28011_v60 = vshrl.u32 (!%p20314_p8), %v7945_v4, 7  ;;  %v7930_v13 = vld [vmem:[#allocation2 + $0x8] sm:$0xff] (!%p20314_p8) }
 0x62a   : > { %v23730_v59 = vld [vmem:[#allocation9 + $0x54] ss:$8 sps:$4 sm:$0xff] (!%p20314_p8)   ;;  %v23732_v12 = vld [vmem:[#allocation9 + $0x50] ss:$8 sps:$4 sm:$0xff] (!%p20314_p8)   ;;  %v23733_v44 = vld [vmem:[#allocation9 + $0x64] ss:$8 sps:$4 sm:$0xff] (!%p20314_p8)  }
 0x62b   : > { %v28014_v55 = vsub.s32 (!%p20314_p8), 1, %v28011_v60  ;;  %v7937_v63 = vld [vmem:[#allocation2 + $0x40] sm:$0xff] (!%p20314_p8)  ;;  %v28016_v14 = vld [vmem:[#allocation7] sm:$0xff] (!%p20314_p8)  ;;  %v23735_v62 = vld [vmem:[#allocation9 + $0x60] ss:$8 sps:$4 sm:$0xff] (!%p20314_p8)   ;;  %v28021_v30 = vsub.s32 (!%p20314_p8), 0, %v28011_v60 }
 0x62c   : > { %8702 = vmatpush1.bf16.msra.mxu0 (!%p20314_p8), %v23720_v1  ;;  %v23736_v57 = vld [vmem:[#allocation9 + $0x74] ss:$8 sps:$4 sm:$0xff] (!%p20314_p8)   ;;  %v23738_v16 = vld [vmem:[#allocation9 + $0x70] ss:$8 sps:$4 sm:$0xff] (!%p20314_p8)   ;;  %v23739_v3 = vld [vmem:[#allocation9 + $0x84] ss:$8 sps:$4 sm:$0xff] (!%p20314_p8)  }
 0x62d   : > { %8703 = vmatprep.subr.bf16.mxu0 (!%p20314_p8), %v23721_v2  ;;  %v7952_v56 = vrot.slane (!%p20314_p8), %v28016_v14, %v28014_v55  ;;  %v23741_v29 = vld [vmem:[#allocation9 + $0x80] ss:$8 sps:$4 sm:$0xff] (!%p20314_p8)   ;;  %v23742_v20 = vld [vmem:[#allocation9 + $0x94] ss:$8 sps:$4 sm:$0xff] (!%p20314_p8)   ;;  %v23744_v21 = vld [vmem:[#allocation9 + $0x90] ss:$8 sps:$4 sm:$0xff] (!%p20314_p8)   ;;  %v7948_v10 = vrot.slane (!%p20314_p8), %v28016_v14, %v28021_v30 }
 0x62e   : > { %v23745_v37 = vld [vmem:[#allocation9 + $0xa4] ss:$8 sps:$4 sm:$0xff]   ;;  %v23747_v22 = vld [vmem:[#allocation9 + $0xa0] ss:$8 sps:$4 sm:$0xff]   ;;  %v23748_v34 = vld [vmem:[#allocation9 + $0xb4] ss:$8 sps:$4 sm:$0xff]  }
 0x62f   : > { %v7981_v0 = vadd.f32 %v7952_v56, %v7930_v13  ;;  %v7988_v5 = vadd.f32 %v7952_v56, %v7937_v63  ;;  %v23750_v23 = vld [vmem:[#allocation9 + $0xb0] ss:$8 sps:$4 sm:$0xff]   ;;  %v23751_v24 = vld [vmem:[#allocation9 + $0xc4] ss:$8 sps:$4 sm:$0xff]   ;;  %v23753_v8 = vld [vmem:[#allocation9 + $0xc0] ss:$8 sps:$4 sm:$0xff]  }
 0x630   : > { %8704 = vmatpush1.bf16.msra.mxu0 %v23723_v25  ;;  %v7959_v31 = vsub.s32 3, %v28011_v60  ;;  %v23754_v32 = vld [vmem:[#allocation9 + $0xd4] ss:$8 sps:$4 sm:$0xff]   ;;  %v23756_v33 = vld [vmem:[#allocation9 + $0xd0] ss:$8 sps:$4 sm:$0xff]   ;;  %v7936_v35 = vld [vmem:[#allocation2 + $0x38] sm:$0xff] }
 0x631   : > { %8705 = vmatprep.subr.bf16.mxu0 %v23724_v28  ;;  %v7995_v17 = vmax.f32 %v7981_v0, 0.0  ;;  %v8002_v18 = vmax.f32 %v7988_v5, 0.0  ;;  %v23757_v40 = vld [vmem:[#allocation9 + $0xe4] ss:$8 sps:$4 sm:$0xff]   ;;  %v7929_v7 = vld [vmem:[#allocation2] sm:$0xff]  ;;  %v7987_v39 = vadd.f32 %v7948_v10, %v7936_v35  ;;  %v7938_v35 = vld [vmem:[#allocation2 + $0x48] sm:$0xff] }
 0x632   : > { %v7960_v36 = vrot.slane %v28016_v14, %v7959_v31  ;;  %v7932_v9 = vld [vmem:[#allocation2 + $0x18] sm:$0xff]  ;;  %v7939_v47 = vld [vmem:[#allocation2 + $0x50] sm:$0xff]  ;;  %v7980_v38 = vadd.f32 %v7948_v10, %v7929_v7  ;;  %v23760_v45 = vld [vmem:[#allocation9 + $0xf4] ss:$8 sps:$4 sm:$0xff]  }
 0x633   : > { %v8009_v19 = vpack.c.bf16 %v8002_v18, %v7995_v17  ;;  %v23759_v41 = vld [vmem:[#allocation9 + $0xe0] ss:$8 sps:$4 sm:$0xff]   ;;  %v8001_v48 = vmax.f32 %v7987_v39, 0.0  ;;  %v23762_v49 = vld [vmem:[#allocation9 + $0xf0] ss:$8 sps:$4 sm:$0xff]  }
 0x634   : > { %8706 = vmatpush1.bf16.msra.mxu0 %v23726_v26  ;;  %v7983_v15 = vadd.f32 %v7960_v36, %v7932_v9  ;;  %v7990_v42 = vadd.f32 %v7960_v36, %v7939_v47  ;;  %v7994_v46 = vmax.f32 %v7980_v38, 0.0  ;;  %v23765_v51 = vld [vmem:[#allocation9 + $0x104] ss:$8 sps:$4 sm:$0xff]   ;;  %v23763_v53 = vld [vmem:[#allocation9 + $0x100] ss:$8 sps:$4 sm:$0xff]   ;;  %v7934_v47 = vld [vmem:[#allocation2 + $0x28] sm:$0xff] }
 0x635   : > { %8707 = vmatprep.subr.bf16.mxu0 %v23727_v6  ;;  %8731 = vmatprep.mubr.bf16.mxu0 %v8009_v19  ;;  %v23768_v58 = vld [vmem:[#allocation9 + $0x114] ss:$8 sps:$4 sm:$0xff]   ;;  %v23766_v61 = vld [vmem:[#allocation9 + $0x110] ss:$8 sps:$4 sm:$0xff]   ;;  %v23771_v43 = vld [vmem:[#allocation9 + $0x124] ss:$8 sps:$4 sm:$0xff]  }
 0x636   : > { %v7997_v50 = vmax.f32 %v7983_v15, 0.0  ;;  %v8004_v27 = vmax.f32 %v7990_v42, 0.0  ;;  %v8008_v52 = vpack.c.bf16 %v8001_v48, %v7994_v46  ;;  %v23769_v1 = vld [vmem:[#allocation9 + $0x120] ss:$8 sps:$4 sm:$0xff]   ;;  %v23774_v2 = vld [vmem:[#allocation9 + $0x134] ss:$8 sps:$4 sm:$0xff]  }
 0x637   : > { %v23772_v25 = vld [vmem:[#allocation9 + $0x130] ss:$8 sps:$4 sm:$0xff]   ;;  %v23777_v28 = vld [vmem:[#allocation9 + $0x144] ss:$8 sps:$4 sm:$0xff]   ;;  %v23775_v26 = vld [vmem:[#allocation9 + $0x140] ss:$8 sps:$4 sm:$0xff]  }
 0x638   : > { %8708 = vmatpush1.bf16.msra.mxu0 %v23729_v11  ;;  %v8011_v54 = vpack.c.bf16 %v8004_v27, %v7997_v50  ;;  %v23780_v4 = vld [vmem:[#allocation9 + $0x154] ss:$8 sps:$4 sm:$0xff]   ;;  %v23778_v6 = vld [vmem:[#allocation9 + $0x150] ss:$8 sps:$4 sm:$0xff]   ;;  %v23783_v11 = vld [vmem:[#allocation9 + $0x164] ss:$8 sps:$4 sm:$0xff]  }
 0x639   : > { %8709 = vmatprep.subr.bf16.mxu0 %v23730_v59  ;;  %v23781_v59 = vld [vmem:[#allocation9 + $0x160] ss:$8 sps:$4 sm:$0xff]   ;;  %v23789_v13 = vld [vmem:[#allocation9 + $0x184] ss:$8 sps:$4 sm:$0xff]   ;;  %v23790_v5 = vld [vmem:[#allocation9 + $0x190] ss:$8 sps:$4 sm:$0xff]  }
 0x63a   : > { %v23787_v63 = vld [vmem:[#allocation9 + $0x180] ss:$8 sps:$4 sm:$0xff]   ;;  %v23798_v19 = vld [vmem:[#allocation9 + $0x1b4] ss:$8 sps:$4 sm:$0xff]   ;;  %v23802_v7 = vld [vmem:[#allocation9 + $0x1d0] ss:$8 sps:$4 sm:$0xff]  }
 0x63b   : > { %v23883_v56 = vld [vmem:[#allocation12 + $0x40] sm:$0xff]   ;;  %v23885_v0 = vld [vmem:[#allocation12 + $0x48] sm:$0xff]   ;;  %v23810_v15 = vld [vmem:[#allocation9 + $0x1f4] ss:$8 sps:$4 sm:$0xff]  }
 0x63c   : > { %8710 = vmatpush1.bf16.msra.mxu0 %v23732_v12  ;;  %v23786_v12 = vld [vmem:[#allocation9 + $0x174] ss:$8 sps:$4 sm:$0xff]   ;;  %21956 = vmatprep.subr.bf16.mxu1 %v23883_v56  ;;  %v23793_v17 = vld [vmem:[#allocation9 + $0x1a0] ss:$8 sps:$4 sm:$0xff]   ;;  %v23807_v36 = vld [vmem:[#allocation9 + $0x1e4] ss:$8 sps:$4 sm:$0xff]  }
 0x63d   : > { %8711 = vmatprep.subr.bf16.mxu0 %v23733_v44  ;;  %v23784_v44 = vld [vmem:[#allocation9 + $0x170] ss:$8 sps:$4 sm:$0xff]   ;;  %v7931_v10 = vld [vmem:[#allocation2 + $0x10] sm:$0xff] }
 0x63e   : > { %v23886_v18 = vld [vmem:[#allocation12 + $0x8] sm:$0xff]  }
 0x63f   : > { %v7941_v38 = vld [vmem:[#allocation2 + $0x60] sm:$0xff]  ;;  %v23813_v50 = vld [vmem:[#allocation9 + $0x204] ss:$8 sps:$4 sm:$0xff]   ;;  %v23835_v56 = vld [vmem:[#allocation9 + $0x280] ss:$8 sps:$4 sm:$0xff]  }
 0x640   : > { %8712 = vmatpush1.bf16.msra.mxu0 %v23735_v62  ;;  %v23792_v62 = vld [vmem:[#allocation9 + $0x194] ss:$8 sps:$4 sm:$0xff]  }
 0x641   : > { %8713 = vmatprep.subr.bf16.mxu0 %v23736_v57  ;;  %v23884_v57 = vld [vmem:[#allocation12] sm:$0xff]  }
 0x642   : > { %21957 = vmatpush3.bf16.msra.mxu1 %v23884_v57  ;;  %v23840_v57 = vld [vmem:[#allocation9 + $0x294] ss:$8 sps:$4 sm:$0xff]  }
 0x643   : > { %21958 = vmatprep.subr.bf16.mxu1 %v23885_v0  ;;  %v23838_v0 = vld [vmem:[#allocation9 + $0x290] ss:$8 sps:$4 sm:$0xff]  }
 0x644   : > { %8714 = vmatpush1.bf16.msra.mxu0 %v23738_v16  ;;  %v23795_v16 = vld [vmem:[#allocation9 + $0x1a4] ss:$8 sps:$4 sm:$0xff]  }
 0x645   : > { %8715 = vmatprep.subr.bf16.mxu0 %v23739_v3  ;;  %v23887_v3 = vld [vmem:[#allocation12 + $0x50] sm:$0xff]  }
 0x646   : > { %21959 = vmatpush3.bf16.msra.mxu1 %v23886_v18  ;;  %v23844_v18 = vld [vmem:[#allocation9 + $0x2b0] ss:$8 sps:$4 sm:$0xff]  }
 0x647   : > { %21960 = vmatprep.subr.bf16.mxu1 %v23887_v3  ;;  %v23849_v3 = vld [vmem:[#allocation9 + $0x2c4] ss:$8 sps:$4 sm:$0xff]  }
 0x648   : > { %8716 = vmatpush1.bf16.msra.mxu0 %v23741_v29  ;;  %v23888_v29 = vld [vmem:[#allocation12 + $0x10] sm:$0xff]  }
 0x649   : > { %8717 = vmatprep.subr.bf16.mxu0 %v23742_v20  ;;  %v23889_v20 = vld [vmem:[#allocation12 + $0x58] sm:$0xff]  }
 0x64a   : > { %21961 = vmatpush3.bf16.msra.mxu1 %v23888_v29  ;;  %v23847_v29 = vld [vmem:[#allocation9 + $0x2c0] ss:$8 sps:$4 sm:$0xff]  }
 0x64b   : > { %21962 = vmatprep.subr.bf16.mxu1 %v23889_v20  ;;  %v23852_v20 = vld [vmem:[#allocation9 + $0x2d4] ss:$8 sps:$4 sm:$0xff]  }
 0x64c   : > { %8718 = vmatpush1.bf16.msra.mxu0 %v23744_v21  ;;  %v23796_v21 = vld [vmem:[#allocation9 + $0x1b0] ss:$8 sps:$4 sm:$0xff]  }
 0x64d   : > { %8719 = vmatprep.subr.bf16.mxu0 %v23745_v37  ;;  %v23801_v37 = vld [vmem:[#allocation9 + $0x1c4] ss:$8 sps:$4 sm:$0xff]  }
 0x650   : > { %8720 = vmatpush1.bf16.msra.mxu0 %v23747_v22  ;;  %v23890_v22 = vld [vmem:[#allocation12 + $0x18] sm:$0xff]  }
 0x651   : > { %8721 = vmatprep.subr.bf16.mxu0 %v23748_v34  ;;  %v23891_v34 = vld [vmem:[#allocation12 + $0x60] sm:$0xff]   ;;  %21963 = vmatpush3.bf16.msra.mxu1 %v23890_v22  ;;  %v7933_v22 = vld [vmem:[#allocation2 + $0x20] sm:$0xff] }
 0x652   : > { %21964 = vmatprep.subr.bf16.mxu1 %v23891_v34  ;;  %v7940_v34 = vld [vmem:[#allocation2 + $0x58] sm:$0xff] }
 0x654   : > { %8722 = vmatpush1.bf16.msra.mxu0 %v23750_v23  ;;  %v23799_v23 = vld [vmem:[#allocation9 + $0x1c0] ss:$8 sps:$4 sm:$0xff]  }
 0x655   : > { %8723 = vmatprep.subr.bf16.mxu0 %v23751_v24  ;;  %v23804_v24 = vld [vmem:[#allocation9 + $0x1d4] ss:$8 sps:$4 sm:$0xff]  }
 0x658   : > { %8724 = vmatpush1.bf16.msra.mxu0 %v23753_v8  ;;  %v7955_v8 = vsub.s32 2, %v28011_v60 }
 0x659   : > { %8725 = vmatprep.subr.bf16.mxu0 %v23754_v32  ;;  %v7967_v32 = vsub.s32 5, %v28011_v60 }
 0x65a   : > { %v7956_v9 = vrot.slane %v28016_v14, %v7955_v8 }
 0x65b   : > { %v7968_v39 = vrot.slane %v28016_v14, %v7967_v32 }
 0x65c   : > { %8726 = vmatpush1.bf16.msra.mxu0 %v23756_v33  ;;  %v23892_v33 = vld [vmem:[#allocation12 + $0x20] sm:$0xff]   ;;  %v7982_v42 = vadd.f32 %v7956_v9, %v7931_v10 }
 0x65d   : > { %8727 = vmatprep.subr.bf16.mxu0 %v23757_v40  ;;  %v23893_v40 = vld [vmem:[#allocation12 + $0x68] sm:$0xff]   ;;  %21965 = vmatpush3.bf16.msra.mxu1 %v23892_v33  ;;  %v7985_v46 = vadd.f32 %v7968_v39, %v7934_v47  ;;  %v7992_v48 = vadd.f32 %v7968_v39, %v7941_v38  ;;  %v23864_v38 = vld [vmem:[#allocation9 + $0x314] ss:$8 sps:$4 sm:$0xff]  }
 0x65e   : > { %21966 = vmatprep.subr.bf16.mxu1 %v23893_v40  ;;  %v7996_v27 = vmax.f32 %v7982_v42, 0.0  ;;  %v23853_v40 = vld [vmem:[#allocation9 + $0x2e0] ss:$8 sps:$4 sm:$0xff]   ;;  %v23862_v39 = vld [vmem:[#allocation9 + $0x310] ss:$8 sps:$4 sm:$0xff]  }
 0x65f   : > { %v23865_v42 = vld [vmem:[#allocation9 + $0x320] ss:$8 sps:$4 sm:$0xff]  }
 0x660   : > { %8728 = vmatpush1.bf16.msra.mxu0 %v23759_v41  ;;  %v23805_v41 = vld [vmem:[#allocation9 + $0x1e0] ss:$8 sps:$4 sm:$0xff]  }
 0x661   : > { %8729 = vmatprep.subr.bf16.mxu0 %v23760_v45  ;;  %v7989_v45 = vadd.f32 %v7956_v9, %v7938_v35  ;;  %v23861_v9 = vld [vmem:[#allocation9 + $0x304] ss:$8 sps:$4 sm:$0xff]  }
 0x664   : > { %8730 = vmatpush1.bf16.msra.mxu0 %v23762_v49  ;;  %v23808_v49 = vld [vmem:[#allocation9 + $0x1f0] ss:$8 sps:$4 sm:$0xff]  }
 0x665   : > { %8742 = vmatprep.subr.bf16.mxu0 %v23765_v51  ;;  %v8003_v51 = vmax.f32 %v7989_v45, 0.0  ;;  %v23870_v45 = vld [vmem:[#allocation9 + $0x334] ss:$8 sps:$4 sm:$0xff]  }
 0x667   : > { %8732 = vmatmul.mubr.bf16.vlgmr.msra.gmra.mrb[0].mxu0 %v8008_v52  ;;  %v7999_v52 = vmax.f32 %v7985_v46, 0.0  ;;  %v23868_v46 = vld [vmem:[#allocation9 + $0x330] ss:$8 sps:$4 sm:$0xff]  }
 0x668   : > { %8743 = vmatpush1.bf16.msra.mxu0 %v23763_v53  ;;  %8774 = vmatprep.mubr.bf16.mxu0 %v8011_v54  ;;  %v8006_v53 = vmax.f32 %v7992_v48, 0.0  ;;  %v23811_v54 = vld [vmem:[#allocation9 + $0x200] ss:$8 sps:$4 sm:$0xff]   ;;  %v23873_v48 = vld [vmem:[#allocation9 + $0x344] ss:$8 sps:$4 sm:$0xff]  }
 0x669   : > { %8744 = vmatprep.subr.bf16.mxu0 %v23768_v58  ;;  %v8010_v58 = vpack.c.bf16 %v8003_v51, %v7996_v27  ;;  %v23876_v27 = vld [vmem:[#allocation9 + $0x354] ss:$8 sps:$4 sm:$0xff]  }
 0x66a   : > { %v24083_v51 = vld [vmem:[#allocation7] sm:$0xff] }
 0x66c   : > { %8745 = vmatpush1.bf16.msra.mxu0 %v23766_v61  ;;  %v23816_v61 = vld [vmem:[#allocation9 + $0x214] ss:$8 sps:$4 sm:$0xff]  }
 0x66d   : > { %8746 = vmatprep.subr.bf16.mxu0 %v23771_v43  ;;  %v8013_v43 = vpack.c.bf16 %v8006_v53, %v7999_v52  ;;  %v23874_v53 = vld [vmem:[#allocation9 + $0x350] ss:$8 sps:$4 sm:$0xff]  }
 0x670   : > { %8747 = vmatpush1.bf16.msra.mxu0 %v23769_v1  ;;  %v23814_v1 = vld [vmem:[#allocation9 + $0x210] ss:$8 sps:$4 sm:$0xff]  }
 0x671   : > { %8748 = vmatprep.subr.bf16.mxu0 %v23774_v2  ;;  %v23819_v2 = vld [vmem:[#allocation9 + $0x224] ss:$8 sps:$4 sm:$0xff]  }
 0x674   : > { %8749 = vmatpush1.bf16.msra.mxu0 %v23772_v25  ;;  %v23817_v25 = vld [vmem:[#allocation9 + $0x220] ss:$8 sps:$4 sm:$0xff]  }
 0x675   : > { %8750 = vmatprep.subr.bf16.mxu0 %v23777_v28  ;;  %v23822_v28 = vld [vmem:[#allocation9 + $0x234] ss:$8 sps:$4 sm:$0xff]  }
 0x678   : > { %8751 = vmatpush1.bf16.msra.mxu0 %v23775_v26  ;;  %v23820_v26 = vld [vmem:[#allocation9 + $0x230] ss:$8 sps:$4 sm:$0xff]  }
 0x679   : > { %8752 = vmatprep.subr.bf16.mxu0 %v23780_v4  ;;  %v23825_v4 = vld [vmem:[#allocation9 + $0x244] ss:$8 sps:$4 sm:$0xff]  }
 0x67c   : > { %8753 = vmatpush1.bf16.msra.mxu0 %v23778_v6  ;;  %v23823_v6 = vld [vmem:[#allocation9 + $0x240] ss:$8 sps:$4 sm:$0xff]  }
 0x67d   : > { %8754 = vmatprep.subr.bf16.mxu0 %v23783_v11  ;;  %v23828_v11 = vld [vmem:[#allocation9 + $0x254] ss:$8 sps:$4 sm:$0xff]  }
 0x680   : > { %8755 = vmatpush1.bf16.msra.mxu0 %v23781_v59  ;;  %v23826_v59 = vld [vmem:[#allocation9 + $0x250] ss:$8 sps:$4 sm:$0xff]  }
 0x681   : > { %8756 = vmatprep.subr.bf16.mxu0 %v23786_v12  ;;  %v23831_v12 = vld [vmem:[#allocation9 + $0x264] ss:$8 sps:$4 sm:$0xff]  }
 0x684   : > { %8757 = vmatpush1.bf16.msra.mxu0 %v23784_v44  ;;  %v23829_v44 = vld [vmem:[#allocation9 + $0x260] ss:$8 sps:$4 sm:$0xff]  }
 0x685   : > { %8758 = vmatprep.subr.bf16.mxu0 %v23789_v13  ;;  %v23834_v13 = vld [vmem:[#allocation9 + $0x274] ss:$8 sps:$4 sm:$0xff]  }
 0x688   : > { %8759 = vmatpush1.bf16.msra.mxu0 %v23787_v63  ;;  %v23832_v63 = vld [vmem:[#allocation9 + $0x270] ss:$8 sps:$4 sm:$0xff]  }
 0x689   : > { %8760 = vmatprep.subr.bf16.mxu0 %v23792_v62  ;;  %v23837_v62 = vld [vmem:[#allocation9 + $0x284] ss:$8 sps:$4 sm:$0xff]  }
 0x68c   : > { %8761 = vmatpush1.bf16.msra.mxu0 %v23790_v5  ;;  %v23843_v5 = vld [vmem:[#allocation9 + $0x2a4] ss:$8 sps:$4 sm:$0xff]  }
 0x68d   : > { %8762 = vmatprep.subr.bf16.mxu0 %v23795_v16  ;;  %v23841_v16 = vld [vmem:[#allocation9 + $0x2a0] ss:$8 sps:$4 sm:$0xff]  }
 0x690   : > { %8763 = vmatpush1.bf16.msra.mxu0 %v23793_v17  ;;  %v23846_v17 = vld [vmem:[#allocation9 + $0x2b4] ss:$8 sps:$4 sm:$0xff]  }
 0x691   : > { %8764 = vmatprep.subr.bf16.mxu0 %v23798_v19  ;;  %v7963_v19 = vsub.s32 4, %v28011_v60 }
 0x694   : > { %8765 = vmatpush1.bf16.msra.mxu0 %v23796_v21  ;;  %v7964_v21 = vrot.slane %v28016_v14, %v7963_v19  ;;  %v23859_v14 = vld [vmem:[#allocation9 + $0x300] ss:$8 sps:$4 sm:$0xff]  }
 0x695   : > { %8766 = vmatprep.subr.bf16.mxu0 %v23801_v37  ;;  %v23850_v37 = vld [vmem:[#allocation9 + $0x2d0] ss:$8 sps:$4 sm:$0xff]  }
 0x696   : > { %v7991_v33 = vadd.f32 %v7964_v21, %v7940_v34 }
 0x698   : > { %8767 = vmatpush1.bf16.msra.mxu0 %v23799_v23  ;;  %v23855_v23 = vld [vmem:[#allocation9 + $0x2e4] ss:$8 sps:$4 sm:$0xff]   ;;  %v8005_v35 = vmax.f32 %v7991_v33, 0.0 }
 0x699   : > { %8768 = vmatprep.subr.bf16.mxu0 %v23804_v24  ;;  %v7984_v24 = vadd.f32 %v7964_v21, %v7933_v22  ;;  %v23899_v33 = vld [vmem:[#allocation15] ss:$8 sps:$4 sm:$0xff]  }
 0x69b   : > { %v7998_v10 = vmax.f32 %v7984_v24, 0.0 }
 0x69c   : > { %8769 = vmatpush1.bf16.msra.mxu0 %v23802_v7  ;;  %v23858_v7 = vld [vmem:[#allocation9 + $0x2f4] ss:$8 sps:$4 sm:$0xff]  }
 0x69d   : > { %8770 = vmatprep.subr.bf16.mxu0 %v23807_v36  ;;  %v23856_v36 = vld [vmem:[#allocation9 + $0x2f0] ss:$8 sps:$4 sm:$0xff]   ;;  %v8012_v47 = vpack.c.bf16 %v8005_v35, %v7998_v10  ;;  %v23905_v35 = vld [vmem:[#allocation15 + $0x20] ss:$8 sps:$4 sm:$0xff]  }
 0x69e   : > { %v23907_v10 = vld [vmem:[#allocation15 + $0x24] ss:$8 sps:$4 sm:$0xff]  }
 0x6a0   : > { %8771 = vmatpush1.bf16.msra.mxu0 %v23805_v41  ;;  %v26397_v41 = vmov 0  }
 0x6a1   : > { %8772 = vmatprep.subr.bf16.mxu0 %v23810_v15  ;;  %v23867_v15 = vld [vmem:[#allocation9 + $0x324] ss:$8 sps:$4 sm:$0xff]  }
 0x6a4   : > { %8773 = vmatpush1.bf16.msra.mxu0 %v23808_v49  ;;  %v7971_v49 = vsub.s32 6, %v28011_v60 }
 0x6a5   : > { %8785 = vmatprep.subr.bf16.mxu0 %v23813_v50  ;;  %v23871_v50 = vld [vmem:[#allocation9 + $0x340] ss:$8 sps:$4 sm:$0xff]  }
 0x6a6   : > { %v7972_v52 = vrot.slane %v24083_v51, %v7971_v49  ;;  %v23956_v51 = vld [vmem:[#allocation18 + $0x50] ss:$28 sps:$4 sm:$0xff]  }
 0x6a7   : > { %8775 = vmatmul.mubr.bf16.vlgmr.msra.gmra.mrb[0].mxu0 %v8010_v58  ;;  %v7942_v58 = vld [vmem:[#allocation2 + $0x68] sm:$0xff] }
 0x6a8   : > { %8786 = vmatpush1.bf16.msra.mxu0 %v23811_v54  ;;  %8817 = vmatprep.mubr.bf16.mxu0 %v8013_v43  ;;  %v7935_v54 = vld [vmem:[#allocation2 + $0x30] sm:$0xff] }
 0x6a9   : > { %8787 = vmatprep.subr.bf16.mxu0 %v23816_v61  ;;  %v23879_v61 = vld [vmem:[#allocation9 + $0x364] ss:$8 sps:$4 sm:$0xff]   ;;  %v7986_v43 = vadd.f32 %v7972_v52, %v7935_v54 }
 0x6aa   : > { %v23965_v54 = vld [vmem:[#allocation18 + $0x280] ss:$28 sps:$4 sm:$0xff]  }
 0x6ac   : > { %8788 = vmatpush1.bf16.msra.mxu0 %v23814_v1  ;;  %v7993_v1 = vadd.f32 %v7972_v52, %v7942_v58  ;;  %v23960_v52 = vld [vmem:[#allocation18 + $0x248] ss:$28 sps:$4 sm:$0xff]   ;;  %v23966_v58 = vld [vmem:[#allocation18 + $0xc0] ss:$28 sps:$4 sm:$0xff]  }
 0x6ad   : > { %8789 = vmatprep.subr.bf16.mxu0 %v23819_v2  ;;  %v23877_v2 = vld [vmem:[#allocation9 + $0x360] ss:$8 sps:$4 sm:$0xff]  }
 0x6b0   : > { %8790 = vmatpush1.bf16.msra.mxu0 %v23817_v25  ;;  %v23882_v25 = vld [vmem:[#allocation9 + $0x374] ss:$8 sps:$4 sm:$0xff]  }
 0x6b1   : > { %8791 = vmatprep.subr.bf16.mxu0 %v23822_v28  ;;  %v8000_v28 = vmax.f32 %v7986_v43, 0.0  ;;  %v23971_v43 = vld [vmem:[#allocation18 + $0xf8] ss:$28 sps:$4 sm:$0xff]  }
 0x6b4   : > { %8792 = vmatpush1.bf16.msra.mxu0 %v23820_v26  ;;  %v8007_v26 = vmax.f32 %v7993_v1, 0.0  ;;  %v23975_v1 = vld [vmem:[#allocation18 + $0x2f0] ss:$28 sps:$4 sm:$0xff]  }
 0x6b5   : > { %8793 = vmatprep.subr.bf16.mxu0 %v23825_v4  ;;  %v23880_v4 = vld [vmem:[#allocation9 + $0x370] ss:$8 sps:$4 sm:$0xff]  }
 0x6b8   : > { %8794 = vmatpush1.bf16.msra.mxu0 %v23823_v6  ;;  %v8014_v6 = vpack.c.bf16 %v8007_v26, %v8000_v28 }
 0x6b9   : > { %8795 = vmatprep.subr.bf16.mxu0 %v23828_v11  ;;  %v23894_v11 = vld [vmem:[#allocation12 + $0x28] sm:$0xff]  }
 0x6ba   : > { %21967 = vmatpush3.bf16.msra.mxu1 %v23894_v11 }
 0x6bc   : > { %8796 = vmatpush1.bf16.msra.mxu0 %v23826_v59  ;;  %v23895_v59 = vld [vmem:[#allocation12 + $0x70] sm:$0xff]  }
 0x6bd   : > { %8797 = vmatprep.subr.bf16.mxu0 %v23831_v12  ;;  %v23896_v12 = vld [vmem:[#allocation12 + $0x30] sm:$0xff]   ;;  %21968 = vmatprep.subr.bf16.mxu1 %v23895_v59 }
 0x6be   : > { %21969 = vmatpush3.bf16.msra.mxu1 %v23896_v12 }
 0x6c0   : > { %8798 = vmatpush1.bf16.msra.mxu0 %v23829_v44  ;;  %v23897_v44 = vld [vmem:[#allocation12 + $0x78] sm:$0xff]  }
 0x6c1   : > { %8799 = vmatprep.subr.bf16.mxu0 %v23834_v13  ;;  %v23898_v13 = vld [vmem:[#allocation12 + $0x38] sm:$0xff]   ;;  %21970 = vmatprep.subr.bf16.mxu1 %v23897_v44  ;;  %v23923_v44 = vld [vmem:[#allocation18] ss:$28 sps:$4 sm:$0xff]  }
 0x6c2   : > { %21971 = vmatpush3.bf16.msra.mxu1 %v23898_v13 }
 0x6c4   : > { %8800 = vmatpush1.bf16.msra.mxu0 %v23832_v63  ;;  %v23901_v63 = vld [vmem:[#allocation15 + $0x4] ss:$8 sps:$4 sm:$0xff]  }
 0x6c5   : > { %8801 = vmatprep.subr.bf16.mxu0 %v23837_v62  ;;  %9162 = vmatprep.subr.bf16.mxu1 %v23901_v63  ;;  %v8127_v62 = vld [vmem:[#allocation10] sm:$0x3] }
 0x6c6   : > { %v23928_v63 = vld [vmem:[#allocation18 + $0x3c] ss:$28 sps:$4 sm:$0xff]  }
 0x6c8   : > { %8802 = vmatpush1.bf16.msra.mxu0 %v23835_v56  ;;  %v8132_v56 = vrot.slane %v8127_v62, %v28021_v30 }
 0x6c9   : > { %8803 = vmatprep.subr.bf16.mxu0 %v23840_v57  ;;  %v8136_v57 = vrot.slane %v8127_v62, %v28014_v55  ;;  %v23926_v62 = vld [vmem:[#allocation18 + $0x38] ss:$28 sps:$4 sm:$0xff]  }
 0x6cc   : > { %8804 = vmatpush1.bf16.msra.mxu0 %v23838_v0 }
 0x6cd   : > { %8805 = vmatprep.subr.bf16.mxu0 %v23843_v5 }
 0x6d0   : > { %8806 = vmatpush1.bf16.msra.mxu0 %v23841_v16 }
 0x6d1   : > { %8807 = vmatprep.subr.bf16.mxu0 %v23846_v17 }
 0x6d4   : > { %8808 = vmatpush1.bf16.msra.mxu0 %v23844_v18 }
 0x6d5   : > { %8809 = vmatprep.subr.bf16.mxu0 %v23849_v3 }
 0x6d8   : > { %8810 = vmatpush1.bf16.msra.mxu0 %v23847_v29 }
 0x6d9   : > { %8811 = vmatprep.subr.bf16.mxu0 %v23852_v20 }
 0x6dc   : > { %8812 = vmatpush1.bf16.msra.mxu0 %v23850_v37 }
 0x6dd   : > { %8813 = vmatprep.subr.bf16.mxu0 %v23855_v23 }
 0x6e0   : > { %8814 = vmatpush1.bf16.msra.mxu0 %v23853_v40  ;;  %v23904_v40 = vld [vmem:[#allocation15 + $0x14] ss:$8 sps:$4 sm:$0xff]  }
 0x6e1   : > { %8815 = vmatprep.subr.bf16.mxu0 %v23858_v7  ;;  %v23902_v7 = vld [vmem:[#allocation15 + $0x10] ss:$8 sps:$4 sm:$0xff]  }
 0x6e4   : > { %8816 = vmatpush1.bf16.msra.mxu0 %v23856_v36  ;;  %v23910_v36 = vld [vmem:[#allocation15 + $0x34] ss:$8 sps:$4 sm:$0xff]  }
 0x6e5   : > { %8828 = vmatprep.subr.bf16.mxu0 %v23861_v9  ;;  %v23908_v9 = vld [vmem:[#allocation15 + $0x30] ss:$8 sps:$4 sm:$0xff]  }
 0x6e7   : > { %8818 = vmatmul.mubr.bf16.vlgmr.msra.gmra.mrb[0].mxu0 %v8012_v47  ;;  %v23913_v47 = vld [vmem:[#allocation15 + $0x44] ss:$8 sps:$4 sm:$0xff]  }
 0x6e8   : > { %8829 = vmatpush1.bf16.msra.mxu0 %v23859_v14  ;;  %8860 = vmatprep.mubr.bf16.mxu0 %v26397_v41  ;;  %v23911_v14 = vld [vmem:[#allocation15 + $0x40] ss:$8 sps:$4 sm:$0xff]  }
 0x6e9   : > { %8830 = vmatprep.subr.bf16.mxu0 %v23864_v38  ;;  %v23916_v38 = vld [vmem:[#allocation15 + $0x54] ss:$8 sps:$4 sm:$0xff]  }
 0x6ec   : > { %8831 = vmatpush1.bf16.msra.mxu0 %v23862_v39  ;;  %v23914_v39 = vld [vmem:[#allocation15 + $0x50] ss:$8 sps:$4 sm:$0xff]  }
 0x6ed   : > { %8832 = vmatprep.subr.bf16.mxu0 %v23867_v15  ;;  %v23919_v15 = vld [vmem:[#allocation15 + $0x64] ss:$8 sps:$4 sm:$0xff]  }
 0x6f0   : > { %8833 = vmatpush1.bf16.msra.mxu0 %v23865_v42  ;;  %v23922_v42 = vld [vmem:[#allocation15 + $0x74] ss:$8 sps:$4 sm:$0xff]  }
 0x6f1   : > { %8834 = vmatprep.subr.bf16.mxu0 %v23870_v45  ;;  %v23920_v45 = vld [vmem:[#allocation15 + $0x70] ss:$8 sps:$4 sm:$0xff]  }
 0x6f4   : > { %8835 = vmatpush1.bf16.msra.mxu0 %v23868_v46  ;;  %v23925_v46 = vld [vmem:[#allocation18 + $0x4] ss:$28 sps:$4 sm:$0xff]  }
 0x6f5   : > { %8836 = vmatprep.subr.bf16.mxu0 %v23873_v48  ;;  %v23950_v48 = vld [vmem:[#allocation18 + $0x1d8] ss:$28 sps:$4 sm:$0xff]  }
 0x6f8   : > { %8837 = vmatpush1.bf16.msra.mxu0 %v23871_v50  ;;  %v23951_v50 = vld [vmem:[#allocation18 + $0x18] ss:$28 sps:$4 sm:$0xff]  }
 0x6f9   : > { %8838 = vmatprep.subr.bf16.mxu0 %v23876_v27  ;;  %v23955_v27 = vld [vmem:[#allocation18 + $0x210] ss:$28 sps:$4 sm:$0xff]  }
 0x6fc   : > { %8839 = vmatpush1.bf16.msra.mxu0 %v23874_v53  ;;  %v23961_v53 = vld [vmem:[#allocation18 + $0x88] ss:$28 sps:$4 sm:$0xff]  }
 0x6fd   : > { %8840 = vmatprep.subr.bf16.mxu0 %v23879_v61  ;;  %v23970_v61 = vld [vmem:[#allocation18 + $0x2b8] ss:$28 sps:$4 sm:$0xff]  }
 0x700   : > { %8841 = vmatpush1.bf16.msra.mxu0 %v23877_v2 }
 0x701   : > { %8842 = vmatprep.subr.bf16.mxu0 %v23882_v25 }
 0x704   : > { %8843 = vmatpush1.bf16.msra.mxu0 %v23880_v4  ;;  %v20427_v4 = vld [vmem:[#allocation13] ss:$0 sm:$0xff] }
 0x705   : > { %21978 = vmatprep.subr.bf16.mxu0 %v23950_v48  ;;  %v23986_v48 = vld [vmem:[#allocation18 + $0x1a0] ss:$28 sps:$4 sm:$0xff]  }
 0x707   : > { %8861 = vmatmul.mubr.bf16.vlgmr.msra.gmra.mrb[0].mxu0 %v8014_v6 }
 0x708   : > { %21979 = vmatpush3.bf16.msra.mxu0 %v23951_v50  ;;  %v23989_v50 = vld [vmem:[#allocation18 + $0xc] ss:$28 sps:$4 sm:$0xff]  }
 0x709   : > { %21980 = vmatprep.subr.bf16.mxu0 %v23955_v27  ;;  %v9070_v27 = vld [vmem:[#allocation16] sm:$0x3] }
 0x70c   : > { %21981 = vmatpush3.bf16.msra.mxu0 %v23956_v51  ;;  %v9075_v51 = vrot.slane %v9070_v27, %v28021_v30 }
 0x70d   : > { %21982 = vmatprep.subr.bf16.mxu0 %v23960_v52  ;;  %v9079_v52 = vrot.slane %v9070_v27, %v28014_v55  ;;  %v24049_v27 = vld [vmem:[#allocation18 + $0xf4] ss:$28 sps:$4 sm:$0xff]  }
 0x710   : > { %21983 = vmatpush3.bf16.msra.mxu0 %v23961_v53 }
 0x711   : > { %21984 = vmatprep.subr.bf16.mxu0 %v23965_v54 }
 0x714   : > { %21985 = vmatpush3.bf16.msra.mxu0 %v23966_v58 }
 0x715   : > { %21986 = vmatprep.subr.bf16.mxu0 %v23970_v61 }
 0x718   : > { %21987 = vmatpush3.bf16.msra.mxu0 %v23971_v43 }
 0x719   : > { %21988 = vmatprep.subr.bf16.mxu0 %v23975_v1 }
 0x7da   : > { %v8862_v0 = vpop.f32.mrb[0].mxu0 }
 0x7db   : > { %v22084_v5 = vadd.f32 %v8862_v0, %v8132_v56  ;;  %v8864_v16 = vpop.f32.mrb[1].mxu0  ;;  %v23934_v0 = vld [vmem:[#allocation18 + $0xac] ss:$28 sps:$4 sm:$0xff]  }
 0x7dc   : > { %v22085_v17 = vadd.f32 %v8864_v16, %v8136_v57  ;;  %v8866_v18 = vpop.f32.mrb[2].mxu0  ;;  %v23937_v16 = vld [vmem:[#allocation18 + $0xe4] ss:$28 sps:$4 sm:$0xff]  }
 0x7dd   : > { %v22086_v3 = vadd.f32 %v8866_v18, %v8132_v56  ;;  %v8868_v29 = vpop.f32.mrb[3].mxu0  ;;  %v8871_v21 = vmax.f32 %v22084_v5, 0.0  ;;  %v23931_v56 = vld [vmem:[#allocation18 + $0x74] ss:$28 sps:$4 sm:$0xff]   ;;  %v23932_v5 = vld [vmem:[#allocation18 + $0xa8] ss:$28 sps:$4 sm:$0xff]  }
 0x7de   : > { %v22087_v20 = vadd.f32 %v8868_v29, %v8136_v57  ;;  %v8872_v22 = vmax.f32 %v22085_v17, 0.0  ;;  %v23929_v57 = vld [vmem:[#allocation18 + $0x70] ss:$28 sps:$4 sm:$0xff]   ;;  %v23935_v17 = vld [vmem:[#allocation18 + $0xe0] ss:$28 sps:$4 sm:$0xff]  }
 0x7df   : > { %v8873_v37 = vmax.f32 %v22086_v3, 0.0  ;;  %v23940_v18 = vld [vmem:[#allocation18 + $0x11c] ss:$28 sps:$4 sm:$0xff]   ;;  %v23943_v29 = vld [vmem:[#allocation18 + $0x154] ss:$28 sps:$4 sm:$0xff]  }
 0x7e0   : > { %v8874_v34 = vmax.f32 %v22087_v20, 0.0  ;;  %v23938_v3 = vld [vmem:[#allocation18 + $0x118] ss:$28 sps:$4 sm:$0xff]   ;;  %v23941_v20 = vld [vmem:[#allocation18 + $0x150] ss:$28 sps:$4 sm:$0xff]  }
 0x7e1   : > { %v8875_v23 = vpack.c.bf16 %v8873_v37, %v8871_v21  ;;  %v23946_v21 = vld [vmem:[#allocation18 + $0x18c] ss:$28 sps:$4 sm:$0xff]  }
 0x7e2   : > { %v8876_v24 = vpack.c.bf16 %v8874_v34, %v8872_v22  ;;  %v23944_v37 = vld [vmem:[#allocation18 + $0x188] ss:$28 sps:$4 sm:$0xff]   ;;  %v23947_v34 = vld [vmem:[#allocation18 + $0x1c0] ss:$28 sps:$4 sm:$0xff]  }
 0x7e3   : > { %v23949_v22 = vld [vmem:[#allocation18 + $0x1c4] ss:$28 sps:$4 sm:$0xff]  }
 0x7e4   : > { %9044 = vmatprep.mubr.bf16.mxu1 %v8876_v24  ;;  %v23952_v24 = vld [vmem:[#allocation18 + $0x1f8] ss:$28 sps:$4 sm:$0xff]  }
 0x7e5   : > { %9045 = vmatmul.mubr.bf16.vlgmr.msra.gmra.mrb[0].mxu1 %v8875_v23  ;;  %v23954_v23 = vld [vmem:[#allocation18 + $0x1fc] ss:$28 sps:$4 sm:$0xff]  }
 0x7e6   : > { %9163 = vmatpush1.bf16.msra.mxu1 %v23899_v33  ;;  %9194 = vmatprep.mubr.bf16.mxu1 %v26397_v41  ;;  %v23917_v41 = vld [vmem:[#allocation15 + $0x60] ss:$8 sps:$4 sm:$0xff]   ;;  %v23959_v33 = vld [vmem:[#allocation18 + $0x234] ss:$28 sps:$4 sm:$0xff]  }
 0x7e7   : > { %9164 = vmatprep.subr.bf16.mxu1 %v23904_v40  ;;  %v23957_v40 = vld [vmem:[#allocation18 + $0x230] ss:$28 sps:$4 sm:$0xff]  }
 0x7ea   : > { %9165 = vmatpush1.bf16.msra.mxu1 %v23902_v7  ;;  %v23964_v7 = vld [vmem:[#allocation18 + $0x26c] ss:$28 sps:$4 sm:$0xff]  }
 0x7eb   : > { %9166 = vmatprep.subr.bf16.mxu1 %v23907_v10  ;;  %v23962_v10 = vld [vmem:[#allocation18 + $0x268] ss:$28 sps:$4 sm:$0xff]  }
 0x7ee   : > { %9167 = vmatpush1.bf16.msra.mxu1 %v23905_v35  ;;  %v23969_v35 = vld [vmem:[#allocation18 + $0x2a4] ss:$28 sps:$4 sm:$0xff]  }
 0x7ef   : > { %9168 = vmatprep.subr.bf16.mxu1 %v23910_v36  ;;  %v23967_v36 = vld [vmem:[#allocation18 + $0x2a0] ss:$28 sps:$4 sm:$0xff]  }
 0x7f2   : > { %9169 = vmatpush1.bf16.msra.mxu1 %v23908_v9  ;;  %v23974_v9 = vld [vmem:[#allocation18 + $0x2dc] ss:$28 sps:$4 sm:$0xff]  }
 0x7f3   : > { %9170 = vmatprep.subr.bf16.mxu1 %v23913_v47  ;;  %v23972_v47 = vld [vmem:[#allocation18 + $0x2d8] ss:$28 sps:$4 sm:$0xff]  }
 0x7f6   : > { %9171 = vmatpush1.bf16.msra.mxu1 %v23911_v14  ;;  %v23976_v14 = vld [vmem:[#allocation18 + $0x130] ss:$28 sps:$4 sm:$0xff]  }
 0x7f7   : > { %9172 = vmatprep.subr.bf16.mxu1 %v23916_v38  ;;  %21989 = vmatpush3.bf16.msra.mxu0 %v23976_v14  ;;  %v23979_v38 = vld [vmem:[#allocation18 + $0x314] ss:$28 sps:$4 sm:$0xff]  }
 0x7f8   : > { %v24034_v14 = vld [vmem:[#allocation18 + $0x354] ss:$28 sps:$4 sm:$0xff]  }
 0x7fa   : > { %9173 = vmatpush1.bf16.msra.mxu1 %v23914_v39  ;;  %v23977_v39 = vld [vmem:[#allocation18 + $0x310] ss:$28 sps:$4 sm:$0xff]  }
 0x7fb   : > { %9174 = vmatprep.subr.bf16.mxu1 %v23919_v15  ;;  %v23980_v15 = vld [vmem:[#allocation18 + $0x328] ss:$28 sps:$4 sm:$0xff]  }
 0x7fc   : > { %21990 = vmatprep.subr.bf16.mxu0 %v23980_v15  ;;  %v24035_v15 = vld [vmem:[#allocation18 + $0x10] ss:$28 sps:$4 sm:$0xff]  }
 0x7fe   : > { %9175 = vmatpush1.bf16.msra.mxu1 %v23917_v41  ;;  %v23981_v41 = vld [vmem:[#allocation18 + $0x168] ss:$28 sps:$4 sm:$0xff]  }
 0x7ff   : > { %9176 = vmatprep.subr.bf16.mxu1 %v23922_v42  ;;  %21991 = vmatpush3.bf16.msra.mxu0 %v23981_v41  ;;  %v23984_v42 = vld [vmem:[#allocation18 + $0x34c] ss:$28 sps:$4 sm:$0xff]  }
 0x800   : > { %v24040_v41 = vld [vmem:[#allocation18 + $0x4c] ss:$28 sps:$4 sm:$0xff]  }
 0x802   : > { %9177 = vmatpush1.bf16.msra.mxu1 %v23920_v45  ;;  %v23982_v45 = vld [vmem:[#allocation18 + $0x348] ss:$28 sps:$4 sm:$0xff]  }
 0x803   : > { %9952 = vmatprep.subr.bf16.mxu1 %v23925_v46  ;;  %v23985_v46 = vld [vmem:[#allocation18 + $0x360] ss:$28 sps:$4 sm:$0xff]  }
 0x804   : > { %21992 = vmatprep.subr.bf16.mxu0 %v23985_v46  ;;  %v24041_v46 = vld [vmem:[#allocation18 + $0x80] ss:$28 sps:$4 sm:$0xff]  }
 0x805   : > { %21993 = vmatpush3.bf16.msra.mxu0 %v23986_v48  ;;  %v24046_v48 = vld [vmem:[#allocation18 + $0xbc] ss:$28 sps:$4 sm:$0xff]  }
 0x8b8   : > { %v21972_v2 = vpop.f32.mrb[0].mxu1 }
 0x8b9   : > { %v21973_v25 = vpop.f32.mrb[1].mxu1 }
 0x8ba   : > { %v21974_v28 = vadd.f32 %v21973_v25, %v21972_v2  ;;  %v21975_v26 = vpop.f32.mrb[2].mxu1 }
 0x8bb   : > { %v21976_v6 = vpop.f32.mrb[3].mxu1 }
 0x8bc   : > { %v21977_v11 = vadd.f32 %v21976_v6, %v21975_v26  ;;  %v9047_v59 = vadd.f32 %v21974_v28, %v20427_v4 }
 0x8be   : > { %v9050_v12 = vadd.f32 %v21977_v11, %v20427_v4 }
 0x8c0   : > { %v9053_v13 = vpack.c.bf16 %v9050_v12, %v9047_v59  ;;  %v23987_v12 = vld [vmem:[#allocation18 + $0x8] ss:$28 sps:$4 sm:$0xff]  }
 0x8c2   : > { %9195 = vmatmul.mubr.bf16.vlgmr.msra.gmra.mrb[4].mxu1 %v9053_v13  ;;  %v23990_v13 = vld [vmem:[#allocation18 + $0x40] ss:$28 sps:$4 sm:$0xff]  }
 0x8c3   : > { %9953 = vmatpush1.bf16.msra.mxu1 %v23923_v44  ;;  %v23992_v44 = vld [vmem:[#allocation18 + $0x44] ss:$28 sps:$4 sm:$0xff]  }
 0x8c4   : > { %9954 = vmatprep.subr.bf16.mxu1 %v23928_v63  ;;  %v23995_v63 = vld [vmem:[#allocation18 + $0x7c] ss:$28 sps:$4 sm:$0xff]  }
 0x8c7   : > { %9955 = vmatpush1.bf16.msra.mxu1 %v23926_v62  ;;  %v23993_v62 = vld [vmem:[#allocation18 + $0x78] ss:$28 sps:$4 sm:$0xff]  }
 0x8c8   : > { %9956 = vmatprep.subr.bf16.mxu1 %v23931_v56  ;;  %v23998_v56 = vld [vmem:[#allocation18 + $0xb4] ss:$28 sps:$4 sm:$0xff]  }
 0x8cb   : > { %9957 = vmatpush1.bf16.msra.mxu1 %v23929_v57  ;;  %v23996_v57 = vld [vmem:[#allocation18 + $0xb0] ss:$28 sps:$4 sm:$0xff]  }
 0x8cc   : > { %9958 = vmatprep.subr.bf16.mxu1 %v23934_v0  ;;  %v24001_v0 = vld [vmem:[#allocation18 + $0xec] ss:$28 sps:$4 sm:$0xff]  }
 0x8cf   : > { %9959 = vmatpush1.bf16.msra.mxu1 %v23932_v5  ;;  %v23999_v5 = vld [vmem:[#allocation18 + $0xe8] ss:$28 sps:$4 sm:$0xff]  }
 0x8d0   : > { %9960 = vmatprep.subr.bf16.mxu1 %v23937_v16  ;;  %v24004_v16 = vld [vmem:[#allocation18 + $0x124] ss:$28 sps:$4 sm:$0xff]  }
 0x8d3   : > { %9961 = vmatpush1.bf16.msra.mxu1 %v23935_v17  ;;  %v24002_v17 = vld [vmem:[#allocation18 + $0x120] ss:$28 sps:$4 sm:$0xff]  }
 0x8d4   : > { %9962 = vmatprep.subr.bf16.mxu1 %v23940_v18  ;;  %v24007_v18 = vld [vmem:[#allocation18 + $0x15c] ss:$28 sps:$4 sm:$0xff]  }
 0x8d7   : > { %9963 = vmatpush1.bf16.msra.mxu1 %v23938_v3  ;;  %v24005_v3 = vld [vmem:[#allocation18 + $0x158] ss:$28 sps:$4 sm:$0xff]  }
 0x8d8   : > { %9964 = vmatprep.subr.bf16.mxu1 %v23943_v29  ;;  %v24010_v29 = vld [vmem:[#allocation18 + $0x194] ss:$28 sps:$4 sm:$0xff]  }
 0x8db   : > { %9965 = vmatpush1.bf16.msra.mxu1 %v23941_v20  ;;  %v24008_v20 = vld [vmem:[#allocation18 + $0x190] ss:$28 sps:$4 sm:$0xff]  }
 0x8dc   : > { %9966 = vmatprep.subr.bf16.mxu1 %v23946_v21  ;;  %v24013_v21 = vld [vmem:[#allocation18 + $0x1cc] ss:$28 sps:$4 sm:$0xff]  }
 0x8df   : > { %9967 = vmatpush1.bf16.msra.mxu1 %v23944_v37  ;;  %v24011_v37 = vld [vmem:[#allocation18 + $0x1c8] ss:$28 sps:$4 sm:$0xff]  }
 0x8e0   : > { %9968 = vmatprep.subr.bf16.mxu1 %v23949_v22  ;;  %v24016_v22 = vld [vmem:[#allocation18 + $0x204] ss:$28 sps:$4 sm:$0xff]  }
 0x8e3   : > { %9969 = vmatpush1.bf16.msra.mxu1 %v23947_v34  ;;  %v24014_v34 = vld [vmem:[#allocation18 + $0x200] ss:$28 sps:$4 sm:$0xff]  }
 0x8e4   : > { %9970 = vmatprep.subr.bf16.mxu1 %v23954_v23  ;;  %v24019_v23 = vld [vmem:[#allocation18 + $0x23c] ss:$28 sps:$4 sm:$0xff]  }
 0x8e7   : > { %9971 = vmatpush1.bf16.msra.mxu1 %v23952_v24  ;;  %v24017_v24 = vld [vmem:[#allocation18 + $0x238] ss:$28 sps:$4 sm:$0xff]  }
 0x8e8   : > { %9972 = vmatprep.subr.bf16.mxu1 %v23959_v33  ;;  %v24022_v33 = vld [vmem:[#allocation18 + $0x274] ss:$28 sps:$4 sm:$0xff]  }
 0x8eb   : > { %9973 = vmatpush1.bf16.msra.mxu1 %v23957_v40  ;;  %v24020_v40 = vld [vmem:[#allocation18 + $0x270] ss:$28 sps:$4 sm:$0xff]  }
 0x8ec   : > { %9974 = vmatprep.subr.bf16.mxu1 %v23964_v7  ;;  %v24025_v7 = vld [vmem:[#allocation18 + $0x2ac] ss:$28 sps:$4 sm:$0xff]  }
 0x8ef   : > { %9975 = vmatpush1.bf16.msra.mxu1 %v23962_v10  ;;  %v24023_v10 = vld [vmem:[#allocation18 + $0x2a8] ss:$28 sps:$4 sm:$0xff]  }
 0x8f0   : > { %9976 = vmatprep.subr.bf16.mxu1 %v23969_v35  ;;  %v24028_v35 = vld [vmem:[#allocation18 + $0x2e4] ss:$28 sps:$4 sm:$0xff]  }
 0x8f3   : > { %9977 = vmatpush1.bf16.msra.mxu1 %v23967_v36  ;;  %v24026_v36 = vld [vmem:[#allocation18 + $0x2e0] ss:$28 sps:$4 sm:$0xff]  }
 0x8f4   : > { %9978 = vmatprep.subr.bf16.mxu1 %v23974_v9  ;;  %v24031_v9 = vld [vmem:[#allocation18 + $0x31c] ss:$28 sps:$4 sm:$0xff]  }
 0x8f7   : > { %9979 = vmatpush1.bf16.msra.mxu1 %v23972_v47  ;;  %v24029_v47 = vld [vmem:[#allocation18 + $0x318] ss:$28 sps:$4 sm:$0xff]  }
 0x8f8   : > { %9980 = vmatprep.subr.bf16.mxu1 %v23979_v38  ;;  %v24032_v38 = vld [vmem:[#allocation18 + $0x350] ss:$28 sps:$4 sm:$0xff]  }
 0x8fb   : > { %9981 = vmatpush1.bf16.msra.mxu1 %v23977_v39  ;;  %v24037_v39 = vld [vmem:[#allocation18 + $0x14] ss:$28 sps:$4 sm:$0xff]  }
 0x8fc   : > { %9982 = vmatprep.subr.bf16.mxu1 %v23984_v42  ;;  %v24038_v42 = vld [vmem:[#allocation18 + $0x48] ss:$28 sps:$4 sm:$0xff]  }
 0x8ff   : > { %9983 = vmatpush1.bf16.msra.mxu1 %v23982_v45  ;;  %v24043_v45 = vld [vmem:[#allocation18 + $0x84] ss:$28 sps:$4 sm:$0xff]  }
 0x900   : > { %9995 = vmatprep.subr.bf16.mxu1 %v23989_v50  ;;  %v24044_v50 = vld [vmem:[#allocation18 + $0xb8] ss:$28 sps:$4 sm:$0xff]  }
 0x995   : > { %v9196_v53 = vpop.f32.mrb[4].mxu1 }
 0x996   : > { %v9197_v54 = vadd.f32 %v9196_v53, %v9075_v51  ;;  %v9198_v58 = vpop.f32.mrb[5].mxu1  ;;  %v24050_v53 = vld [vmem:[#allocation18 + $0x128] ss:$28 sps:$4 sm:$0xff]  }
 0x997   : > { %v9199_v61 = vadd.f32 %v9198_v58, %v9079_v52  ;;  %v9200_v43 = vpop.f32.mrb[6].mxu1  ;;  %v24053_v58 = vld [vmem:[#allocation18 + $0x160] ss:$28 sps:$4 sm:$0xff]  }
 0x998   : > { %v9201_v1 = vadd.f32 %v9200_v43, %v9075_v51  ;;  %v9202_v2 = vpop.f32.mrb[7].mxu1  ;;  %v9205_v28 = vmax.f32 %v9197_v54, 0.0  ;;  %v24047_v51 = vld [vmem:[#allocation18 + $0xf0] ss:$28 sps:$4 sm:$0xff]   ;;  %v24055_v54 = vld [vmem:[#allocation18 + $0x164] ss:$28 sps:$4 sm:$0xff]  }
 0x999   : > { %v9203_v25 = vadd.f32 %v9202_v2, %v9079_v52  ;;  %v9206_v4 = vmax.f32 %v9199_v61, 0.0  ;;  %v24052_v52 = vld [vmem:[#allocation18 + $0x12c] ss:$28 sps:$4 sm:$0xff]   ;;  %v24058_v61 = vld [vmem:[#allocation18 + $0x19c] ss:$28 sps:$4 sm:$0xff]  }
 0x99a   : > { %v9207_v26 = vmax.f32 %v9201_v1, 0.0  ;;  %v24056_v43 = vld [vmem:[#allocation18 + $0x198] ss:$28 sps:$4 sm:$0xff]   ;;  %v24059_v2 = vld [vmem:[#allocation18 + $0x1d0] ss:$28 sps:$4 sm:$0xff]  }
 0x99b   : > { %v9208_v6 = vmax.f32 %v9203_v25, 0.0  ;;  %v24061_v1 = vld [vmem:[#allocation18 + $0x1d4] ss:$28 sps:$4 sm:$0xff]   ;;  %v24064_v25 = vld [vmem:[#allocation18 + $0x20c] ss:$28 sps:$4 sm:$0xff]  }
 0x99c   : > { %v28050_v11 = vpack.c.bf16 %v9207_v26, %v9205_v28  ;;  %v24062_v28 = vld [vmem:[#allocation18 + $0x208] ss:$28 sps:$4 sm:$0xff]  }
 0x99d   : > { %v28052_v59 = vpack.c.bf16 %v9208_v6, %v9206_v4  ;;  %v24067_v26 = vld [vmem:[#allocation18 + $0x244] ss:$28 sps:$4 sm:$0xff]   ;;  %v24070_v6 = vld [vmem:[#allocation18 + $0x27c] ss:$28 sps:$4 sm:$0xff]  }
 0x99e   : > { %v24065_v4 = vld [vmem:[#allocation18 + $0x240] ss:$28 sps:$4 sm:$0xff]  }
 0x99f   : > { %9984 = vmatprep.mubr.bf16.mxu1 %v28052_v59  ;;  %10113 = vmatprep.mubr.bf16.mxu0 %v28052_v59 }
 0x9a0   : > { %9985 = vmatmul.mubr.bf16.vlgmr.msra.gmra.mrb[8].mxu1 %v28050_v11  ;;  %10114 = vmatmul.mubr.bf16.vlgmr.msra.gmra.mrb[4].mxu0 %v28050_v11 }
 0x9a1   : > { %9996 = vmatpush1.bf16.msra.mxu1 %v23987_v12  ;;  %10027 = vmatprep.mubr.bf16.mxu1 %v28052_v59  ;;  %v24073_v12 = vld [vmem:[#allocation18 + $0x2b4] ss:$28 sps:$4 sm:$0xff]  }
 0x9a2   : > { %9997 = vmatprep.subr.bf16.mxu1 %v23992_v44  ;;  %v24071_v44 = vld [vmem:[#allocation18 + $0x2b0] ss:$28 sps:$4 sm:$0xff]  }
 0x9a5   : > { %9998 = vmatpush1.bf16.msra.mxu1 %v23990_v13  ;;  %v24076_v13 = vld [vmem:[#allocation18 + $0x2ec] ss:$28 sps:$4 sm:$0xff]  }
 0x9a6   : > { %9999 = vmatprep.subr.bf16.mxu1 %v23995_v63  ;;  %v24074_v63 = vld [vmem:[#allocation18 + $0x2e8] ss:$28 sps:$4 sm:$0xff]  }
 0x9a9   : > { %10000 = vmatpush1.bf16.msra.mxu1 %v23993_v62  ;;  %v24079_v62 = vld [vmem:[#allocation18 + $0x324] ss:$28 sps:$4 sm:$0xff]  }
 0x9aa   : > { %10001 = vmatprep.subr.bf16.mxu1 %v23998_v56  ;;  %v24077_v56 = vld [vmem:[#allocation18 + $0x320] ss:$28 sps:$4 sm:$0xff]  }
 0x9ad   : > { %10002 = vmatpush1.bf16.msra.mxu1 %v23996_v57  ;;  %v24082_v57 = vld [vmem:[#allocation18 + $0x35c] ss:$28 sps:$4 sm:$0xff]  }
 0x9ae   : > { %10003 = vmatprep.subr.bf16.mxu1 %v24001_v0  ;;  %v24080_v0 = vld [vmem:[#allocation18 + $0x358] ss:$28 sps:$4 sm:$0xff]  }
 0x9b1   : > { %10004 = vmatpush1.bf16.msra.mxu1 %v23999_v5  ;;  %v9339_v5 = vld [vmem:[#allocation19] sm:$0xff] }
 0x9b2   : > { %10005 = vmatprep.subr.bf16.mxu1 %v24004_v16  ;;  %v9344_v16 = vrot.slane %v9339_v5, %v28021_v30 }
 0x9b5   : > { %10006 = vmatpush1.bf16.msra.mxu1 %v24002_v17  ;;  %v9348_v17 = vrot.slane %v9339_v5, %v28014_v55 }
 0x9b6   : > { %10007 = vmatprep.subr.bf16.mxu1 %v24007_v18 }
 0x9b9   : > { %10008 = vmatpush1.bf16.msra.mxu1 %v24005_v3 }
 0x9ba   : > { %10009 = vmatprep.subr.bf16.mxu1 %v24010_v29  ;;  %v9368_v29 = vrot.slane %v9339_v5, %v7971_v49 }
 0x9bd   : > { %10010 = vmatpush1.bf16.msra.mxu1 %v24008_v20 }
 0x9be   : > { %10011 = vmatprep.subr.bf16.mxu1 %v24013_v21 }
 0x9c1   : > { %10012 = vmatpush1.bf16.msra.mxu1 %v24011_v37 }
 0x9c2   : > { %10013 = vmatprep.subr.bf16.mxu1 %v24016_v22 }
 0x9c5   : > { %10014 = vmatpush1.bf16.msra.mxu1 %v24014_v34 }
 0x9c6   : > { %10015 = vmatprep.subr.bf16.mxu1 %v24019_v23 }
 0x9c9   : > { %10016 = vmatpush1.bf16.msra.mxu1 %v24017_v24 }
 0x9ca   : > { %10017 = vmatprep.subr.bf16.mxu1 %v24022_v33 }
 0x9cd   : > { %10018 = vmatpush1.bf16.msra.mxu1 %v24020_v40 }
 0x9ce   : > { %10019 = vmatprep.subr.bf16.mxu1 %v24025_v7 }
 0x9d1   : > { %10020 = vmatpush1.bf16.msra.mxu1 %v24023_v10 }
 0x9d2   : > { %10021 = vmatprep.subr.bf16.mxu1 %v24028_v35 }
 0x9d5   : > { %10022 = vmatpush1.bf16.msra.mxu1 %v24026_v36 }
 0x9d6   : > { %10023 = vmatprep.subr.bf16.mxu1 %v24031_v9 }
 0x9d9   : > { %10024 = vmatpush1.bf16.msra.mxu1 %v24029_v47 }
 0x9da   : > { %10025 = vmatprep.subr.bf16.mxu1 %v24034_v14 }
 0x9dd   : > { %10026 = vmatpush1.bf16.msra.mxu1 %v24032_v38 }
 0x9de   : > { %10038 = vmatprep.subr.bf16.mxu1 %v24037_v39 }
 0x9e0   : > { %10028 = vmatmul.mubr.bf16.vlgmr.msra.gmra.mrb[12].mxu1 %v28050_v11 }
 0x9e1   : > { %10039 = vmatpush1.bf16.msra.mxu1 %v24035_v15  ;;  %10070 = vmatprep.mubr.bf16.mxu1 %v28052_v59  ;;  %v24068_v59 = vld [vmem:[#allocation18 + $0x278] ss:$28 sps:$4 sm:$0xff]  }
 0x9e2   : > { %10040 = vmatprep.subr.bf16.mxu1 %v24040_v41  ;;  %v9352_v41 = vrot.slane %v9339_v5, %v7955_v8  ;;  %v9360_v8 = vrot.slane %v9339_v5, %v7963_v19 }
 0x9e5   : > { %10041 = vmatpush1.bf16.msra.mxu1 %v24038_v42  ;;  %v9356_v42 = vrot.slane %v9339_v5, %v7959_v31  ;;  %v9364_v31 = vrot.slane %v9339_v5, %v7967_v32 }
 0x9e6   : > { %10042 = vmatprep.subr.bf16.mxu1 %v24043_v45 }
 0x9e9   : > { %10043 = vmatpush1.bf16.msra.mxu1 %v24041_v46 }
 0x9ea   : > { %10044 = vmatprep.subr.bf16.mxu1 %v24046_v48 }
 0x9ed   : > { %10045 = vmatpush1.bf16.msra.mxu1 %v24044_v50 }
 0x9ee   : > { %10046 = vmatprep.subr.bf16.mxu1 %v24049_v27 }
 0x9f1   : > { %10047 = vmatpush1.bf16.msra.mxu1 %v24047_v51 }
 0x9f2   : > { %10048 = vmatprep.subr.bf16.mxu1 %v24052_v52 }
 0x9f5   : > { %10049 = vmatpush1.bf16.msra.mxu1 %v24050_v53 }
 0x9f6   : > { %10050 = vmatprep.subr.bf16.mxu1 %v24055_v54 }
 0x9f9   : > { %10051 = vmatpush1.bf16.msra.mxu1 %v24053_v58 }
 0x9fa   : > { %10052 = vmatprep.subr.bf16.mxu1 %v24058_v61 }
 0x9fd   : > { %10053 = vmatpush1.bf16.msra.mxu1 %v24056_v43 }
 0x9fe   : > { %10054 = vmatprep.subr.bf16.mxu1 %v24061_v1 }
 0xa01   : > { %10055 = vmatpush1.bf16.msra.mxu1 %v24059_v2 }
 0xa02   : > { %10056 = vmatprep.subr.bf16.mxu1 %v24064_v25 }
 0xa05   : > { %10057 = vmatpush1.bf16.msra.mxu1 %v24062_v28 }
 0xa06   : > { %10058 = vmatprep.subr.bf16.mxu1 %v24067_v26 }
 0xa09   : > { %10059 = vmatpush1.bf16.msra.mxu1 %v24065_v4 }
 0xa0a   : > { %10060 = vmatprep.subr.bf16.mxu1 %v24070_v6 }
 0xa0d   : > { %10061 = vmatpush1.bf16.msra.mxu1 %v24068_v59 }
 0xa0e   : > { %10062 = vmatprep.subr.bf16.mxu1 %v24073_v12 }
 0xa11   : > { %10063 = vmatpush1.bf16.msra.mxu1 %v24071_v44 }
 0xa12   : > { %10064 = vmatprep.subr.bf16.mxu1 %v24076_v13 }
 0xa15   : > { %10065 = vmatpush1.bf16.msra.mxu1 %v24074_v63 }
 0xa16   : > { %10066 = vmatprep.subr.bf16.mxu1 %v24079_v62 }
 0xa19   : > { %10067 = vmatpush1.bf16.msra.mxu1 %v24077_v56 }
 0xa1a   : > { %10068 = vmatprep.subr.bf16.mxu1 %v24082_v57 }
 0xa1d   : > { %10069 = vmatpush1.bf16.msra.mxu1 %v24080_v0 }
 0xa20   : > { %10071 = vmatmul.mubr.bf16.vlgmr.msra.gmra.mrb[16].mxu1 %v28050_v11 }
 0xa73   : > { %v9986_v18 = vpop.f32.mrb[8].mxu1  ;;  %v21994_v3 = vpop.f32.mrb[4].mxu0 }
 0xa74   : > { %v9987_v20 = vadd.f32 %v9986_v18, %v9344_v16  ;;  %v9988_v21 = vpop.f32.mrb[9].mxu1  ;;  %v21995_v37 = vpop.f32.mrb[5].mxu0 }
 0xa75   : > { %v9989_v22 = vadd.f32 %v9988_v21, %v9348_v17  ;;  %v21996_v34 = vadd.f32 %v21995_v37, %v21994_v3  ;;  %v9990_v23 = vpop.f32.mrb[10].mxu1  ;;  %v21997_v24 = vpop.f32.mrb[6].mxu0 }
 0xa76   : > { %v9991_v33 = vadd.f32 %v9990_v23, %v9344_v16  ;;  %v9992_v40 = vpop.f32.mrb[11].mxu1  ;;  %v21998_v11 = vpop.f32.mrb[7].mxu0  ;;  %v10122_v35 = vmax.f32 %v9987_v20, 0.0 }
 0xa77   : > { %v10116_v7 = vadd.f32 %v21996_v34, %v9368_v29  ;;  %v9993_v10 = vadd.f32 %v9992_v40, %v9348_v17  ;;  %v21999_v30 = vadd.f32 %v21998_v11, %v21997_v24  ;;  %v10123_v36 = vmax.f32 %v9989_v22, 0.0 }
 0xa78   : > { %v10129_v55 = vmax.f32 %v9991_v33, 0.0 }
 0xa79   : > { %v10130_v9 = vmax.f32 %v9993_v10, 0.0  ;;  %v10119_v47 = vadd.f32 %v21999_v30, %v9368_v29  ;;  %v10128_v49 = vmax.f32 %v10116_v7, 0.0 }
 0xa7a   : > { %v10136_v14 = vpack.c.bf16 %v10129_v55, %v10122_v35 }
 0xa7b   : > { %v10137_v38 = vpack.c.bf16 %v10130_v9, %v10123_v36  ;;  %v10135_v39 = vmax.f32 %v10119_v47, 0.0 }
 0xa7c   : > { %10143 = vst [vmem:[#allocation3] sm:$0xff] %v10136_v14 }
 0xa7d   : > { %10144 = vst [vmem:[#allocation3 + $0x8] sm:$0xff] %v10137_v38  ;;  %v10142_v15 = vpack.c.bf16 %v10135_v39, %v10128_v49 }
 0xa7f   : > { %10149 = vst [vmem:[#allocation3 + $0x30] sm:$0xff] %v10142_v15 }
 0xab3   : > { %v10029_v45 = vpop.f32.mrb[12].mxu1 }
 0xab4   : > { %v10030_v46 = vadd.f32 %v10029_v45, %v9352_v41  ;;  %v10031_v48 = vpop.f32.mrb[13].mxu1 }
 0xab5   : > { %v10032_v50 = vadd.f32 %v10031_v48, %v9356_v42  ;;  %v10033_v27 = vpop.f32.mrb[14].mxu1 }
 0xab6   : > { %v10034_v51 = vadd.f32 %v10033_v27, %v9352_v41  ;;  %v10035_v52 = vpop.f32.mrb[15].mxu1  ;;  %v10124_v54 = vmax.f32 %v10030_v46, 0.0 }
 0xab7   : > { %v10036_v53 = vadd.f32 %v10035_v52, %v9356_v42  ;;  %v10125_v61 = vmax.f32 %v10032_v50, 0.0 }
 0xab8   : > { %v10131_v58 = vmax.f32 %v10034_v51, 0.0 }
 0xab9   : > { %v10132_v43 = vmax.f32 %v10036_v53, 0.0 }
 0xaba   : > { %v10138_v1 = vpack.c.bf16 %v10131_v58, %v10124_v54 }
 0xabb   : > { %v10139_v2 = vpack.c.bf16 %v10132_v43, %v10125_v61 }
 0xabc   : > { %10145 = vst [vmem:[#allocation3 + $0x10] sm:$0xff] %v10138_v1 }
 0xabd   : > { %10146 = vst [vmem:[#allocation3 + $0x18] sm:$0xff] %v10139_v2 }
 0xaf3   : > { %v10072_v25 = vpop.f32.mrb[16].mxu1 }
 0xaf4   : > { %v10073_v28 = vadd.f32 %v10072_v25, %v9360_v8  ;;  %v10074_v26 = vpop.f32.mrb[17].mxu1 }
 0xaf5   : > { %v10075_v4 = vadd.f32 %v10074_v26, %v9364_v31  ;;  %v10076_v6 = vpop.f32.mrb[18].mxu1 }
 0xaf6   : > { %v10077_v59 = vadd.f32 %v10076_v6, %v9360_v8  ;;  %v10078_v12 = vpop.f32.mrb[19].mxu1  ;;  %v10126_v13 = vmax.f32 %v10073_v28, 0.0 }
 0xaf7   : > { %v10079_v44 = vadd.f32 %v10078_v12, %v9364_v31  ;;  %v10127_v62 = vmax.f32 %v10075_v4, 0.0 }
 0xaf8   : > { %v10133_v63 = vmax.f32 %v10077_v59, 0.0 }
 0xaf9   : > { %v10134_v56 = vmax.f32 %v10079_v44, 0.0 }
 0xafa   : > { %v10140_v57 = vpack.c.bf16 %v10133_v63, %v10126_v13 }
 0xafb   : > { %v10141_v0 = vpack.c.bf16 %v10134_v56, %v10127_v62 }
 0xafc   : > { %10147 = vst [vmem:[#allocation3 + $0x20] sm:$0xff] %v10140_v57 }
 0xafd   : > { %10148 = vst [vmem:[#allocation3 + $0x28] sm:$0xff] %v10141_v0 }
 0xafe PF: > { %s29429_s1 = sld [smem:[#allocation33_spill]] }
 0xb04   : > { %p20572_p6 = scmp.lt.s32.totalorder %s29429_s1, 5 }
 0xb05   : > { %v24084_v60 = vld [vmem:[%s26929_s12 + $0x4] ss:$80 sps:$4 sm:$0xff] (!%p20572_p6)   ;;  %v24086_v32 = vld [vmem:[%s26929_s12 + $0xc] ss:$80 sps:$4 sm:$0xff] (!%p20572_p6)   ;;  %v24088_v19 = vld [vmem:[%s26929_s12] ss:$80 sps:$4 sm:$0xff] (!%p20572_p6)  }
 0xb06   : > { %10153 = sbr.rel (%p20572_p6) target bundleno = 4192 (0x1060), region = 159  ;;  %16987 = vmatprep.subr.bf16.mxu0 (!%p20572_p6), %v24084_v60  ;;  %v24089_v5 = vld [vmem:[%s26929_s12 + $0x8] ss:$80 sps:$4 sm:$0xff] (!%p20572_p6)   ;;  %17159 = vmatprep.subr.bf16.mxu1 (!%p20572_p6), %v24086_v32  ;;  %v24090_v16 = vld [vmem:[%s26929_s12 + $0xa4] ss:$80 sps:$4 sm:$0xff] (!%p20572_p6)  }
 0xb07   : > { %16988 = vmatpush1.bf16.msra.mxu0 (!%p20572_p6), %v24088_v19  ;;  %17160 = vmatpush1.bf16.msra.mxu1 (!%p20572_p6), %v24089_v5  ;;  %v24092_v17 = vld [vmem:[%s26929_s12 + $0xac] ss:$80 sps:$4 sm:$0xff] (!%p20572_p6)   ;;  %v24094_v18 = vld [vmem:[%s26929_s12 + $0xa0] ss:$80 sps:$4 sm:$0xff] (!%p20572_p6)   ;;  %v24095_v3 = vld [vmem:[%s26929_s12 + $0xa8] ss:$80 sps:$4 sm:$0xff] (!%p20572_p6)  }
 0xb08   : > { %16989 = vmatprep.subr.bf16.mxu0 (!%p20572_p6), %v24090_v16  ;;  %17161 = vmatprep.subr.bf16.mxu1 (!%p20572_p6), %v24092_v17  ;;  %v24096_v29 = vld [vmem:[%s26929_s12 + $0x144] ss:$80 sps:$4 sm:$0xff] (!%p20572_p6)   ;;  %v24098_v20 = vld [vmem:[%s26929_s12 + $0x14c] ss:$80 sps:$4 sm:$0xff] (!%p20572_p6)   ;;  %v24100_v21 = vld [vmem:[%s26929_s12 + $0x140] ss:$80 sps:$4 sm:$0xff] (!%p20572_p6)  }
 0xb09   : > { %v24101_v37 = vld [vmem:[%s26929_s12 + $0x148] ss:$80 sps:$4 sm:$0xff] (!%p20572_p6)   ;;  %v24102_v22 = vld [vmem:[%s26929_s12 + $0x1e4] ss:$80 sps:$4 sm:$0xff] (!%p20572_p6)   ;;  %v24104_v34 = vld [vmem:[%s26929_s12 + $0x1ec] ss:$80 sps:$4 sm:$0xff] (!%p20572_p6)  }
 0xb0a   : > { %v24106_v23 = vld [vmem:[%s26929_s12 + $0x1e0] ss:$80 sps:$4 sm:$0xff] (!%p20572_p6)   ;;  %v24107_v24 = vld [vmem:[%s26929_s12 + $0x1e8] ss:$80 sps:$4 sm:$0xff] (!%p20572_p6)   ;;  %v24108_v33 = vld [vmem:[%s26929_s12 + $0x284] ss:$80 sps:$4 sm:$0xff] (!%p20572_p6)  }
 0xb0b   : > { %16990 = vmatpush1.bf16.msra.mxu0 (!%p20572_p6), %v24094_v18  ;;  %17162 = vmatpush1.bf16.msra.mxu1 (!%p20572_p6), %v24095_v3  ;;  %v24110_v40 = vld [vmem:[%s26929_s12 + $0x28c] ss:$80 sps:$4 sm:$0xff] (!%p20572_p6)   ;;  %v24112_v11 = vld [vmem:[%s26929_s12 + $0x280] ss:$80 sps:$4 sm:$0xff] (!%p20572_p6)   ;;  %v24113_v7 = vld [vmem:[%s26929_s12 + $0x288] ss:$80 sps:$4 sm:$0xff] (!%p20572_p6)  }
 0xb0c   : > { %16991 = vmatprep.subr.bf16.mxu0 (!%p20572_p6), %v24096_v29  ;;  %17163 = vmatprep.subr.bf16.mxu1 (!%p20572_p6), %v24098_v20  ;;  %v24114_v10 = vld [vmem:[%s26929_s12 + $0x324] ss:$80 sps:$4 sm:$0xff] (!%p20572_p6)   ;;  %v24116_v30 = vld [vmem:[%s26929_s12 + $0x32c] ss:$80 sps:$4 sm:$0xff] (!%p20572_p6)   ;;  %v24118_v35 = vld [vmem:[%s26929_s12 + $0x320] ss:$80 sps:$4 sm:$0xff] (!%p20572_p6)  }
 0xb0d   : > { %v24119_v55 = vld [vmem:[%s26929_s12 + $0x328] ss:$80 sps:$4 sm:$0xff]   ;;  %v24120_v36 = vld [vmem:[%s26929_s12 + $0x3c4] ss:$80 sps:$4 sm:$0xff]   ;;  %v24122_v9 = vld [vmem:[%s26929_s12 + $0x3cc] ss:$80 sps:$4 sm:$0xff]  }
 0xb0e   : > { %v24124_v47 = vld [vmem:[%s26929_s12 + $0x3c0] ss:$80 sps:$4 sm:$0xff]   ;;  %v24125_v14 = vld [vmem:[%s26929_s12 + $0x3c8] ss:$80 sps:$4 sm:$0xff]   ;;  %v24126_v49 = vld [vmem:[%s26929_s12 + $0x464] ss:$80 sps:$4 sm:$0xff]  }
 0xb0f   : > { %16992 = vmatpush1.bf16.msra.mxu0 %v24100_v21  ;;  %17164 = vmatpush1.bf16.msra.mxu1 %v24101_v37  ;;  %v24128_v38 = vld [vmem:[%s26929_s12 + $0x46c] ss:$80 sps:$4 sm:$0xff]   ;;  %v24130_v39 = vld [vmem:[%s26929_s12 + $0x460] ss:$80 sps:$4 sm:$0xff]   ;;  %v24131_v15 = vld [vmem:[%s26929_s12 + $0x468] ss:$80 sps:$4 sm:$0xff]  }
 0xb10   : > { %16993 = vmatprep.subr.bf16.mxu0 %v24102_v22  ;;  %17165 = vmatprep.subr.bf16.mxu1 %v24104_v34  ;;  %v24132_v41 = vld [vmem:[%s26929_s12 + $0x504] ss:$80 sps:$4 sm:$0xff]   ;;  %v24134_v42 = vld [vmem:[%s26929_s12 + $0x50c] ss:$80 sps:$4 sm:$0xff]   ;;  %v24136_v45 = vld [vmem:[%s26929_s12 + $0x500] ss:$80 sps:$4 sm:$0xff]  }
 0xb11   : > { %v24137_v46 = vld [vmem:[%s26929_s12 + $0x508] ss:$80 sps:$4 sm:$0xff]   ;;  %v24138_v48 = vld [vmem:[%s26929_s12 + $0x5a4] ss:$80 sps:$4 sm:$0xff]   ;;  %v24140_v50 = vld [vmem:[%s26929_s12 + $0x5ac] ss:$80 sps:$4 sm:$0xff]  }
 0xb12   : > { %v24142_v27 = vld [vmem:[%s26929_s12 + $0x5a0] ss:$80 sps:$4 sm:$0xff]   ;;  %v24143_v51 = vld [vmem:[%s26929_s12 + $0x5a8] ss:$80 sps:$4 sm:$0xff]   ;;  %v24144_v52 = vld [vmem:[%s26929_s12 + $0x644] ss:$80 sps:$4 sm:$0xff]  }
 0xb13   : > { %16994 = vmatpush1.bf16.msra.mxu0 %v24106_v23  ;;  %17166 = vmatpush1.bf16.msra.mxu1 %v24107_v24  ;;  %v24146_v53 = vld [vmem:[%s26929_s12 + $0x64c] ss:$80 sps:$4 sm:$0xff]   ;;  %v24148_v54 = vld [vmem:[%s26929_s12 + $0x640] ss:$80 sps:$4 sm:$0xff]   ;;  %v24149_v58 = vld [vmem:[%s26929_s12 + $0x648] ss:$80 sps:$4 sm:$0xff]  }
 0xb14   : > { %16995 = vmatprep.subr.bf16.mxu0 %v24108_v33  ;;  %17167 = vmatprep.subr.bf16.mxu1 %v24110_v40  ;;  %v24150_v61 = vld [vmem:[%s26929_s12 + $0x6e4] ss:$80 sps:$4 sm:$0xff]   ;;  %v24152_v43 = vld [vmem:[%s26929_s12 + $0x6ec] ss:$80 sps:$4 sm:$0xff]   ;;  %v24154_v2 = vld [vmem:[%s26929_s12 + $0x6e0] ss:$80 sps:$4 sm:$0xff]  }
 0xb15   : > { %v10155_v1 = vld [vmem:[#allocation3 + $0x8] sm:$0xff]  ;;  %v24156_v31 = vld [vmem:[%s26929_s12 + $0x784] ss:$80 sps:$4 sm:$0xff]  }
 0xb16   : > { %17019 = vmatprep.mubr.bf16.mxu0 %v10155_v1  ;;  %17191 = vmatprep.mubr.bf16.mxu1 %v10155_v1  ;;  %v24155_v8 = vld [vmem:[%s26929_s12 + $0x6e8] ss:$80 sps:$4 sm:$0xff]   ;;  %v24158_v25 = vld [vmem:[%s26929_s12 + $0x78c] ss:$80 sps:$4 sm:$0xff]   ;;  %v24160_v28 = vld [vmem:[%s26929_s12 + $0x780] ss:$80 sps:$4 sm:$0xff]  }
 0xb17   : > { %16996 = vmatpush1.bf16.msra.mxu0 %v24112_v11  ;;  %17168 = vmatpush1.bf16.msra.mxu1 %v24113_v7  ;;  %v24161_v26 = vld [vmem:[%s26929_s12 + $0x788] ss:$80 sps:$4 sm:$0xff]   ;;  %v24162_v4 = vld [vmem:[%s26929_s12 + $0x824] ss:$80 sps:$4 sm:$0xff]   ;;  %v24164_v6 = vld [vmem:[%s26929_s12 + $0x82c] ss:$80 sps:$4 sm:$0xff]  }
 0xb18   : > { %16997 = vmatprep.subr.bf16.mxu0 %v24114_v10  ;;  %17169 = vmatprep.subr.bf16.mxu1 %v24116_v30  ;;  %v24166_v59 = vld [vmem:[%s26929_s12 + $0x820] ss:$80 sps:$4 sm:$0xff]   ;;  %v24167_v12 = vld [vmem:[%s26929_s12 + $0x828] ss:$80 sps:$4 sm:$0xff]   ;;  %v24168_v44 = vld [vmem:[%s26929_s12 + $0x8c4] ss:$80 sps:$4 sm:$0xff]  }
 0xb19   : > { %v24170_v13 = vld [vmem:[%s26929_s12 + $0x8cc] ss:$80 sps:$4 sm:$0xff]   ;;  %v24172_v63 = vld [vmem:[%s26929_s12 + $0x8c0] ss:$80 sps:$4 sm:$0xff]   ;;  %v24173_v62 = vld [vmem:[%s26929_s12 + $0x8c8] ss:$80 sps:$4 sm:$0xff]  }
 0xb1a   : > { %v24174_v56 = vld [vmem:[%s26929_s12 + $0x964] ss:$80 sps:$4 sm:$0xff]   ;;  %v24176_v57 = vld [vmem:[%s26929_s12 + $0x96c] ss:$80 sps:$4 sm:$0xff]   ;;  %v24178_v0 = vld [vmem:[%s26929_s12 + $0x960] ss:$80 sps:$4 sm:$0xff]  }
 0xb1b   : > { %16998 = vmatpush1.bf16.msra.mxu0 %v24118_v35  ;;  %17170 = vmatpush1.bf16.msra.mxu1 %v24119_v55  ;;  %v24179_v60 = vld [vmem:[%s26929_s12 + $0x968] ss:$80 sps:$4 sm:$0xff]   ;;  %v24182_v32 = vld [vmem:[%s26929_s12 + $0xa04] ss:$80 sps:$4 sm:$0xff]   ;;  %v24185_v19 = vld [vmem:[%s26929_s12 + $0xa0c] ss:$80 sps:$4 sm:$0xff]  }
 0xb1c   : > { %16999 = vmatprep.subr.bf16.mxu0 %v24120_v36  ;;  %17171 = vmatprep.subr.bf16.mxu1 %v24122_v9  ;;  %v24180_v5 = vld [vmem:[%s26929_s12 + $0xa00] ss:$80 sps:$4 sm:$0xff]   ;;  %v24183_v16 = vld [vmem:[%s26929_s12 + $0xa08] ss:$80 sps:$4 sm:$0xff]   ;;  %v24188_v18 = vld [vmem:[%s26929_s12 + $0xaa4] ss:$80 sps:$4 sm:$0xff]  }
 0xb1d   : > { %v10154_v17 = vld [vmem:[#allocation3] sm:$0xff]  ;;  %v24191_v3 = vld [vmem:[%s26929_s12 + $0xaac] ss:$80 sps:$4 sm:$0xff]  }
 0xb1e   : > { %v24186_v29 = vld [vmem:[%s26929_s12 + $0xaa0] ss:$80 sps:$4 sm:$0xff]   ;;  %v24189_v20 = vld [vmem:[%s26929_s12 + $0xaa8] ss:$80 sps:$4 sm:$0xff]   ;;  %v24194_v21 = vld [vmem:[%s26929_s12 + $0xb44] ss:$80 sps:$4 sm:$0xff]  }
 0xb1f   : > { %17000 = vmatpush1.bf16.msra.mxu0 %v24124_v47  ;;  %17172 = vmatpush1.bf16.msra.mxu1 %v24125_v14  ;;  %v24197_v37 = vld [vmem:[%s26929_s12 + $0xb4c] ss:$80 sps:$4 sm:$0xff]   ;;  %v24192_v22 = vld [vmem:[%s26929_s12 + $0xb40] ss:$80 sps:$4 sm:$0xff]   ;;  %v24195_v34 = vld [vmem:[%s26929_s12 + $0xb48] ss:$80 sps:$4 sm:$0xff]  }
 0xb20   : > { %17001 = vmatprep.subr.bf16.mxu0 %v24126_v49  ;;  %17173 = vmatprep.subr.bf16.mxu1 %v24128_v38  ;;  %v24200_v23 = vld [vmem:[%s26929_s12 + $0xbe4] ss:$80 sps:$4 sm:$0xff]   ;;  %v24203_v24 = vld [vmem:[%s26929_s12 + $0xbec] ss:$80 sps:$4 sm:$0xff]   ;;  %v24198_v33 = vld [vmem:[%s26929_s12 + $0xbe0] ss:$80 sps:$4 sm:$0xff]  }
 0xb21   : > { %v24201_v40 = vld [vmem:[%s26929_s12 + $0xbe8] ss:$80 sps:$4 sm:$0xff]   ;;  %v24206_v11 = vld [vmem:[%s26929_s12 + $0xc84] ss:$80 sps:$4 sm:$0xff]   ;;  %v24209_v7 = vld [vmem:[%s26929_s12 + $0xc8c] ss:$80 sps:$4 sm:$0xff]  }
 0xb22   : > { %v24204_v10 = vld [vmem:[%s26929_s12 + $0xc80] ss:$80 sps:$4 sm:$0xff]   ;;  %v24207_v30 = vld [vmem:[%s26929_s12 + $0xc88] ss:$80 sps:$4 sm:$0xff]   ;;  %v24212_v35 = vld [vmem:[%s26929_s12 + $0xd24] ss:$80 sps:$4 sm:$0xff]  }
 0xb23   : > { %17002 = vmatpush1.bf16.msra.mxu0 %v24130_v39  ;;  %17174 = vmatpush1.bf16.msra.mxu1 %v24131_v15  ;;  %v24215_v55 = vld [vmem:[%s26929_s12 + $0xd2c] ss:$80 sps:$4 sm:$0xff]   ;;  %v24210_v36 = vld [vmem:[%s26929_s12 + $0xd20] ss:$80 sps:$4 sm:$0xff]   ;;  %v24213_v9 = vld [vmem:[%s26929_s12 + $0xd28] ss:$80 sps:$4 sm:$0xff]  }
 0xb24   : > { %17003 = vmatprep.subr.bf16.mxu0 %v24132_v41  ;;  %17175 = vmatprep.subr.bf16.mxu1 %v24134_v42  ;;  %v24218_v47 = vld [vmem:[%s26929_s12 + $0xdc4] ss:$80 sps:$4 sm:$0xff]   ;;  %v24221_v14 = vld [vmem:[%s26929_s12 + $0xdcc] ss:$80 sps:$4 sm:$0xff]   ;;  %v24216_v38 = vld [vmem:[%s26929_s12 + $0xdc0] ss:$80 sps:$4 sm:$0xff]  }
 0xb25   : > { %v10157_v49 = vld [vmem:[#allocation3 + $0x18] sm:$0xff]  ;;  %v24224_v15 = vld [vmem:[%s26929_s12 + $0xe64] ss:$80 sps:$4 sm:$0xff]  }
 0xb26   : > { %v24219_v39 = vld [vmem:[%s26929_s12 + $0xdc8] ss:$80 sps:$4 sm:$0xff]   ;;  %v24227_v41 = vld [vmem:[%s26929_s12 + $0xe6c] ss:$80 sps:$4 sm:$0xff]   ;;  %v24222_v42 = vld [vmem:[%s26929_s12 + $0xe60] ss:$80 sps:$4 sm:$0xff]  }
 0xb27   : > { %17004 = vmatpush1.bf16.msra.mxu0 %v24136_v45  ;;  %17176 = vmatpush1.bf16.msra.mxu1 %v24137_v46  ;;  %v24225_v45 = vld [vmem:[%s26929_s12 + $0xe68] ss:$80 sps:$4 sm:$0xff]   ;;  %v24230_v46 = vld [vmem:[%s26929_s12 + $0xf04] ss:$80 sps:$4 sm:$0xff]  }
 0xb28   : > { %17005 = vmatprep.subr.bf16.mxu0 %v24138_v48  ;;  %17177 = vmatprep.subr.bf16.mxu1 %v24140_v50  ;;  %v24233_v48 = vld [vmem:[%s26929_s12 + $0xf0c] ss:$80 sps:$4 sm:$0xff]   ;;  %v24228_v50 = vld [vmem:[%s26929_s12 + $0xf00] ss:$80 sps:$4 sm:$0xff]   ;;  %v24243_v1 = vld [vmem:[%s26929_s12 + $0x1048] ss:$80 sps:$4 sm:$0xff]  }
 0xb2b   : > { %17006 = vmatpush1.bf16.msra.mxu0 %v24142_v27  ;;  %17178 = vmatpush1.bf16.msra.mxu1 %v24143_v51  ;;  %v24231_v27 = vld [vmem:[%s26929_s12 + $0xf08] ss:$80 sps:$4 sm:$0xff]   ;;  %v24236_v51 = vld [vmem:[%s26929_s12 + $0xfa4] ss:$80 sps:$4 sm:$0xff]  }
 0xb2c   : > { %17007 = vmatprep.subr.bf16.mxu0 %v24144_v52  ;;  %17179 = vmatprep.subr.bf16.mxu1 %v24146_v53  ;;  %v24239_v52 = vld [vmem:[%s26929_s12 + $0xfac] ss:$80 sps:$4 sm:$0xff]   ;;  %v24234_v53 = vld [vmem:[%s26929_s12 + $0xfa0] ss:$80 sps:$4 sm:$0xff]  }
 0xb2f   : > { %17008 = vmatpush1.bf16.msra.mxu0 %v24148_v54  ;;  %17180 = vmatpush1.bf16.msra.mxu1 %v24149_v58  ;;  %v24237_v54 = vld [vmem:[%s26929_s12 + $0xfa8] ss:$80 sps:$4 sm:$0xff]   ;;  %v24242_v58 = vld [vmem:[%s26929_s12 + $0x1044] ss:$80 sps:$4 sm:$0xff]  }
 0xb30   : > { %17009 = vmatprep.subr.bf16.mxu0 %v24150_v61  ;;  %17181 = vmatprep.subr.bf16.mxu1 %v24152_v43  ;;  %v24245_v61 = vld [vmem:[%s26929_s12 + $0x104c] ss:$80 sps:$4 sm:$0xff]   ;;  %v24240_v43 = vld [vmem:[%s26929_s12 + $0x1040] ss:$80 sps:$4 sm:$0xff]  }
 0xb33   : > { %17010 = vmatpush1.bf16.msra.mxu0 %v24154_v2  ;;  %17182 = vmatpush1.bf16.msra.mxu1 %v24155_v8  ;;  %v24248_v2 = vld [vmem:[%s26929_s12 + $0x10e4] ss:$80 sps:$4 sm:$0xff]   ;;  %v24251_v8 = vld [vmem:[%s26929_s12 + $0x10ec] ss:$80 sps:$4 sm:$0xff]  }
 0xb34   : > { %17011 = vmatprep.subr.bf16.mxu0 %v24156_v31  ;;  %17183 = vmatprep.subr.bf16.mxu1 %v24158_v25  ;;  %v24246_v31 = vld [vmem:[%s26929_s12 + $0x10e0] ss:$80 sps:$4 sm:$0xff]   ;;  %v24249_v25 = vld [vmem:[%s26929_s12 + $0x10e8] ss:$80 sps:$4 sm:$0xff]  }
 0xb37   : > { %17012 = vmatpush1.bf16.msra.mxu0 %v24160_v28  ;;  %17184 = vmatpush1.bf16.msra.mxu1 %v24161_v26  ;;  %v24254_v28 = vld [vmem:[%s26929_s12 + $0x1184] ss:$80 sps:$4 sm:$0xff]   ;;  %v24257_v26 = vld [vmem:[%s26929_s12 + $0x118c] ss:$80 sps:$4 sm:$0xff]  }
 0xb38   : > { %17013 = vmatprep.subr.bf16.mxu0 %v24162_v4  ;;  %17185 = vmatprep.subr.bf16.mxu1 %v24164_v6  ;;  %v24252_v4 = vld [vmem:[%s26929_s12 + $0x1180] ss:$80 sps:$4 sm:$0xff]   ;;  %v24255_v6 = vld [vmem:[%s26929_s12 + $0x1188] ss:$80 sps:$4 sm:$0xff]  }
 0xb3b   : > { %17014 = vmatpush1.bf16.msra.mxu0 %v24166_v59  ;;  %17186 = vmatpush1.bf16.msra.mxu1 %v24167_v12  ;;  %v24260_v59 = vld [vmem:[%s26929_s12 + $0x1224] ss:$80 sps:$4 sm:$0xff]   ;;  %v24263_v12 = vld [vmem:[%s26929_s12 + $0x122c] ss:$80 sps:$4 sm:$0xff]  }
 0xb3c   : > { %17015 = vmatprep.subr.bf16.mxu0 %v24168_v44  ;;  %17187 = vmatprep.subr.bf16.mxu1 %v24170_v13  ;;  %v24258_v44 = vld [vmem:[%s26929_s12 + $0x1220] ss:$80 sps:$4 sm:$0xff]   ;;  %v24261_v13 = vld [vmem:[%s26929_s12 + $0x1228] ss:$80 sps:$4 sm:$0xff]  }
 0xb3f   : > { %17016 = vmatpush1.bf16.msra.mxu0 %v24172_v63  ;;  %17188 = vmatpush1.bf16.msra.mxu1 %v24173_v62  ;;  %v24266_v63 = vld [vmem:[%s26929_s12 + $0x12c4] ss:$80 sps:$4 sm:$0xff]   ;;  %v24269_v62 = vld [vmem:[%s26929_s12 + $0x12cc] ss:$80 sps:$4 sm:$0xff]  }
 0xb40   : > { %17017 = vmatprep.subr.bf16.mxu0 %v24174_v56  ;;  %17189 = vmatprep.subr.bf16.mxu1 %v24176_v57  ;;  %v24264_v56 = vld [vmem:[%s26929_s12 + $0x12c0] ss:$80 sps:$4 sm:$0xff]   ;;  %v24267_v57 = vld [vmem:[%s26929_s12 + $0x12c8] ss:$80 sps:$4 sm:$0xff]  }
 0xb43   : > { %17018 = vmatpush1.bf16.msra.mxu0 %v24178_v0  ;;  %17190 = vmatpush1.bf16.msra.mxu1 %v24179_v60  ;;  %v24272_v0 = vld [vmem:[%s26929_s12 + $0x1364] ss:$80 sps:$4 sm:$0xff]   ;;  %v24275_v60 = vld [vmem:[%s26929_s12 + $0x136c] ss:$80 sps:$4 sm:$0xff]  }
 0xb44   : > { %17030 = vmatprep.subr.bf16.mxu0 %v24182_v32  ;;  %17202 = vmatprep.subr.bf16.mxu1 %v24185_v19  ;;  %v24270_v32 = vld [vmem:[%s26929_s12 + $0x1360] ss:$80 sps:$4 sm:$0xff]   ;;  %v24273_v19 = vld [vmem:[%s26929_s12 + $0x1368] ss:$80 sps:$4 sm:$0xff]  }
 0xb46   : > { %17020 = vmatmul.mubr.bf16.vlgmr.msra.gmra.mrb[0].mxu0 %v10154_v17  ;;  %17192 = vmatmul.mubr.bf16.vlgmr.msra.gmra.mrb[0].mxu1 %v10154_v17  ;;  %v24276_v17 = vld [vmem:[%s26929_s12 + $0x1400] ss:$80 sps:$4 sm:$0xff]  }
 0xb47   : > { %17031 = vmatpush1.bf16.msra.mxu0 %v24180_v5  ;;  %17203 = vmatpush1.bf16.msra.mxu1 %v24183_v16  ;;  %v24278_v5 = vld [vmem:[%s26929_s12 + $0x1404] ss:$80 sps:$4 sm:$0xff]   ;;  %v24281_v16 = vld [vmem:[%s26929_s12 + $0x140c] ss:$80 sps:$4 sm:$0xff]  }
 0xb48   : > { %17032 = vmatprep.subr.bf16.mxu0 %v24188_v18  ;;  %17204 = vmatprep.subr.bf16.mxu1 %v24191_v3  ;;  %v24279_v18 = vld [vmem:[%s26929_s12 + $0x1408] ss:$80 sps:$4 sm:$0xff]  }
 0xb49   : > { %17062 = vmatprep.mubr.bf16.mxu0 %v10157_v49  ;;  %17234 = vmatprep.mubr.bf16.mxu1 %v10157_v49  ;;  %v10156_v3 = vld [vmem:[#allocation3 + $0x10] sm:$0xff] }
 0xb4a   : > { %v24309_v49 = vld [vmem:[%s26929_s12 + $0x1728] ss:$80 sps:$4 sm:$0xff]  }
 0xb4b   : > { %17033 = vmatpush1.bf16.msra.mxu0 %v24186_v29  ;;  %17205 = vmatpush1.bf16.msra.mxu1 %v24189_v20  ;;  %v24284_v29 = vld [vmem:[%s26929_s12 + $0x14a4] ss:$80 sps:$4 sm:$0xff]   ;;  %v24287_v20 = vld [vmem:[%s26929_s12 + $0x14ac] ss:$80 sps:$4 sm:$0xff]  }
 0xb4c   : > { %17034 = vmatprep.subr.bf16.mxu0 %v24194_v21  ;;  %17206 = vmatprep.subr.bf16.mxu1 %v24197_v37  ;;  %v10159_v21 = vld [vmem:[#allocation3 + $0x28] sm:$0xff] }
 0xb4d   : > { %v24282_v37 = vld [vmem:[%s26929_s12 + $0x14a0] ss:$80 sps:$4 sm:$0xff]  }
 0xb4f   : > { %17035 = vmatpush1.bf16.msra.mxu0 %v24192_v22  ;;  %17207 = vmatpush1.bf16.msra.mxu1 %v24195_v34  ;;  %v24285_v22 = vld [vmem:[%s26929_s12 + $0x14a8] ss:$80 sps:$4 sm:$0xff]   ;;  %v24290_v34 = vld [vmem:[%s26929_s12 + $0x1544] ss:$80 sps:$4 sm:$0xff]  }
 0xb50   : > { %17036 = vmatprep.subr.bf16.mxu0 %v24200_v23  ;;  %17208 = vmatprep.subr.bf16.mxu1 %v24203_v24  ;;  %v24293_v23 = vld [vmem:[%s26929_s12 + $0x154c] ss:$80 sps:$4 sm:$0xff]   ;;  %v24288_v24 = vld [vmem:[%s26929_s12 + $0x1540] ss:$80 sps:$4 sm:$0xff]  }
 0xb53   : > { %17037 = vmatpush1.bf16.msra.mxu0 %v24198_v33  ;;  %17209 = vmatpush1.bf16.msra.mxu1 %v24201_v40  ;;  %v24291_v33 = vld [vmem:[%s26929_s12 + $0x1548] ss:$80 sps:$4 sm:$0xff]   ;;  %v24296_v40 = vld [vmem:[%s26929_s12 + $0x15e4] ss:$80 sps:$4 sm:$0xff]  }
 0xb54   : > { %17038 = vmatprep.subr.bf16.mxu0 %v24206_v11  ;;  %17210 = vmatprep.subr.bf16.mxu1 %v24209_v7  ;;  %v24299_v11 = vld [vmem:[%s26929_s12 + $0x15ec] ss:$80 sps:$4 sm:$0xff]   ;;  %v24294_v7 = vld [vmem:[%s26929_s12 + $0x15e0] ss:$80 sps:$4 sm:$0xff]  }
 0xb57   : > { %17039 = vmatpush1.bf16.msra.mxu0 %v24204_v10  ;;  %17211 = vmatpush1.bf16.msra.mxu1 %v24207_v30  ;;  %v24297_v10 = vld [vmem:[%s26929_s12 + $0x15e8] ss:$80 sps:$4 sm:$0xff]   ;;  %v24302_v30 = vld [vmem:[%s26929_s12 + $0x1684] ss:$80 sps:$4 sm:$0xff]  }
 0xb58   : > { %17040 = vmatprep.subr.bf16.mxu0 %v24212_v35  ;;  %17212 = vmatprep.subr.bf16.mxu1 %v24215_v55  ;;  %v24305_v35 = vld [vmem:[%s26929_s12 + $0x168c] ss:$80 sps:$4 sm:$0xff]   ;;  %v24300_v55 = vld [vmem:[%s26929_s12 + $0x1680] ss:$80 sps:$4 sm:$0xff]  }
 0xb5b   : > { %17041 = vmatpush1.bf16.msra.mxu0 %v24210_v36  ;;  %17213 = vmatpush1.bf16.msra.mxu1 %v24213_v9  ;;  %v24303_v36 = vld [vmem:[%s26929_s12 + $0x1688] ss:$80 sps:$4 sm:$0xff]   ;;  %v24308_v9 = vld [vmem:[%s26929_s12 + $0x1724] ss:$80 sps:$4 sm:$0xff]  }
 0xb5c   : > { %17042 = vmatprep.subr.bf16.mxu0 %v24218_v47  ;;  %17214 = vmatprep.subr.bf16.mxu1 %v24221_v14  ;;  %v24311_v47 = vld [vmem:[%s26929_s12 + $0x172c] ss:$80 sps:$4 sm:$0xff]   ;;  %v24306_v14 = vld [vmem:[%s26929_s12 + $0x1720] ss:$80 sps:$4 sm:$0xff]  }
 0xb5f   : > { %17043 = vmatpush1.bf16.msra.mxu0 %v24216_v38  ;;  %17215 = vmatpush1.bf16.msra.mxu1 %v24219_v39  ;;  %v24314_v38 = vld [vmem:[%s26929_s12 + $0x17c4] ss:$80 sps:$4 sm:$0xff]   ;;  %v24317_v39 = vld [vmem:[%s26929_s12 + $0x17cc] ss:$80 sps:$4 sm:$0xff]  }
 0xb60   : > { %17044 = vmatprep.subr.bf16.mxu0 %v24224_v15  ;;  %17216 = vmatprep.subr.bf16.mxu1 %v24227_v41  ;;  %v24312_v15 = vld [vmem:[%s26929_s12 + $0x17c0] ss:$80 sps:$4 sm:$0xff]   ;;  %v24315_v41 = vld [vmem:[%s26929_s12 + $0x17c8] ss:$80 sps:$4 sm:$0xff]  }
 0xb63   : > { %17045 = vmatpush1.bf16.msra.mxu0 %v24222_v42  ;;  %17217 = vmatpush1.bf16.msra.mxu1 %v24225_v45  ;;  %v24320_v42 = vld [vmem:[%s26929_s12 + $0x1864] ss:$80 sps:$4 sm:$0xff]   ;;  %v24323_v45 = vld [vmem:[%s26929_s12 + $0x186c] ss:$80 sps:$4 sm:$0xff]  }
 0xb64   : > { %17046 = vmatprep.subr.bf16.mxu0 %v24230_v46  ;;  %17218 = vmatprep.subr.bf16.mxu1 %v24233_v48  ;;  %v24318_v46 = vld [vmem:[%s26929_s12 + $0x1860] ss:$80 sps:$4 sm:$0xff]   ;;  %v24321_v48 = vld [vmem:[%s26929_s12 + $0x1868] ss:$80 sps:$4 sm:$0xff]  }
 0xb67   : > { %17047 = vmatpush1.bf16.msra.mxu0 %v24228_v50  ;;  %17219 = vmatpush1.bf16.msra.mxu1 %v24231_v27  ;;  %v24326_v50 = vld [vmem:[%s26929_s12 + $0x1904] ss:$80 sps:$4 sm:$0xff]   ;;  %v24329_v27 = vld [vmem:[%s26929_s12 + $0x190c] ss:$80 sps:$4 sm:$0xff]  }
 0xb68   : > { %17048 = vmatprep.subr.bf16.mxu0 %v24236_v51  ;;  %17220 = vmatprep.subr.bf16.mxu1 %v24239_v52  ;;  %v24324_v51 = vld [vmem:[%s26929_s12 + $0x1900] ss:$80 sps:$4 sm:$0xff]   ;;  %v24327_v52 = vld [vmem:[%s26929_s12 + $0x1908] ss:$80 sps:$4 sm:$0xff]  }
 0xb6b   : > { %17049 = vmatpush1.bf16.msra.mxu0 %v24234_v53  ;;  %17221 = vmatpush1.bf16.msra.mxu1 %v24237_v54  ;;  %v24332_v53 = vld [vmem:[%s26929_s12 + $0x19a4] ss:$80 sps:$4 sm:$0xff]   ;;  %v24335_v54 = vld [vmem:[%s26929_s12 + $0x19ac] ss:$80 sps:$4 sm:$0xff]  }
 0xb6c   : > { %17050 = vmatprep.subr.bf16.mxu0 %v24242_v58  ;;  %17222 = vmatprep.subr.bf16.mxu1 %v24245_v61  ;;  %v24330_v58 = vld [vmem:[%s26929_s12 + $0x19a0] ss:$80 sps:$4 sm:$0xff]   ;;  %v24333_v61 = vld [vmem:[%s26929_s12 + $0x19a8] ss:$80 sps:$4 sm:$0xff]  }
 0xb6f   : > { %17051 = vmatpush1.bf16.msra.mxu0 %v24240_v43  ;;  %17223 = vmatpush1.bf16.msra.mxu1 %v24243_v1  ;;  %v24338_v43 = vld [vmem:[%s26929_s12 + $0x1a44] ss:$80 sps:$4 sm:$0xff]   ;;  %v24341_v1 = vld [vmem:[%s26929_s12 + $0x1a4c] ss:$80 sps:$4 sm:$0xff]  }
 0xb70   : > { %17052 = vmatprep.subr.bf16.mxu0 %v24248_v2  ;;  %17224 = vmatprep.subr.bf16.mxu1 %v24251_v8  ;;  %v24336_v2 = vld [vmem:[%s26929_s12 + $0x1a40] ss:$80 sps:$4 sm:$0xff]   ;;  %v24339_v8 = vld [vmem:[%s26929_s12 + $0x1a48] ss:$80 sps:$4 sm:$0xff]  }
 0xb73   : > { %17053 = vmatpush1.bf16.msra.mxu0 %v24246_v31  ;;  %17225 = vmatpush1.bf16.msra.mxu1 %v24249_v25  ;;  %v24344_v31 = vld [vmem:[%s26929_s12 + $0x1ae4] ss:$80 sps:$4 sm:$0xff]   ;;  %v24347_v25 = vld [vmem:[%s26929_s12 + $0x1aec] ss:$80 sps:$4 sm:$0xff]  }
 0xb74   : > { %17054 = vmatprep.subr.bf16.mxu0 %v24254_v28  ;;  %17226 = vmatprep.subr.bf16.mxu1 %v24257_v26  ;;  %v24342_v28 = vld [vmem:[%s26929_s12 + $0x1ae0] ss:$80 sps:$4 sm:$0xff]   ;;  %v24345_v26 = vld [vmem:[%s26929_s12 + $0x1ae8] ss:$80 sps:$4 sm:$0xff]  }
 0xb77   : > { %17055 = vmatpush1.bf16.msra.mxu0 %v24252_v4  ;;  %17227 = vmatpush1.bf16.msra.mxu1 %v24255_v6  ;;  %v24350_v4 = vld [vmem:[%s26929_s12 + $0x1b84] ss:$80 sps:$4 sm:$0xff]   ;;  %v24353_v6 = vld [vmem:[%s26929_s12 + $0x1b8c] ss:$80 sps:$4 sm:$0xff]  }
 0xb78   : > { %17056 = vmatprep.subr.bf16.mxu0 %v24260_v59  ;;  %17228 = vmatprep.subr.bf16.mxu1 %v24263_v12  ;;  %v24348_v59 = vld [vmem:[%s26929_s12 + $0x1b80] ss:$80 sps:$4 sm:$0xff]   ;;  %v24351_v12 = vld [vmem:[%s26929_s12 + $0x1b88] ss:$80 sps:$4 sm:$0xff]  }
 0xb7b   : > { %17057 = vmatpush1.bf16.msra.mxu0 %v24258_v44  ;;  %17229 = vmatpush1.bf16.msra.mxu1 %v24261_v13  ;;  %v24356_v44 = vld [vmem:[%s26929_s12 + $0x1c24] ss:$80 sps:$4 sm:$0xff]   ;;  %v24359_v13 = vld [vmem:[%s26929_s12 + $0x1c2c] ss:$80 sps:$4 sm:$0xff]  }
 0xb7c   : > { %17058 = vmatprep.subr.bf16.mxu0 %v24266_v63  ;;  %17230 = vmatprep.subr.bf16.mxu1 %v24269_v62  ;;  %v24354_v63 = vld [vmem:[%s26929_s12 + $0x1c20] ss:$80 sps:$4 sm:$0xff]   ;;  %v24357_v62 = vld [vmem:[%s26929_s12 + $0x1c28] ss:$80 sps:$4 sm:$0xff]  }
 0xb7f   : > { %17059 = vmatpush1.bf16.msra.mxu0 %v24264_v56  ;;  %17231 = vmatpush1.bf16.msra.mxu1 %v24267_v57  ;;  %v24362_v56 = vld [vmem:[%s26929_s12 + $0x1cc4] ss:$80 sps:$4 sm:$0xff]   ;;  %v24365_v57 = vld [vmem:[%s26929_s12 + $0x1ccc] ss:$80 sps:$4 sm:$0xff]  }
 0xb80   : > { %17060 = vmatprep.subr.bf16.mxu0 %v24272_v0  ;;  %17232 = vmatprep.subr.bf16.mxu1 %v24275_v60  ;;  %v24360_v0 = vld [vmem:[%s26929_s12 + $0x1cc0] ss:$80 sps:$4 sm:$0xff]   ;;  %v24363_v60 = vld [vmem:[%s26929_s12 + $0x1cc8] ss:$80 sps:$4 sm:$0xff]  }
 0xb83   : > { %17061 = vmatpush1.bf16.msra.mxu0 %v24270_v32  ;;  %17233 = vmatpush1.bf16.msra.mxu1 %v24273_v19  ;;  %v24368_v32 = vld [vmem:[%s26929_s12 + $0x1d64] ss:$80 sps:$4 sm:$0xff]   ;;  %v24371_v19 = vld [vmem:[%s26929_s12 + $0x1d6c] ss:$80 sps:$4 sm:$0xff]  }
 0xb84   : > { %17073 = vmatprep.subr.bf16.mxu0 %v24278_v5  ;;  %17245 = vmatprep.subr.bf16.mxu1 %v24281_v16  ;;  %v24366_v5 = vld [vmem:[%s26929_s12 + $0x1d60] ss:$80 sps:$4 sm:$0xff]   ;;  %v24369_v16 = vld [vmem:[%s26929_s12 + $0x1d68] ss:$80 sps:$4 sm:$0xff]  }
 0xb86   : > { %17063 = vmatmul.mubr.bf16.vlgmr.msra.gmra.mrb[0].mxu0 %v10156_v3  ;;  %17235 = vmatmul.mubr.bf16.vlgmr.msra.gmra.mrb[0].mxu1 %v10156_v3  ;;  %v24372_v3 = vld [vmem:[%s26929_s12 + $0x1e00] ss:$80 sps:$4 sm:$0xff]  }
 0xb87   : > { %17074 = vmatpush1.bf16.msra.mxu0 %v24276_v17  ;;  %17246 = vmatpush1.bf16.msra.mxu1 %v24279_v18  ;;  %v24374_v17 = vld [vmem:[%s26929_s12 + $0x1e04] ss:$80 sps:$4 sm:$0xff]   ;;  %v24377_v18 = vld [vmem:[%s26929_s12 + $0x1e0c] ss:$80 sps:$4 sm:$0xff]  }
 0xb88   : > { %17075 = vmatprep.subr.bf16.mxu0 %v24284_v29  ;;  %17247 = vmatprep.subr.bf16.mxu1 %v24287_v20  ;;  %v24375_v29 = vld [vmem:[%s26929_s12 + $0x1e08] ss:$80 sps:$4 sm:$0xff]  }
 0xb89   : > { %17105 = vmatprep.mubr.bf16.mxu0 %v10159_v21  ;;  %17277 = vmatprep.mubr.bf16.mxu1 %v10159_v21  ;;  %v10158_v20 = vld [vmem:[#allocation3 + $0x20] sm:$0xff] }
 0xb8a   : > { %v24380_v21 = vld [vmem:[%s26929_s12 + $0x1ea4] ss:$80 sps:$4 sm:$0xff]  }
 0xb8b   : > { %17076 = vmatpush1.bf16.msra.mxu0 %v24282_v37  ;;  %17248 = vmatpush1.bf16.msra.mxu1 %v24285_v22  ;;  %v24383_v37 = vld [vmem:[%s26929_s12 + $0x1eac] ss:$80 sps:$4 sm:$0xff]   ;;  %v24378_v22 = vld [vmem:[%s26929_s12 + $0x1ea0] ss:$80 sps:$4 sm:$0xff]  }
 0xb8c   : > { %17077 = vmatprep.subr.bf16.mxu0 %v24290_v34  ;;  %17249 = vmatprep.subr.bf16.mxu1 %v24293_v23  ;;  %v24381_v34 = vld [vmem:[%s26929_s12 + $0x1ea8] ss:$80 sps:$4 sm:$0xff]   ;;  %v24386_v23 = vld [vmem:[%s26929_s12 + $0x1f44] ss:$80 sps:$4 sm:$0xff]  }
 0xb8f   : > { %17078 = vmatpush1.bf16.msra.mxu0 %v24288_v24  ;;  %17250 = vmatpush1.bf16.msra.mxu1 %v24291_v33  ;;  %v24389_v24 = vld [vmem:[%s26929_s12 + $0x1f4c] ss:$80 sps:$4 sm:$0xff]   ;;  %v26398_v33 = vmov 0  }
 0xb90   : > { %17079 = vmatprep.subr.bf16.mxu0 %v24296_v40  ;;  %17251 = vmatprep.subr.bf16.mxu1 %v24299_v11  ;;  %v24384_v40 = vld [vmem:[%s26929_s12 + $0x1f40] ss:$80 sps:$4 sm:$0xff]   ;;  %v24387_v11 = vld [vmem:[%s26929_s12 + $0x1f48] ss:$80 sps:$4 sm:$0xff]  }
 0xb93   : > { %17080 = vmatpush1.bf16.msra.mxu0 %v24294_v7  ;;  %17252 = vmatpush1.bf16.msra.mxu1 %v24297_v10  ;;  %v24392_v7 = vld [vmem:[%s26929_s12 + $0x1fe4] ss:$80 sps:$4 sm:$0xff]   ;;  %v24395_v10 = vld [vmem:[%s26929_s12 + $0x1fec] ss:$80 sps:$4 sm:$0xff]  }
 0xb94   : > { %17081 = vmatprep.subr.bf16.mxu0 %v24302_v30  ;;  %17253 = vmatprep.subr.bf16.mxu1 %v24305_v35  ;;  %v24390_v30 = vld [vmem:[%s26929_s12 + $0x1fe0] ss:$80 sps:$4 sm:$0xff]   ;;  %v24393_v35 = vld [vmem:[%s26929_s12 + $0x1fe8] ss:$80 sps:$4 sm:$0xff]  }
 0xb97   : > { %17082 = vmatpush1.bf16.msra.mxu0 %v24300_v55  ;;  %17254 = vmatpush1.bf16.msra.mxu1 %v24303_v36  ;;  %v24398_v55 = vld [vmem:[%s26929_s12 + $0x2084] ss:$80 sps:$4 sm:$0xff]   ;;  %v24401_v36 = vld [vmem:[%s26929_s12 + $0x208c] ss:$80 sps:$4 sm:$0xff]  }
 0xb98   : > { %17083 = vmatprep.subr.bf16.mxu0 %v24308_v9  ;;  %17255 = vmatprep.subr.bf16.mxu1 %v24311_v47  ;;  %v24396_v9 = vld [vmem:[%s26929_s12 + $0x2080] ss:$80 sps:$4 sm:$0xff]   ;;  %v24399_v47 = vld [vmem:[%s26929_s12 + $0x2088] ss:$80 sps:$4 sm:$0xff]  }
 0xb9b   : > { %17084 = vmatpush1.bf16.msra.mxu0 %v24306_v14  ;;  %17256 = vmatpush1.bf16.msra.mxu1 %v24309_v49  ;;  %v24404_v14 = vld [vmem:[%s26929_s12 + $0x2124] ss:$80 sps:$4 sm:$0xff]   ;;  %v24407_v49 = vld [vmem:[%s26929_s12 + $0x212c] ss:$80 sps:$4 sm:$0xff]  }
 0xb9c   : > { %17085 = vmatprep.subr.bf16.mxu0 %v24314_v38  ;;  %17257 = vmatprep.subr.bf16.mxu1 %v24317_v39  ;;  %v24402_v38 = vld [vmem:[%s26929_s12 + $0x2120] ss:$80 sps:$4 sm:$0xff]   ;;  %v24405_v39 = vld [vmem:[%s26929_s12 + $0x2128] ss:$80 sps:$4 sm:$0xff]  }
 0xb9f   : > { %17086 = vmatpush1.bf16.msra.mxu0 %v24312_v15  ;;  %17258 = vmatpush1.bf16.msra.mxu1 %v24315_v41  ;;  %v24410_v15 = vld [vmem:[%s26929_s12 + $0x21c4] ss:$80 sps:$4 sm:$0xff]   ;;  %v24413_v41 = vld [vmem:[%s26929_s12 + $0x21cc] ss:$80 sps:$4 sm:$0xff]  }
 0xba0   : > { %17087 = vmatprep.subr.bf16.mxu0 %v24320_v42  ;;  %17259 = vmatprep.subr.bf16.mxu1 %v24323_v45  ;;  %v24408_v42 = vld [vmem:[%s26929_s12 + $0x21c0] ss:$80 sps:$4 sm:$0xff]   ;;  %v24411_v45 = vld [vmem:[%s26929_s12 + $0x21c8] ss:$80 sps:$4 sm:$0xff]  }
 0xba3   : > { %17088 = vmatpush1.bf16.msra.mxu0 %v24318_v46  ;;  %17260 = vmatpush1.bf16.msra.mxu1 %v24321_v48  ;;  %v24416_v46 = vld [vmem:[%s26929_s12 + $0x2264] ss:$80 sps:$4 sm:$0xff]   ;;  %v24419_v48 = vld [vmem:[%s26929_s12 + $0x226c] ss:$80 sps:$4 sm:$0xff]  }
 0xba4   : > { %17089 = vmatprep.subr.bf16.mxu0 %v24326_v50  ;;  %17261 = vmatprep.subr.bf16.mxu1 %v24329_v27  ;;  %v24414_v50 = vld [vmem:[%s26929_s12 + $0x2260] ss:$80 sps:$4 sm:$0xff]   ;;  %v24417_v27 = vld [vmem:[%s26929_s12 + $0x2268] ss:$80 sps:$4 sm:$0xff]  }
 0xba7   : > { %17090 = vmatpush1.bf16.msra.mxu0 %v24324_v51  ;;  %17262 = vmatpush1.bf16.msra.mxu1 %v24327_v52  ;;  %v24422_v51 = vld [vmem:[%s26929_s12 + $0x14] ss:$80 sps:$4 sm:$0xff]   ;;  %v24425_v52 = vld [vmem:[%s26929_s12 + $0x1c] ss:$80 sps:$4 sm:$0xff]  }
 0xba8   : > { %17091 = vmatprep.subr.bf16.mxu0 %v24332_v53  ;;  %17263 = vmatprep.subr.bf16.mxu1 %v24335_v54  ;;  %v10160_v53 = vld [vmem:[#allocation3 + $0x30] sm:$0xff] }
 0xba9   : > { %v24420_v54 = vld [vmem:[%s26929_s12 + $0x10] ss:$80 sps:$4 sm:$0xff]  }
 0xbab   : > { %17092 = vmatpush1.bf16.msra.mxu0 %v24330_v58  ;;  %17264 = vmatpush1.bf16.msra.mxu1 %v24333_v61  ;;  %v24423_v58 = vld [vmem:[%s26929_s12 + $0x18] ss:$80 sps:$4 sm:$0xff]   ;;  %v24428_v61 = vld [vmem:[%s26929_s12 + $0xb4] ss:$80 sps:$4 sm:$0xff]  }
 0xbac   : > { %17093 = vmatprep.subr.bf16.mxu0 %v24338_v43  ;;  %17265 = vmatprep.subr.bf16.mxu1 %v24341_v1  ;;  %v24431_v43 = vld [vmem:[%s26929_s12 + $0xbc] ss:$80 sps:$4 sm:$0xff]   ;;  %v24426_v1 = vld [vmem:[%s26929_s12 + $0xb0] ss:$80 sps:$4 sm:$0xff]  }
 0xbaf   : > { %17094 = vmatpush1.bf16.msra.mxu0 %v24336_v2  ;;  %17266 = vmatpush1.bf16.msra.mxu1 %v24339_v8  ;;  %v24429_v2 = vld [vmem:[%s26929_s12 + $0xb8] ss:$80 sps:$4 sm:$0xff]   ;;  %v24434_v8 = vld [vmem:[%s26929_s12 + $0x154] ss:$80 sps:$4 sm:$0xff]  }
 0xbb0   : > { %17095 = vmatprep.subr.bf16.mxu0 %v24344_v31  ;;  %17267 = vmatprep.subr.bf16.mxu1 %v24347_v25  ;;  %v24437_v31 = vld [vmem:[%s26929_s12 + $0x15c] ss:$80 sps:$4 sm:$0xff]  }
 0xbb1   : > { %v25924_v25 = vld [vmem:[#allocation3 + $0x8] sm:$0xff] }
 0xbb3   : > { %17096 = vmatpush1.bf16.msra.mxu0 %v24342_v28  ;;  %17268 = vmatpush1.bf16.msra.mxu1 %v24345_v26  ;;  %v24432_v28 = vld [vmem:[%s26929_s12 + $0x150] ss:$80 sps:$4 sm:$0xff]   ;;  %v24435_v26 = vld [vmem:[%s26929_s12 + $0x158] ss:$80 sps:$4 sm:$0xff]  }
 0xbb4   : > { %17097 = vmatprep.subr.bf16.mxu0 %v24350_v4  ;;  %17269 = vmatprep.subr.bf16.mxu1 %v24353_v6  ;;  %v24440_v4 = vld [vmem:[%s26929_s12 + $0x1f4] ss:$80 sps:$4 sm:$0xff]   ;;  %v24443_v6 = vld [vmem:[%s26929_s12 + $0x1fc] ss:$80 sps:$4 sm:$0xff]  }
 0xbb7   : > { %17098 = vmatpush1.bf16.msra.mxu0 %v24348_v59  ;;  %17270 = vmatpush1.bf16.msra.mxu1 %v24351_v12  ;;  %v24438_v59 = vld [vmem:[%s26929_s12 + $0x1f0] ss:$80 sps:$4 sm:$0xff]   ;;  %v24441_v12 = vld [vmem:[%s26929_s12 + $0x1f8] ss:$80 sps:$4 sm:$0xff]  }
 0xbb8   : > { %17099 = vmatprep.subr.bf16.mxu0 %v24356_v44  ;;  %17271 = vmatprep.subr.bf16.mxu1 %v24359_v13  ;;  %v24446_v44 = vld [vmem:[%s26929_s12 + $0x294] ss:$80 sps:$4 sm:$0xff]   ;;  %v24449_v13 = vld [vmem:[%s26929_s12 + $0x29c] ss:$80 sps:$4 sm:$0xff]  }
 0xbbb   : > { %17100 = vmatpush1.bf16.msra.mxu0 %v24354_v63  ;;  %17272 = vmatpush1.bf16.msra.mxu1 %v24357_v62  ;;  %v24444_v63 = vld [vmem:[%s26929_s12 + $0x290] ss:$80 sps:$4 sm:$0xff]   ;;  %v24447_v62 = vld [vmem:[%s26929_s12 + $0x298] ss:$80 sps:$4 sm:$0xff]  }
 0xbbc   : > { %17101 = vmatprep.subr.bf16.mxu0 %v24362_v56  ;;  %17273 = vmatprep.subr.bf16.mxu1 %v24365_v57  ;;  %v24452_v56 = vld [vmem:[%s26929_s12 + $0x334] ss:$80 sps:$4 sm:$0xff]   ;;  %v24455_v57 = vld [vmem:[%s26929_s12 + $0x33c] ss:$80 sps:$4 sm:$0xff]  }
 0xbbf   : > { %17102 = vmatpush1.bf16.msra.mxu0 %v24360_v0  ;;  %17274 = vmatpush1.bf16.msra.mxu1 %v24363_v60  ;;  %v24450_v0 = vld [vmem:[%s26929_s12 + $0x330] ss:$80 sps:$4 sm:$0xff]   ;;  %v24453_v60 = vld [vmem:[%s26929_s12 + $0x338] ss:$80 sps:$4 sm:$0xff]  }
 0xbc0   : > { %17103 = vmatprep.subr.bf16.mxu0 %v24368_v32  ;;  %17275 = vmatprep.subr.bf16.mxu1 %v24371_v19  ;;  %v24458_v32 = vld [vmem:[%s26929_s12 + $0x3d4] ss:$80 sps:$4 sm:$0xff]   ;;  %v24461_v19 = vld [vmem:[%s26929_s12 + $0x3dc] ss:$80 sps:$4 sm:$0xff]  }
 0xbc3   : > { %17104 = vmatpush1.bf16.msra.mxu0 %v24366_v5  ;;  %17276 = vmatpush1.bf16.msra.mxu1 %v24369_v16  ;;  %v24456_v5 = vld [vmem:[%s26929_s12 + $0x3d0] ss:$80 sps:$4 sm:$0xff]   ;;  %v24459_v16 = vld [vmem:[%s26929_s12 + $0x3d8] ss:$80 sps:$4 sm:$0xff]  }
 0xbc4   : > { %17116 = vmatprep.subr.bf16.mxu0 %v24374_v17  ;;  %17288 = vmatprep.subr.bf16.mxu1 %v24377_v18  ;;  %v24464_v17 = vld [vmem:[%s26929_s12 + $0x474] ss:$80 sps:$4 sm:$0xff]   ;;  %v24467_v18 = vld [vmem:[%s26929_s12 + $0x47c] ss:$80 sps:$4 sm:$0xff]  }
 0xbc6   : > { %17106 = vmatmul.mubr.bf16.vlgmr.msra.gmra.mrb[0].mxu0 %v10158_v20  ;;  %17278 = vmatmul.mubr.bf16.vlgmr.msra.gmra.mrb[0].mxu1 %v10158_v20  ;;  %v24470_v20 = vld [vmem:[%s26929_s12 + $0x514] ss:$80 sps:$4 sm:$0xff]  }
 0xbc7   : > { %17117 = vmatpush1.bf16.msra.mxu0 %v24372_v3  ;;  %17289 = vmatpush1.bf16.msra.mxu1 %v24375_v29  ;;  %v24462_v3 = vld [vmem:[%s26929_s12 + $0x470] ss:$80 sps:$4 sm:$0xff]   ;;  %v24465_v29 = vld [vmem:[%s26929_s12 + $0x478] ss:$80 sps:$4 sm:$0xff]  }
 0xbc8   : > { %17118 = vmatprep.subr.bf16.mxu0 %v24380_v21  ;;  %17290 = vmatprep.subr.bf16.mxu1 %v24383_v37  ;;  %v24473_v21 = vld [vmem:[%s26929_s12 + $0x51c] ss:$80 sps:$4 sm:$0xff]   ;;  %v24468_v37 = vld [vmem:[%s26929_s12 + $0x510] ss:$80 sps:$4 sm:$0xff]  }
 0xbc9   : > { %17148 = vmatprep.mubr.bf16.mxu0 %v26398_v33  ;;  %17320 = vmatprep.mubr.bf16.mxu1 %v26398_v33 }
 0xbcb   : > { %17119 = vmatpush1.bf16.msra.mxu0 %v24378_v22  ;;  %17291 = vmatpush1.bf16.msra.mxu1 %v24381_v34  ;;  %v24471_v22 = vld [vmem:[%s26929_s12 + $0x518] ss:$80 sps:$4 sm:$0xff]   ;;  %v24476_v34 = vld [vmem:[%s26929_s12 + $0x5b4] ss:$80 sps:$4 sm:$0xff]  }
 0xbcc   : > { %17120 = vmatprep.subr.bf16.mxu0 %v24386_v23  ;;  %17292 = vmatprep.subr.bf16.mxu1 %v24389_v24  ;;  %v24479_v23 = vld [vmem:[%s26929_s12 + $0x5bc] ss:$80 sps:$4 sm:$0xff]   ;;  %v24474_v24 = vld [vmem:[%s26929_s12 + $0x5b0] ss:$80 sps:$4 sm:$0xff]  }
 0xbcf   : > { %17121 = vmatpush1.bf16.msra.mxu0 %v24384_v40  ;;  %17293 = vmatpush1.bf16.msra.mxu1 %v24387_v11  ;;  %v24477_v40 = vld [vmem:[%s26929_s12 + $0x5b8] ss:$80 sps:$4 sm:$0xff]   ;;  %v24482_v11 = vld [vmem:[%s26929_s12 + $0x654] ss:$80 sps:$4 sm:$0xff]  }
 0xbd0   : > { %17122 = vmatprep.subr.bf16.mxu0 %v24392_v7  ;;  %17294 = vmatprep.subr.bf16.mxu1 %v24395_v10  ;;  %v24485_v7 = vld [vmem:[%s26929_s12 + $0x65c] ss:$80 sps:$4 sm:$0xff]   ;;  %v24480_v10 = vld [vmem:[%s26929_s12 + $0x650] ss:$80 sps:$4 sm:$0xff]  }
 0xbd3   : > { %17123 = vmatpush1.bf16.msra.mxu0 %v24390_v30  ;;  %17295 = vmatpush1.bf16.msra.mxu1 %v24393_v35  ;;  %v24483_v30 = vld [vmem:[%s26929_s12 + $0x658] ss:$80 sps:$4 sm:$0xff]   ;;  %v24488_v35 = vld [vmem:[%s26929_s12 + $0x6f4] ss:$80 sps:$4 sm:$0xff]  }
 0xbd4   : > { %17124 = vmatprep.subr.bf16.mxu0 %v24398_v55  ;;  %17296 = vmatprep.subr.bf16.mxu1 %v24401_v36  ;;  %v24491_v55 = vld [vmem:[%s26929_s12 + $0x6fc] ss:$80 sps:$4 sm:$0xff]   ;;  %v24486_v36 = vld [vmem:[%s26929_s12 + $0x6f0] ss:$80 sps:$4 sm:$0xff]  }
 0xbd7   : > { %17125 = vmatpush1.bf16.msra.mxu0 %v24396_v9  ;;  %17297 = vmatpush1.bf16.msra.mxu1 %v24399_v47  ;;  %v24489_v9 = vld [vmem:[%s26929_s12 + $0x6f8] ss:$80 sps:$4 sm:$0xff]   ;;  %v24494_v47 = vld [vmem:[%s26929_s12 + $0x794] ss:$80 sps:$4 sm:$0xff]  }
 0xbd8   : > { %17126 = vmatprep.subr.bf16.mxu0 %v24404_v14  ;;  %17298 = vmatprep.subr.bf16.mxu1 %v24407_v49  ;;  %v24497_v14 = vld [vmem:[%s26929_s12 + $0x79c] ss:$80 sps:$4 sm:$0xff]   ;;  %v24492_v49 = vld [vmem:[%s26929_s12 + $0x790] ss:$80 sps:$4 sm:$0xff]  }
 0xbdb   : > { %17127 = vmatpush1.bf16.msra.mxu0 %v24402_v38  ;;  %17299 = vmatpush1.bf16.msra.mxu1 %v24405_v39  ;;  %v24495_v38 = vld [vmem:[%s26929_s12 + $0x798] ss:$80 sps:$4 sm:$0xff]   ;;  %v24500_v39 = vld [vmem:[%s26929_s12 + $0x834] ss:$80 sps:$4 sm:$0xff]  }
 0xbdc   : > { %17128 = vmatprep.subr.bf16.mxu0 %v24410_v15  ;;  %17300 = vmatprep.subr.bf16.mxu1 %v24413_v41  ;;  %v24503_v15 = vld [vmem:[%s26929_s12 + $0x83c] ss:$80 sps:$4 sm:$0xff]   ;;  %v24498_v41 = vld [vmem:[%s26929_s12 + $0x830] ss:$80 sps:$4 sm:$0xff]  }
 0xbdf   : > { %17129 = vmatpush1.bf16.msra.mxu0 %v24408_v42  ;;  %17301 = vmatpush1.bf16.msra.mxu1 %v24411_v45  ;;  %v24501_v42 = vld [vmem:[%s26929_s12 + $0x838] ss:$80 sps:$4 sm:$0xff]   ;;  %v24506_v45 = vld [vmem:[%s26929_s12 + $0x8d4] ss:$80 sps:$4 sm:$0xff]  }
 0xbe0   : > { %17130 = vmatprep.subr.bf16.mxu0 %v24416_v46  ;;  %17302 = vmatprep.subr.bf16.mxu1 %v24419_v48  ;;  %v24509_v46 = vld [vmem:[%s26929_s12 + $0x8dc] ss:$80 sps:$4 sm:$0xff]   ;;  %v24504_v48 = vld [vmem:[%s26929_s12 + $0x8d0] ss:$80 sps:$4 sm:$0xff]  }
 0xbe3   : > { %17131 = vmatpush1.bf16.msra.mxu0 %v24414_v50  ;;  %17303 = vmatpush1.bf16.msra.mxu1 %v24417_v27  ;;  %v24507_v50 = vld [vmem:[%s26929_s12 + $0x8d8] ss:$80 sps:$4 sm:$0xff]   ;;  %v24512_v27 = vld [vmem:[%s26929_s12 + $0x974] ss:$80 sps:$4 sm:$0xff]  }
 0xbe4   : > { %17331 = vmatprep.subr.bf16.mxu0 %v24422_v51  ;;  %17503 = vmatprep.subr.bf16.mxu1 %v24425_v52  ;;  %v24515_v51 = vld [vmem:[%s26929_s12 + $0x97c] ss:$80 sps:$4 sm:$0xff]   ;;  %v24510_v52 = vld [vmem:[%s26929_s12 + $0x970] ss:$80 sps:$4 sm:$0xff]  }
 0xbe6   : > { %17149 = vmatmul.mubr.bf16.vlgmr.msra.gmra.mrb[0].mxu0 %v10160_v53  ;;  %17321 = vmatmul.mubr.bf16.vlgmr.msra.gmra.mrb[0].mxu1 %v10160_v53  ;;  %v24513_v53 = vld [vmem:[%s26929_s12 + $0x978] ss:$80 sps:$4 sm:$0xff]  }
 0xbe7   : > { %17332 = vmatpush1.bf16.msra.mxu0 %v24420_v54  ;;  %17504 = vmatpush1.bf16.msra.mxu1 %v24423_v58  ;;  %v24518_v54 = vld [vmem:[%s26929_s12 + $0xa14] ss:$80 sps:$4 sm:$0xff]   ;;  %v24521_v58 = vld [vmem:[%s26929_s12 + $0xa1c] ss:$80 sps:$4 sm:$0xff]  }
 0xbe8   : > { %17333 = vmatprep.subr.bf16.mxu0 %v24428_v61  ;;  %17505 = vmatprep.subr.bf16.mxu1 %v24431_v43  ;;  %v24516_v61 = vld [vmem:[%s26929_s12 + $0xa10] ss:$80 sps:$4 sm:$0xff]   ;;  %v24519_v43 = vld [vmem:[%s26929_s12 + $0xa18] ss:$80 sps:$4 sm:$0xff]  }
 0xbe9   : > { %17363 = vmatprep.mubr.bf16.mxu0 %v25924_v25  ;;  %17535 = vmatprep.mubr.bf16.mxu1 %v25924_v25  ;;  %v24525_v25 = vld [vmem:[%s26929_s12 + $0xab8] ss:$80 sps:$4 sm:$0xff]  }
 0xbeb   : > { %17334 = vmatpush1.bf16.msra.mxu0 %v24426_v1  ;;  %17506 = vmatpush1.bf16.msra.mxu1 %v24429_v2  ;;  %v24524_v1 = vld [vmem:[%s26929_s12 + $0xab4] ss:$80 sps:$4 sm:$0xff]   ;;  %v24527_v2 = vld [vmem:[%s26929_s12 + $0xabc] ss:$80 sps:$4 sm:$0xff]  }
 0xbec   : > { %17335 = vmatprep.subr.bf16.mxu0 %v24434_v8  ;;  %17507 = vmatprep.subr.bf16.mxu1 %v24437_v31  ;;  %v25925_v8 = vld [vmem:[#allocation3] sm:$0xff] }
 0xbed   : > { %v24522_v31 = vld [vmem:[%s26929_s12 + $0xab0] ss:$80 sps:$4 sm:$0xff]  }
 0xbef   : > { %17336 = vmatpush1.bf16.msra.mxu0 %v24432_v28  ;;  %17508 = vmatpush1.bf16.msra.mxu1 %v24435_v26  ;;  %v24530_v28 = vld [vmem:[%s26929_s12 + $0xb54] ss:$80 sps:$4 sm:$0xff]   ;;  %v24533_v26 = vld [vmem:[%s26929_s12 + $0xb5c] ss:$80 sps:$4 sm:$0xff]  }
 0xbf0   : > { %17337 = vmatprep.subr.bf16.mxu0 %v24440_v4  ;;  %17509 = vmatprep.subr.bf16.mxu1 %v24443_v6  ;;  %v25926_v4 = vld [vmem:[#allocation3 + $0x18] sm:$0xff] }
 0xbf1   : > { %v24528_v6 = vld [vmem:[%s26929_s12 + $0xb50] ss:$80 sps:$4 sm:$0xff]  }
 0xbf3   : > { %17338 = vmatpush1.bf16.msra.mxu0 %v24438_v59  ;;  %17510 = vmatpush1.bf16.msra.mxu1 %v24441_v12  ;;  %v24531_v59 = vld [vmem:[%s26929_s12 + $0xb58] ss:$80 sps:$4 sm:$0xff]   ;;  %v24536_v12 = vld [vmem:[%s26929_s12 + $0xbf4] ss:$80 sps:$4 sm:$0xff]  }
 0xbf4   : > { %17339 = vmatprep.subr.bf16.mxu0 %v24446_v44  ;;  %17511 = vmatprep.subr.bf16.mxu1 %v24449_v13  ;;  %v24539_v44 = vld [vmem:[%s26929_s12 + $0xbfc] ss:$80 sps:$4 sm:$0xff]   ;;  %v24534_v13 = vld [vmem:[%s26929_s12 + $0xbf0] ss:$80 sps:$4 sm:$0xff]  }
 0xbf7   : > { %17340 = vmatpush1.bf16.msra.mxu0 %v24444_v63  ;;  %17512 = vmatpush1.bf16.msra.mxu1 %v24447_v62  ;;  %v24537_v63 = vld [vmem:[%s26929_s12 + $0xbf8] ss:$80 sps:$4 sm:$0xff]   ;;  %v24542_v62 = vld [vmem:[%s26929_s12 + $0xc94] ss:$80 sps:$4 sm:$0xff]  }
 0xbf8   : > { %17341 = vmatprep.subr.bf16.mxu0 %v24452_v56  ;;  %17513 = vmatprep.subr.bf16.mxu1 %v24455_v57  ;;  %v24545_v56 = vld [vmem:[%s26929_s12 + $0xc9c] ss:$80 sps:$4 sm:$0xff]   ;;  %v24540_v57 = vld [vmem:[%s26929_s12 + $0xc90] ss:$80 sps:$4 sm:$0xff]  }
 0xbfb   : > { %17342 = vmatpush1.bf16.msra.mxu0 %v24450_v0  ;;  %17514 = vmatpush1.bf16.msra.mxu1 %v24453_v60  ;;  %v24543_v0 = vld [vmem:[%s26929_s12 + $0xc98] ss:$80 sps:$4 sm:$0xff]   ;;  %v24548_v60 = vld [vmem:[%s26929_s12 + $0xd34] ss:$80 sps:$4 sm:$0xff]  }
 0xbfc   : > { %17343 = vmatprep.subr.bf16.mxu0 %v24458_v32  ;;  %17515 = vmatprep.subr.bf16.mxu1 %v24461_v19  ;;  %v24551_v32 = vld [vmem:[%s26929_s12 + $0xd3c] ss:$80 sps:$4 sm:$0xff]   ;;  %v24546_v19 = vld [vmem:[%s26929_s12 + $0xd30] ss:$80 sps:$4 sm:$0xff]  }
 0xbff   : > { %17344 = vmatpush1.bf16.msra.mxu0 %v24456_v5  ;;  %17516 = vmatpush1.bf16.msra.mxu1 %v24459_v16  ;;  %v24549_v5 = vld [vmem:[%s26929_s12 + $0xd38] ss:$80 sps:$4 sm:$0xff]   ;;  %v24554_v16 = vld [vmem:[%s26929_s12 + $0xdd4] ss:$80 sps:$4 sm:$0xff]  }
 0xc00   : > { %17345 = vmatprep.subr.bf16.mxu0 %v24464_v17  ;;  %17517 = vmatprep.subr.bf16.mxu1 %v24467_v18  ;;  %v24557_v17 = vld [vmem:[%s26929_s12 + $0xddc] ss:$80 sps:$4 sm:$0xff]   ;;  %v24552_v18 = vld [vmem:[%s26929_s12 + $0xdd0] ss:$80 sps:$4 sm:$0xff]  }
 0xc03   : > { %17346 = vmatpush1.bf16.msra.mxu0 %v24462_v3  ;;  %17518 = vmatpush1.bf16.msra.mxu1 %v24465_v29  ;;  %v24555_v3 = vld [vmem:[%s26929_s12 + $0xdd8] ss:$80 sps:$4 sm:$0xff]   ;;  %v24560_v29 = vld [vmem:[%s26929_s12 + $0xe74] ss:$80 sps:$4 sm:$0xff]  }
 0xc04   : > { %17347 = vmatprep.subr.bf16.mxu0 %v24470_v20  ;;  %17519 = vmatprep.subr.bf16.mxu1 %v24473_v21  ;;  %v24563_v20 = vld [vmem:[%s26929_s12 + $0xe7c] ss:$80 sps:$4 sm:$0xff]   ;;  %v24558_v21 = vld [vmem:[%s26929_s12 + $0xe70] ss:$80 sps:$4 sm:$0xff]  }
 0xc07   : > { %17348 = vmatpush1.bf16.msra.mxu0 %v24468_v37  ;;  %17520 = vmatpush1.bf16.msra.mxu1 %v24471_v22  ;;  %v24561_v37 = vld [vmem:[%s26929_s12 + $0xe78] ss:$80 sps:$4 sm:$0xff]   ;;  %v24566_v22 = vld [vmem:[%s26929_s12 + $0xf14] ss:$80 sps:$4 sm:$0xff]  }
 0xc08   : > { %17349 = vmatprep.subr.bf16.mxu0 %v24476_v34  ;;  %17521 = vmatprep.subr.bf16.mxu1 %v24479_v23  ;;  %v24569_v34 = vld [vmem:[%s26929_s12 + $0xf1c] ss:$80 sps:$4 sm:$0xff]   ;;  %v24564_v23 = vld [vmem:[%s26929_s12 + $0xf10] ss:$80 sps:$4 sm:$0xff]  }
 0xc0b   : > { %17350 = vmatpush1.bf16.msra.mxu0 %v24474_v24  ;;  %17522 = vmatpush1.bf16.msra.mxu1 %v24477_v40  ;;  %v24567_v24 = vld [vmem:[%s26929_s12 + $0xf18] ss:$80 sps:$4 sm:$0xff]   ;;  %v24572_v40 = vld [vmem:[%s26929_s12 + $0xfb4] ss:$80 sps:$4 sm:$0xff]  }
 0xc0c   : > { %17351 = vmatprep.subr.bf16.mxu0 %v24482_v11  ;;  %17523 = vmatprep.subr.bf16.mxu1 %v24485_v7  ;;  %v24575_v11 = vld [vmem:[%s26929_s12 + $0xfbc] ss:$80 sps:$4 sm:$0xff]   ;;  %v24570_v7 = vld [vmem:[%s26929_s12 + $0xfb0] ss:$80 sps:$4 sm:$0xff]  }
 0xc0f   : > { %17352 = vmatpush1.bf16.msra.mxu0 %v24480_v10  ;;  %17524 = vmatpush1.bf16.msra.mxu1 %v24483_v30  ;;  %v24573_v10 = vld [vmem:[%s26929_s12 + $0xfb8] ss:$80 sps:$4 sm:$0xff]   ;;  %v24578_v30 = vld [vmem:[%s26929_s12 + $0x1054] ss:$80 sps:$4 sm:$0xff]  }
 0xc10   : > { %17353 = vmatprep.subr.bf16.mxu0 %v24488_v35  ;;  %17525 = vmatprep.subr.bf16.mxu1 %v24491_v55  ;;  %v24581_v35 = vld [vmem:[%s26929_s12 + $0x105c] ss:$80 sps:$4 sm:$0xff]   ;;  %v24576_v55 = vld [vmem:[%s26929_s12 + $0x1050] ss:$80 sps:$4 sm:$0xff]  }
 0xc13   : > { %17354 = vmatpush1.bf16.msra.mxu0 %v24486_v36  ;;  %17526 = vmatpush1.bf16.msra.mxu1 %v24489_v9  ;;  %v24579_v36 = vld [vmem:[%s26929_s12 + $0x1058] ss:$80 sps:$4 sm:$0xff]   ;;  %v24584_v9 = vld [vmem:[%s26929_s12 + $0x10f4] ss:$80 sps:$4 sm:$0xff]  }
 0xc14   : > { %17355 = vmatprep.subr.bf16.mxu0 %v24494_v47  ;;  %17527 = vmatprep.subr.bf16.mxu1 %v24497_v14  ;;  %v24587_v47 = vld [vmem:[%s26929_s12 + $0x10fc] ss:$80 sps:$4 sm:$0xff]   ;;  %v24582_v14 = vld [vmem:[%s26929_s12 + $0x10f0] ss:$80 sps:$4 sm:$0xff]  }
 0xc17   : > { %17356 = vmatpush1.bf16.msra.mxu0 %v24492_v49  ;;  %17528 = vmatpush1.bf16.msra.mxu1 %v24495_v38  ;;  %v24585_v49 = vld [vmem:[%s26929_s12 + $0x10f8] ss:$80 sps:$4 sm:$0xff]   ;;  %v24590_v38 = vld [vmem:[%s26929_s12 + $0x1194] ss:$80 sps:$4 sm:$0xff]  }
 0xc18   : > { %17357 = vmatprep.subr.bf16.mxu0 %v24500_v39  ;;  %17529 = vmatprep.subr.bf16.mxu1 %v24503_v15  ;;  %v24593_v39 = vld [vmem:[%s26929_s12 + $0x119c] ss:$80 sps:$4 sm:$0xff]   ;;  %v24588_v15 = vld [vmem:[%s26929_s12 + $0x1190] ss:$80 sps:$4 sm:$0xff]  }
 0xc1b   : > { %17358 = vmatpush1.bf16.msra.mxu0 %v24498_v41  ;;  %17530 = vmatpush1.bf16.msra.mxu1 %v24501_v42  ;;  %v24591_v41 = vld [vmem:[%s26929_s12 + $0x1198] ss:$80 sps:$4 sm:$0xff]   ;;  %v24596_v42 = vld [vmem:[%s26929_s12 + $0x1234] ss:$80 sps:$4 sm:$0xff]  }
 0xc1c   : > { %17359 = vmatprep.subr.bf16.mxu0 %v24506_v45  ;;  %17531 = vmatprep.subr.bf16.mxu1 %v24509_v46  ;;  %v24599_v45 = vld [vmem:[%s26929_s12 + $0x123c] ss:$80 sps:$4 sm:$0xff]   ;;  %v24594_v46 = vld [vmem:[%s26929_s12 + $0x1230] ss:$80 sps:$4 sm:$0xff]  }
 0xc1f   : > { %17360 = vmatpush1.bf16.msra.mxu0 %v24504_v48  ;;  %17532 = vmatpush1.bf16.msra.mxu1 %v24507_v50  ;;  %v24597_v48 = vld [vmem:[%s26929_s12 + $0x1238] ss:$80 sps:$4 sm:$0xff]   ;;  %v24602_v50 = vld [vmem:[%s26929_s12 + $0x12d4] ss:$80 sps:$4 sm:$0xff]  }
 0xc20   : > { %17361 = vmatprep.subr.bf16.mxu0 %v24512_v27  ;;  %17533 = vmatprep.subr.bf16.mxu1 %v24515_v51  ;;  %v24605_v27 = vld [vmem:[%s26929_s12 + $0x12dc] ss:$80 sps:$4 sm:$0xff]   ;;  %v24600_v51 = vld [vmem:[%s26929_s12 + $0x12d0] ss:$80 sps:$4 sm:$0xff]  }
 0xc23   : > { %17362 = vmatpush1.bf16.msra.mxu0 %v24510_v52  ;;  %17534 = vmatpush1.bf16.msra.mxu1 %v24513_v53  ;;  %v24603_v52 = vld [vmem:[%s26929_s12 + $0x12d8] ss:$80 sps:$4 sm:$0xff]   ;;  %v24608_v53 = vld [vmem:[%s26929_s12 + $0x1374] ss:$80 sps:$4 sm:$0xff]  }
 0xc24   : > { %17374 = vmatprep.subr.bf16.mxu0 %v24518_v54  ;;  %17546 = vmatprep.subr.bf16.mxu1 %v24521_v58  ;;  %v24611_v54 = vld [vmem:[%s26929_s12 + $0x137c] ss:$80 sps:$4 sm:$0xff]   ;;  %v24606_v58 = vld [vmem:[%s26929_s12 + $0x1370] ss:$80 sps:$4 sm:$0xff]  }
 0xc26   : > { %17364 = vmatmul.mubr.bf16.vlgmr.msra.gmra.mrb[4].mxu0 %v25925_v8  ;;  %17536 = vmatmul.mubr.bf16.vlgmr.msra.gmra.mrb[4].mxu1 %v25925_v8  ;;  %v24615_v8 = vld [vmem:[%s26929_s12 + $0x1418] ss:$80 sps:$4 sm:$0xff]  }
 0xc27   : > { %17375 = vmatpush1.bf16.msra.mxu0 %v24516_v61  ;;  %17547 = vmatpush1.bf16.msra.mxu1 %v24519_v43  ;;  %v24609_v61 = vld [vmem:[%s26929_s12 + $0x1378] ss:$80 sps:$4 sm:$0xff]   ;;  %v24614_v43 = vld [vmem:[%s26929_s12 + $0x1414] ss:$80 sps:$4 sm:$0xff]  }
 0xc28   : > { %17376 = vmatprep.subr.bf16.mxu0 %v24524_v1  ;;  %17548 = vmatprep.subr.bf16.mxu1 %v24527_v2  ;;  %v24617_v1 = vld [vmem:[%s26929_s12 + $0x141c] ss:$80 sps:$4 sm:$0xff]   ;;  %v24612_v2 = vld [vmem:[%s26929_s12 + $0x1410] ss:$80 sps:$4 sm:$0xff]  }
 0xc29   : > { %17406 = vmatprep.mubr.bf16.mxu0 %v25926_v4  ;;  %17578 = vmatprep.mubr.bf16.mxu1 %v25926_v4  ;;  %v24621_v4 = vld [vmem:[%s26929_s12 + $0x14b8] ss:$80 sps:$4 sm:$0xff]  }
 0xc2b   : > { %17377 = vmatpush1.bf16.msra.mxu0 %v24522_v31  ;;  %17549 = vmatpush1.bf16.msra.mxu1 %v24525_v25  ;;  %v24620_v31 = vld [vmem:[%s26929_s12 + $0x14b4] ss:$80 sps:$4 sm:$0xff]   ;;  %v24623_v25 = vld [vmem:[%s26929_s12 + $0x14bc] ss:$80 sps:$4 sm:$0xff]  }
 0xc2c   : > { %17378 = vmatprep.subr.bf16.mxu0 %v24530_v28  ;;  %17550 = vmatprep.subr.bf16.mxu1 %v24533_v26  ;;  %v25927_v28 = vld [vmem:[#allocation3 + $0x10] sm:$0xff] }
 0xc2d   : > { %v24618_v26 = vld [vmem:[%s26929_s12 + $0x14b0] ss:$80 sps:$4 sm:$0xff]  }
 0xc2f   : > { %17379 = vmatpush1.bf16.msra.mxu0 %v24528_v6  ;;  %17551 = vmatpush1.bf16.msra.mxu1 %v24531_v59  ;;  %v24626_v6 = vld [vmem:[%s26929_s12 + $0x1554] ss:$80 sps:$4 sm:$0xff]   ;;  %v24629_v59 = vld [vmem:[%s26929_s12 + $0x155c] ss:$80 sps:$4 sm:$0xff]  }
 0xc30   : > { %17380 = vmatprep.subr.bf16.mxu0 %v24536_v12  ;;  %17552 = vmatprep.subr.bf16.mxu1 %v24539_v44  ;;  %v25928_v12 = vld [vmem:[#allocation3 + $0x28] sm:$0xff] }
 0xc31   : > { %v24624_v44 = vld [vmem:[%s26929_s12 + $0x1550] ss:$80 sps:$4 sm:$0xff]  }
 0xc33   : > { %17381 = vmatpush1.bf16.msra.mxu0 %v24534_v13  ;;  %17553 = vmatpush1.bf16.msra.mxu1 %v24537_v63  ;;  %v24627_v13 = vld [vmem:[%s26929_s12 + $0x1558] ss:$80 sps:$4 sm:$0xff]   ;;  %v24632_v63 = vld [vmem:[%s26929_s12 + $0x15f4] ss:$80 sps:$4 sm:$0xff]  }
 0xc34   : > { %17382 = vmatprep.subr.bf16.mxu0 %v24542_v62  ;;  %17554 = vmatprep.subr.bf16.mxu1 %v24545_v56  ;;  %v24635_v62 = vld [vmem:[%s26929_s12 + $0x15fc] ss:$80 sps:$4 sm:$0xff]   ;;  %v24630_v56 = vld [vmem:[%s26929_s12 + $0x15f0] ss:$80 sps:$4 sm:$0xff]  }
 0xc37   : > { %17383 = vmatpush1.bf16.msra.mxu0 %v24540_v57  ;;  %17555 = vmatpush1.bf16.msra.mxu1 %v24543_v0  ;;  %v24633_v57 = vld [vmem:[%s26929_s12 + $0x15f8] ss:$80 sps:$4 sm:$0xff]   ;;  %v24638_v0 = vld [vmem:[%s26929_s12 + $0x1694] ss:$80 sps:$4 sm:$0xff]  }
 0xc38   : > { %17384 = vmatprep.subr.bf16.mxu0 %v24548_v60  ;;  %17556 = vmatprep.subr.bf16.mxu1 %v24551_v32  ;;  %v24641_v60 = vld [vmem:[%s26929_s12 + $0x169c] ss:$80 sps:$4 sm:$0xff]   ;;  %v24636_v32 = vld [vmem:[%s26929_s12 + $0x1690] ss:$80 sps:$4 sm:$0xff]  }
 0xc3b   : > { %17385 = vmatpush1.bf16.msra.mxu0 %v24546_v19  ;;  %17557 = vmatpush1.bf16.msra.mxu1 %v24549_v5  ;;  %v24639_v19 = vld [vmem:[%s26929_s12 + $0x1698] ss:$80 sps:$4 sm:$0xff]   ;;  %v24644_v5 = vld [vmem:[%s26929_s12 + $0x1734] ss:$80 sps:$4 sm:$0xff]  }
 0xc3c   : > { %17386 = vmatprep.subr.bf16.mxu0 %v24554_v16  ;;  %17558 = vmatprep.subr.bf16.mxu1 %v24557_v17  ;;  %v24647_v16 = vld [vmem:[%s26929_s12 + $0x173c] ss:$80 sps:$4 sm:$0xff]   ;;  %v24642_v17 = vld [vmem:[%s26929_s12 + $0x1730] ss:$80 sps:$4 sm:$0xff]  }
 0xc3f   : > { %17387 = vmatpush1.bf16.msra.mxu0 %v24552_v18  ;;  %17559 = vmatpush1.bf16.msra.mxu1 %v24555_v3  ;;  %v24645_v18 = vld [vmem:[%s26929_s12 + $0x1738] ss:$80 sps:$4 sm:$0xff]   ;;  %v24650_v3 = vld [vmem:[%s26929_s12 + $0x17d4] ss:$80 sps:$4 sm:$0xff]  }
 0xc40   : > { %17388 = vmatprep.subr.bf16.mxu0 %v24560_v29  ;;  %17560 = vmatprep.subr.bf16.mxu1 %v24563_v20  ;;  %v24653_v29 = vld [vmem:[%s26929_s12 + $0x17dc] ss:$80 sps:$4 sm:$0xff]   ;;  %v24648_v20 = vld [vmem:[%s26929_s12 + $0x17d0] ss:$80 sps:$4 sm:$0xff]  }
 0xc43   : > { %17389 = vmatpush1.bf16.msra.mxu0 %v24558_v21  ;;  %17561 = vmatpush1.bf16.msra.mxu1 %v24561_v37  ;;  %v24651_v21 = vld [vmem:[%s26929_s12 + $0x17d8] ss:$80 sps:$4 sm:$0xff]   ;;  %v24656_v37 = vld [vmem:[%s26929_s12 + $0x1874] ss:$80 sps:$4 sm:$0xff]  }
 0xc44   : > { %17390 = vmatprep.subr.bf16.mxu0 %v24566_v22  ;;  %17562 = vmatprep.subr.bf16.mxu1 %v24569_v34  ;;  %v24659_v22 = vld [vmem:[%s26929_s12 + $0x187c] ss:$80 sps:$4 sm:$0xff]   ;;  %v24654_v34 = vld [vmem:[%s26929_s12 + $0x1870] ss:$80 sps:$4 sm:$0xff]  }
 0xc47   : > { %17391 = vmatpush1.bf16.msra.mxu0 %v24564_v23  ;;  %17563 = vmatpush1.bf16.msra.mxu1 %v24567_v24  ;;  %v24657_v23 = vld [vmem:[%s26929_s12 + $0x1878] ss:$80 sps:$4 sm:$0xff]   ;;  %v24662_v24 = vld [vmem:[%s26929_s12 + $0x1914] ss:$80 sps:$4 sm:$0xff]  }
 0xc48   : > { %17392 = vmatprep.subr.bf16.mxu0 %v24572_v40  ;;  %17564 = vmatprep.subr.bf16.mxu1 %v24575_v11  ;;  %v24665_v40 = vld [vmem:[%s26929_s12 + $0x191c] ss:$80 sps:$4 sm:$0xff]   ;;  %v24660_v11 = vld [vmem:[%s26929_s12 + $0x1910] ss:$80 sps:$4 sm:$0xff]  }
 0xc4b   : > { %17393 = vmatpush1.bf16.msra.mxu0 %v24570_v7  ;;  %17565 = vmatpush1.bf16.msra.mxu1 %v24573_v10  ;;  %v24663_v7 = vld [vmem:[%s26929_s12 + $0x1918] ss:$80 sps:$4 sm:$0xff]   ;;  %v24668_v10 = vld [vmem:[%s26929_s12 + $0x19b4] ss:$80 sps:$4 sm:$0xff]  }
 0xc4c   : > { %17394 = vmatprep.subr.bf16.mxu0 %v24578_v30  ;;  %17566 = vmatprep.subr.bf16.mxu1 %v24581_v35  ;;  %v24671_v30 = vld [vmem:[%s26929_s12 + $0x19bc] ss:$80 sps:$4 sm:$0xff]   ;;  %v24666_v35 = vld [vmem:[%s26929_s12 + $0x19b0] ss:$80 sps:$4 sm:$0xff]  }
 0xc4f   : > { %17395 = vmatpush1.bf16.msra.mxu0 %v24576_v55  ;;  %17567 = vmatpush1.bf16.msra.mxu1 %v24579_v36  ;;  %v24669_v55 = vld [vmem:[%s26929_s12 + $0x19b8] ss:$80 sps:$4 sm:$0xff]   ;;  %v24674_v36 = vld [vmem:[%s26929_s12 + $0x1a54] ss:$80 sps:$4 sm:$0xff]  }
 0xc50   : > { %17396 = vmatprep.subr.bf16.mxu0 %v24584_v9  ;;  %17568 = vmatprep.subr.bf16.mxu1 %v24587_v47  ;;  %v24677_v9 = vld [vmem:[%s26929_s12 + $0x1a5c] ss:$80 sps:$4 sm:$0xff]   ;;  %v24672_v47 = vld [vmem:[%s26929_s12 + $0x1a50] ss:$80 sps:$4 sm:$0xff]  }
 0xc53   : > { %17397 = vmatpush1.bf16.msra.mxu0 %v24582_v14  ;;  %17569 = vmatpush1.bf16.msra.mxu1 %v24585_v49  ;;  %v24675_v14 = vld [vmem:[%s26929_s12 + $0x1a58] ss:$80 sps:$4 sm:$0xff]   ;;  %v24680_v49 = vld [vmem:[%s26929_s12 + $0x1af4] ss:$80 sps:$4 sm:$0xff]  }
 0xc54   : > { %17398 = vmatprep.subr.bf16.mxu0 %v24590_v38  ;;  %17570 = vmatprep.subr.bf16.mxu1 %v24593_v39  ;;  %v24683_v38 = vld [vmem:[%s26929_s12 + $0x1afc] ss:$80 sps:$4 sm:$0xff]   ;;  %v24678_v39 = vld [vmem:[%s26929_s12 + $0x1af0] ss:$80 sps:$4 sm:$0xff]  }
 0xc57   : > { %17399 = vmatpush1.bf16.msra.mxu0 %v24588_v15  ;;  %17571 = vmatpush1.bf16.msra.mxu1 %v24591_v41  ;;  %v24681_v15 = vld [vmem:[%s26929_s12 + $0x1af8] ss:$80 sps:$4 sm:$0xff]   ;;  %v24686_v41 = vld [vmem:[%s26929_s12 + $0x1b94] ss:$80 sps:$4 sm:$0xff]  }
 0xc58   : > { %17400 = vmatprep.subr.bf16.mxu0 %v24596_v42  ;;  %17572 = vmatprep.subr.bf16.mxu1 %v24599_v45  ;;  %v24689_v42 = vld [vmem:[%s26929_s12 + $0x1b9c] ss:$80 sps:$4 sm:$0xff]   ;;  %v24684_v45 = vld [vmem:[%s26929_s12 + $0x1b90] ss:$80 sps:$4 sm:$0xff]  }
 0xc5b   : > { %17401 = vmatpush1.bf16.msra.mxu0 %v24594_v46  ;;  %17573 = vmatpush1.bf16.msra.mxu1 %v24597_v48  ;;  %v24687_v46 = vld [vmem:[%s26929_s12 + $0x1b98] ss:$80 sps:$4 sm:$0xff]   ;;  %v24692_v48 = vld [vmem:[%s26929_s12 + $0x1c34] ss:$80 sps:$4 sm:$0xff]  }
 0xc5c   : > { %17402 = vmatprep.subr.bf16.mxu0 %v24602_v50  ;;  %17574 = vmatprep.subr.bf16.mxu1 %v24605_v27  ;;  %v24695_v50 = vld [vmem:[%s26929_s12 + $0x1c3c] ss:$80 sps:$4 sm:$0xff]   ;;  %v24690_v27 = vld [vmem:[%s26929_s12 + $0x1c30] ss:$80 sps:$4 sm:$0xff]  }
 0xc5f   : > { %17403 = vmatpush1.bf16.msra.mxu0 %v24600_v51  ;;  %17575 = vmatpush1.bf16.msra.mxu1 %v24603_v52  ;;  %v24693_v51 = vld [vmem:[%s26929_s12 + $0x1c38] ss:$80 sps:$4 sm:$0xff]   ;;  %v24698_v52 = vld [vmem:[%s26929_s12 + $0x1cd4] ss:$80 sps:$4 sm:$0xff]  }
 0xc60   : > { %17404 = vmatprep.subr.bf16.mxu0 %v24608_v53  ;;  %17576 = vmatprep.subr.bf16.mxu1 %v24611_v54  ;;  %v24701_v53 = vld [vmem:[%s26929_s12 + $0x1cdc] ss:$80 sps:$4 sm:$0xff]   ;;  %v24696_v54 = vld [vmem:[%s26929_s12 + $0x1cd0] ss:$80 sps:$4 sm:$0xff]  }
 0xc63   : > { %17405 = vmatpush1.bf16.msra.mxu0 %v24606_v58  ;;  %17577 = vmatpush1.bf16.msra.mxu1 %v24609_v61  ;;  %v24699_v58 = vld [vmem:[%s26929_s12 + $0x1cd8] ss:$80 sps:$4 sm:$0xff]   ;;  %v24704_v61 = vld [vmem:[%s26929_s12 + $0x1d74] ss:$80 sps:$4 sm:$0xff]  }
 0xc64   : > { %17417 = vmatprep.subr.bf16.mxu0 %v24614_v43  ;;  %17589 = vmatprep.subr.bf16.mxu1 %v24617_v1  ;;  %v24707_v43 = vld [vmem:[%s26929_s12 + $0x1d7c] ss:$80 sps:$4 sm:$0xff]   ;;  %v24702_v1 = vld [vmem:[%s26929_s12 + $0x1d70] ss:$80 sps:$4 sm:$0xff]  }
 0xc66   : > { %17407 = vmatmul.mubr.bf16.vlgmr.msra.gmra.mrb[4].mxu0 %v25927_v28  ;;  %17579 = vmatmul.mubr.bf16.vlgmr.msra.gmra.mrb[4].mxu1 %v25927_v28  ;;  %v24711_v28 = vld [vmem:[%s26929_s12 + $0x1e18] ss:$80 sps:$4 sm:$0xff]  }
 0xc67   : > { %17418 = vmatpush1.bf16.msra.mxu0 %v24612_v2  ;;  %17590 = vmatpush1.bf16.msra.mxu1 %v24615_v8  ;;  %v24705_v2 = vld [vmem:[%s26929_s12 + $0x1d78] ss:$80 sps:$4 sm:$0xff]   ;;  %v24710_v8 = vld [vmem:[%s26929_s12 + $0x1e14] ss:$80 sps:$4 sm:$0xff]  }
 0xc68   : > { %17419 = vmatprep.subr.bf16.mxu0 %v24620_v31  ;;  %17591 = vmatprep.subr.bf16.mxu1 %v24623_v25  ;;  %v24713_v31 = vld [vmem:[%s26929_s12 + $0x1e1c] ss:$80 sps:$4 sm:$0xff]   ;;  %v24708_v25 = vld [vmem:[%s26929_s12 + $0x1e10] ss:$80 sps:$4 sm:$0xff]  }
 0xc69   : > { %17449 = vmatprep.mubr.bf16.mxu0 %v25928_v12  ;;  %17621 = vmatprep.mubr.bf16.mxu1 %v25928_v12  ;;  %v24717_v12 = vld [vmem:[%s26929_s12 + $0x1eb8] ss:$80 sps:$4 sm:$0xff]  }
 0xc6b   : > { %17420 = vmatpush1.bf16.msra.mxu0 %v24618_v26  ;;  %17592 = vmatpush1.bf16.msra.mxu1 %v24621_v4  ;;  %v24716_v26 = vld [vmem:[%s26929_s12 + $0x1eb4] ss:$80 sps:$4 sm:$0xff]   ;;  %v24719_v4 = vld [vmem:[%s26929_s12 + $0x1ebc] ss:$80 sps:$4 sm:$0xff]  }
 0xc6c   : > { %17421 = vmatprep.subr.bf16.mxu0 %v24626_v6  ;;  %17593 = vmatprep.subr.bf16.mxu1 %v24629_v59  ;;  %v25929_v6 = vld [vmem:[#allocation3 + $0x20] sm:$0xff] }
 0xc6d   : > { %v24714_v59 = vld [vmem:[%s26929_s12 + $0x1eb0] ss:$80 sps:$4 sm:$0xff]  }
 0xc6f   : > { %17422 = vmatpush1.bf16.msra.mxu0 %v24624_v44  ;;  %17594 = vmatpush1.bf16.msra.mxu1 %v24627_v13  ;;  %v24722_v44 = vld [vmem:[%s26929_s12 + $0x1f54] ss:$80 sps:$4 sm:$0xff]   ;;  %v24725_v13 = vld [vmem:[%s26929_s12 + $0x1f5c] ss:$80 sps:$4 sm:$0xff]  }
 0xc70   : > { %17423 = vmatprep.subr.bf16.mxu0 %v24632_v63  ;;  %17595 = vmatprep.subr.bf16.mxu1 %v24635_v62  ;;  %v11287_v63 = vlaneseq  ;;  %v24720_v62 = vld [vmem:[%s26929_s12 + $0x1f50] ss:$80 sps:$4 sm:$0xff]  }
 0xc73   : > { %17424 = vmatpush1.bf16.msra.mxu0 %v24630_v56  ;;  %17596 = vmatpush1.bf16.msra.mxu1 %v24633_v57  ;;  %v24723_v56 = vld [vmem:[%s26929_s12 + $0x1f58] ss:$80 sps:$4 sm:$0xff]   ;;  %v24728_v57 = vld [vmem:[%s26929_s12 + $0x1ff4] ss:$80 sps:$4 sm:$0xff]  }
 0xc74   : > { %17425 = vmatprep.subr.bf16.mxu0 %v24638_v0  ;;  %17597 = vmatprep.subr.bf16.mxu1 %v24641_v60  ;;  %v24731_v0 = vld [vmem:[%s26929_s12 + $0x1ffc] ss:$80 sps:$4 sm:$0xff]   ;;  %v28509_v60 = vshrl.u32 %v11287_v63, 7  ;;  %v25930_v63 = vld [vmem:[#allocation3 + $0x30] sm:$0xff] }
 0xc77   : > { %17426 = vmatpush1.bf16.msra.mxu0 %v24636_v32  ;;  %17598 = vmatpush1.bf16.msra.mxu1 %v24639_v19  ;;  %v24726_v32 = vld [vmem:[%s26929_s12 + $0x1ff0] ss:$80 sps:$4 sm:$0xff]   ;;  %v24729_v19 = vld [vmem:[%s26929_s12 + $0x1ff8] ss:$80 sps:$4 sm:$0xff]  }
 0xc78   : > { %17427 = vmatprep.subr.bf16.mxu0 %v24644_v5  ;;  %17599 = vmatprep.subr.bf16.mxu1 %v24647_v16  ;;  %v24734_v5 = vld [vmem:[%s26929_s12 + $0x2094] ss:$80 sps:$4 sm:$0xff]   ;;  %v24737_v16 = vld [vmem:[%s26929_s12 + $0x209c] ss:$80 sps:$4 sm:$0xff]  }
 0xc7b   : > { %17428 = vmatpush1.bf16.msra.mxu0 %v24642_v17  ;;  %17600 = vmatpush1.bf16.msra.mxu1 %v24645_v18  ;;  %v24732_v17 = vld [vmem:[%s26929_s12 + $0x2090] ss:$80 sps:$4 sm:$0xff]   ;;  %v28517_v18 = vsub.s32 0, %v28509_v60 }
 0xc7c   : > { %17429 = vmatprep.subr.bf16.mxu0 %v24650_v3  ;;  %17601 = vmatprep.subr.bf16.mxu1 %v24653_v29  ;;  %v28520_v3 = vsub.s32 2, %v28509_v60  ;;  %v24735_v29 = vld [vmem:[%s26929_s12 + $0x2098] ss:$80 sps:$4 sm:$0xff]  }
 0xc7f   : > { %17430 = vmatpush1.bf16.msra.mxu0 %v24648_v20  ;;  %17602 = vmatpush1.bf16.msra.mxu1 %v24651_v21  ;;  %v11281_v20 = vld [vmem:[%s26935_s14] sm:$0xff]  ;;  %v28525_v21 = vsub.s32 1, %v28509_v60 }
 0xc80   : > { %17431 = vmatprep.subr.bf16.mxu0 %v24656_v37  ;;  %17603 = vmatprep.subr.bf16.mxu1 %v24659_v22  ;;  %v28528_v37 = vsub.s32 3, %v28509_v60  ;;  %v24740_v22 = vld [vmem:[%s26929_s12 + $0x2134] ss:$80 sps:$4 sm:$0xff]  }
 0xc83   : > { %17432 = vmatpush1.bf16.msra.mxu0 %v24654_v34  ;;  %17604 = vmatpush1.bf16.msra.mxu1 %v24657_v23  ;;  %v24743_v34 = vld [vmem:[%s26929_s12 + $0x213c] ss:$80 sps:$4 sm:$0xff]   ;;  %v11290_v23 = vrot.slane %v11281_v20, %v28517_v18 }
 0xc84   : > { %17433 = vmatprep.subr.bf16.mxu0 %v24662_v24  ;;  %17605 = vmatprep.subr.bf16.mxu1 %v24665_v40  ;;  %v11298_v24 = vrot.slane %v11281_v20, %v28520_v3  ;;  %v11294_v40 = vrot.slane %v11281_v20, %v28525_v21 }
 0xc87   : > { %17434 = vmatpush1.bf16.msra.mxu0 %v24660_v11  ;;  %17606 = vmatpush1.bf16.msra.mxu1 %v24663_v7  ;;  %v11302_v11 = vrot.slane %v11281_v20, %v28528_v37  ;;  %v24738_v7 = vld [vmem:[%s26929_s12 + $0x2130] ss:$80 sps:$4 sm:$0xff]  }
 0xc88   : > { %17435 = vmatprep.subr.bf16.mxu0 %v24668_v10  ;;  %17607 = vmatprep.subr.bf16.mxu1 %v24671_v30  ;;  %v24741_v10 = vld [vmem:[%s26929_s12 + $0x2138] ss:$80 sps:$4 sm:$0xff]   ;;  %v24746_v30 = vld [vmem:[%s26929_s12 + $0x21d4] ss:$80 sps:$4 sm:$0xff]  }
 0xc8b   : > { %17436 = vmatpush1.bf16.msra.mxu0 %v24666_v35  ;;  %17608 = vmatpush1.bf16.msra.mxu1 %v24669_v55  ;;  %v24749_v35 = vld [vmem:[%s26929_s12 + $0x21dc] ss:$80 sps:$4 sm:$0xff]  }
 0xc8c   : > { %17437 = vmatprep.subr.bf16.mxu0 %v24674_v36  ;;  %17609 = vmatprep.subr.bf16.mxu1 %v24677_v9  ;;  %v24744_v9 = vld [vmem:[%s26929_s12 + $0x21d0] ss:$80 sps:$4 sm:$0xff]  }
 0xc8f   : > { %17438 = vmatpush1.bf16.msra.mxu0 %v24672_v47  ;;  %17610 = vmatpush1.bf16.msra.mxu1 %v24675_v14  ;;  %v24747_v47 = vld [vmem:[%s26929_s12 + $0x21d8] ss:$80 sps:$4 sm:$0xff]  }
 0xc90   : > { %17439 = vmatprep.subr.bf16.mxu0 %v24680_v49  ;;  %17611 = vmatprep.subr.bf16.mxu1 %v24683_v38 }
 0xc93   : > { %17440 = vmatpush1.bf16.msra.mxu0 %v24678_v39  ;;  %17612 = vmatpush1.bf16.msra.mxu1 %v24681_v15 }
 0xc94   : > { %17441 = vmatprep.subr.bf16.mxu0 %v24686_v41  ;;  %17613 = vmatprep.subr.bf16.mxu1 %v24689_v42 }
 0xc97   : > { %17442 = vmatpush1.bf16.msra.mxu0 %v24684_v45  ;;  %17614 = vmatpush1.bf16.msra.mxu1 %v24687_v46  ;;  %v24752_v46 = vld [vmem:[%s26929_s12 + $0x2274] ss:$80 sps:$4 sm:$0xff]  }
 0xc98   : > { %17443 = vmatprep.subr.bf16.mxu0 %v24692_v48  ;;  %17615 = vmatprep.subr.bf16.mxu1 %v24695_v50  ;;  %v24755_v48 = vld [vmem:[%s26929_s12 + $0x227c] ss:$80 sps:$4 sm:$0xff]  }
 0xc9b   : > { %17444 = vmatpush1.bf16.msra.mxu0 %v24690_v27  ;;  %17616 = vmatpush1.bf16.msra.mxu1 %v24693_v51 }
 0xc9c   : > { %17445 = vmatprep.subr.bf16.mxu0 %v24698_v52  ;;  %17617 = vmatprep.subr.bf16.mxu1 %v24701_v53 }
 0xc9f   : > { %17446 = vmatpush1.bf16.msra.mxu0 %v24696_v54  ;;  %17618 = vmatpush1.bf16.msra.mxu1 %v24699_v58 }
 0xca0   : > { %17447 = vmatprep.subr.bf16.mxu0 %v24704_v61  ;;  %17619 = vmatprep.subr.bf16.mxu1 %v24707_v43 }
 0xca3   : > { %17448 = vmatpush1.bf16.msra.mxu0 %v24702_v1  ;;  %17620 = vmatpush1.bf16.msra.mxu1 %v24705_v2 }
 0xca4   : > { %17460 = vmatprep.subr.bf16.mxu0 %v24710_v8  ;;  %17632 = vmatprep.subr.bf16.mxu1 %v24713_v31  ;;  %v24750_v31 = vld [vmem:[%s26929_s12 + $0x2270] ss:$80 sps:$4 sm:$0xff]  }
 0xca6   : > { %17450 = vmatmul.mubr.bf16.vlgmr.msra.gmra.mrb[4].mxu0 %v25929_v6  ;;  %17622 = vmatmul.mubr.bf16.vlgmr.msra.gmra.mrb[4].mxu1 %v25929_v6 }
 0xca7   : > { %17461 = vmatpush1.bf16.msra.mxu0 %v24708_v25  ;;  %17633 = vmatpush1.bf16.msra.mxu1 %v24711_v28  ;;  %v24753_v25 = vld [vmem:[%s26929_s12 + $0x2278] ss:$80 sps:$4 sm:$0xff]  }
 0xca8   : > { %17462 = vmatprep.subr.bf16.mxu0 %v24716_v26  ;;  %17634 = vmatprep.subr.bf16.mxu1 %v24719_v4  ;;  %v24758_v26 = vld [vmem:[%s26929_s12 + $0x24] ss:$80 sps:$4 sm:$0xff]   ;;  %v24761_v4 = vld [vmem:[%s26929_s12 + $0x2c] ss:$80 sps:$4 sm:$0xff]  }
 0xca9   : > { %17492 = vmatprep.mubr.bf16.mxu0 %v26398_v33  ;;  %17664 = vmatprep.mubr.bf16.mxu1 %v26398_v33 }
 0xcab   : > { %17463 = vmatpush1.bf16.msra.mxu0 %v24714_v59  ;;  %17635 = vmatpush1.bf16.msra.mxu1 %v24717_v12  ;;  %v24756_v59 = vld [vmem:[%s26929_s12 + $0x20] ss:$80 sps:$4 sm:$0xff]   ;;  %v24759_v12 = vld [vmem:[%s26929_s12 + $0x28] ss:$80 sps:$4 sm:$0xff]  }
 0xcac   : > { %17464 = vmatprep.subr.bf16.mxu0 %v24722_v44  ;;  %17636 = vmatprep.subr.bf16.mxu1 %v24725_v13  ;;  %v24764_v44 = vld [vmem:[%s26929_s12 + $0xc4] ss:$80 sps:$4 sm:$0xff]   ;;  %v24767_v13 = vld [vmem:[%s26929_s12 + $0xcc] ss:$80 sps:$4 sm:$0xff]  }
 0xcaf   : > { %17465 = vmatpush1.bf16.msra.mxu0 %v24720_v62  ;;  %17637 = vmatpush1.bf16.msra.mxu1 %v24723_v56  ;;  %v24762_v62 = vld [vmem:[%s26929_s12 + $0xc0] ss:$80 sps:$4 sm:$0xff]   ;;  %v24765_v56 = vld [vmem:[%s26929_s12 + $0xc8] ss:$80 sps:$4 sm:$0xff]  }
 0xcb0   : > { %17466 = vmatprep.subr.bf16.mxu0 %v24728_v57  ;;  %17638 = vmatprep.subr.bf16.mxu1 %v24731_v0  ;;  %v24770_v0 = vld [vmem:[%s26929_s12 + $0x164] ss:$80 sps:$4 sm:$0xff]  }
 0xcb3   : > { %17467 = vmatpush1.bf16.msra.mxu0 %v24726_v32  ;;  %17639 = vmatpush1.bf16.msra.mxu1 %v24729_v19  ;;  %v24773_v32 = vld [vmem:[%s26929_s12 + $0x16c] ss:$80 sps:$4 sm:$0xff]  }
 0xcb4   : > { %17468 = vmatprep.subr.bf16.mxu0 %v24734_v5  ;;  %17640 = vmatprep.subr.bf16.mxu1 %v24737_v16  ;;  %v25931_v16 = vld [vmem:[#allocation3 + $0x8] sm:$0xff] }
 0xcb7   : > { %17469 = vmatpush1.bf16.msra.mxu0 %v24732_v17  ;;  %17641 = vmatpush1.bf16.msra.mxu1 %v24735_v29 }
 0xcb8   : > { %17470 = vmatprep.subr.bf16.mxu0 %v24740_v22  ;;  %17642 = vmatprep.subr.bf16.mxu1 %v24743_v34  ;;  %v24768_v34 = vld [vmem:[%s26929_s12 + $0x160] ss:$80 sps:$4 sm:$0xff]  }
 0xcb9   : > { %v17150_v55 = vpop.f32.mrb[0].mxu0  ;;  %v17322_v36 = vpop.f32.mrb[0].mxu1 }
 0xcba   : > { %v22100_v14 = vadd.f32 %v17150_v55, %v11290_v23  ;;  %v22104_v49 = vadd.f32 %v17322_v36, %v11298_v24  ;;  %v17152_v38 = vpop.f32.mrb[1].mxu0  ;;  %v17324_v39 = vpop.f32.mrb[1].mxu1 }
 0xcbb   : > { %v22101_v15 = vadd.f32 %v17152_v38, %v11294_v40  ;;  %v22105_v41 = vadd.f32 %v17324_v39, %v11302_v11  ;;  %v17154_v42 = vpop.f32.mrb[2].mxu0  ;;  %v17326_v45 = vpop.f32.mrb[2].mxu1  ;;  %17471 = vmatpush1.bf16.msra.mxu0 %v24738_v7  ;;  %17643 = vmatpush1.bf16.msra.mxu1 %v24741_v10  ;;  %v24779_v7 = vld [vmem:[%s26929_s12 + $0x20c] ss:$80 sps:$4 sm:$0xff]   ;;  %v24782_v38 = vld [vmem:[%s26929_s12 + $0x2a4] ss:$80 sps:$4 sm:$0xff]  }
 0xcbc   : > { %v21693_v50 = vmul.f32 -1.442695, %v22100_v14  ;;  %v21695_v27 = vmul.f32 -1.442695, %v22104_v49  ;;  %v22102_v51 = vadd.f32 %v17154_v42, %v11290_v23  ;;  %v22106_v52 = vadd.f32 %v17326_v45, %v11298_v24  ;;  %v17156_v53 = vpop.f32.mrb[3].mxu0  ;;  %v17328_v54 = vpop.f32.mrb[3].mxu1  ;;  %17472 = vmatprep.subr.bf16.mxu0 %v24746_v30  ;;  %17644 = vmatprep.subr.bf16.mxu1 %v24749_v35 }
 0xcbd   : > { %v21694_v58 = vmul.f32 -1.442695, %v22101_v15  ;;  %v21696_v61 = vmul.f32 -1.442695, %v22105_v41  ;;  %v22103_v43 = vadd.f32 %v17156_v53, %v11294_v40  ;;  %v22107_v1 = vadd.f32 %v17328_v54, %v11302_v11  ;;  %v24771_v23 = vld [vmem:[%s26929_s12 + $0x168] ss:$80 sps:$4 sm:$0xff]  }
 0xcbe   : > { %25764 = vpow2.f32 %v21693_v50  ;;  %v21713_v2 = vmul.f32 -1.442695, %v22102_v51  ;;  %v21715_v8 = vmul.f32 -1.442695, %v22106_v52  ;;  %v24776_v11 = vld [vmem:[%s26929_s12 + $0x204] ss:$80 sps:$4 sm:$0xff]  }
 0xcbf   : > { %25766 = vpow2.f32 %v21695_v27  ;;  %17473 = vmatpush1.bf16.msra.mxu0 %v24744_v9  ;;  %17645 = vmatpush1.bf16.msra.mxu1 %v24747_v47  ;;  %v21714_v28 = vmul.f32 -1.442695, %v22103_v43  ;;  %v21716_v6 = vmul.f32 -1.442695, %v22107_v1  ;;  %v24774_v47 = vld [vmem:[%s26929_s12 + $0x200] ss:$80 sps:$4 sm:$0xff]  }
 0xcc0   : > { %25768 = vpow2.f32 %v21694_v58  ;;  %17474 = vmatprep.subr.bf16.mxu0 %v24752_v46  ;;  %17646 = vmatprep.subr.bf16.mxu1 %v24755_v48  ;;  %v24777_v14 = vld [vmem:[%s26929_s12 + $0x208] ss:$80 sps:$4 sm:$0xff]   ;;  %v24785_v39 = vld [vmem:[%s26929_s12 + $0x2ac] ss:$80 sps:$4 sm:$0xff]   ;;  %v24780_v15 = vld [vmem:[%s26929_s12 + $0x2a0] ss:$80 sps:$4 sm:$0xff]  }
 0xcc1   : > { %25770 = vpow2.f32 %v21696_v61  ;;  %v24783_v41 = vld [vmem:[%s26929_s12 + $0x2a8] ss:$80 sps:$4 sm:$0xff]   ;;  %v24788_v42 = vld [vmem:[%s26929_s12 + $0x344] ss:$80 sps:$4 sm:$0xff]   ;;  %v24791_v45 = vld [vmem:[%s26929_s12 + $0x34c] ss:$80 sps:$4 sm:$0xff]  }
 0xcc2   : > { %25772 = vpow2.f32 %v21713_v2  ;;  %v24786_v27 = vld [vmem:[%s26929_s12 + $0x340] ss:$80 sps:$4 sm:$0xff]   ;;  %v24789_v51 = vld [vmem:[%s26929_s12 + $0x348] ss:$80 sps:$4 sm:$0xff]   ;;  %v24794_v54 = vld [vmem:[%s26929_s12 + $0x3e4] ss:$80 sps:$4 sm:$0xff]  }
 0xcc3   : > { %25774 = vpow2.f32 %v21715_v8  ;;  %17475 = vmatpush1.bf16.msra.mxu0 %v24750_v31  ;;  %17647 = vmatpush1.bf16.msra.mxu1 %v24753_v25  ;;  %v24797_v58 = vld [vmem:[%s26929_s12 + $0x3ec] ss:$80 sps:$4 sm:$0xff]   ;;  %v24792_v8 = vld [vmem:[%s26929_s12 + $0x3e0] ss:$80 sps:$4 sm:$0xff]   ;;  %v24795_v31 = vld [vmem:[%s26929_s12 + $0x3e8] ss:$80 sps:$4 sm:$0xff]  }
 0xcc4   : > { %25776 = vpow2.f32 %v21714_v28  ;;  %17675 = vmatprep.subr.bf16.mxu0 %v24758_v26  ;;  %17847 = vmatprep.subr.bf16.mxu1 %v24761_v4  ;;  %v24800_v26 = vld [vmem:[%s26929_s12 + $0x484] ss:$80 sps:$4 sm:$0xff]   ;;  %v24803_v4 = vld [vmem:[%s26929_s12 + $0x48c] ss:$80 sps:$4 sm:$0xff]  }
 0xcc5   : > { %25778 = vpow2.f32 %v21716_v6 }
 0xcc6   : > { %17493 = vmatmul.mubr.bf16.vlgmr.msra.gmra.mrb[4].mxu0 %v25930_v63  ;;  %17665 = vmatmul.mubr.bf16.vlgmr.msra.gmra.mrb[4].mxu1 %v25930_v63  ;;  %v24804_v63 = vld [vmem:[%s26929_s12 + $0x520] ss:$80 sps:$4 sm:$0xff]  }
 0xcc7   : > { %17676 = vmatpush1.bf16.msra.mxu0 %v24756_v59  ;;  %17848 = vmatpush1.bf16.msra.mxu1 %v24759_v12  ;;  %v24798_v59 = vld [vmem:[%s26929_s12 + $0x480] ss:$80 sps:$4 sm:$0xff]   ;;  %v24801_v12 = vld [vmem:[%s26929_s12 + $0x488] ss:$80 sps:$4 sm:$0xff]  }
 0xcc8   : > { %v25765_v57 = vpop.eup %25764  ;;  %17677 = vmatprep.subr.bf16.mxu0 %v24764_v44  ;;  %17849 = vmatprep.subr.bf16.mxu1 %v24767_v13  ;;  %v24806_v44 = vld [vmem:[%s26929_s12 + $0x524] ss:$80 sps:$4 sm:$0xff]   ;;  %v24809_v13 = vld [vmem:[%s26929_s12 + $0x52c] ss:$80 sps:$4 sm:$0xff]  }
 0xcc9   : > { %v25767_v19 = vpop.eup %25766  ;;  %v18827_v5 = vadd.f32 1.0, %v25765_v57  ;;  %17707 = vmatprep.mubr.bf16.mxu0 %v25931_v16  ;;  %17879 = vmatprep.mubr.bf16.mxu1 %v25931_v16  ;;  %v24815_v57 = vld [vmem:[%s26929_s12 + $0x5cc] ss:$80 sps:$4 sm:$0xff]   ;;  %v24816_v16 = vld [vmem:[%s26929_s12 + $0x660] ss:$80 sps:$4 sm:$0xff]  }
 0xcca   : > { %v25769_v17 = vpop.eup %25768  ;;  %v18829_v29 = vadd.f32 1.0, %v25767_v19  ;;  %v24818_v19 = vld [vmem:[%s26929_s12 + $0x664] ss:$80 sps:$4 sm:$0xff]  }
 0xccb   : > { %v25771_v20 = vpop.eup %25770  ;;  %25780 = vrcp.f32 %v18827_v5  ;;  %v18828_v22 = vadd.f32 1.0, %v25769_v17  ;;  %17678 = vmatpush1.bf16.msra.mxu0 %v24762_v62  ;;  %17850 = vmatpush1.bf16.msra.mxu1 %v24765_v56  ;;  %v24807_v62 = vld [vmem:[%s26929_s12 + $0x528] ss:$80 sps:$4 sm:$0xff]   ;;  %v24812_v56 = vld [vmem:[%s26929_s12 + $0x5c4] ss:$80 sps:$4 sm:$0xff]  }
 0xccc   : > { %v25773_v24 = vpop.eup %25772  ;;  %25782 = vrcp.f32 %v18829_v29  ;;  %v18830_v40 = vadd.f32 1.0, %v25771_v20  ;;  %17679 = vmatprep.subr.bf16.mxu0 %v24770_v0  ;;  %17851 = vmatprep.subr.bf16.mxu1 %v24773_v32  ;;  %v24810_v0 = vld [vmem:[%s26929_s12 + $0x5c0] ss:$80 sps:$4 sm:$0xff]   ;;  %v24813_v32 = vld [vmem:[%s26929_s12 + $0x5c8] ss:$80 sps:$4 sm:$0xff]  }
 0xccd   : > { %v25775_v10 = vpop.eup %25774  ;;  %25784 = vrcp.f32 %v18828_v22  ;;  %v18847_v30 = vadd.f32 1.0, %v25773_v24  ;;  %v24821_v5 = vld [vmem:[%s26929_s12 + $0x66c] ss:$80 sps:$4 sm:$0xff]   ;;  %v24819_v17 = vld [vmem:[%s26929_s12 + $0x668] ss:$80 sps:$4 sm:$0xff]  }
 0xcce   : > { %v25777_v35 = vpop.eup %25776  ;;  %25786 = vrcp.f32 %v18830_v40  ;;  %v18849_v55 = vadd.f32 1.0, %v25775_v10  ;;  %v24824_v29 = vld [vmem:[%s26929_s12 + $0x704] ss:$80 sps:$4 sm:$0xff]   ;;  %v24827_v20 = vld [vmem:[%s26929_s12 + $0x70c] ss:$80 sps:$4 sm:$0xff]  }
 0xccf   : > { %v25779_v36 = vpop.eup %25778  ;;  %25788 = vrcp.f32 %v18847_v30  ;;  %v18848_v9 = vadd.f32 1.0, %v25777_v35  ;;  %17680 = vmatpush1.bf16.msra.mxu0 %v24768_v34  ;;  %17852 = vmatpush1.bf16.msra.mxu1 %v24771_v23  ;;  %v24822_v22 = vld [vmem:[%s26929_s12 + $0x700] ss:$80 sps:$4 sm:$0xff]   ;;  %v24825_v34 = vld [vmem:[%s26929_s12 + $0x708] ss:$80 sps:$4 sm:$0xff]  }
 0xcd0   : > { %25790 = vrcp.f32 %v18849_v55  ;;  %v18850_v49 = vadd.f32 1.0, %v25779_v36  ;;  %17681 = vmatprep.subr.bf16.mxu0 %v24776_v11  ;;  %17853 = vmatprep.subr.bf16.mxu1 %v24779_v7  ;;  %v24830_v23 = vld [vmem:[%s26929_s12 + $0x7a4] ss:$80 sps:$4 sm:$0xff]   ;;  %v24833_v24 = vld [vmem:[%s26929_s12 + $0x7ac] ss:$80 sps:$4 sm:$0xff]  }
 0xcd1   : > { %25792 = vrcp.f32 %v18848_v9  ;;  %v24828_v40 = vld [vmem:[%s26929_s12 + $0x7a0] ss:$80 sps:$4 sm:$0xff]   ;;  %v24831_v11 = vld [vmem:[%s26929_s12 + $0x7a8] ss:$80 sps:$4 sm:$0xff]   ;;  %v24836_v7 = vld [vmem:[%s26929_s12 + $0x844] ss:$80 sps:$4 sm:$0xff]  }
 0xcd2   : > { %25794 = vrcp.f32 %v18850_v49  ;;  %v24839_v10 = vld [vmem:[%s26929_s12 + $0x84c] ss:$80 sps:$4 sm:$0xff]   ;;  %v24834_v30 = vld [vmem:[%s26929_s12 + $0x840] ss:$80 sps:$4 sm:$0xff]   ;;  %v24837_v35 = vld [vmem:[%s26929_s12 + $0x848] ss:$80 sps:$4 sm:$0xff]  }
 0xcd3   : > { %17682 = vmatpush1.bf16.msra.mxu0 %v24774_v47  ;;  %17854 = vmatpush1.bf16.msra.mxu1 %v24777_v14  ;;  %v24842_v55 = vld [vmem:[%s26929_s12 + $0x8e4] ss:$80 sps:$4 sm:$0xff]   ;;  %v24845_v36 = vld [vmem:[%s26929_s12 + $0x8ec] ss:$80 sps:$4 sm:$0xff]   ;;  %v24840_v9 = vld [vmem:[%s26929_s12 + $0x8e0] ss:$80 sps:$4 sm:$0xff]  }
 0xcd4   : > { %17683 = vmatprep.subr.bf16.mxu0 %v24782_v38  ;;  %17855 = vmatprep.subr.bf16.mxu1 %v24785_v39  ;;  %v24843_v47 = vld [vmem:[%s26929_s12 + $0x8e8] ss:$80 sps:$4 sm:$0xff]   ;;  %v24848_v14 = vld [vmem:[%s26929_s12 + $0x984] ss:$80 sps:$4 sm:$0xff]   ;;  %v24851_v49 = vld [vmem:[%s26929_s12 + $0x98c] ss:$80 sps:$4 sm:$0xff]  }
 0xcd5   : > { %v25781_v46 = vpop.eup %25780  ;;  %v24846_v38 = vld [vmem:[%s26929_s12 + $0x980] ss:$80 sps:$4 sm:$0xff]   ;;  %v24849_v39 = vld [vmem:[%s26929_s12 + $0x988] ss:$80 sps:$4 sm:$0xff]  }
 0xcd6   : > { %v25783_v48 = vpop.eup %25782 }
 0xcd7   : > { %v25785_v50 = vpop.eup %25784  ;;  %17684 = vmatpush1.bf16.msra.mxu0 %v24780_v15  ;;  %17856 = vmatpush1.bf16.msra.mxu1 %v24783_v41  ;;  %v24854_v15 = vld [vmem:[%s26929_s12 + $0xa24] ss:$80 sps:$4 sm:$0xff]   ;;  %v24857_v41 = vld [vmem:[%s26929_s12 + $0xa2c] ss:$80 sps:$4 sm:$0xff]  }
 0xcd8   : > { %v25787_v52 = vpop.eup %25786  ;;  %v21759_v53 = vpack.c.bf16 %v25785_v50, %v25781_v46  ;;  %17685 = vmatprep.subr.bf16.mxu0 %v24788_v42  ;;  %17857 = vmatprep.subr.bf16.mxu1 %v24791_v45  ;;  %v24852_v42 = vld [vmem:[%s26929_s12 + $0xa20] ss:$80 sps:$4 sm:$0xff]   ;;  %v24855_v45 = vld [vmem:[%s26929_s12 + $0xa28] ss:$80 sps:$4 sm:$0xff]   ;;  %v24860_v46 = vld [vmem:[%s26929_s12 + $0xac4] ss:$80 sps:$4 sm:$0xff]  }
 0xcd9   : > { %v25789_v61 = vpop.eup %25788  ;;  %v21760_v43 = vpack.c.bf16 %v25787_v52, %v25783_v48  ;;  %v24863_v48 = vld [vmem:[%s26929_s12 + $0xacc] ss:$80 sps:$4 sm:$0xff]   ;;  %v25932_v50 = vld [vmem:[#allocation3] sm:$0xff] }
 0xcda   : > { %v25791_v1 = vpop.eup %25790  ;;  %19067 = vst [vmem:[%s26937_s25] sm:$0xff] %v21759_v53  ;;  %v24866_v52 = vld [vmem:[%s26929_s12 + $0xb64] ss:$80 sps:$4 sm:$0xff]   ;;  %v24869_v53 = vld [vmem:[%s26929_s12 + $0xb6c] ss:$80 sps:$4 sm:$0xff]  }
 0xcdb   : > { %v25793_v2 = vpop.eup %25792  ;;  %19068 = vst [vmem:[%s26937_s25 + $0x8] sm:$0xff] %v21760_v43  ;;  %17686 = vmatpush1.bf16.msra.mxu0 %v24786_v27  ;;  %17858 = vmatpush1.bf16.msra.mxu1 %v24789_v51  ;;  %v24858_v27 = vld [vmem:[%s26929_s12 + $0xac0] ss:$80 sps:$4 sm:$0xff]   ;;  %v24861_v51 = vld [vmem:[%s26929_s12 + $0xac8] ss:$80 sps:$4 sm:$0xff]  }
 0xcdc   : > { %v25795_v25 = vpop.eup %25794  ;;  %v21769_v28 = vpack.c.bf16 %v25793_v2, %v25789_v61  ;;  %17687 = vmatprep.subr.bf16.mxu0 %v24794_v54  ;;  %17859 = vmatprep.subr.bf16.mxu1 %v24797_v58  ;;  %v25933_v54 = vld [vmem:[#allocation3 + $0x18] sm:$0xff]  ;;  %v24872_v43 = vld [vmem:[%s26929_s12 + $0xc04] ss:$80 sps:$4 sm:$0xff]  }
 0xcdd   : > { %v21770_v6 = vpack.c.bf16 %v25795_v25, %v25791_v1  ;;  %v24864_v58 = vld [vmem:[%s26929_s12 + $0xb60] ss:$80 sps:$4 sm:$0xff]   ;;  %v24867_v61 = vld [vmem:[%s26929_s12 + $0xb68] ss:$80 sps:$4 sm:$0xff]   ;;  %v24875_v1 = vld [vmem:[%s26929_s12 + $0xc0c] ss:$80 sps:$4 sm:$0xff]  }
 0xcde   : > { %19077 = vst [vmem:[%s26937_s25 + $0x50] sm:$0xff] %v21769_v28  ;;  %v24870_v2 = vld [vmem:[%s26929_s12 + $0xc00] ss:$80 sps:$4 sm:$0xff]   ;;  %v24881_v25 = vld [vmem:[%s26929_s12 + $0xcac] ss:$80 sps:$4 sm:$0xff]  }
 0xcdf   : > { %19078 = vst [vmem:[%s26937_s25 + $0x58] sm:$0xff] %v21770_v6  ;;  %17688 = vmatpush1.bf16.msra.mxu0 %v24792_v8  ;;  %17860 = vmatpush1.bf16.msra.mxu1 %v24795_v31  ;;  %v24873_v8 = vld [vmem:[%s26929_s12 + $0xc08] ss:$80 sps:$4 sm:$0xff]   ;;  %v24878_v31 = vld [vmem:[%s26929_s12 + $0xca4] ss:$80 sps:$4 sm:$0xff]  }
 0xce0   : > { %17689 = vmatprep.subr.bf16.mxu0 %v24800_v26  ;;  %17861 = vmatprep.subr.bf16.mxu1 %v24803_v4  ;;  %v24876_v28 = vld [vmem:[%s26929_s12 + $0xca0] ss:$80 sps:$4 sm:$0xff]   ;;  %v24879_v26 = vld [vmem:[%s26929_s12 + $0xca8] ss:$80 sps:$4 sm:$0xff]   ;;  %v24884_v4 = vld [vmem:[%s26929_s12 + $0xd44] ss:$80 sps:$4 sm:$0xff]  }
 0xce1   : > { %v24887_v6 = vld [vmem:[%s26929_s12 + $0xd4c] ss:$80 sps:$4 sm:$0xff]  }
 0xce3   : > { %17690 = vmatpush1.bf16.msra.mxu0 %v24798_v59  ;;  %17862 = vmatpush1.bf16.msra.mxu1 %v24801_v12  ;;  %v24882_v59 = vld [vmem:[%s26929_s12 + $0xd40] ss:$80 sps:$4 sm:$0xff]   ;;  %v24885_v12 = vld [vmem:[%s26929_s12 + $0xd48] ss:$80 sps:$4 sm:$0xff]  }
 0xce4   : > { %17691 = vmatprep.subr.bf16.mxu0 %v24806_v44  ;;  %17863 = vmatprep.subr.bf16.mxu1 %v24809_v13  ;;  %v24890_v44 = vld [vmem:[%s26929_s12 + $0xde4] ss:$80 sps:$4 sm:$0xff]   ;;  %v24893_v13 = vld [vmem:[%s26929_s12 + $0xdec] ss:$80 sps:$4 sm:$0xff]  }
 0xce7   : > { %17692 = vmatpush1.bf16.msra.mxu0 %v24804_v63  ;;  %17864 = vmatpush1.bf16.msra.mxu1 %v24807_v62  ;;  %v24888_v63 = vld [vmem:[%s26929_s12 + $0xde0] ss:$80 sps:$4 sm:$0xff]   ;;  %v24891_v62 = vld [vmem:[%s26929_s12 + $0xde8] ss:$80 sps:$4 sm:$0xff]  }
 0xce8   : > { %17693 = vmatprep.subr.bf16.mxu0 %v24812_v56  ;;  %17865 = vmatprep.subr.bf16.mxu1 %v24815_v57  ;;  %v24896_v56 = vld [vmem:[%s26929_s12 + $0xe84] ss:$80 sps:$4 sm:$0xff]   ;;  %v24899_v57 = vld [vmem:[%s26929_s12 + $0xe8c] ss:$80 sps:$4 sm:$0xff]  }
 0xceb   : > { %17694 = vmatpush1.bf16.msra.mxu0 %v24810_v0  ;;  %17866 = vmatpush1.bf16.msra.mxu1 %v24813_v32  ;;  %v24894_v0 = vld [vmem:[%s26929_s12 + $0xe80] ss:$80 sps:$4 sm:$0xff]   ;;  %v24897_v32 = vld [vmem:[%s26929_s12 + $0xe88] ss:$80 sps:$4 sm:$0xff]  }
 0xcec   : > { %17695 = vmatprep.subr.bf16.mxu0 %v24818_v19  ;;  %17867 = vmatprep.subr.bf16.mxu1 %v24821_v5  ;;  %v24902_v19 = vld [vmem:[%s26929_s12 + $0xf24] ss:$80 sps:$4 sm:$0xff]   ;;  %v24905_v5 = vld [vmem:[%s26929_s12 + $0xf2c] ss:$80 sps:$4 sm:$0xff]  }
 0xcef   : > { %17696 = vmatpush1.bf16.msra.mxu0 %v24816_v16  ;;  %17868 = vmatpush1.bf16.msra.mxu1 %v24819_v17  ;;  %v24900_v16 = vld [vmem:[%s26929_s12 + $0xf20] ss:$80 sps:$4 sm:$0xff]   ;;  %v24903_v17 = vld [vmem:[%s26929_s12 + $0xf28] ss:$80 sps:$4 sm:$0xff]  }
 0xcf0   : > { %17697 = vmatprep.subr.bf16.mxu0 %v24824_v29  ;;  %17869 = vmatprep.subr.bf16.mxu1 %v24827_v20  ;;  %v24908_v29 = vld [vmem:[%s26929_s12 + $0xfc4] ss:$80 sps:$4 sm:$0xff]   ;;  %v24911_v20 = vld [vmem:[%s26929_s12 + $0xfcc] ss:$80 sps:$4 sm:$0xff]  }
 0xcf3   : > { %17698 = vmatpush1.bf16.msra.mxu0 %v24822_v22  ;;  %17870 = vmatpush1.bf16.msra.mxu1 %v24825_v34  ;;  %v24906_v22 = vld [vmem:[%s26929_s12 + $0xfc0] ss:$80 sps:$4 sm:$0xff]   ;;  %v24909_v34 = vld [vmem:[%s26929_s12 + $0xfc8] ss:$80 sps:$4 sm:$0xff]  }
 0xcf4   : > { %17699 = vmatprep.subr.bf16.mxu0 %v24830_v23  ;;  %17871 = vmatprep.subr.bf16.mxu1 %v24833_v24  ;;  %v24914_v23 = vld [vmem:[%s26929_s12 + $0x1064] ss:$80 sps:$4 sm:$0xff]   ;;  %v24917_v24 = vld [vmem:[%s26929_s12 + $0x106c] ss:$80 sps:$4 sm:$0xff]  }
 0xcf7   : > { %17700 = vmatpush1.bf16.msra.mxu0 %v24828_v40  ;;  %17872 = vmatpush1.bf16.msra.mxu1 %v24831_v11  ;;  %v24912_v40 = vld [vmem:[%s26929_s12 + $0x1060] ss:$80 sps:$4 sm:$0xff]   ;;  %v24915_v11 = vld [vmem:[%s26929_s12 + $0x1068] ss:$80 sps:$4 sm:$0xff]  }
 0xcf8   : > { %17701 = vmatprep.subr.bf16.mxu0 %v24836_v7  ;;  %17873 = vmatprep.subr.bf16.mxu1 %v24839_v10  ;;  %v24920_v7 = vld [vmem:[%s26929_s12 + $0x1104] ss:$80 sps:$4 sm:$0xff]   ;;  %v24923_v10 = vld [vmem:[%s26929_s12 + $0x110c] ss:$80 sps:$4 sm:$0xff]  }
 0xcfb   : > { %17702 = vmatpush1.bf16.msra.mxu0 %v24834_v30  ;;  %17874 = vmatpush1.bf16.msra.mxu1 %v24837_v35  ;;  %v24918_v30 = vld [vmem:[%s26929_s12 + $0x1100] ss:$80 sps:$4 sm:$0xff]   ;;  %v24921_v35 = vld [vmem:[%s26929_s12 + $0x1108] ss:$80 sps:$4 sm:$0xff]  }
 0xcfc   : > { %17703 = vmatprep.subr.bf16.mxu0 %v24842_v55  ;;  %17875 = vmatprep.subr.bf16.mxu1 %v24845_v36  ;;  %v24926_v55 = vld [vmem:[%s26929_s12 + $0x11a4] ss:$80 sps:$4 sm:$0xff]   ;;  %v24929_v36 = vld [vmem:[%s26929_s12 + $0x11ac] ss:$80 sps:$4 sm:$0xff]  }
 0xcff   : > { %17704 = vmatpush1.bf16.msra.mxu0 %v24840_v9  ;;  %17876 = vmatpush1.bf16.msra.mxu1 %v24843_v47  ;;  %v24924_v9 = vld [vmem:[%s26929_s12 + $0x11a0] ss:$80 sps:$4 sm:$0xff]   ;;  %v24927_v47 = vld [vmem:[%s26929_s12 + $0x11a8] ss:$80 sps:$4 sm:$0xff]  }
 0xd00   : > { %17705 = vmatprep.subr.bf16.mxu0 %v24848_v14  ;;  %17877 = vmatprep.subr.bf16.mxu1 %v24851_v49  ;;  %v24932_v14 = vld [vmem:[%s26929_s12 + $0x1244] ss:$80 sps:$4 sm:$0xff]   ;;  %v24935_v49 = vld [vmem:[%s26929_s12 + $0x124c] ss:$80 sps:$4 sm:$0xff]  }
 0xd03   : > { %17706 = vmatpush1.bf16.msra.mxu0 %v24846_v38  ;;  %17878 = vmatpush1.bf16.msra.mxu1 %v24849_v39  ;;  %v24930_v38 = vld [vmem:[%s26929_s12 + $0x1240] ss:$80 sps:$4 sm:$0xff]   ;;  %v24933_v39 = vld [vmem:[%s26929_s12 + $0x1248] ss:$80 sps:$4 sm:$0xff]  }
 0xd04   : > { %17718 = vmatprep.subr.bf16.mxu0 %v24854_v15  ;;  %17890 = vmatprep.subr.bf16.mxu1 %v24857_v41  ;;  %v24938_v15 = vld [vmem:[%s26929_s12 + $0x12e4] ss:$80 sps:$4 sm:$0xff]   ;;  %v24941_v41 = vld [vmem:[%s26929_s12 + $0x12ec] ss:$80 sps:$4 sm:$0xff]  }
 0xd06   : > { %17708 = vmatmul.mubr.bf16.vlgmr.msra.gmra.mrb[8].mxu0 %v25932_v50  ;;  %17880 = vmatmul.mubr.bf16.vlgmr.msra.gmra.mrb[8].mxu1 %v25932_v50  ;;  %v24942_v50 = vld [vmem:[%s26929_s12 + $0x1380] ss:$80 sps:$4 sm:$0xff]  }
 0xd07   : > { %17719 = vmatpush1.bf16.msra.mxu0 %v24852_v42  ;;  %17891 = vmatpush1.bf16.msra.mxu1 %v24855_v45  ;;  %v24936_v42 = vld [vmem:[%s26929_s12 + $0x12e0] ss:$80 sps:$4 sm:$0xff]   ;;  %v24939_v45 = vld [vmem:[%s26929_s12 + $0x12e8] ss:$80 sps:$4 sm:$0xff]  }
 0xd08   : > { %17720 = vmatprep.subr.bf16.mxu0 %v24860_v46  ;;  %17892 = vmatprep.subr.bf16.mxu1 %v24863_v48  ;;  %v24944_v46 = vld [vmem:[%s26929_s12 + $0x1384] ss:$80 sps:$4 sm:$0xff]   ;;  %v24947_v48 = vld [vmem:[%s26929_s12 + $0x138c] ss:$80 sps:$4 sm:$0xff]  }
 0xd09   : > { %17750 = vmatprep.mubr.bf16.mxu0 %v25933_v54  ;;  %17922 = vmatprep.mubr.bf16.mxu1 %v25933_v54  ;;  %v24951_v54 = vld [vmem:[%s26929_s12 + $0x1428] ss:$80 sps:$4 sm:$0xff]  }
 0xd0b   : > { %17721 = vmatpush1.bf16.msra.mxu0 %v24858_v27  ;;  %17893 = vmatpush1.bf16.msra.mxu1 %v24861_v51  ;;  %v24945_v27 = vld [vmem:[%s26929_s12 + $0x1388] ss:$80 sps:$4 sm:$0xff]   ;;  %v24950_v51 = vld [vmem:[%s26929_s12 + $0x1424] ss:$80 sps:$4 sm:$0xff]  }
 0xd0c   : > { %17722 = vmatprep.subr.bf16.mxu0 %v24866_v52  ;;  %17894 = vmatprep.subr.bf16.mxu1 %v24869_v53  ;;  %v24953_v52 = vld [vmem:[%s26929_s12 + $0x142c] ss:$80 sps:$4 sm:$0xff]   ;;  %v24948_v53 = vld [vmem:[%s26929_s12 + $0x1420] ss:$80 sps:$4 sm:$0xff]  }
 0xd0f   : > { %17723 = vmatpush1.bf16.msra.mxu0 %v24864_v58  ;;  %17895 = vmatpush1.bf16.msra.mxu1 %v24867_v61  ;;  %v24956_v58 = vld [vmem:[%s26929_s12 + $0x14c4] ss:$80 sps:$4 sm:$0xff]   ;;  %v24959_v61 = vld [vmem:[%s26929_s12 + $0x14cc] ss:$80 sps:$4 sm:$0xff]  }
 0xd10   : > { %17724 = vmatprep.subr.bf16.mxu0 %v24872_v43  ;;  %17896 = vmatprep.subr.bf16.mxu1 %v24875_v1  ;;  %v25934_v43 = vld [vmem:[#allocation3 + $0x10] sm:$0xff] }
 0xd11   : > { %v24954_v1 = vld [vmem:[%s26929_s12 + $0x14c0] ss:$80 sps:$4 sm:$0xff]  }
 0xd13   : > { %17725 = vmatpush1.bf16.msra.mxu0 %v24870_v2  ;;  %17897 = vmatpush1.bf16.msra.mxu1 %v24873_v8  ;;  %v24957_v2 = vld [vmem:[%s26929_s12 + $0x14c8] ss:$80 sps:$4 sm:$0xff]   ;;  %v24962_v8 = vld [vmem:[%s26929_s12 + $0x1564] ss:$80 sps:$4 sm:$0xff]  }
 0xd14   : > { %17726 = vmatprep.subr.bf16.mxu0 %v24878_v31  ;;  %17898 = vmatprep.subr.bf16.mxu1 %v24881_v25  ;;  %v24965_v31 = vld [vmem:[%s26929_s12 + $0x156c] ss:$80 sps:$4 sm:$0xff]  }
 0xd15   : > { %v25935_v25 = vld [vmem:[#allocation3 + $0x28] sm:$0xff] }
 0xd17   : > { %17727 = vmatpush1.bf16.msra.mxu0 %v24876_v28  ;;  %17899 = vmatpush1.bf16.msra.mxu1 %v24879_v26  ;;  %v24960_v28 = vld [vmem:[%s26929_s12 + $0x1560] ss:$80 sps:$4 sm:$0xff]   ;;  %v24963_v26 = vld [vmem:[%s26929_s12 + $0x1568] ss:$80 sps:$4 sm:$0xff]  }
 0xd18   : > { %17728 = vmatprep.subr.bf16.mxu0 %v24884_v4  ;;  %17900 = vmatprep.subr.bf16.mxu1 %v24887_v6  ;;  %v24968_v4 = vld [vmem:[%s26929_s12 + $0x1604] ss:$80 sps:$4 sm:$0xff]   ;;  %v24971_v6 = vld [vmem:[%s26929_s12 + $0x160c] ss:$80 sps:$4 sm:$0xff]  }
 0xd1b   : > { %17729 = vmatpush1.bf16.msra.mxu0 %v24882_v59  ;;  %17901 = vmatpush1.bf16.msra.mxu1 %v24885_v12  ;;  %v24966_v59 = vld [vmem:[%s26929_s12 + $0x1600] ss:$80 sps:$4 sm:$0xff]   ;;  %v24969_v12 = vld [vmem:[%s26929_s12 + $0x1608] ss:$80 sps:$4 sm:$0xff]  }
 0xd1c   : > { %17730 = vmatprep.subr.bf16.mxu0 %v24890_v44  ;;  %17902 = vmatprep.subr.bf16.mxu1 %v24893_v13  ;;  %v24974_v44 = vld [vmem:[%s26929_s12 + $0x16a4] ss:$80 sps:$4 sm:$0xff]   ;;  %v24977_v13 = vld [vmem:[%s26929_s12 + $0x16ac] ss:$80 sps:$4 sm:$0xff]  }
 0xd1f   : > { %17731 = vmatpush1.bf16.msra.mxu0 %v24888_v63  ;;  %17903 = vmatpush1.bf16.msra.mxu1 %v24891_v62  ;;  %v24972_v63 = vld [vmem:[%s26929_s12 + $0x16a0] ss:$80 sps:$4 sm:$0xff]   ;;  %v24975_v62 = vld [vmem:[%s26929_s12 + $0x16a8] ss:$80 sps:$4 sm:$0xff]  }
 0xd20   : > { %17732 = vmatprep.subr.bf16.mxu0 %v24896_v56  ;;  %17904 = vmatprep.subr.bf16.mxu1 %v24899_v57  ;;  %v24980_v56 = vld [vmem:[%s26929_s12 + $0x1744] ss:$80 sps:$4 sm:$0xff]   ;;  %v24983_v57 = vld [vmem:[%s26929_s12 + $0x174c] ss:$80 sps:$4 sm:$0xff]  }
 0xd23   : > { %17733 = vmatpush1.bf16.msra.mxu0 %v24894_v0  ;;  %17905 = vmatpush1.bf16.msra.mxu1 %v24897_v32  ;;  %v24978_v0 = vld [vmem:[%s26929_s12 + $0x1740] ss:$80 sps:$4 sm:$0xff]   ;;  %v24981_v32 = vld [vmem:[%s26929_s12 + $0x1748] ss:$80 sps:$4 sm:$0xff]  }
 0xd24   : > { %17734 = vmatprep.subr.bf16.mxu0 %v24902_v19  ;;  %17906 = vmatprep.subr.bf16.mxu1 %v24905_v5  ;;  %v24986_v19 = vld [vmem:[%s26929_s12 + $0x17e4] ss:$80 sps:$4 sm:$0xff]   ;;  %v24989_v5 = vld [vmem:[%s26929_s12 + $0x17ec] ss:$80 sps:$4 sm:$0xff]  }
 0xd27   : > { %17735 = vmatpush1.bf16.msra.mxu0 %v24900_v16  ;;  %17907 = vmatpush1.bf16.msra.mxu1 %v24903_v17  ;;  %v24984_v16 = vld [vmem:[%s26929_s12 + $0x17e0] ss:$80 sps:$4 sm:$0xff]   ;;  %v24987_v17 = vld [vmem:[%s26929_s12 + $0x17e8] ss:$80 sps:$4 sm:$0xff]  }
 0xd28   : > { %17736 = vmatprep.subr.bf16.mxu0 %v24908_v29  ;;  %17908 = vmatprep.subr.bf16.mxu1 %v24911_v20  ;;  %v24992_v29 = vld [vmem:[%s26929_s12 + $0x1884] ss:$80 sps:$4 sm:$0xff]   ;;  %v24995_v20 = vld [vmem:[%s26929_s12 + $0x188c] ss:$80 sps:$4 sm:$0xff]  }
 0xd2b   : > { %17737 = vmatpush1.bf16.msra.mxu0 %v24906_v22  ;;  %17909 = vmatpush1.bf16.msra.mxu1 %v24909_v34  ;;  %v24990_v22 = vld [vmem:[%s26929_s12 + $0x1880] ss:$80 sps:$4 sm:$0xff]   ;;  %v24993_v34 = vld [vmem:[%s26929_s12 + $0x1888] ss:$80 sps:$4 sm:$0xff]  }
 0xd2c   : > { %17738 = vmatprep.subr.bf16.mxu0 %v24914_v23  ;;  %17910 = vmatprep.subr.bf16.mxu1 %v24917_v24  ;;  %v24998_v23 = vld [vmem:[%s26929_s12 + $0x1924] ss:$80 sps:$4 sm:$0xff]   ;;  %v25001_v24 = vld [vmem:[%s26929_s12 + $0x192c] ss:$80 sps:$4 sm:$0xff]  }
 0xd2f   : > { %17739 = vmatpush1.bf16.msra.mxu0 %v24912_v40  ;;  %17911 = vmatpush1.bf16.msra.mxu1 %v24915_v11  ;;  %v24996_v40 = vld [vmem:[%s26929_s12 + $0x1920] ss:$80 sps:$4 sm:$0xff]   ;;  %v24999_v11 = vld [vmem:[%s26929_s12 + $0x1928] ss:$80 sps:$4 sm:$0xff]  }
 0xd30   : > { %17740 = vmatprep.subr.bf16.mxu0 %v24920_v7  ;;  %17912 = vmatprep.subr.bf16.mxu1 %v24923_v10  ;;  %v25004_v7 = vld [vmem:[%s26929_s12 + $0x19c4] ss:$80 sps:$4 sm:$0xff]   ;;  %v25007_v10 = vld [vmem:[%s26929_s12 + $0x19cc] ss:$80 sps:$4 sm:$0xff]  }
 0xd33   : > { %17741 = vmatpush1.bf16.msra.mxu0 %v24918_v30  ;;  %17913 = vmatpush1.bf16.msra.mxu1 %v24921_v35  ;;  %v25002_v30 = vld [vmem:[%s26929_s12 + $0x19c0] ss:$80 sps:$4 sm:$0xff]   ;;  %v25005_v35 = vld [vmem:[%s26929_s12 + $0x19c8] ss:$80 sps:$4 sm:$0xff]  }
 0xd34   : > { %17742 = vmatprep.subr.bf16.mxu0 %v24926_v55  ;;  %17914 = vmatprep.subr.bf16.mxu1 %v24929_v36  ;;  %v25010_v55 = vld [vmem:[%s26929_s12 + $0x1a64] ss:$80 sps:$4 sm:$0xff]   ;;  %v25013_v36 = vld [vmem:[%s26929_s12 + $0x1a6c] ss:$80 sps:$4 sm:$0xff]  }
 0xd37   : > { %17743 = vmatpush1.bf16.msra.mxu0 %v24924_v9  ;;  %17915 = vmatpush1.bf16.msra.mxu1 %v24927_v47  ;;  %v25008_v9 = vld [vmem:[%s26929_s12 + $0x1a60] ss:$80 sps:$4 sm:$0xff]   ;;  %v25011_v47 = vld [vmem:[%s26929_s12 + $0x1a68] ss:$80 sps:$4 sm:$0xff]  }
 0xd38   : > { %17744 = vmatprep.subr.bf16.mxu0 %v24932_v14  ;;  %17916 = vmatprep.subr.bf16.mxu1 %v24935_v49  ;;  %v25016_v14 = vld [vmem:[%s26929_s12 + $0x1b04] ss:$80 sps:$4 sm:$0xff]   ;;  %v25019_v49 = vld [vmem:[%s26929_s12 + $0x1b0c] ss:$80 sps:$4 sm:$0xff]  }
 0xd3b   : > { %17745 = vmatpush1.bf16.msra.mxu0 %v24930_v38  ;;  %17917 = vmatpush1.bf16.msra.mxu1 %v24933_v39  ;;  %v25014_v38 = vld [vmem:[%s26929_s12 + $0x1b00] ss:$80 sps:$4 sm:$0xff]   ;;  %v25017_v39 = vld [vmem:[%s26929_s12 + $0x1b08] ss:$80 sps:$4 sm:$0xff]  }
 0xd3c   : > { %17746 = vmatprep.subr.bf16.mxu0 %v24938_v15  ;;  %17918 = vmatprep.subr.bf16.mxu1 %v24941_v41  ;;  %v25022_v15 = vld [vmem:[%s26929_s12 + $0x1ba4] ss:$80 sps:$4 sm:$0xff]   ;;  %v25025_v41 = vld [vmem:[%s26929_s12 + $0x1bac] ss:$80 sps:$4 sm:$0xff]  }
 0xd3f   : > { %17747 = vmatpush1.bf16.msra.mxu0 %v24936_v42  ;;  %17919 = vmatpush1.bf16.msra.mxu1 %v24939_v45  ;;  %v25020_v42 = vld [vmem:[%s26929_s12 + $0x1ba0] ss:$80 sps:$4 sm:$0xff]   ;;  %v25023_v45 = vld [vmem:[%s26929_s12 + $0x1ba8] ss:$80 sps:$4 sm:$0xff]  }
 0xd40   : > { %17748 = vmatprep.subr.bf16.mxu0 %v24944_v46  ;;  %17920 = vmatprep.subr.bf16.mxu1 %v24947_v48  ;;  %v25028_v46 = vld [vmem:[%s26929_s12 + $0x1c44] ss:$80 sps:$4 sm:$0xff]   ;;  %v25031_v48 = vld [vmem:[%s26929_s12 + $0x1c4c] ss:$80 sps:$4 sm:$0xff]  }
 0xd43   : > { %17749 = vmatpush1.bf16.msra.mxu0 %v24942_v50  ;;  %17921 = vmatpush1.bf16.msra.mxu1 %v24945_v27  ;;  %v25026_v50 = vld [vmem:[%s26929_s12 + $0x1c40] ss:$80 sps:$4 sm:$0xff]   ;;  %v25029_v27 = vld [vmem:[%s26929_s12 + $0x1c48] ss:$80 sps:$4 sm:$0xff]  }
 0xd44   : > { %17761 = vmatprep.subr.bf16.mxu0 %v24950_v51  ;;  %17933 = vmatprep.subr.bf16.mxu1 %v24953_v52  ;;  %v25034_v51 = vld [vmem:[%s26929_s12 + $0x1ce4] ss:$80 sps:$4 sm:$0xff]   ;;  %v25037_v52 = vld [vmem:[%s26929_s12 + $0x1cec] ss:$80 sps:$4 sm:$0xff]  }
 0xd46   : > { %17751 = vmatmul.mubr.bf16.vlgmr.msra.gmra.mrb[8].mxu0 %v25934_v43  ;;  %17923 = vmatmul.mubr.bf16.vlgmr.msra.gmra.mrb[8].mxu1 %v25934_v43  ;;  %v25038_v43 = vld [vmem:[%s26929_s12 + $0x1d80] ss:$80 sps:$4 sm:$0xff]  }
 0xd47   : > { %17762 = vmatpush1.bf16.msra.mxu0 %v24948_v53  ;;  %17934 = vmatpush1.bf16.msra.mxu1 %v24951_v54  ;;  %v25032_v53 = vld [vmem:[%s26929_s12 + $0x1ce0] ss:$80 sps:$4 sm:$0xff]   ;;  %v25035_v54 = vld [vmem:[%s26929_s12 + $0x1ce8] ss:$80 sps:$4 sm:$0xff]  }
 0xd48   : > { %17763 = vmatprep.subr.bf16.mxu0 %v24956_v58  ;;  %17935 = vmatprep.subr.bf16.mxu1 %v24959_v61  ;;  %v25040_v58 = vld [vmem:[%s26929_s12 + $0x1d84] ss:$80 sps:$4 sm:$0xff]   ;;  %v25043_v61 = vld [vmem:[%s26929_s12 + $0x1d8c] ss:$80 sps:$4 sm:$0xff]  }
 0xd49   : > { %17793 = vmatprep.mubr.bf16.mxu0 %v25935_v25  ;;  %17965 = vmatprep.mubr.bf16.mxu1 %v25935_v25  ;;  %v25047_v25 = vld [vmem:[%s26929_s12 + $0x1e28] ss:$80 sps:$4 sm:$0xff]  }
 0xd4b   : > { %17764 = vmatpush1.bf16.msra.mxu0 %v24954_v1  ;;  %17936 = vmatpush1.bf16.msra.mxu1 %v24957_v2  ;;  %v25041_v1 = vld [vmem:[%s26929_s12 + $0x1d88] ss:$80 sps:$4 sm:$0xff]   ;;  %v25046_v2 = vld [vmem:[%s26929_s12 + $0x1e24] ss:$80 sps:$4 sm:$0xff]  }
 0xd4c   : > { %17765 = vmatprep.subr.bf16.mxu0 %v24962_v8  ;;  %17937 = vmatprep.subr.bf16.mxu1 %v24965_v31  ;;  %v25049_v8 = vld [vmem:[%s26929_s12 + $0x1e2c] ss:$80 sps:$4 sm:$0xff]   ;;  %v25044_v31 = vld [vmem:[%s26929_s12 + $0x1e20] ss:$80 sps:$4 sm:$0xff]  }
 0xd4f   : > { %17766 = vmatpush1.bf16.msra.mxu0 %v24960_v28  ;;  %17938 = vmatpush1.bf16.msra.mxu1 %v24963_v26  ;;  %v25052_v28 = vld [vmem:[%s26929_s12 + $0x1ec4] ss:$80 sps:$4 sm:$0xff]   ;;  %v25055_v26 = vld [vmem:[%s26929_s12 + $0x1ecc] ss:$80 sps:$4 sm:$0xff]  }
 0xd50   : > { %17767 = vmatprep.subr.bf16.mxu0 %v24968_v4  ;;  %17939 = vmatprep.subr.bf16.mxu1 %v24971_v6  ;;  %v25936_v4 = vld [vmem:[#allocation3 + $0x20] sm:$0xff] }
 0xd51   : > { %v25050_v6 = vld [vmem:[%s26929_s12 + $0x1ec0] ss:$80 sps:$4 sm:$0xff]  }
 0xd53   : > { %17768 = vmatpush1.bf16.msra.mxu0 %v24966_v59  ;;  %17940 = vmatpush1.bf16.msra.mxu1 %v24969_v12  ;;  %v25053_v59 = vld [vmem:[%s26929_s12 + $0x1ec8] ss:$80 sps:$4 sm:$0xff]   ;;  %v25058_v12 = vld [vmem:[%s26929_s12 + $0x1f64] ss:$80 sps:$4 sm:$0xff]  }
 0xd54   : > { %17769 = vmatprep.subr.bf16.mxu0 %v24974_v44  ;;  %17941 = vmatprep.subr.bf16.mxu1 %v24977_v13  ;;  %v25061_v44 = vld [vmem:[%s26929_s12 + $0x1f6c] ss:$80 sps:$4 sm:$0xff]   ;;  %v25056_v13 = vld [vmem:[%s26929_s12 + $0x1f60] ss:$80 sps:$4 sm:$0xff]  }
 0xd57   : > { %17770 = vmatpush1.bf16.msra.mxu0 %v24972_v63  ;;  %17942 = vmatpush1.bf16.msra.mxu1 %v24975_v62  ;;  %v25059_v63 = vld [vmem:[%s26929_s12 + $0x1f68] ss:$80 sps:$4 sm:$0xff]   ;;  %v25064_v62 = vld [vmem:[%s26929_s12 + $0x2004] ss:$80 sps:$4 sm:$0xff]  }
 0xd58   : > { %17771 = vmatprep.subr.bf16.mxu0 %v24980_v56  ;;  %17943 = vmatprep.subr.bf16.mxu1 %v24983_v57  ;;  %v25067_v56 = vld [vmem:[%s26929_s12 + $0x200c] ss:$80 sps:$4 sm:$0xff]   ;;  %v25062_v57 = vld [vmem:[%s26929_s12 + $0x2000] ss:$80 sps:$4 sm:$0xff]  }
 0xd5b   : > { %17772 = vmatpush1.bf16.msra.mxu0 %v24978_v0  ;;  %17944 = vmatpush1.bf16.msra.mxu1 %v24981_v32  ;;  %v25065_v0 = vld [vmem:[%s26929_s12 + $0x2008] ss:$80 sps:$4 sm:$0xff]   ;;  %v25070_v32 = vld [vmem:[%s26929_s12 + $0x20a4] ss:$80 sps:$4 sm:$0xff]  }
 0xd5c   : > { %17773 = vmatprep.subr.bf16.mxu0 %v24986_v19  ;;  %17945 = vmatprep.subr.bf16.mxu1 %v24989_v5  ;;  %v25073_v19 = vld [vmem:[%s26929_s12 + $0x20ac] ss:$80 sps:$4 sm:$0xff]   ;;  %v11305_v5 = vsub.s32 4, %v28509_v60 }
 0xd5f   : > { %17774 = vmatpush1.bf16.msra.mxu0 %v24984_v16  ;;  %17946 = vmatpush1.bf16.msra.mxu1 %v24987_v17  ;;  %v11313_v16 = vsub.s32 6, %v28509_v60  ;;  %v25068_v17 = vld [vmem:[%s26929_s12 + $0x20a0] ss:$80 sps:$4 sm:$0xff]  }
 0xd60   : > { %17775 = vmatprep.subr.bf16.mxu0 %v24992_v29  ;;  %17947 = vmatprep.subr.bf16.mxu1 %v24995_v20  ;;  %v25071_v29 = vld [vmem:[%s26929_s12 + $0x20a8] ss:$80 sps:$4 sm:$0xff]   ;;  %v11309_v20 = vsub.s32 5, %v28509_v60 }
 0xd63   : > { %17776 = vmatpush1.bf16.msra.mxu0 %v24990_v22  ;;  %17948 = vmatpush1.bf16.msra.mxu1 %v24993_v34  ;;  %v11317_v22 = vsub.s32 7, %v28509_v60  ;;  %v25076_v34 = vld [vmem:[%s26929_s12 + $0x2144] ss:$80 sps:$4 sm:$0xff]  }
 0xd64   : > { %17777 = vmatprep.subr.bf16.mxu0 %v24998_v23  ;;  %17949 = vmatprep.subr.bf16.mxu1 %v25001_v24  ;;  %v25079_v23 = vld [vmem:[%s26929_s12 + $0x214c] ss:$80 sps:$4 sm:$0xff]   ;;  %v25937_v24 = vld [vmem:[%s26935_s14] sm:$0xff] }
 0xd67   : > { %17778 = vmatpush1.bf16.msra.mxu0 %v24996_v40  ;;  %17950 = vmatpush1.bf16.msra.mxu1 %v24999_v11  ;;  %v11306_v40 = vrot.slane %v25937_v24, %v11305_v5  ;;  %v11314_v11 = vrot.slane %v25937_v24, %v11313_v16 }
 0xd68   : > { %17779 = vmatprep.subr.bf16.mxu0 %v25004_v7  ;;  %17951 = vmatprep.subr.bf16.mxu1 %v25007_v10  ;;  %v11310_v7 = vrot.slane %v25937_v24, %v11309_v20  ;;  %v11318_v10 = vrot.slane %v25937_v24, %v11317_v22 }
 0xd6b   : > { %17780 = vmatpush1.bf16.msra.mxu0 %v25002_v30  ;;  %17952 = vmatpush1.bf16.msra.mxu1 %v25005_v35  ;;  %v25074_v30 = vld [vmem:[%s26929_s12 + $0x2140] ss:$80 sps:$4 sm:$0xff]   ;;  %v25077_v35 = vld [vmem:[%s26929_s12 + $0x2148] ss:$80 sps:$4 sm:$0xff]  }
 0xd6c   : > { %17781 = vmatprep.subr.bf16.mxu0 %v25010_v55  ;;  %17953 = vmatprep.subr.bf16.mxu1 %v25013_v36  ;;  %v25082_v55 = vld [vmem:[%s26929_s12 + $0x21e4] ss:$80 sps:$4 sm:$0xff]   ;;  %v25085_v36 = vld [vmem:[%s26929_s12 + $0x21ec] ss:$80 sps:$4 sm:$0xff]  }
 0xd6f   : > { %17782 = vmatpush1.bf16.msra.mxu0 %v25008_v9  ;;  %17954 = vmatpush1.bf16.msra.mxu1 %v25011_v47 }
 0xd70   : > { %17783 = vmatprep.subr.bf16.mxu0 %v25016_v14  ;;  %17955 = vmatprep.subr.bf16.mxu1 %v25019_v49 }
 0xd73   : > { %17784 = vmatpush1.bf16.msra.mxu0 %v25014_v38  ;;  %17956 = vmatpush1.bf16.msra.mxu1 %v25017_v39 }
 0xd74   : > { %17785 = vmatprep.subr.bf16.mxu0 %v25022_v15  ;;  %17957 = vmatprep.subr.bf16.mxu1 %v25025_v41  ;;  %v25080_v15 = vld [vmem:[%s26929_s12 + $0x21e0] ss:$80 sps:$4 sm:$0xff]   ;;  %v25083_v41 = vld [vmem:[%s26929_s12 + $0x21e8] ss:$80 sps:$4 sm:$0xff]  }
 0xd77   : > { %17786 = vmatpush1.bf16.msra.mxu0 %v25020_v42  ;;  %17958 = vmatpush1.bf16.msra.mxu1 %v25023_v45 }
 0xd78   : > { %17787 = vmatprep.subr.bf16.mxu0 %v25028_v46  ;;  %17959 = vmatprep.subr.bf16.mxu1 %v25031_v48 }
 0xd7b   : > { %17788 = vmatpush1.bf16.msra.mxu0 %v25026_v50  ;;  %17960 = vmatpush1.bf16.msra.mxu1 %v25029_v27  ;;  %v25088_v50 = vld [vmem:[%s26929_s12 + $0x2284] ss:$80 sps:$4 sm:$0xff]   ;;  %v25091_v27 = vld [vmem:[%s26929_s12 + $0x228c] ss:$80 sps:$4 sm:$0xff]  }
 0xd7c   : > { %17789 = vmatprep.subr.bf16.mxu0 %v25034_v51  ;;  %17961 = vmatprep.subr.bf16.mxu1 %v25037_v52 }
 0xd7f   : > { %17790 = vmatpush1.bf16.msra.mxu0 %v25032_v53  ;;  %17962 = vmatpush1.bf16.msra.mxu1 %v25035_v54 }
 0xd80   : > { %17791 = vmatprep.subr.bf16.mxu0 %v25040_v58  ;;  %17963 = vmatprep.subr.bf16.mxu1 %v25043_v61 }
 0xd83   : > { %17792 = vmatpush1.bf16.msra.mxu0 %v25038_v43  ;;  %17964 = vmatpush1.bf16.msra.mxu1 %v25041_v1 }
 0xd84   : > { %17804 = vmatprep.subr.bf16.mxu0 %v25046_v2  ;;  %17976 = vmatprep.subr.bf16.mxu1 %v25049_v8 }
 0xd86   : > { %17794 = vmatmul.mubr.bf16.vlgmr.msra.gmra.mrb[8].mxu0 %v25936_v4  ;;  %17966 = vmatmul.mubr.bf16.vlgmr.msra.gmra.mrb[8].mxu1 %v25936_v4 }
 0xd87   : > { %17805 = vmatpush1.bf16.msra.mxu0 %v25044_v31  ;;  %17977 = vmatpush1.bf16.msra.mxu1 %v25047_v25 }
 0xd88   : > { %17806 = vmatprep.subr.bf16.mxu0 %v25052_v28  ;;  %17978 = vmatprep.subr.bf16.mxu1 %v25055_v26  ;;  %v25086_v28 = vld [vmem:[%s26929_s12 + $0x2280] ss:$80 sps:$4 sm:$0xff]   ;;  %v25089_v26 = vld [vmem:[%s26929_s12 + $0x2288] ss:$80 sps:$4 sm:$0xff]  }
 0xd89   : > { %17836 = vmatprep.mubr.bf16.mxu0 %v26398_v33  ;;  %18008 = vmatprep.mubr.bf16.mxu1 %v26398_v33 }
 0xd8b   : > { %17807 = vmatpush1.bf16.msra.mxu0 %v25050_v6  ;;  %17979 = vmatpush1.bf16.msra.mxu1 %v25053_v59  ;;  %v25094_v6 = vld [vmem:[%s26929_s12 + $0x34] ss:$80 sps:$4 sm:$0xff]   ;;  %v25097_v59 = vld [vmem:[%s26929_s12 + $0x3c] ss:$80 sps:$4 sm:$0xff]  }
 0xd8c   : > { %17808 = vmatprep.subr.bf16.mxu0 %v25058_v12  ;;  %17980 = vmatprep.subr.bf16.mxu1 %v25061_v44  ;;  %v25092_v44 = vld [vmem:[%s26929_s12 + $0x30] ss:$80 sps:$4 sm:$0xff]  }
 0xd8f   : > { %17809 = vmatpush1.bf16.msra.mxu0 %v25056_v13  ;;  %17981 = vmatpush1.bf16.msra.mxu1 %v25059_v63  ;;  %v25095_v13 = vld [vmem:[%s26929_s12 + $0x38] ss:$80 sps:$4 sm:$0xff]   ;;  %v25100_v63 = vld [vmem:[%s26929_s12 + $0xd4] ss:$80 sps:$4 sm:$0xff]  }
 0xd90   : > { %17810 = vmatprep.subr.bf16.mxu0 %v25064_v62  ;;  %17982 = vmatprep.subr.bf16.mxu1 %v25067_v56  ;;  %v25103_v62 = vld [vmem:[%s26929_s12 + $0xdc] ss:$80 sps:$4 sm:$0xff]   ;;  %v25938_v56 = vld [vmem:[#allocation3 + $0x30] sm:$0xff] }
 0xd93   : > { %17811 = vmatpush1.bf16.msra.mxu0 %v25062_v57  ;;  %17983 = vmatpush1.bf16.msra.mxu1 %v25065_v0  ;;  %v25098_v57 = vld [vmem:[%s26929_s12 + $0xd0] ss:$80 sps:$4 sm:$0xff]   ;;  %v25101_v0 = vld [vmem:[%s26929_s12 + $0xd8] ss:$80 sps:$4 sm:$0xff]  }
 0xd94   : > { %17812 = vmatprep.subr.bf16.mxu0 %v25070_v32  ;;  %17984 = vmatprep.subr.bf16.mxu1 %v25073_v19  ;;  %v25106_v19 = vld [vmem:[%s26929_s12 + $0x174] ss:$80 sps:$4 sm:$0xff]  }
 0xd97   : > { %17813 = vmatpush1.bf16.msra.mxu0 %v25068_v17  ;;  %17985 = vmatpush1.bf16.msra.mxu1 %v25071_v29  ;;  %v25109_v17 = vld [vmem:[%s26929_s12 + $0x17c] ss:$80 sps:$4 sm:$0xff]  }
 0xd98   : > { %17814 = vmatprep.subr.bf16.mxu0 %v25076_v34  ;;  %17986 = vmatprep.subr.bf16.mxu1 %v25079_v23  ;;  %v25939_v23 = vld [vmem:[#allocation3 + $0x8] sm:$0xff] }
 0xd99   : > { %v17494_v9 = vpop.f32.mrb[4].mxu0  ;;  %v17666_v47 = vpop.f32.mrb[4].mxu1 }
 0xd9a   : > { %v22108_v14 = vadd.f32 %v17494_v9, %v11306_v40  ;;  %v22112_v49 = vadd.f32 %v17666_v47, %v11314_v11  ;;  %v17496_v38 = vpop.f32.mrb[5].mxu0  ;;  %v17668_v39 = vpop.f32.mrb[5].mxu1  ;;  %v25115_v9 = vld [vmem:[%s26929_s12 + $0x21c] ss:$80 sps:$4 sm:$0xff]  }
 0xd9b   : > { %v22109_v42 = vadd.f32 %v17496_v38, %v11310_v7  ;;  %v22113_v45 = vadd.f32 %v17668_v39, %v11318_v10  ;;  %v17498_v46 = vpop.f32.mrb[6].mxu0  ;;  %v17670_v48 = vpop.f32.mrb[6].mxu1  ;;  %17815 = vmatpush1.bf16.msra.mxu0 %v25074_v30  ;;  %17987 = vmatpush1.bf16.msra.mxu1 %v25077_v35  ;;  %v25107_v30 = vld [vmem:[%s26929_s12 + $0x178] ss:$80 sps:$4 sm:$0xff]  }
 0xd9c   : > { %v21697_v51 = vmul.f32 -1.442695, %v22108_v14  ;;  %v21699_v52 = vmul.f32 -1.442695, %v22112_v49  ;;  %v22110_v53 = vadd.f32 %v17498_v46, %v11306_v40  ;;  %v22114_v54 = vadd.f32 %v17670_v48, %v11314_v11  ;;  %v17500_v58 = vpop.f32.mrb[7].mxu0  ;;  %v17672_v61 = vpop.f32.mrb[7].mxu1  ;;  %17816 = vmatprep.subr.bf16.mxu0 %v25082_v55  ;;  %17988 = vmatprep.subr.bf16.mxu1 %v25085_v36 }
 0xd9d   : > { %v21698_v43 = vmul.f32 -1.442695, %v22109_v42  ;;  %v21700_v1 = vmul.f32 -1.442695, %v22113_v45  ;;  %v22111_v2 = vadd.f32 %v17500_v58, %v11310_v7  ;;  %v22115_v8 = vadd.f32 %v17672_v61, %v11318_v10  ;;  %v25104_v10 = vld [vmem:[%s26929_s12 + $0x170] ss:$80 sps:$4 sm:$0xff]  }
 0xd9e   : > { %25796 = vpow2.f32 %v21697_v51  ;;  %v21717_v31 = vmul.f32 -1.442695, %v22110_v53  ;;  %v21719_v25 = vmul.f32 -1.442695, %v22114_v54  ;;  %v25112_v36 = vld [vmem:[%s26929_s12 + $0x214] ss:$80 sps:$4 sm:$0xff]  }
 0xd9f   : > { %25798 = vpow2.f32 %v21699_v52  ;;  %17817 = vmatpush1.bf16.msra.mxu0 %v25080_v15  ;;  %17989 = vmatpush1.bf16.msra.mxu1 %v25083_v41  ;;  %v21718_v4 = vmul.f32 -1.442695, %v22111_v2  ;;  %v21720_v12 = vmul.f32 -1.442695, %v22115_v8  ;;  %v25110_v41 = vld [vmem:[%s26929_s12 + $0x210] ss:$80 sps:$4 sm:$0xff]  }
 0xda0   : > { %25800 = vpow2.f32 %v21698_v43  ;;  %17818 = vmatprep.subr.bf16.mxu0 %v25088_v50  ;;  %17990 = vmatprep.subr.bf16.mxu1 %v25091_v27  ;;  %v25113_v42 = vld [vmem:[%s26929_s12 + $0x218] ss:$80 sps:$4 sm:$0xff]   ;;  %v25118_v46 = vld [vmem:[%s26929_s12 + $0x2b4] ss:$80 sps:$4 sm:$0xff]   ;;  %v25121_v48 = vld [vmem:[%s26929_s12 + $0x2bc] ss:$80 sps:$4 sm:$0xff]  }
 0xda1   : > { %25802 = vpow2.f32 %v21700_v1  ;;  %v25116_v50 = vld [vmem:[%s26929_s12 + $0x2b0] ss:$80 sps:$4 sm:$0xff]   ;;  %v25119_v27 = vld [vmem:[%s26929_s12 + $0x2b8] ss:$80 sps:$4 sm:$0xff]   ;;  %v25124_v51 = vld [vmem:[%s26929_s12 + $0x354] ss:$80 sps:$4 sm:$0xff]  }
 0xda2   : > { %25804 = vpow2.f32 %v21717_v31  ;;  %v25127_v52 = vld [vmem:[%s26929_s12 + $0x35c] ss:$80 sps:$4 sm:$0xff]   ;;  %v25122_v61 = vld [vmem:[%s26929_s12 + $0x350] ss:$80 sps:$4 sm:$0xff]   ;;  %v25125_v43 = vld [vmem:[%s26929_s12 + $0x358] ss:$80 sps:$4 sm:$0xff]  }
 0xda3   : > { %25806 = vpow2.f32 %v21719_v25  ;;  %17819 = vmatpush1.bf16.msra.mxu0 %v25086_v28  ;;  %17991 = vmatpush1.bf16.msra.mxu1 %v25089_v26  ;;  %v25130_v8 = vld [vmem:[%s26929_s12 + $0x3f4] ss:$80 sps:$4 sm:$0xff]   ;;  %v25133_v31 = vld [vmem:[%s26929_s12 + $0x3fc] ss:$80 sps:$4 sm:$0xff]  }
 0xda4   : > { %25808 = vpow2.f32 %v21718_v4  ;;  %18019 = vmatprep.subr.bf16.mxu0 %v25094_v6  ;;  %18191 = vmatprep.subr.bf16.mxu1 %v25097_v59  ;;  %v25128_v6 = vld [vmem:[%s26929_s12 + $0x3f0] ss:$80 sps:$4 sm:$0xff]   ;;  %v25131_v59 = vld [vmem:[%s26929_s12 + $0x3f8] ss:$80 sps:$4 sm:$0xff]  }
 0xda5   : > { %25810 = vpow2.f32 %v21720_v12 }
 0xda6   : > { %17837 = vmatmul.mubr.bf16.vlgmr.msra.gmra.mrb[8].mxu0 %v25938_v56  ;;  %18009 = vmatmul.mubr.bf16.vlgmr.msra.gmra.mrb[8].mxu1 %v25938_v56  ;;  %v25134_v56 = vld [vmem:[%s26929_s12 + $0x490] ss:$80 sps:$4 sm:$0xff]  }
 0xda7   : > { %18020 = vmatpush1.bf16.msra.mxu0 %v25092_v44  ;;  %18192 = vmatpush1.bf16.msra.mxu1 %v25095_v13  ;;  %v25136_v13 = vld [vmem:[%s26929_s12 + $0x494] ss:$80 sps:$4 sm:$0xff]  }
 0xda8   : > { %v25797_v32 = vpop.eup %25796  ;;  %18021 = vmatprep.subr.bf16.mxu0 %v25100_v63  ;;  %18193 = vmatprep.subr.bf16.mxu1 %v25103_v62  ;;  %v25139_v63 = vld [vmem:[%s26929_s12 + $0x49c] ss:$80 sps:$4 sm:$0xff]  }
 0xda9   : > { %v25799_v29 = vpop.eup %25798  ;;  %v18831_v34 = vadd.f32 1.0, %v25797_v32  ;;  %18051 = vmatprep.mubr.bf16.mxu0 %v25939_v23  ;;  %18223 = vmatprep.mubr.bf16.mxu1 %v25939_v23  ;;  %v25145_v32 = vld [vmem:[%s26929_s12 + $0x53c] ss:$80 sps:$4 sm:$0xff]   ;;  %v25146_v23 = vld [vmem:[%s26929_s12 + $0x5d0] ss:$80 sps:$4 sm:$0xff]  }
 0xdaa   : > { %v25801_v24 = vpop.eup %25800  ;;  %v18833_v40 = vadd.f32 1.0, %v25799_v29  ;;  %v25148_v29 = vld [vmem:[%s26929_s12 + $0x5d4] ss:$80 sps:$4 sm:$0xff]  }
 0xdab   : > { %v25803_v11 = vpop.eup %25802  ;;  %25812 = vrcp.f32 %v18831_v34  ;;  %v18832_v7 = vadd.f32 1.0, %v25801_v24  ;;  %18022 = vmatpush1.bf16.msra.mxu0 %v25098_v57  ;;  %18194 = vmatpush1.bf16.msra.mxu1 %v25101_v0  ;;  %v25137_v57 = vld [vmem:[%s26929_s12 + $0x498] ss:$80 sps:$4 sm:$0xff]   ;;  %v25142_v0 = vld [vmem:[%s26929_s12 + $0x534] ss:$80 sps:$4 sm:$0xff]  }
 0xdac   : > { %v25805_v35 = vpop.eup %25804  ;;  %25814 = vrcp.f32 %v18833_v40  ;;  %v18834_v55 = vadd.f32 1.0, %v25803_v11  ;;  %18023 = vmatprep.subr.bf16.mxu0 %v25106_v19  ;;  %18195 = vmatprep.subr.bf16.mxu1 %v25109_v17  ;;  %v25140_v19 = vld [vmem:[%s26929_s12 + $0x530] ss:$80 sps:$4 sm:$0xff]   ;;  %v25143_v17 = vld [vmem:[%s26929_s12 + $0x538] ss:$80 sps:$4 sm:$0xff]  }
 0xdad   : > { %v25807_v47 = vpop.eup %25806  ;;  %25816 = vrcp.f32 %v18832_v7  ;;  %v18851_v14 = vadd.f32 1.0, %v25805_v35  ;;  %v25151_v34 = vld [vmem:[%s26929_s12 + $0x5dc] ss:$80 sps:$4 sm:$0xff]   ;;  %v25149_v24 = vld [vmem:[%s26929_s12 + $0x5d8] ss:$80 sps:$4 sm:$0xff]  }
 0xdae   : > { %v25809_v49 = vpop.eup %25808  ;;  %25818 = vrcp.f32 %v18834_v55  ;;  %v18853_v38 = vadd.f32 1.0, %v25807_v47  ;;  %v25154_v40 = vld [vmem:[%s26929_s12 + $0x674] ss:$80 sps:$4 sm:$0xff]   ;;  %v25157_v11 = vld [vmem:[%s26929_s12 + $0x67c] ss:$80 sps:$4 sm:$0xff]  }
 0xdaf   : > { %v25811_v39 = vpop.eup %25810  ;;  %25820 = vrcp.f32 %v18851_v14  ;;  %v18852_v15 = vadd.f32 1.0, %v25809_v49  ;;  %18024 = vmatpush1.bf16.msra.mxu0 %v25104_v10  ;;  %18196 = vmatpush1.bf16.msra.mxu1 %v25107_v30  ;;  %v25152_v7 = vld [vmem:[%s26929_s12 + $0x670] ss:$80 sps:$4 sm:$0xff]   ;;  %v25155_v10 = vld [vmem:[%s26929_s12 + $0x678] ss:$80 sps:$4 sm:$0xff]  }
 0xdb0   : > { %25822 = vrcp.f32 %v18853_v38  ;;  %v18854_v45 = vadd.f32 1.0, %v25811_v39  ;;  %18025 = vmatprep.subr.bf16.mxu0 %v25112_v36  ;;  %18197 = vmatprep.subr.bf16.mxu1 %v25115_v9  ;;  %v25160_v30 = vld [vmem:[%s26929_s12 + $0x714] ss:$80 sps:$4 sm:$0xff]   ;;  %v25163_v35 = vld [vmem:[%s26929_s12 + $0x71c] ss:$80 sps:$4 sm:$0xff]  }
 0xdb1   : > { %25824 = vrcp.f32 %v18852_v15  ;;  %v25158_v55 = vld [vmem:[%s26929_s12 + $0x710] ss:$80 sps:$4 sm:$0xff]   ;;  %v25161_v36 = vld [vmem:[%s26929_s12 + $0x718] ss:$80 sps:$4 sm:$0xff]   ;;  %v25166_v9 = vld [vmem:[%s26929_s12 + $0x7b4] ss:$80 sps:$4 sm:$0xff]  }
 0xdb2   : > { %25826 = vrcp.f32 %v18854_v45  ;;  %v25169_v47 = vld [vmem:[%s26929_s12 + $0x7bc] ss:$80 sps:$4 sm:$0xff]   ;;  %v25164_v14 = vld [vmem:[%s26929_s12 + $0x7b0] ss:$80 sps:$4 sm:$0xff]   ;;  %v25167_v49 = vld [vmem:[%s26929_s12 + $0x7b8] ss:$80 sps:$4 sm:$0xff]  }
 0xdb3   : > { %18026 = vmatpush1.bf16.msra.mxu0 %v25110_v41  ;;  %18198 = vmatpush1.bf16.msra.mxu1 %v25113_v42  ;;  %v25172_v38 = vld [vmem:[%s26929_s12 + $0x854] ss:$80 sps:$4 sm:$0xff]   ;;  %v25175_v39 = vld [vmem:[%s26929_s12 + $0x85c] ss:$80 sps:$4 sm:$0xff]   ;;  %v25170_v15 = vld [vmem:[%s26929_s12 + $0x850] ss:$80 sps:$4 sm:$0xff]  }
 0xdb4   : > { %18027 = vmatprep.subr.bf16.mxu0 %v25118_v46  ;;  %18199 = vmatprep.subr.bf16.mxu1 %v25121_v48  ;;  %v25173_v41 = vld [vmem:[%s26929_s12 + $0x858] ss:$80 sps:$4 sm:$0xff]   ;;  %v25178_v42 = vld [vmem:[%s26929_s12 + $0x8f4] ss:$80 sps:$4 sm:$0xff]   ;;  %v25181_v45 = vld [vmem:[%s26929_s12 + $0x8fc] ss:$80 sps:$4 sm:$0xff]  }
 0xdb5   : > { %v25813_v53 = vpop.eup %25812  ;;  %v25176_v46 = vld [vmem:[%s26929_s12 + $0x8f0] ss:$80 sps:$4 sm:$0xff]   ;;  %v25179_v48 = vld [vmem:[%s26929_s12 + $0x8f8] ss:$80 sps:$4 sm:$0xff]  }
 0xdb6   : > { %v25815_v54 = vpop.eup %25814 }
 0xdb7   : > { %v25817_v58 = vpop.eup %25816  ;;  %18028 = vmatpush1.bf16.msra.mxu0 %v25116_v50  ;;  %18200 = vmatpush1.bf16.msra.mxu1 %v25119_v27  ;;  %v25184_v50 = vld [vmem:[%s26929_s12 + $0x994] ss:$80 sps:$4 sm:$0xff]   ;;  %v25187_v27 = vld [vmem:[%s26929_s12 + $0x99c] ss:$80 sps:$4 sm:$0xff]  }
 0xdb8   : > { %v25819_v1 = vpop.eup %25818  ;;  %v21761_v2 = vpack.c.bf16 %v25817_v58, %v25813_v53  ;;  %18029 = vmatprep.subr.bf16.mxu0 %v25124_v51  ;;  %18201 = vmatprep.subr.bf16.mxu1 %v25127_v52  ;;  %v25182_v51 = vld [vmem:[%s26929_s12 + $0x990] ss:$80 sps:$4 sm:$0xff]   ;;  %v25185_v52 = vld [vmem:[%s26929_s12 + $0x998] ss:$80 sps:$4 sm:$0xff]   ;;  %v25190_v53 = vld [vmem:[%s26929_s12 + $0xa34] ss:$80 sps:$4 sm:$0xff]  }
 0xdb9   : > { %v25821_v25 = vpop.eup %25820  ;;  %v21762_v28 = vpack.c.bf16 %v25819_v1, %v25815_v54  ;;  %v25193_v54 = vld [vmem:[%s26929_s12 + $0xa3c] ss:$80 sps:$4 sm:$0xff]   ;;  %v25188_v58 = vld [vmem:[%s26929_s12 + $0xa30] ss:$80 sps:$4 sm:$0xff]  }
 0xdba   : > { %v25823_v26 = vpop.eup %25822  ;;  %19069 = vst [vmem:[%s26937_s25 + $0x10] sm:$0xff] %v21761_v2  ;;  %v25199_v1 = vld [vmem:[%s26929_s12 + $0xadc] ss:$80 sps:$4 sm:$0xff]   ;;  %v25940_v2 = vld [vmem:[#allocation3] sm:$0xff] }
 0xdbb   : > { %v25825_v4 = vpop.eup %25824  ;;  %19070 = vst [vmem:[%s26937_s25 + $0x18] sm:$0xff] %v21762_v28  ;;  %18030 = vmatpush1.bf16.msra.mxu0 %v25122_v61  ;;  %18202 = vmatpush1.bf16.msra.mxu1 %v25125_v43  ;;  %v25191_v61 = vld [vmem:[%s26929_s12 + $0xa38] ss:$80 sps:$4 sm:$0xff]   ;;  %v25196_v43 = vld [vmem:[%s26929_s12 + $0xad4] ss:$80 sps:$4 sm:$0xff]  }
 0xdbc   : > { %v25827_v12 = vpop.eup %25826  ;;  %v21771_v44 = vpack.c.bf16 %v25825_v4, %v25821_v25  ;;  %18031 = vmatprep.subr.bf16.mxu0 %v25130_v8  ;;  %18203 = vmatprep.subr.bf16.mxu1 %v25133_v31  ;;  %v25194_v8 = vld [vmem:[%s26929_s12 + $0xad0] ss:$80 sps:$4 sm:$0xff]   ;;  %v25197_v31 = vld [vmem:[%s26929_s12 + $0xad8] ss:$80 sps:$4 sm:$0xff]   ;;  %v25202_v25 = vld [vmem:[%s26929_s12 + $0xb74] ss:$80 sps:$4 sm:$0xff]  }
 0xdbd   : > { %v21772_v62 = vpack.c.bf16 %v25827_v12, %v25823_v26  ;;  %v25205_v28 = vld [vmem:[%s26929_s12 + $0xb7c] ss:$80 sps:$4 sm:$0xff]   ;;  %v25200_v4 = vld [vmem:[%s26929_s12 + $0xb70] ss:$80 sps:$4 sm:$0xff]  }
 0xdbe   : > { %19079 = vst [vmem:[%s26937_s25 + $0x60] sm:$0xff] %v21771_v44  ;;  %v25941_v26 = vld [vmem:[#allocation3 + $0x18] sm:$0xff] }
 0xdbf   : > { %19080 = vst [vmem:[%s26937_s25 + $0x68] sm:$0xff] %v21772_v62  ;;  %18032 = vmatpush1.bf16.msra.mxu0 %v25128_v6  ;;  %18204 = vmatpush1.bf16.msra.mxu1 %v25131_v59  ;;  %v25203_v6 = vld [vmem:[%s26929_s12 + $0xb78] ss:$80 sps:$4 sm:$0xff]   ;;  %v25208_v59 = vld [vmem:[%s26929_s12 + $0xc14] ss:$80 sps:$4 sm:$0xff]  }
 0xdc0   : > { %18033 = vmatprep.subr.bf16.mxu0 %v25136_v13  ;;  %18205 = vmatprep.subr.bf16.mxu1 %v25139_v63  ;;  %v25211_v12 = vld [vmem:[%s26929_s12 + $0xc1c] ss:$80 sps:$4 sm:$0xff]   ;;  %v25206_v44 = vld [vmem:[%s26929_s12 + $0xc10] ss:$80 sps:$4 sm:$0xff]   ;;  %v25209_v13 = vld [vmem:[%s26929_s12 + $0xc18] ss:$80 sps:$4 sm:$0xff]  }
 0xdc1   : > { %v25214_v63 = vld [vmem:[%s26929_s12 + $0xcb4] ss:$80 sps:$4 sm:$0xff]   ;;  %v25217_v62 = vld [vmem:[%s26929_s12 + $0xcbc] ss:$80 sps:$4 sm:$0xff]  }
 0xdc3   : > { %18034 = vmatpush1.bf16.msra.mxu0 %v25134_v56  ;;  %18206 = vmatpush1.bf16.msra.mxu1 %v25137_v57  ;;  %v25212_v56 = vld [vmem:[%s26929_s12 + $0xcb0] ss:$80 sps:$4 sm:$0xff]   ;;  %v25215_v57 = vld [vmem:[%s26929_s12 + $0xcb8] ss:$80 sps:$4 sm:$0xff]  }
 0xdc4   : > { %18035 = vmatprep.subr.bf16.mxu0 %v25142_v0  ;;  %18207 = vmatprep.subr.bf16.mxu1 %v25145_v32  ;;  %v25220_v0 = vld [vmem:[%s26929_s12 + $0xd54] ss:$80 sps:$4 sm:$0xff]   ;;  %v25223_v32 = vld [vmem:[%s26929_s12 + $0xd5c] ss:$80 sps:$4 sm:$0xff]  }
 0xdc7   : > { %18036 = vmatpush1.bf16.msra.mxu0 %v25140_v19  ;;  %18208 = vmatpush1.bf16.msra.mxu1 %v25143_v17  ;;  %v25218_v19 = vld [vmem:[%s26929_s12 + $0xd50] ss:$80 sps:$4 sm:$0xff]   ;;  %v25221_v17 = vld [vmem:[%s26929_s12 + $0xd58] ss:$80 sps:$4 sm:$0xff]  }
 0xdc8   : > { %18037 = vmatprep.subr.bf16.mxu0 %v25148_v29  ;;  %18209 = vmatprep.subr.bf16.mxu1 %v25151_v34  ;;  %v25226_v29 = vld [vmem:[%s26929_s12 + $0xdf4] ss:$80 sps:$4 sm:$0xff]   ;;  %v25229_v34 = vld [vmem:[%s26929_s12 + $0xdfc] ss:$80 sps:$4 sm:$0xff]  }
 0xdcb   : > { %18038 = vmatpush1.bf16.msra.mxu0 %v25146_v23  ;;  %18210 = vmatpush1.bf16.msra.mxu1 %v25149_v24  ;;  %v25224_v23 = vld [vmem:[%s26929_s12 + $0xdf0] ss:$80 sps:$4 sm:$0xff]   ;;  %v25227_v24 = vld [vmem:[%s26929_s12 + $0xdf8] ss:$80 sps:$4 sm:$0xff]  }
 0xdcc   : > { %18039 = vmatprep.subr.bf16.mxu0 %v25154_v40  ;;  %18211 = vmatprep.subr.bf16.mxu1 %v25157_v11  ;;  %v25232_v40 = vld [vmem:[%s26929_s12 + $0xe94] ss:$80 sps:$4 sm:$0xff]   ;;  %v25235_v11 = vld [vmem:[%s26929_s12 + $0xe9c] ss:$80 sps:$4 sm:$0xff]  }
 0xdcf   : > { %18040 = vmatpush1.bf16.msra.mxu0 %v25152_v7  ;;  %18212 = vmatpush1.bf16.msra.mxu1 %v25155_v10  ;;  %v25230_v7 = vld [vmem:[%s26929_s12 + $0xe90] ss:$80 sps:$4 sm:$0xff]   ;;  %v25233_v10 = vld [vmem:[%s26929_s12 + $0xe98] ss:$80 sps:$4 sm:$0xff]  }
 0xdd0   : > { %18041 = vmatprep.subr.bf16.mxu0 %v25160_v30  ;;  %18213 = vmatprep.subr.bf16.mxu1 %v25163_v35  ;;  %v25238_v30 = vld [vmem:[%s26929_s12 + $0xf34] ss:$80 sps:$4 sm:$0xff]   ;;  %v25241_v35 = vld [vmem:[%s26929_s12 + $0xf3c] ss:$80 sps:$4 sm:$0xff]  }
 0xdd3   : > { %18042 = vmatpush1.bf16.msra.mxu0 %v25158_v55  ;;  %18214 = vmatpush1.bf16.msra.mxu1 %v25161_v36  ;;  %v25236_v55 = vld [vmem:[%s26929_s12 + $0xf30] ss:$80 sps:$4 sm:$0xff]   ;;  %v25239_v36 = vld [vmem:[%s26929_s12 + $0xf38] ss:$80 sps:$4 sm:$0xff]  }
 0xdd4   : > { %18043 = vmatprep.subr.bf16.mxu0 %v25166_v9  ;;  %18215 = vmatprep.subr.bf16.mxu1 %v25169_v47  ;;  %v25244_v9 = vld [vmem:[%s26929_s12 + $0xfd4] ss:$80 sps:$4 sm:$0xff]   ;;  %v25247_v47 = vld [vmem:[%s26929_s12 + $0xfdc] ss:$80 sps:$4 sm:$0xff]  }
 0xdd7   : > { %18044 = vmatpush1.bf16.msra.mxu0 %v25164_v14  ;;  %18216 = vmatpush1.bf16.msra.mxu1 %v25167_v49  ;;  %v25242_v14 = vld [vmem:[%s26929_s12 + $0xfd0] ss:$80 sps:$4 sm:$0xff]   ;;  %v25245_v49 = vld [vmem:[%s26929_s12 + $0xfd8] ss:$80 sps:$4 sm:$0xff]  }
 0xdd8   : > { %18045 = vmatprep.subr.bf16.mxu0 %v25172_v38  ;;  %18217 = vmatprep.subr.bf16.mxu1 %v25175_v39  ;;  %v25250_v38 = vld [vmem:[%s26929_s12 + $0x1074] ss:$80 sps:$4 sm:$0xff]   ;;  %v25253_v39 = vld [vmem:[%s26929_s12 + $0x107c] ss:$80 sps:$4 sm:$0xff]  }
 0xddb   : > { %18046 = vmatpush1.bf16.msra.mxu0 %v25170_v15  ;;  %18218 = vmatpush1.bf16.msra.mxu1 %v25173_v41  ;;  %v25248_v15 = vld [vmem:[%s26929_s12 + $0x1070] ss:$80 sps:$4 sm:$0xff]   ;;  %v25251_v41 = vld [vmem:[%s26929_s12 + $0x1078] ss:$80 sps:$4 sm:$0xff]  }
 0xddc   : > { %18047 = vmatprep.subr.bf16.mxu0 %v25178_v42  ;;  %18219 = vmatprep.subr.bf16.mxu1 %v25181_v45  ;;  %v25256_v42 = vld [vmem:[%s26929_s12 + $0x1114] ss:$80 sps:$4 sm:$0xff]   ;;  %v25259_v45 = vld [vmem:[%s26929_s12 + $0x111c] ss:$80 sps:$4 sm:$0xff]  }
 0xddf   : > { %18048 = vmatpush1.bf16.msra.mxu0 %v25176_v46  ;;  %18220 = vmatpush1.bf16.msra.mxu1 %v25179_v48  ;;  %v25254_v46 = vld [vmem:[%s26929_s12 + $0x1110] ss:$80 sps:$4 sm:$0xff]   ;;  %v25257_v48 = vld [vmem:[%s26929_s12 + $0x1118] ss:$80 sps:$4 sm:$0xff]  }
 0xde0   : > { %18049 = vmatprep.subr.bf16.mxu0 %v25184_v50  ;;  %18221 = vmatprep.subr.bf16.mxu1 %v25187_v27  ;;  %v25262_v50 = vld [vmem:[%s26929_s12 + $0x11b4] ss:$80 sps:$4 sm:$0xff]   ;;  %v25265_v27 = vld [vmem:[%s26929_s12 + $0x11bc] ss:$80 sps:$4 sm:$0xff]  }
 0xde3   : > { %18050 = vmatpush1.bf16.msra.mxu0 %v25182_v51  ;;  %18222 = vmatpush1.bf16.msra.mxu1 %v25185_v52  ;;  %v25260_v51 = vld [vmem:[%s26929_s12 + $0x11b0] ss:$80 sps:$4 sm:$0xff]   ;;  %v25263_v52 = vld [vmem:[%s26929_s12 + $0x11b8] ss:$80 sps:$4 sm:$0xff]  }
 0xde4   : > { %18062 = vmatprep.subr.bf16.mxu0 %v25190_v53  ;;  %18234 = vmatprep.subr.bf16.mxu1 %v25193_v54  ;;  %v25268_v53 = vld [vmem:[%s26929_s12 + $0x1254] ss:$80 sps:$4 sm:$0xff]   ;;  %v25271_v54 = vld [vmem:[%s26929_s12 + $0x125c] ss:$80 sps:$4 sm:$0xff]  }
 0xde6   : > { %18052 = vmatmul.mubr.bf16.vlgmr.msra.gmra.mrb[12].mxu0 %v25940_v2  ;;  %18224 = vmatmul.mubr.bf16.vlgmr.msra.gmra.mrb[12].mxu1 %v25940_v2  ;;  %v25272_v2 = vld [vmem:[%s26929_s12 + $0x12f0] ss:$80 sps:$4 sm:$0xff]  }
 0xde7   : > { %18063 = vmatpush1.bf16.msra.mxu0 %v25188_v58  ;;  %18235 = vmatpush1.bf16.msra.mxu1 %v25191_v61  ;;  %v25266_v58 = vld [vmem:[%s26929_s12 + $0x1250] ss:$80 sps:$4 sm:$0xff]   ;;  %v25269_v61 = vld [vmem:[%s26929_s12 + $0x1258] ss:$80 sps:$4 sm:$0xff]  }
 0xde8   : > { %18064 = vmatprep.subr.bf16.mxu0 %v25196_v43  ;;  %18236 = vmatprep.subr.bf16.mxu1 %v25199_v1  ;;  %v25274_v43 = vld [vmem:[%s26929_s12 + $0x12f4] ss:$80 sps:$4 sm:$0xff]   ;;  %v25277_v1 = vld [vmem:[%s26929_s12 + $0x12fc] ss:$80 sps:$4 sm:$0xff]  }
 0xde9   : > { %18094 = vmatprep.mubr.bf16.mxu0 %v25941_v26  ;;  %18266 = vmatprep.mubr.bf16.mxu1 %v25941_v26  ;;  %v25281_v26 = vld [vmem:[%s26929_s12 + $0x1398] ss:$80 sps:$4 sm:$0xff]  }
 0xdeb   : > { %18065 = vmatpush1.bf16.msra.mxu0 %v25194_v8  ;;  %18237 = vmatpush1.bf16.msra.mxu1 %v25197_v31  ;;  %v25275_v8 = vld [vmem:[%s26929_s12 + $0x12f8] ss:$80 sps:$4 sm:$0xff]   ;;  %v25280_v31 = vld [vmem:[%s26929_s12 + $0x1394] ss:$80 sps:$4 sm:$0xff]  }
 0xdec   : > { %18066 = vmatprep.subr.bf16.mxu0 %v25202_v25  ;;  %18238 = vmatprep.subr.bf16.mxu1 %v25205_v28  ;;  %v25283_v25 = vld [vmem:[%s26929_s12 + $0x139c] ss:$80 sps:$4 sm:$0xff]   ;;  %v25278_v28 = vld [vmem:[%s26929_s12 + $0x1390] ss:$80 sps:$4 sm:$0xff]  }
 0xdef   : > { %18067 = vmatpush1.bf16.msra.mxu0 %v25200_v4  ;;  %18239 = vmatpush1.bf16.msra.mxu1 %v25203_v6  ;;  %v25286_v4 = vld [vmem:[%s26929_s12 + $0x1434] ss:$80 sps:$4 sm:$0xff]   ;;  %v25289_v6 = vld [vmem:[%s26929_s12 + $0x143c] ss:$80 sps:$4 sm:$0xff]  }
 0xdf0   : > { %18068 = vmatprep.subr.bf16.mxu0 %v25208_v59  ;;  %18240 = vmatprep.subr.bf16.mxu1 %v25211_v12  ;;  %v25284_v59 = vld [vmem:[%s26929_s12 + $0x1430] ss:$80 sps:$4 sm:$0xff]   ;;  %v25287_v12 = vld [vmem:[%s26929_s12 + $0x1438] ss:$80 sps:$4 sm:$0xff]  }
 0xdf3   : > { %18069 = vmatpush1.bf16.msra.mxu0 %v25206_v44  ;;  %18241 = vmatpush1.bf16.msra.mxu1 %v25209_v13  ;;  %v25292_v44 = vld [vmem:[%s26929_s12 + $0x14d4] ss:$80 sps:$4 sm:$0xff]   ;;  %v25295_v13 = vld [vmem:[%s26929_s12 + $0x14dc] ss:$80 sps:$4 sm:$0xff]  }
 0xdf4   : > { %18070 = vmatprep.subr.bf16.mxu0 %v25214_v63  ;;  %18242 = vmatprep.subr.bf16.mxu1 %v25217_v62  ;;  %v25942_v63 = vld [vmem:[#allocation3 + $0x10] sm:$0xff] }
 0xdf5   : > { %v25290_v62 = vld [vmem:[%s26929_s12 + $0x14d0] ss:$80 sps:$4 sm:$0xff]  }
 0xdf7   : > { %18071 = vmatpush1.bf16.msra.mxu0 %v25212_v56  ;;  %18243 = vmatpush1.bf16.msra.mxu1 %v25215_v57  ;;  %v25293_v56 = vld [vmem:[%s26929_s12 + $0x14d8] ss:$80 sps:$4 sm:$0xff]   ;;  %v25298_v57 = vld [vmem:[%s26929_s12 + $0x1574] ss:$80 sps:$4 sm:$0xff]  }
 0xdf8   : > { %18072 = vmatprep.subr.bf16.mxu0 %v25220_v0  ;;  %18244 = vmatprep.subr.bf16.mxu1 %v25223_v32  ;;  %v25301_v0 = vld [vmem:[%s26929_s12 + $0x157c] ss:$80 sps:$4 sm:$0xff]  }
 0xdf9   : > { %v25943_v32 = vld [vmem:[#allocation3 + $0x28] sm:$0xff] }
 0xdfb   : > { %18073 = vmatpush1.bf16.msra.mxu0 %v25218_v19  ;;  %18245 = vmatpush1.bf16.msra.mxu1 %v25221_v17  ;;  %v25296_v19 = vld [vmem:[%s26929_s12 + $0x1570] ss:$80 sps:$4 sm:$0xff]   ;;  %v25299_v17 = vld [vmem:[%s26929_s12 + $0x1578] ss:$80 sps:$4 sm:$0xff]  }
 0xdfc   : > { %18074 = vmatprep.subr.bf16.mxu0 %v25226_v29  ;;  %18246 = vmatprep.subr.bf16.mxu1 %v25229_v34  ;;  %v25304_v29 = vld [vmem:[%s26929_s12 + $0x1614] ss:$80 sps:$4 sm:$0xff]   ;;  %v25307_v34 = vld [vmem:[%s26929_s12 + $0x161c] ss:$80 sps:$4 sm:$0xff]  }
 0xdff   : > { %18075 = vmatpush1.bf16.msra.mxu0 %v25224_v23  ;;  %18247 = vmatpush1.bf16.msra.mxu1 %v25227_v24  ;;  %v25302_v23 = vld [vmem:[%s26929_s12 + $0x1610] ss:$80 sps:$4 sm:$0xff]   ;;  %v25305_v24 = vld [vmem:[%s26929_s12 + $0x1618] ss:$80 sps:$4 sm:$0xff]  }
 0xe00   : > { %18076 = vmatprep.subr.bf16.mxu0 %v25232_v40  ;;  %18248 = vmatprep.subr.bf16.mxu1 %v25235_v11  ;;  %v25310_v40 = vld [vmem:[%s26929_s12 + $0x16b4] ss:$80 sps:$4 sm:$0xff]   ;;  %v25313_v11 = vld [vmem:[%s26929_s12 + $0x16bc] ss:$80 sps:$4 sm:$0xff]  }
 0xe03   : > { %18077 = vmatpush1.bf16.msra.mxu0 %v25230_v7  ;;  %18249 = vmatpush1.bf16.msra.mxu1 %v25233_v10  ;;  %v25308_v7 = vld [vmem:[%s26929_s12 + $0x16b0] ss:$80 sps:$4 sm:$0xff]   ;;  %v25311_v10 = vld [vmem:[%s26929_s12 + $0x16b8] ss:$80 sps:$4 sm:$0xff]  }
 0xe04   : > { %18078 = vmatprep.subr.bf16.mxu0 %v25238_v30  ;;  %18250 = vmatprep.subr.bf16.mxu1 %v25241_v35  ;;  %v25316_v30 = vld [vmem:[%s26929_s12 + $0x1754] ss:$80 sps:$4 sm:$0xff]   ;;  %v25319_v35 = vld [vmem:[%s26929_s12 + $0x175c] ss:$80 sps:$4 sm:$0xff]  }
 0xe07   : > { %18079 = vmatpush1.bf16.msra.mxu0 %v25236_v55  ;;  %18251 = vmatpush1.bf16.msra.mxu1 %v25239_v36  ;;  %v25314_v55 = vld [vmem:[%s26929_s12 + $0x1750] ss:$80 sps:$4 sm:$0xff]   ;;  %v25317_v36 = vld [vmem:[%s26929_s12 + $0x1758] ss:$80 sps:$4 sm:$0xff]  }
 0xe08   : > { %18080 = vmatprep.subr.bf16.mxu0 %v25244_v9  ;;  %18252 = vmatprep.subr.bf16.mxu1 %v25247_v47  ;;  %v25322_v9 = vld [vmem:[%s26929_s12 + $0x17f4] ss:$80 sps:$4 sm:$0xff]   ;;  %v25325_v47 = vld [vmem:[%s26929_s12 + $0x17fc] ss:$80 sps:$4 sm:$0xff]  }
 0xe0b   : > { %18081 = vmatpush1.bf16.msra.mxu0 %v25242_v14  ;;  %18253 = vmatpush1.bf16.msra.mxu1 %v25245_v49  ;;  %v25320_v14 = vld [vmem:[%s26929_s12 + $0x17f0] ss:$80 sps:$4 sm:$0xff]   ;;  %v25323_v49 = vld [vmem:[%s26929_s12 + $0x17f8] ss:$80 sps:$4 sm:$0xff]  }
 0xe0c   : > { %18082 = vmatprep.subr.bf16.mxu0 %v25250_v38  ;;  %18254 = vmatprep.subr.bf16.mxu1 %v25253_v39  ;;  %v25328_v38 = vld [vmem:[%s26929_s12 + $0x1894] ss:$80 sps:$4 sm:$0xff]   ;;  %v25331_v39 = vld [vmem:[%s26929_s12 + $0x189c] ss:$80 sps:$4 sm:$0xff]  }
 0xe0f   : > { %18083 = vmatpush1.bf16.msra.mxu0 %v25248_v15  ;;  %18255 = vmatpush1.bf16.msra.mxu1 %v25251_v41  ;;  %v25326_v15 = vld [vmem:[%s26929_s12 + $0x1890] ss:$80 sps:$4 sm:$0xff]   ;;  %v25329_v41 = vld [vmem:[%s26929_s12 + $0x1898] ss:$80 sps:$4 sm:$0xff]  }
 0xe10   : > { %18084 = vmatprep.subr.bf16.mxu0 %v25256_v42  ;;  %18256 = vmatprep.subr.bf16.mxu1 %v25259_v45  ;;  %v25334_v42 = vld [vmem:[%s26929_s12 + $0x1934] ss:$80 sps:$4 sm:$0xff]   ;;  %v25337_v45 = vld [vmem:[%s26929_s12 + $0x193c] ss:$80 sps:$4 sm:$0xff]  }
 0xe13   : > { %18085 = vmatpush1.bf16.msra.mxu0 %v25254_v46  ;;  %18257 = vmatpush1.bf16.msra.mxu1 %v25257_v48  ;;  %v25332_v46 = vld [vmem:[%s26929_s12 + $0x1930] ss:$80 sps:$4 sm:$0xff]   ;;  %v25335_v48 = vld [vmem:[%s26929_s12 + $0x1938] ss:$80 sps:$4 sm:$0xff]  }
 0xe14   : > { %18086 = vmatprep.subr.bf16.mxu0 %v25262_v50  ;;  %18258 = vmatprep.subr.bf16.mxu1 %v25265_v27  ;;  %v25340_v50 = vld [vmem:[%s26929_s12 + $0x19d4] ss:$80 sps:$4 sm:$0xff]   ;;  %v25343_v27 = vld [vmem:[%s26929_s12 + $0x19dc] ss:$80 sps:$4 sm:$0xff]  }
 0xe17   : > { %18087 = vmatpush1.bf16.msra.mxu0 %v25260_v51  ;;  %18259 = vmatpush1.bf16.msra.mxu1 %v25263_v52  ;;  %v25338_v51 = vld [vmem:[%s26929_s12 + $0x19d0] ss:$80 sps:$4 sm:$0xff]   ;;  %v25341_v52 = vld [vmem:[%s26929_s12 + $0x19d8] ss:$80 sps:$4 sm:$0xff]  }
 0xe18   : > { %18088 = vmatprep.subr.bf16.mxu0 %v25268_v53  ;;  %18260 = vmatprep.subr.bf16.mxu1 %v25271_v54  ;;  %v25346_v53 = vld [vmem:[%s26929_s12 + $0x1a74] ss:$80 sps:$4 sm:$0xff]   ;;  %v25349_v54 = vld [vmem:[%s26929_s12 + $0x1a7c] ss:$80 sps:$4 sm:$0xff]  }
 0xe1b   : > { %18089 = vmatpush1.bf16.msra.mxu0 %v25266_v58  ;;  %18261 = vmatpush1.bf16.msra.mxu1 %v25269_v61  ;;  %v25344_v58 = vld [vmem:[%s26929_s12 + $0x1a70] ss:$80 sps:$4 sm:$0xff]   ;;  %v25347_v61 = vld [vmem:[%s26929_s12 + $0x1a78] ss:$80 sps:$4 sm:$0xff]  }
 0xe1c   : > { %18090 = vmatprep.subr.bf16.mxu0 %v25274_v43  ;;  %18262 = vmatprep.subr.bf16.mxu1 %v25277_v1  ;;  %v25352_v43 = vld [vmem:[%s26929_s12 + $0x1b14] ss:$80 sps:$4 sm:$0xff]   ;;  %v25355_v1 = vld [vmem:[%s26929_s12 + $0x1b1c] ss:$80 sps:$4 sm:$0xff]  }
 0xe1f   : > { %18091 = vmatpush1.bf16.msra.mxu0 %v25272_v2  ;;  %18263 = vmatpush1.bf16.msra.mxu1 %v25275_v8  ;;  %v25350_v2 = vld [vmem:[%s26929_s12 + $0x1b10] ss:$80 sps:$4 sm:$0xff]   ;;  %v25353_v8 = vld [vmem:[%s26929_s12 + $0x1b18] ss:$80 sps:$4 sm:$0xff]  }
 0xe20   : > { %18092 = vmatprep.subr.bf16.mxu0 %v25280_v31  ;;  %18264 = vmatprep.subr.bf16.mxu1 %v25283_v25  ;;  %v25358_v31 = vld [vmem:[%s26929_s12 + $0x1bb4] ss:$80 sps:$4 sm:$0xff]   ;;  %v25361_v25 = vld [vmem:[%s26929_s12 + $0x1bbc] ss:$80 sps:$4 sm:$0xff]  }
 0xe23   : > { %18093 = vmatpush1.bf16.msra.mxu0 %v25278_v28  ;;  %18265 = vmatpush1.bf16.msra.mxu1 %v25281_v26  ;;  %v25356_v28 = vld [vmem:[%s26929_s12 + $0x1bb0] ss:$80 sps:$4 sm:$0xff]   ;;  %v25359_v26 = vld [vmem:[%s26929_s12 + $0x1bb8] ss:$80 sps:$4 sm:$0xff]  }
 0xe24   : > { %18105 = vmatprep.subr.bf16.mxu0 %v25286_v4  ;;  %18277 = vmatprep.subr.bf16.mxu1 %v25289_v6  ;;  %v25364_v4 = vld [vmem:[%s26929_s12 + $0x1c54] ss:$80 sps:$4 sm:$0xff]   ;;  %v25367_v6 = vld [vmem:[%s26929_s12 + $0x1c5c] ss:$80 sps:$4 sm:$0xff]  }
 0xe26   : > { %18095 = vmatmul.mubr.bf16.vlgmr.msra.gmra.mrb[12].mxu0 %v25942_v63  ;;  %18267 = vmatmul.mubr.bf16.vlgmr.msra.gmra.mrb[12].mxu1 %v25942_v63  ;;  %v25368_v63 = vld [vmem:[%s26929_s12 + $0x1cf0] ss:$80 sps:$4 sm:$0xff]  }
 0xe27   : > { %18106 = vmatpush1.bf16.msra.mxu0 %v25284_v59  ;;  %18278 = vmatpush1.bf16.msra.mxu1 %v25287_v12  ;;  %v25362_v59 = vld [vmem:[%s26929_s12 + $0x1c50] ss:$80 sps:$4 sm:$0xff]   ;;  %v25365_v12 = vld [vmem:[%s26929_s12 + $0x1c58] ss:$80 sps:$4 sm:$0xff]  }
 0xe28   : > { %18107 = vmatprep.subr.bf16.mxu0 %v25292_v44  ;;  %18279 = vmatprep.subr.bf16.mxu1 %v25295_v13  ;;  %v25370_v44 = vld [vmem:[%s26929_s12 + $0x1cf4] ss:$80 sps:$4 sm:$0xff]   ;;  %v25373_v13 = vld [vmem:[%s26929_s12 + $0x1cfc] ss:$80 sps:$4 sm:$0xff]  }
 0xe29   : > { %18137 = vmatprep.mubr.bf16.mxu0 %v25943_v32  ;;  %18309 = vmatprep.mubr.bf16.mxu1 %v25943_v32  ;;  %v25377_v32 = vld [vmem:[%s26929_s12 + $0x1d98] ss:$80 sps:$4 sm:$0xff]  }
 0xe2b   : > { %18108 = vmatpush1.bf16.msra.mxu0 %v25290_v62  ;;  %18280 = vmatpush1.bf16.msra.mxu1 %v25293_v56  ;;  %v25371_v62 = vld [vmem:[%s26929_s12 + $0x1cf8] ss:$80 sps:$4 sm:$0xff]   ;;  %v25376_v56 = vld [vmem:[%s26929_s12 + $0x1d94] ss:$80 sps:$4 sm:$0xff]  }
 0xe2c   : > { %18109 = vmatprep.subr.bf16.mxu0 %v25298_v57  ;;  %18281 = vmatprep.subr.bf16.mxu1 %v25301_v0  ;;  %v25379_v57 = vld [vmem:[%s26929_s12 + $0x1d9c] ss:$80 sps:$4 sm:$0xff]   ;;  %v25374_v0 = vld [vmem:[%s26929_s12 + $0x1d90] ss:$80 sps:$4 sm:$0xff]  }
 0xe2f   : > { %18110 = vmatpush1.bf16.msra.mxu0 %v25296_v19  ;;  %18282 = vmatpush1.bf16.msra.mxu1 %v25299_v17  ;;  %v25382_v19 = vld [vmem:[%s26929_s12 + $0x1e34] ss:$80 sps:$4 sm:$0xff]   ;;  %v25385_v17 = vld [vmem:[%s26929_s12 + $0x1e3c] ss:$80 sps:$4 sm:$0xff]  }
 0xe30   : > { %18111 = vmatprep.subr.bf16.mxu0 %v25304_v29  ;;  %18283 = vmatprep.subr.bf16.mxu1 %v25307_v34  ;;  %v25380_v29 = vld [vmem:[%s26929_s12 + $0x1e30] ss:$80 sps:$4 sm:$0xff]   ;;  %v25383_v34 = vld [vmem:[%s26929_s12 + $0x1e38] ss:$80 sps:$4 sm:$0xff]  }
 0xe33   : > { %18112 = vmatpush1.bf16.msra.mxu0 %v25302_v23  ;;  %18284 = vmatpush1.bf16.msra.mxu1 %v25305_v24  ;;  %v25388_v23 = vld [vmem:[%s26929_s12 + $0x1ed4] ss:$80 sps:$4 sm:$0xff]   ;;  %v25391_v24 = vld [vmem:[%s26929_s12 + $0x1edc] ss:$80 sps:$4 sm:$0xff]  }
 0xe34   : > { %18113 = vmatprep.subr.bf16.mxu0 %v25310_v40  ;;  %18285 = vmatprep.subr.bf16.mxu1 %v25313_v11  ;;  %v25944_v40 = vld [vmem:[#allocation3 + $0x20] sm:$0xff] }
 0xe35   : > { %v25386_v11 = vld [vmem:[%s26929_s12 + $0x1ed0] ss:$80 sps:$4 sm:$0xff]  }
 0xe37   : > { %18114 = vmatpush1.bf16.msra.mxu0 %v25308_v7  ;;  %18286 = vmatpush1.bf16.msra.mxu1 %v25311_v10  ;;  %v25389_v7 = vld [vmem:[%s26929_s12 + $0x1ed8] ss:$80 sps:$4 sm:$0xff]   ;;  %v25394_v10 = vld [vmem:[%s26929_s12 + $0x1f74] ss:$80 sps:$4 sm:$0xff]  }
 0xe38   : > { %18115 = vmatprep.subr.bf16.mxu0 %v25316_v30  ;;  %18287 = vmatprep.subr.bf16.mxu1 %v25319_v35  ;;  %v25397_v30 = vld [vmem:[%s26929_s12 + $0x1f7c] ss:$80 sps:$4 sm:$0xff]   ;;  %v25392_v35 = vld [vmem:[%s26929_s12 + $0x1f70] ss:$80 sps:$4 sm:$0xff]  }
 0xe3b   : > { %18116 = vmatpush1.bf16.msra.mxu0 %v25314_v55  ;;  %18288 = vmatpush1.bf16.msra.mxu1 %v25317_v36  ;;  %v25395_v55 = vld [vmem:[%s26929_s12 + $0x1f78] ss:$80 sps:$4 sm:$0xff]   ;;  %v25400_v36 = vld [vmem:[%s26929_s12 + $0x2014] ss:$80 sps:$4 sm:$0xff]  }
 0xe3c   : > { %18117 = vmatprep.subr.bf16.mxu0 %v25322_v9  ;;  %18289 = vmatprep.subr.bf16.mxu1 %v25325_v47  ;;  %v25403_v9 = vld [vmem:[%s26929_s12 + $0x201c] ss:$80 sps:$4 sm:$0xff]   ;;  %v25398_v47 = vld [vmem:[%s26929_s12 + $0x2010] ss:$80 sps:$4 sm:$0xff]  }
 0xe3f   : > { %18118 = vmatpush1.bf16.msra.mxu0 %v25320_v14  ;;  %18290 = vmatpush1.bf16.msra.mxu1 %v25323_v49  ;;  %v25401_v14 = vld [vmem:[%s26929_s12 + $0x2018] ss:$80 sps:$4 sm:$0xff]   ;;  %v25406_v49 = vld [vmem:[%s26929_s12 + $0x20b4] ss:$80 sps:$4 sm:$0xff]  }
 0xe40   : > { %18119 = vmatprep.subr.bf16.mxu0 %v25328_v38  ;;  %18291 = vmatprep.subr.bf16.mxu1 %v25331_v39  ;;  %v25409_v38 = vld [vmem:[%s26929_s12 + $0x20bc] ss:$80 sps:$4 sm:$0xff]   ;;  %v25404_v39 = vld [vmem:[%s26929_s12 + $0x20b0] ss:$80 sps:$4 sm:$0xff]  }
 0xe43   : > { %18120 = vmatpush1.bf16.msra.mxu0 %v25326_v15  ;;  %18292 = vmatpush1.bf16.msra.mxu1 %v25329_v41  ;;  %v25407_v15 = vld [vmem:[%s26929_s12 + $0x20b8] ss:$80 sps:$4 sm:$0xff]  }
 0xe44   : > { %18121 = vmatprep.subr.bf16.mxu0 %v25334_v42  ;;  %18293 = vmatprep.subr.bf16.mxu1 %v25337_v45  ;;  %v11282_v41 = vld [vmem:[%s26935_s14 + $0x8] sm:$0xff]  ;;  %v25412_v42 = vld [vmem:[%s26929_s12 + $0x2154] ss:$80 sps:$4 sm:$0xff]  }
 0xe45   : > { %v25415_v45 = vld [vmem:[%s26929_s12 + $0x215c] ss:$80 sps:$4 sm:$0xff]  }
 0xe47   : > { %18122 = vmatpush1.bf16.msra.mxu0 %v25332_v46  ;;  %18294 = vmatpush1.bf16.msra.mxu1 %v25335_v48  ;;  %v11322_v46 = vrot.slane %v11282_v41, %v28517_v18  ;;  %v11330_v48 = vrot.slane %v11282_v41, %v28520_v3 }
 0xe48   : > { %18123 = vmatprep.subr.bf16.mxu0 %v25340_v50  ;;  %18295 = vmatprep.subr.bf16.mxu1 %v25343_v27  ;;  %v11326_v50 = vrot.slane %v11282_v41, %v28525_v21  ;;  %v11334_v27 = vrot.slane %v11282_v41, %v28528_v37 }
 0xe4b   : > { %18124 = vmatpush1.bf16.msra.mxu0 %v25338_v51  ;;  %18296 = vmatpush1.bf16.msra.mxu1 %v25341_v52  ;;  %v25410_v51 = vld [vmem:[%s26929_s12 + $0x2150] ss:$80 sps:$4 sm:$0xff]   ;;  %v25413_v52 = vld [vmem:[%s26929_s12 + $0x2158] ss:$80 sps:$4 sm:$0xff]  }
 0xe4c   : > { %18125 = vmatprep.subr.bf16.mxu0 %v25346_v53  ;;  %18297 = vmatprep.subr.bf16.mxu1 %v25349_v54  ;;  %v25418_v53 = vld [vmem:[%s26929_s12 + $0x21f4] ss:$80 sps:$4 sm:$0xff]   ;;  %v25421_v54 = vld [vmem:[%s26929_s12 + $0x21fc] ss:$80 sps:$4 sm:$0xff]  }
 0xe4f   : > { %18126 = vmatpush1.bf16.msra.mxu0 %v25344_v58  ;;  %18298 = vmatpush1.bf16.msra.mxu1 %v25347_v61 }
 0xe50   : > { %18127 = vmatprep.subr.bf16.mxu0 %v25352_v43  ;;  %18299 = vmatprep.subr.bf16.mxu1 %v25355_v1 }
 0xe53   : > { %18128 = vmatpush1.bf16.msra.mxu0 %v25350_v2  ;;  %18300 = vmatpush1.bf16.msra.mxu1 %v25353_v8 }
 0xe54   : > { %18129 = vmatprep.subr.bf16.mxu0 %v25358_v31  ;;  %18301 = vmatprep.subr.bf16.mxu1 %v25361_v25  ;;  %v25416_v31 = vld [vmem:[%s26929_s12 + $0x21f0] ss:$80 sps:$4 sm:$0xff]   ;;  %v25419_v25 = vld [vmem:[%s26929_s12 + $0x21f8] ss:$80 sps:$4 sm:$0xff]  }
 0xe57   : > { %18130 = vmatpush1.bf16.msra.mxu0 %v25356_v28  ;;  %18302 = vmatpush1.bf16.msra.mxu1 %v25359_v26 }
 0xe58   : > { %18131 = vmatprep.subr.bf16.mxu0 %v25364_v4  ;;  %18303 = vmatprep.subr.bf16.mxu1 %v25367_v6 }
 0xe5b   : > { %18132 = vmatpush1.bf16.msra.mxu0 %v25362_v59  ;;  %18304 = vmatpush1.bf16.msra.mxu1 %v25365_v12  ;;  %v25424_v59 = vld [vmem:[%s26929_s12 + $0x2294] ss:$80 sps:$4 sm:$0xff]   ;;  %v25427_v12 = vld [vmem:[%s26929_s12 + $0x229c] ss:$80 sps:$4 sm:$0xff]  }
 0xe5c   : > { %18133 = vmatprep.subr.bf16.mxu0 %v25370_v44  ;;  %18305 = vmatprep.subr.bf16.mxu1 %v25373_v13 }
 0xe5f   : > { %18134 = vmatpush1.bf16.msra.mxu0 %v25368_v63  ;;  %18306 = vmatpush1.bf16.msra.mxu1 %v25371_v62 }
 0xe60   : > { %18135 = vmatprep.subr.bf16.mxu0 %v25376_v56  ;;  %18307 = vmatprep.subr.bf16.mxu1 %v25379_v57 }
 0xe63   : > { %18136 = vmatpush1.bf16.msra.mxu0 %v25374_v0  ;;  %18308 = vmatpush1.bf16.msra.mxu1 %v25377_v32 }
 0xe64   : > { %18148 = vmatprep.subr.bf16.mxu0 %v25382_v19  ;;  %18320 = vmatprep.subr.bf16.mxu1 %v25385_v17 }
 0xe66   : > { %18138 = vmatmul.mubr.bf16.vlgmr.msra.gmra.mrb[12].mxu0 %v25944_v40  ;;  %18310 = vmatmul.mubr.bf16.vlgmr.msra.gmra.mrb[12].mxu1 %v25944_v40 }
 0xe67   : > { %18149 = vmatpush1.bf16.msra.mxu0 %v25380_v29  ;;  %18321 = vmatpush1.bf16.msra.mxu1 %v25383_v34 }
 0xe68   : > { %18150 = vmatprep.subr.bf16.mxu0 %v25388_v23  ;;  %18322 = vmatprep.subr.bf16.mxu1 %v25391_v24  ;;  %v25422_v23 = vld [vmem:[%s26929_s12 + $0x2290] ss:$80 sps:$4 sm:$0xff]   ;;  %v25425_v24 = vld [vmem:[%s26929_s12 + $0x2298] ss:$80 sps:$4 sm:$0xff]  }
 0xe69   : > { %18180 = vmatprep.mubr.bf16.mxu0 %v26398_v33  ;;  %18352 = vmatprep.mubr.bf16.mxu1 %v26398_v33 }
 0xe6b   : > { %18151 = vmatpush1.bf16.msra.mxu0 %v25386_v11  ;;  %18323 = vmatpush1.bf16.msra.mxu1 %v25389_v7  ;;  %v25430_v11 = vld [vmem:[%s26929_s12 + $0x44] ss:$80 sps:$4 sm:$0xff]   ;;  %v25433_v7 = vld [vmem:[%s26929_s12 + $0x4c] ss:$80 sps:$4 sm:$0xff]  }
 0xe6c   : > { %18152 = vmatprep.subr.bf16.mxu0 %v25394_v10  ;;  %18324 = vmatprep.subr.bf16.mxu1 %v25397_v30  ;;  %v25428_v30 = vld [vmem:[%s26929_s12 + $0x40] ss:$80 sps:$4 sm:$0xff]  }
 0xe6f   : > { %18153 = vmatpush1.bf16.msra.mxu0 %v25392_v35  ;;  %18325 = vmatpush1.bf16.msra.mxu1 %v25395_v55  ;;  %v25431_v35 = vld [vmem:[%s26929_s12 + $0x48] ss:$80 sps:$4 sm:$0xff]   ;;  %v25436_v55 = vld [vmem:[%s26929_s12 + $0xe4] ss:$80 sps:$4 sm:$0xff]  }
 0xe70   : > { %18154 = vmatprep.subr.bf16.mxu0 %v25400_v36  ;;  %18326 = vmatprep.subr.bf16.mxu1 %v25403_v9  ;;  %v25439_v36 = vld [vmem:[%s26929_s12 + $0xec] ss:$80 sps:$4 sm:$0xff]   ;;  %v25945_v9 = vld [vmem:[#allocation3 + $0x30] sm:$0xff] }
 0xe73   : > { %18155 = vmatpush1.bf16.msra.mxu0 %v25398_v47  ;;  %18327 = vmatpush1.bf16.msra.mxu1 %v25401_v14  ;;  %v25434_v47 = vld [vmem:[%s26929_s12 + $0xe0] ss:$80 sps:$4 sm:$0xff]   ;;  %v25437_v14 = vld [vmem:[%s26929_s12 + $0xe8] ss:$80 sps:$4 sm:$0xff]  }
 0xe74   : > { %18156 = vmatprep.subr.bf16.mxu0 %v25406_v49  ;;  %18328 = vmatprep.subr.bf16.mxu1 %v25409_v38  ;;  %v25442_v38 = vld [vmem:[%s26929_s12 + $0x184] ss:$80 sps:$4 sm:$0xff]  }
 0xe77   : > { %18157 = vmatpush1.bf16.msra.mxu0 %v25404_v39  ;;  %18329 = vmatpush1.bf16.msra.mxu1 %v25407_v15  ;;  %v25445_v39 = vld [vmem:[%s26929_s12 + $0x18c] ss:$80 sps:$4 sm:$0xff]  }
 0xe78   : > { %18158 = vmatprep.subr.bf16.mxu0 %v25412_v42  ;;  %18330 = vmatprep.subr.bf16.mxu1 %v25415_v45  ;;  %v25946_v42 = vld [vmem:[#allocation3 + $0x8] sm:$0xff] }
 0xe79   : > { %v17838_v58 = vpop.f32.mrb[8].mxu0  ;;  %v18010_v61 = vpop.f32.mrb[8].mxu1 }
 0xe7a   : > { %v22116_v43 = vadd.f32 %v17838_v58, %v11322_v46  ;;  %v22120_v1 = vadd.f32 %v18010_v61, %v11330_v48  ;;  %v17840_v2 = vpop.f32.mrb[9].mxu0  ;;  %v18012_v8 = vpop.f32.mrb[9].mxu1  ;;  %v25451_v58 = vld [vmem:[%s26929_s12 + $0x22c] ss:$80 sps:$4 sm:$0xff]  }
 0xe7b   : > { %v22117_v28 = vadd.f32 %v17840_v2, %v11326_v50  ;;  %v22121_v26 = vadd.f32 %v18012_v8, %v11334_v27  ;;  %v17842_v4 = vpop.f32.mrb[10].mxu0  ;;  %v18014_v6 = vpop.f32.mrb[10].mxu1  ;;  %18159 = vmatpush1.bf16.msra.mxu0 %v25410_v51  ;;  %18331 = vmatpush1.bf16.msra.mxu1 %v25413_v52  ;;  %v25443_v51 = vld [vmem:[%s26929_s12 + $0x188] ss:$80 sps:$4 sm:$0xff]  }
 0xe7c   : > { %v21701_v44 = vmul.f32 -1.442695, %v22116_v43  ;;  %v21703_v13 = vmul.f32 -1.442695, %v22120_v1  ;;  %v22118_v63 = vadd.f32 %v17842_v4, %v11322_v46  ;;  %v22122_v62 = vadd.f32 %v18014_v6, %v11330_v48  ;;  %v17844_v56 = vpop.f32.mrb[11].mxu0  ;;  %v18016_v57 = vpop.f32.mrb[11].mxu1  ;;  %18160 = vmatprep.subr.bf16.mxu0 %v25418_v53  ;;  %18332 = vmatprep.subr.bf16.mxu1 %v25421_v54 }
 0xe7d   : > { %v21702_v0 = vmul.f32 -1.442695, %v22117_v28  ;;  %v21704_v32 = vmul.f32 -1.442695, %v22121_v26  ;;  %v22119_v19 = vadd.f32 %v17844_v56, %v11326_v50  ;;  %v22123_v17 = vadd.f32 %v18016_v57, %v11334_v27  ;;  %v25440_v27 = vld [vmem:[%s26929_s12 + $0x180] ss:$80 sps:$4 sm:$0xff]  }
 0xe7e   : > { %25828 = vpow2.f32 %v21701_v44  ;;  %v21721_v29 = vmul.f32 -1.442695, %v22118_v63  ;;  %v21723_v34 = vmul.f32 -1.442695, %v22122_v62  ;;  %v25448_v54 = vld [vmem:[%s26929_s12 + $0x224] ss:$80 sps:$4 sm:$0xff]  }
 0xe7f   : > { %25830 = vpow2.f32 %v21703_v13  ;;  %18161 = vmatpush1.bf16.msra.mxu0 %v25416_v31  ;;  %18333 = vmatpush1.bf16.msra.mxu1 %v25419_v25  ;;  %v21722_v40 = vmul.f32 -1.442695, %v22119_v19  ;;  %v21724_v10 = vmul.f32 -1.442695, %v22123_v17  ;;  %v25446_v25 = vld [vmem:[%s26929_s12 + $0x220] ss:$80 sps:$4 sm:$0xff]  }
 0xe80   : > { %25832 = vpow2.f32 %v21702_v0  ;;  %18162 = vmatprep.subr.bf16.mxu0 %v25424_v59  ;;  %18334 = vmatprep.subr.bf16.mxu1 %v25427_v12  ;;  %v25449_v28 = vld [vmem:[%s26929_s12 + $0x228] ss:$80 sps:$4 sm:$0xff]   ;;  %v25454_v4 = vld [vmem:[%s26929_s12 + $0x2c4] ss:$80 sps:$4 sm:$0xff]   ;;  %v25457_v6 = vld [vmem:[%s26929_s12 + $0x2cc] ss:$80 sps:$4 sm:$0xff]  }
 0xe81   : > { %25834 = vpow2.f32 %v21704_v32  ;;  %v25452_v59 = vld [vmem:[%s26929_s12 + $0x2c0] ss:$80 sps:$4 sm:$0xff]   ;;  %v25455_v12 = vld [vmem:[%s26929_s12 + $0x2c8] ss:$80 sps:$4 sm:$0xff]   ;;  %v25460_v44 = vld [vmem:[%s26929_s12 + $0x364] ss:$80 sps:$4 sm:$0xff]  }
 0xe82   : > { %25836 = vpow2.f32 %v21721_v29  ;;  %v25463_v13 = vld [vmem:[%s26929_s12 + $0x36c] ss:$80 sps:$4 sm:$0xff]   ;;  %v25458_v57 = vld [vmem:[%s26929_s12 + $0x360] ss:$80 sps:$4 sm:$0xff]   ;;  %v25461_v0 = vld [vmem:[%s26929_s12 + $0x368] ss:$80 sps:$4 sm:$0xff]  }
 0xe83   : > { %25838 = vpow2.f32 %v21723_v34  ;;  %18163 = vmatpush1.bf16.msra.mxu0 %v25422_v23  ;;  %18335 = vmatpush1.bf16.msra.mxu1 %v25425_v24  ;;  %v25466_v17 = vld [vmem:[%s26929_s12 + $0x404] ss:$80 sps:$4 sm:$0xff]   ;;  %v25469_v29 = vld [vmem:[%s26929_s12 + $0x40c] ss:$80 sps:$4 sm:$0xff]  }
 0xe84   : > { %25840 = vpow2.f32 %v21722_v40  ;;  %18363 = vmatprep.subr.bf16.mxu0 %v25430_v11  ;;  %18535 = vmatprep.subr.bf16.mxu1 %v25433_v7  ;;  %v25464_v11 = vld [vmem:[%s26929_s12 + $0x400] ss:$80 sps:$4 sm:$0xff]   ;;  %v25467_v7 = vld [vmem:[%s26929_s12 + $0x408] ss:$80 sps:$4 sm:$0xff]  }
 0xe85   : > { %25842 = vpow2.f32 %v21724_v10 }
 0xe86   : > { %18181 = vmatmul.mubr.bf16.vlgmr.msra.gmra.mrb[12].mxu0 %v25945_v9  ;;  %18353 = vmatmul.mubr.bf16.vlgmr.msra.gmra.mrb[12].mxu1 %v25945_v9  ;;  %v25470_v9 = vld [vmem:[%s26929_s12 + $0x4a0] ss:$80 sps:$4 sm:$0xff]  }
 0xe87   : > { %18364 = vmatpush1.bf16.msra.mxu0 %v25428_v30  ;;  %18536 = vmatpush1.bf16.msra.mxu1 %v25431_v35  ;;  %v25472_v35 = vld [vmem:[%s26929_s12 + $0x4a4] ss:$80 sps:$4 sm:$0xff]  }
 0xe88   : > { %v25829_v49 = vpop.eup %25828  ;;  %18365 = vmatprep.subr.bf16.mxu0 %v25436_v55  ;;  %18537 = vmatprep.subr.bf16.mxu1 %v25439_v36  ;;  %v25475_v55 = vld [vmem:[%s26929_s12 + $0x4ac] ss:$80 sps:$4 sm:$0xff]  }
 0xe89   : > { %v25831_v15 = vpop.eup %25830  ;;  %v18835_v41 = vadd.f32 1.0, %v25829_v49  ;;  %18395 = vmatprep.mubr.bf16.mxu0 %v25946_v42  ;;  %18567 = vmatprep.mubr.bf16.mxu1 %v25946_v42  ;;  %v25481_v49 = vld [vmem:[%s26929_s12 + $0x54c] ss:$80 sps:$4 sm:$0xff]   ;;  %v25482_v42 = vld [vmem:[%s26929_s12 + $0x5e0] ss:$80 sps:$4 sm:$0xff]  }
 0xe8a   : > { %v25833_v45 = vpop.eup %25832  ;;  %v18837_v46 = vadd.f32 1.0, %v25831_v15  ;;  %v25484_v15 = vld [vmem:[%s26929_s12 + $0x5e4] ss:$80 sps:$4 sm:$0xff]  }
 0xe8b   : > { %v25835_v48 = vpop.eup %25834  ;;  %25844 = vrcp.f32 %v18835_v41  ;;  %v18836_v50 = vadd.f32 1.0, %v25833_v45  ;;  %18366 = vmatpush1.bf16.msra.mxu0 %v25434_v47  ;;  %18538 = vmatpush1.bf16.msra.mxu1 %v25437_v14  ;;  %v25473_v47 = vld [vmem:[%s26929_s12 + $0x4a8] ss:$80 sps:$4 sm:$0xff]   ;;  %v25478_v14 = vld [vmem:[%s26929_s12 + $0x544] ss:$80 sps:$4 sm:$0xff]  }
 0xe8c   : > { %v25837_v52 = vpop.eup %25836  ;;  %25846 = vrcp.f32 %v18837_v46  ;;  %v18838_v53 = vadd.f32 1.0, %v25835_v48  ;;  %18367 = vmatprep.subr.bf16.mxu0 %v25442_v38  ;;  %18539 = vmatprep.subr.bf16.mxu1 %v25445_v39  ;;  %v25476_v38 = vld [vmem:[%s26929_s12 + $0x540] ss:$80 sps:$4 sm:$0xff]   ;;  %v25479_v39 = vld [vmem:[%s26929_s12 + $0x548] ss:$80 sps:$4 sm:$0xff]  }
 0xe8d   : > { %v25839_v61 = vpop.eup %25838  ;;  %25848 = vrcp.f32 %v18836_v50  ;;  %v18855_v43 = vadd.f32 1.0, %v25837_v52  ;;  %v25487_v41 = vld [vmem:[%s26929_s12 + $0x5ec] ss:$80 sps:$4 sm:$0xff]   ;;  %v25485_v45 = vld [vmem:[%s26929_s12 + $0x5e8] ss:$80 sps:$4 sm:$0xff]  }
 0xe8e   : > { %v25841_v1 = vpop.eup %25840  ;;  %25850 = vrcp.f32 %v18838_v53  ;;  %v18857_v2 = vadd.f32 1.0, %v25839_v61  ;;  %v25490_v46 = vld [vmem:[%s26929_s12 + $0x684] ss:$80 sps:$4 sm:$0xff]   ;;  %v25493_v48 = vld [vmem:[%s26929_s12 + $0x68c] ss:$80 sps:$4 sm:$0xff]  }
 0xe8f   : > { %v25843_v8 = vpop.eup %25842  ;;  %25852 = vrcp.f32 %v18855_v43  ;;  %v18856_v31 = vadd.f32 1.0, %v25841_v1  ;;  %18368 = vmatpush1.bf16.msra.mxu0 %v25440_v27  ;;  %18540 = vmatpush1.bf16.msra.mxu1 %v25443_v51  ;;  %v25488_v50 = vld [vmem:[%s26929_s12 + $0x680] ss:$80 sps:$4 sm:$0xff]   ;;  %v25491_v27 = vld [vmem:[%s26929_s12 + $0x688] ss:$80 sps:$4 sm:$0xff]  }
 0xe90   : > { %25854 = vrcp.f32 %v18857_v2  ;;  %v18858_v26 = vadd.f32 1.0, %v25843_v8  ;;  %18369 = vmatprep.subr.bf16.mxu0 %v25448_v54  ;;  %18541 = vmatprep.subr.bf16.mxu1 %v25451_v58  ;;  %v25496_v51 = vld [vmem:[%s26929_s12 + $0x724] ss:$80 sps:$4 sm:$0xff]   ;;  %v25499_v52 = vld [vmem:[%s26929_s12 + $0x72c] ss:$80 sps:$4 sm:$0xff]  }
 0xe91   : > { %25856 = vrcp.f32 %v18856_v31  ;;  %v25494_v53 = vld [vmem:[%s26929_s12 + $0x720] ss:$80 sps:$4 sm:$0xff]   ;;  %v25497_v54 = vld [vmem:[%s26929_s12 + $0x728] ss:$80 sps:$4 sm:$0xff]   ;;  %v25502_v58 = vld [vmem:[%s26929_s12 + $0x7c4] ss:$80 sps:$4 sm:$0xff]  }
 0xe92   : > { %25858 = vrcp.f32 %v18858_v26  ;;  %v25505_v61 = vld [vmem:[%s26929_s12 + $0x7cc] ss:$80 sps:$4 sm:$0xff]   ;;  %v25500_v43 = vld [vmem:[%s26929_s12 + $0x7c0] ss:$80 sps:$4 sm:$0xff]   ;;  %v25503_v1 = vld [vmem:[%s26929_s12 + $0x7c8] ss:$80 sps:$4 sm:$0xff]  }
 0xe93   : > { %18370 = vmatpush1.bf16.msra.mxu0 %v25446_v25  ;;  %18542 = vmatpush1.bf16.msra.mxu1 %v25449_v28  ;;  %v25508_v2 = vld [vmem:[%s26929_s12 + $0x864] ss:$80 sps:$4 sm:$0xff]   ;;  %v25511_v8 = vld [vmem:[%s26929_s12 + $0x86c] ss:$80 sps:$4 sm:$0xff]   ;;  %v25506_v31 = vld [vmem:[%s26929_s12 + $0x860] ss:$80 sps:$4 sm:$0xff]  }
 0xe94   : > { %18371 = vmatprep.subr.bf16.mxu0 %v25454_v4  ;;  %18543 = vmatprep.subr.bf16.mxu1 %v25457_v6  ;;  %v25509_v25 = vld [vmem:[%s26929_s12 + $0x868] ss:$80 sps:$4 sm:$0xff]   ;;  %v25514_v28 = vld [vmem:[%s26929_s12 + $0x904] ss:$80 sps:$4 sm:$0xff]   ;;  %v25517_v26 = vld [vmem:[%s26929_s12 + $0x90c] ss:$80 sps:$4 sm:$0xff]  }
 0xe95   : > { %v25845_v63 = vpop.eup %25844  ;;  %v25512_v4 = vld [vmem:[%s26929_s12 + $0x900] ss:$80 sps:$4 sm:$0xff]   ;;  %v25515_v6 = vld [vmem:[%s26929_s12 + $0x908] ss:$80 sps:$4 sm:$0xff]  }
 0xe96   : > { %v25847_v62 = vpop.eup %25846 }
 0xe97   : > { %v25849_v56 = vpop.eup %25848  ;;  %18372 = vmatpush1.bf16.msra.mxu0 %v25452_v59  ;;  %18544 = vmatpush1.bf16.msra.mxu1 %v25455_v12  ;;  %v25520_v59 = vld [vmem:[%s26929_s12 + $0x9a4] ss:$80 sps:$4 sm:$0xff]   ;;  %v25523_v12 = vld [vmem:[%s26929_s12 + $0x9ac] ss:$80 sps:$4 sm:$0xff]  }
 0xe98   : > { %v25851_v32 = vpop.eup %25850  ;;  %v21763_v19 = vpack.c.bf16 %v25849_v56, %v25845_v63  ;;  %18373 = vmatprep.subr.bf16.mxu0 %v25460_v44  ;;  %18545 = vmatprep.subr.bf16.mxu1 %v25463_v13  ;;  %v25518_v44 = vld [vmem:[%s26929_s12 + $0x9a0] ss:$80 sps:$4 sm:$0xff]   ;;  %v25521_v13 = vld [vmem:[%s26929_s12 + $0x9a8] ss:$80 sps:$4 sm:$0xff]   ;;  %v25526_v63 = vld [vmem:[%s26929_s12 + $0xa44] ss:$80 sps:$4 sm:$0xff]  }
 0xe99   : > { %v25853_v34 = vpop.eup %25852  ;;  %v21764_v23 = vpack.c.bf16 %v25851_v32, %v25847_v62  ;;  %v25529_v62 = vld [vmem:[%s26929_s12 + $0xa4c] ss:$80 sps:$4 sm:$0xff]   ;;  %v25524_v56 = vld [vmem:[%s26929_s12 + $0xa40] ss:$80 sps:$4 sm:$0xff]  }
 0xe9a   : > { %v25855_v24 = vpop.eup %25854  ;;  %19071 = vst [vmem:[%s26937_s25 + $0x20] sm:$0xff] %v21763_v19  ;;  %v25535_v32 = vld [vmem:[%s26929_s12 + $0xaec] ss:$80 sps:$4 sm:$0xff]   ;;  %v25947_v19 = vld [vmem:[#allocation3] sm:$0xff] }
 0xe9b   : > { %v25857_v40 = vpop.eup %25856  ;;  %19072 = vst [vmem:[%s26937_s25 + $0x28] sm:$0xff] %v21764_v23  ;;  %18374 = vmatpush1.bf16.msra.mxu0 %v25458_v57  ;;  %18546 = vmatpush1.bf16.msra.mxu1 %v25461_v0  ;;  %v25527_v57 = vld [vmem:[%s26929_s12 + $0xa48] ss:$80 sps:$4 sm:$0xff]   ;;  %v25532_v0 = vld [vmem:[%s26929_s12 + $0xae4] ss:$80 sps:$4 sm:$0xff]  }
 0xe9c   : > { %v25859_v10 = vpop.eup %25858  ;;  %v21773_v30 = vpack.c.bf16 %v25857_v40, %v25853_v34  ;;  %18375 = vmatprep.subr.bf16.mxu0 %v25466_v17  ;;  %18547 = vmatprep.subr.bf16.mxu1 %v25469_v29  ;;  %v25530_v17 = vld [vmem:[%s26929_s12 + $0xae0] ss:$80 sps:$4 sm:$0xff]   ;;  %v25533_v29 = vld [vmem:[%s26929_s12 + $0xae8] ss:$80 sps:$4 sm:$0xff]   ;;  %v25538_v34 = vld [vmem:[%s26929_s12 + $0xb84] ss:$80 sps:$4 sm:$0xff]  }
 0xe9d   : > { %v21774_v36 = vpack.c.bf16 %v25859_v10, %v25855_v24  ;;  %v25541_v23 = vld [vmem:[%s26929_s12 + $0xb8c] ss:$80 sps:$4 sm:$0xff]   ;;  %v25536_v40 = vld [vmem:[%s26929_s12 + $0xb80] ss:$80 sps:$4 sm:$0xff]  }
 0xe9e   : > { %19081 = vst [vmem:[%s26937_s25 + $0x70] sm:$0xff] %v21773_v30  ;;  %v25948_v24 = vld [vmem:[#allocation3 + $0x18] sm:$0xff] }
 0xe9f   : > { %19082 = vst [vmem:[%s26937_s25 + $0x78] sm:$0xff] %v21774_v36  ;;  %18376 = vmatpush1.bf16.msra.mxu0 %v25464_v11  ;;  %18548 = vmatpush1.bf16.msra.mxu1 %v25467_v7  ;;  %v25539_v11 = vld [vmem:[%s26929_s12 + $0xb88] ss:$80 sps:$4 sm:$0xff]   ;;  %v25544_v7 = vld [vmem:[%s26929_s12 + $0xc24] ss:$80 sps:$4 sm:$0xff]  }
 0xea0   : > { %18377 = vmatprep.subr.bf16.mxu0 %v25472_v35  ;;  %18549 = vmatprep.subr.bf16.mxu1 %v25475_v55  ;;  %v25547_v10 = vld [vmem:[%s26929_s12 + $0xc2c] ss:$80 sps:$4 sm:$0xff]   ;;  %v25542_v30 = vld [vmem:[%s26929_s12 + $0xc20] ss:$80 sps:$4 sm:$0xff]   ;;  %v25545_v35 = vld [vmem:[%s26929_s12 + $0xc28] ss:$80 sps:$4 sm:$0xff]  }
 0xea1   : > { %v25550_v55 = vld [vmem:[%s26929_s12 + $0xcc4] ss:$80 sps:$4 sm:$0xff]   ;;  %v25553_v36 = vld [vmem:[%s26929_s12 + $0xccc] ss:$80 sps:$4 sm:$0xff]  }
 0xea3   : > { %18378 = vmatpush1.bf16.msra.mxu0 %v25470_v9  ;;  %18550 = vmatpush1.bf16.msra.mxu1 %v25473_v47  ;;  %v25548_v9 = vld [vmem:[%s26929_s12 + $0xcc0] ss:$80 sps:$4 sm:$0xff]   ;;  %v25551_v47 = vld [vmem:[%s26929_s12 + $0xcc8] ss:$80 sps:$4 sm:$0xff]  }
 0xea4   : > { %18379 = vmatprep.subr.bf16.mxu0 %v25478_v14  ;;  %18551 = vmatprep.subr.bf16.mxu1 %v25481_v49  ;;  %v25556_v14 = vld [vmem:[%s26929_s12 + $0xd64] ss:$80 sps:$4 sm:$0xff]   ;;  %v25559_v49 = vld [vmem:[%s26929_s12 + $0xd6c] ss:$80 sps:$4 sm:$0xff]  }
 0xea7   : > { %18380 = vmatpush1.bf16.msra.mxu0 %v25476_v38  ;;  %18552 = vmatpush1.bf16.msra.mxu1 %v25479_v39  ;;  %v25554_v38 = vld [vmem:[%s26929_s12 + $0xd60] ss:$80 sps:$4 sm:$0xff]   ;;  %v25557_v39 = vld [vmem:[%s26929_s12 + $0xd68] ss:$80 sps:$4 sm:$0xff]  }
 0xea8   : > { %18381 = vmatprep.subr.bf16.mxu0 %v25484_v15  ;;  %18553 = vmatprep.subr.bf16.mxu1 %v25487_v41  ;;  %v25562_v15 = vld [vmem:[%s26929_s12 + $0xe04] ss:$80 sps:$4 sm:$0xff]   ;;  %v25565_v41 = vld [vmem:[%s26929_s12 + $0xe0c] ss:$80 sps:$4 sm:$0xff]  }
 0xeab   : > { %18382 = vmatpush1.bf16.msra.mxu0 %v25482_v42  ;;  %18554 = vmatpush1.bf16.msra.mxu1 %v25485_v45  ;;  %v25560_v42 = vld [vmem:[%s26929_s12 + $0xe00] ss:$80 sps:$4 sm:$0xff]   ;;  %v25563_v45 = vld [vmem:[%s26929_s12 + $0xe08] ss:$80 sps:$4 sm:$0xff]  }
 0xeac   : > { %18383 = vmatprep.subr.bf16.mxu0 %v25490_v46  ;;  %18555 = vmatprep.subr.bf16.mxu1 %v25493_v48  ;;  %v25568_v46 = vld [vmem:[%s26929_s12 + $0xea4] ss:$80 sps:$4 sm:$0xff]   ;;  %v25571_v48 = vld [vmem:[%s26929_s12 + $0xeac] ss:$80 sps:$4 sm:$0xff]  }
 0xeaf   : > { %18384 = vmatpush1.bf16.msra.mxu0 %v25488_v50  ;;  %18556 = vmatpush1.bf16.msra.mxu1 %v25491_v27  ;;  %v25566_v50 = vld [vmem:[%s26929_s12 + $0xea0] ss:$80 sps:$4 sm:$0xff]   ;;  %v25569_v27 = vld [vmem:[%s26929_s12 + $0xea8] ss:$80 sps:$4 sm:$0xff]  }
 0xeb0   : > { %18385 = vmatprep.subr.bf16.mxu0 %v25496_v51  ;;  %18557 = vmatprep.subr.bf16.mxu1 %v25499_v52  ;;  %v25574_v51 = vld [vmem:[%s26929_s12 + $0xf44] ss:$80 sps:$4 sm:$0xff]   ;;  %v25577_v52 = vld [vmem:[%s26929_s12 + $0xf4c] ss:$80 sps:$4 sm:$0xff]  }
 0xeb3   : > { %18386 = vmatpush1.bf16.msra.mxu0 %v25494_v53  ;;  %18558 = vmatpush1.bf16.msra.mxu1 %v25497_v54  ;;  %v25572_v53 = vld [vmem:[%s26929_s12 + $0xf40] ss:$80 sps:$4 sm:$0xff]   ;;  %v25575_v54 = vld [vmem:[%s26929_s12 + $0xf48] ss:$80 sps:$4 sm:$0xff]  }
 0xeb4   : > { %18387 = vmatprep.subr.bf16.mxu0 %v25502_v58  ;;  %18559 = vmatprep.subr.bf16.mxu1 %v25505_v61  ;;  %v25580_v58 = vld [vmem:[%s26929_s12 + $0xfe4] ss:$80 sps:$4 sm:$0xff]   ;;  %v25583_v61 = vld [vmem:[%s26929_s12 + $0xfec] ss:$80 sps:$4 sm:$0xff]  }
 0xeb7   : > { %18388 = vmatpush1.bf16.msra.mxu0 %v25500_v43  ;;  %18560 = vmatpush1.bf16.msra.mxu1 %v25503_v1  ;;  %v25578_v43 = vld [vmem:[%s26929_s12 + $0xfe0] ss:$80 sps:$4 sm:$0xff]   ;;  %v25581_v1 = vld [vmem:[%s26929_s12 + $0xfe8] ss:$80 sps:$4 sm:$0xff]  }
 0xeb8   : > { %18389 = vmatprep.subr.bf16.mxu0 %v25508_v2  ;;  %18561 = vmatprep.subr.bf16.mxu1 %v25511_v8  ;;  %v25586_v2 = vld [vmem:[%s26929_s12 + $0x1084] ss:$80 sps:$4 sm:$0xff]   ;;  %v25589_v8 = vld [vmem:[%s26929_s12 + $0x108c] ss:$80 sps:$4 sm:$0xff]  }
 0xebb   : > { %18390 = vmatpush1.bf16.msra.mxu0 %v25506_v31  ;;  %18562 = vmatpush1.bf16.msra.mxu1 %v25509_v25  ;;  %v25584_v31 = vld [vmem:[%s26929_s12 + $0x1080] ss:$80 sps:$4 sm:$0xff]   ;;  %v25587_v25 = vld [vmem:[%s26929_s12 + $0x1088] ss:$80 sps:$4 sm:$0xff]  }
 0xebc   : > { %18391 = vmatprep.subr.bf16.mxu0 %v25514_v28  ;;  %18563 = vmatprep.subr.bf16.mxu1 %v25517_v26  ;;  %v25592_v28 = vld [vmem:[%s26929_s12 + $0x1124] ss:$80 sps:$4 sm:$0xff]   ;;  %v25595_v26 = vld [vmem:[%s26929_s12 + $0x112c] ss:$80 sps:$4 sm:$0xff]  }
 0xebf   : > { %18392 = vmatpush1.bf16.msra.mxu0 %v25512_v4  ;;  %18564 = vmatpush1.bf16.msra.mxu1 %v25515_v6  ;;  %v25590_v4 = vld [vmem:[%s26929_s12 + $0x1120] ss:$80 sps:$4 sm:$0xff]   ;;  %v25593_v6 = vld [vmem:[%s26929_s12 + $0x1128] ss:$80 sps:$4 sm:$0xff]  }
 0xec0   : > { %18393 = vmatprep.subr.bf16.mxu0 %v25520_v59  ;;  %18565 = vmatprep.subr.bf16.mxu1 %v25523_v12  ;;  %v25598_v59 = vld [vmem:[%s26929_s12 + $0x11c4] ss:$80 sps:$4 sm:$0xff]   ;;  %v25601_v12 = vld [vmem:[%s26929_s12 + $0x11cc] ss:$80 sps:$4 sm:$0xff]  }
 0xec3   : > { %18394 = vmatpush1.bf16.msra.mxu0 %v25518_v44  ;;  %18566 = vmatpush1.bf16.msra.mxu1 %v25521_v13  ;;  %v25596_v44 = vld [vmem:[%s26929_s12 + $0x11c0] ss:$80 sps:$4 sm:$0xff]   ;;  %v25599_v13 = vld [vmem:[%s26929_s12 + $0x11c8] ss:$80 sps:$4 sm:$0xff]  }
 0xec4   : > { %18406 = vmatprep.subr.bf16.mxu0 %v25526_v63  ;;  %18578 = vmatprep.subr.bf16.mxu1 %v25529_v62  ;;  %v25604_v63 = vld [vmem:[%s26929_s12 + $0x1264] ss:$80 sps:$4 sm:$0xff]   ;;  %v25607_v62 = vld [vmem:[%s26929_s12 + $0x126c] ss:$80 sps:$4 sm:$0xff]  }
 0xec6   : > { %18396 = vmatmul.mubr.bf16.vlgmr.msra.gmra.mrb[16].mxu0 %v25947_v19  ;;  %18568 = vmatmul.mubr.bf16.vlgmr.msra.gmra.mrb[16].mxu1 %v25947_v19  ;;  %v25608_v19 = vld [vmem:[%s26929_s12 + $0x1300] ss:$80 sps:$4 sm:$0xff]  }
 0xec7   : > { %18407 = vmatpush1.bf16.msra.mxu0 %v25524_v56  ;;  %18579 = vmatpush1.bf16.msra.mxu1 %v25527_v57  ;;  %v25602_v56 = vld [vmem:[%s26929_s12 + $0x1260] ss:$80 sps:$4 sm:$0xff]   ;;  %v25605_v57 = vld [vmem:[%s26929_s12 + $0x1268] ss:$80 sps:$4 sm:$0xff]  }
 0xec8   : > { %18408 = vmatprep.subr.bf16.mxu0 %v25532_v0  ;;  %18580 = vmatprep.subr.bf16.mxu1 %v25535_v32  ;;  %v25610_v0 = vld [vmem:[%s26929_s12 + $0x1304] ss:$80 sps:$4 sm:$0xff]   ;;  %v25613_v32 = vld [vmem:[%s26929_s12 + $0x130c] ss:$80 sps:$4 sm:$0xff]  }
 0xec9   : > { %18438 = vmatprep.mubr.bf16.mxu0 %v25948_v24  ;;  %18610 = vmatprep.mubr.bf16.mxu1 %v25948_v24  ;;  %v25617_v24 = vld [vmem:[%s26929_s12 + $0x13a8] ss:$80 sps:$4 sm:$0xff]  }
 0xecb   : > { %18409 = vmatpush1.bf16.msra.mxu0 %v25530_v17  ;;  %18581 = vmatpush1.bf16.msra.mxu1 %v25533_v29  ;;  %v25611_v17 = vld [vmem:[%s26929_s12 + $0x1308] ss:$80 sps:$4 sm:$0xff]   ;;  %v25616_v29 = vld [vmem:[%s26929_s12 + $0x13a4] ss:$80 sps:$4 sm:$0xff]  }
 0xecc   : > { %18410 = vmatprep.subr.bf16.mxu0 %v25538_v34  ;;  %18582 = vmatprep.subr.bf16.mxu1 %v25541_v23  ;;  %v25619_v34 = vld [vmem:[%s26929_s12 + $0x13ac] ss:$80 sps:$4 sm:$0xff]   ;;  %v25614_v23 = vld [vmem:[%s26929_s12 + $0x13a0] ss:$80 sps:$4 sm:$0xff]  }
 0xecf   : > { %18411 = vmatpush1.bf16.msra.mxu0 %v25536_v40  ;;  %18583 = vmatpush1.bf16.msra.mxu1 %v25539_v11  ;;  %v25622_v40 = vld [vmem:[%s26929_s12 + $0x1444] ss:$80 sps:$4 sm:$0xff]   ;;  %v25625_v11 = vld [vmem:[%s26929_s12 + $0x144c] ss:$80 sps:$4 sm:$0xff]  }
 0xed0   : > { %18412 = vmatprep.subr.bf16.mxu0 %v25544_v7  ;;  %18584 = vmatprep.subr.bf16.mxu1 %v25547_v10  ;;  %v25620_v7 = vld [vmem:[%s26929_s12 + $0x1440] ss:$80 sps:$4 sm:$0xff]   ;;  %v25623_v10 = vld [vmem:[%s26929_s12 + $0x1448] ss:$80 sps:$4 sm:$0xff]  }
 0xed3   : > { %18413 = vmatpush1.bf16.msra.mxu0 %v25542_v30  ;;  %18585 = vmatpush1.bf16.msra.mxu1 %v25545_v35  ;;  %v25628_v30 = vld [vmem:[%s26929_s12 + $0x14e4] ss:$80 sps:$4 sm:$0xff]   ;;  %v25631_v35 = vld [vmem:[%s26929_s12 + $0x14ec] ss:$80 sps:$4 sm:$0xff]  }
 0xed4   : > { %18414 = vmatprep.subr.bf16.mxu0 %v25550_v55  ;;  %18586 = vmatprep.subr.bf16.mxu1 %v25553_v36  ;;  %v25949_v55 = vld [vmem:[#allocation3 + $0x10] sm:$0xff] }
 0xed5   : > { %v25626_v36 = vld [vmem:[%s26929_s12 + $0x14e0] ss:$80 sps:$4 sm:$0xff]  }
 0xed7   : > { %18415 = vmatpush1.bf16.msra.mxu0 %v25548_v9  ;;  %18587 = vmatpush1.bf16.msra.mxu1 %v25551_v47  ;;  %v25629_v9 = vld [vmem:[%s26929_s12 + $0x14e8] ss:$80 sps:$4 sm:$0xff]   ;;  %v25634_v47 = vld [vmem:[%s26929_s12 + $0x1584] ss:$80 sps:$4 sm:$0xff]  }
 0xed8   : > { %18416 = vmatprep.subr.bf16.mxu0 %v25556_v14  ;;  %18588 = vmatprep.subr.bf16.mxu1 %v25559_v49  ;;  %v25637_v14 = vld [vmem:[%s26929_s12 + $0x158c] ss:$80 sps:$4 sm:$0xff]  }
 0xed9   : > { %v25950_v49 = vld [vmem:[#allocation3 + $0x28] sm:$0xff] }
 0xedb   : > { %18417 = vmatpush1.bf16.msra.mxu0 %v25554_v38  ;;  %18589 = vmatpush1.bf16.msra.mxu1 %v25557_v39  ;;  %v25632_v38 = vld [vmem:[%s26929_s12 + $0x1580] ss:$80 sps:$4 sm:$0xff]   ;;  %v25635_v39 = vld [vmem:[%s26929_s12 + $0x1588] ss:$80 sps:$4 sm:$0xff]  }
 0xedc   : > { %18418 = vmatprep.subr.bf16.mxu0 %v25562_v15  ;;  %18590 = vmatprep.subr.bf16.mxu1 %v25565_v41  ;;  %v25640_v15 = vld [vmem:[%s26929_s12 + $0x1624] ss:$80 sps:$4 sm:$0xff]   ;;  %v25643_v41 = vld [vmem:[%s26929_s12 + $0x162c] ss:$80 sps:$4 sm:$0xff]  }
 0xedf   : > { %18419 = vmatpush1.bf16.msra.mxu0 %v25560_v42  ;;  %18591 = vmatpush1.bf16.msra.mxu1 %v25563_v45  ;;  %v25638_v42 = vld [vmem:[%s26929_s12 + $0x1620] ss:$80 sps:$4 sm:$0xff]   ;;  %v25641_v45 = vld [vmem:[%s26929_s12 + $0x1628] ss:$80 sps:$4 sm:$0xff]  }
 0xee0   : > { %18420 = vmatprep.subr.bf16.mxu0 %v25568_v46  ;;  %18592 = vmatprep.subr.bf16.mxu1 %v25571_v48  ;;  %v25646_v46 = vld [vmem:[%s26929_s12 + $0x16c4] ss:$80 sps:$4 sm:$0xff]   ;;  %v25649_v48 = vld [vmem:[%s26929_s12 + $0x16cc] ss:$80 sps:$4 sm:$0xff]  }
 0xee3   : > { %18421 = vmatpush1.bf16.msra.mxu0 %v25566_v50  ;;  %18593 = vmatpush1.bf16.msra.mxu1 %v25569_v27  ;;  %v25644_v50 = vld [vmem:[%s26929_s12 + $0x16c0] ss:$80 sps:$4 sm:$0xff]   ;;  %v25647_v27 = vld [vmem:[%s26929_s12 + $0x16c8] ss:$80 sps:$4 sm:$0xff]  }
 0xee4   : > { %18422 = vmatprep.subr.bf16.mxu0 %v25574_v51  ;;  %18594 = vmatprep.subr.bf16.mxu1 %v25577_v52  ;;  %v25652_v51 = vld [vmem:[%s26929_s12 + $0x1764] ss:$80 sps:$4 sm:$0xff]   ;;  %v25655_v52 = vld [vmem:[%s26929_s12 + $0x176c] ss:$80 sps:$4 sm:$0xff]  }
 0xee7   : > { %18423 = vmatpush1.bf16.msra.mxu0 %v25572_v53  ;;  %18595 = vmatpush1.bf16.msra.mxu1 %v25575_v54  ;;  %v25650_v53 = vld [vmem:[%s26929_s12 + $0x1760] ss:$80 sps:$4 sm:$0xff]   ;;  %v25653_v54 = vld [vmem:[%s26929_s12 + $0x1768] ss:$80 sps:$4 sm:$0xff]  }
 0xee8   : > { %18424 = vmatprep.subr.bf16.mxu0 %v25580_v58  ;;  %18596 = vmatprep.subr.bf16.mxu1 %v25583_v61  ;;  %v25658_v58 = vld [vmem:[%s26929_s12 + $0x1804] ss:$80 sps:$4 sm:$0xff]   ;;  %v25661_v61 = vld [vmem:[%s26929_s12 + $0x180c] ss:$80 sps:$4 sm:$0xff]  }
 0xeeb   : > { %18425 = vmatpush1.bf16.msra.mxu0 %v25578_v43  ;;  %18597 = vmatpush1.bf16.msra.mxu1 %v25581_v1  ;;  %v25656_v43 = vld [vmem:[%s26929_s12 + $0x1800] ss:$80 sps:$4 sm:$0xff]   ;;  %v25659_v1 = vld [vmem:[%s26929_s12 + $0x1808] ss:$80 sps:$4 sm:$0xff]  }
 0xeec   : > { %18426 = vmatprep.subr.bf16.mxu0 %v25586_v2  ;;  %18598 = vmatprep.subr.bf16.mxu1 %v25589_v8  ;;  %v25664_v2 = vld [vmem:[%s26929_s12 + $0x18a4] ss:$80 sps:$4 sm:$0xff]   ;;  %v25667_v8 = vld [vmem:[%s26929_s12 + $0x18ac] ss:$80 sps:$4 sm:$0xff]  }
 0xeef   : > { %18427 = vmatpush1.bf16.msra.mxu0 %v25584_v31  ;;  %18599 = vmatpush1.bf16.msra.mxu1 %v25587_v25  ;;  %v25662_v31 = vld [vmem:[%s26929_s12 + $0x18a0] ss:$80 sps:$4 sm:$0xff]   ;;  %v25665_v25 = vld [vmem:[%s26929_s12 + $0x18a8] ss:$80 sps:$4 sm:$0xff]  }
 0xef0   : > { %18428 = vmatprep.subr.bf16.mxu0 %v25592_v28  ;;  %18600 = vmatprep.subr.bf16.mxu1 %v25595_v26  ;;  %v25670_v28 = vld [vmem:[%s26929_s12 + $0x1944] ss:$80 sps:$4 sm:$0xff]   ;;  %v25673_v26 = vld [vmem:[%s26929_s12 + $0x194c] ss:$80 sps:$4 sm:$0xff]  }
 0xef3   : > { %18429 = vmatpush1.bf16.msra.mxu0 %v25590_v4  ;;  %18601 = vmatpush1.bf16.msra.mxu1 %v25593_v6  ;;  %v25668_v4 = vld [vmem:[%s26929_s12 + $0x1940] ss:$80 sps:$4 sm:$0xff]   ;;  %v25671_v6 = vld [vmem:[%s26929_s12 + $0x1948] ss:$80 sps:$4 sm:$0xff]  }
 0xef4   : > { %18430 = vmatprep.subr.bf16.mxu0 %v25598_v59  ;;  %18602 = vmatprep.subr.bf16.mxu1 %v25601_v12  ;;  %v25676_v59 = vld [vmem:[%s26929_s12 + $0x19e4] ss:$80 sps:$4 sm:$0xff]   ;;  %v25679_v12 = vld [vmem:[%s26929_s12 + $0x19ec] ss:$80 sps:$4 sm:$0xff]  }
 0xef7   : > { %18431 = vmatpush1.bf16.msra.mxu0 %v25596_v44  ;;  %18603 = vmatpush1.bf16.msra.mxu1 %v25599_v13  ;;  %v25674_v44 = vld [vmem:[%s26929_s12 + $0x19e0] ss:$80 sps:$4 sm:$0xff]   ;;  %v25677_v13 = vld [vmem:[%s26929_s12 + $0x19e8] ss:$80 sps:$4 sm:$0xff]  }
 0xef8   : > { %18432 = vmatprep.subr.bf16.mxu0 %v25604_v63  ;;  %18604 = vmatprep.subr.bf16.mxu1 %v25607_v62  ;;  %v25682_v63 = vld [vmem:[%s26929_s12 + $0x1a84] ss:$80 sps:$4 sm:$0xff]   ;;  %v25685_v62 = vld [vmem:[%s26929_s12 + $0x1a8c] ss:$80 sps:$4 sm:$0xff]  }
 0xefb   : > { %18433 = vmatpush1.bf16.msra.mxu0 %v25602_v56  ;;  %18605 = vmatpush1.bf16.msra.mxu1 %v25605_v57  ;;  %v25680_v56 = vld [vmem:[%s26929_s12 + $0x1a80] ss:$80 sps:$4 sm:$0xff]   ;;  %v25683_v57 = vld [vmem:[%s26929_s12 + $0x1a88] ss:$80 sps:$4 sm:$0xff]  }
 0xefc   : > { %18434 = vmatprep.subr.bf16.mxu0 %v25610_v0  ;;  %18606 = vmatprep.subr.bf16.mxu1 %v25613_v32  ;;  %v25688_v0 = vld [vmem:[%s26929_s12 + $0x1b24] ss:$80 sps:$4 sm:$0xff]   ;;  %v25691_v32 = vld [vmem:[%s26929_s12 + $0x1b2c] ss:$80 sps:$4 sm:$0xff]  }
 0xeff   : > { %18435 = vmatpush1.bf16.msra.mxu0 %v25608_v19  ;;  %18607 = vmatpush1.bf16.msra.mxu1 %v25611_v17  ;;  %v25686_v19 = vld [vmem:[%s26929_s12 + $0x1b20] ss:$80 sps:$4 sm:$0xff]   ;;  %v25689_v17 = vld [vmem:[%s26929_s12 + $0x1b28] ss:$80 sps:$4 sm:$0xff]  }
 0xf00   : > { %18436 = vmatprep.subr.bf16.mxu0 %v25616_v29  ;;  %18608 = vmatprep.subr.bf16.mxu1 %v25619_v34  ;;  %v25694_v29 = vld [vmem:[%s26929_s12 + $0x1bc4] ss:$80 sps:$4 sm:$0xff]   ;;  %v25697_v34 = vld [vmem:[%s26929_s12 + $0x1bcc] ss:$80 sps:$4 sm:$0xff]  }
 0xf03   : > { %18437 = vmatpush1.bf16.msra.mxu0 %v25614_v23  ;;  %18609 = vmatpush1.bf16.msra.mxu1 %v25617_v24  ;;  %v25692_v23 = vld [vmem:[%s26929_s12 + $0x1bc0] ss:$80 sps:$4 sm:$0xff]   ;;  %v25695_v24 = vld [vmem:[%s26929_s12 + $0x1bc8] ss:$80 sps:$4 sm:$0xff]  }
 0xf04   : > { %18449 = vmatprep.subr.bf16.mxu0 %v25622_v40  ;;  %18621 = vmatprep.subr.bf16.mxu1 %v25625_v11  ;;  %v25700_v40 = vld [vmem:[%s26929_s12 + $0x1c64] ss:$80 sps:$4 sm:$0xff]   ;;  %v25703_v11 = vld [vmem:[%s26929_s12 + $0x1c6c] ss:$80 sps:$4 sm:$0xff]  }
 0xf06   : > { %18439 = vmatmul.mubr.bf16.vlgmr.msra.gmra.mrb[16].mxu0 %v25949_v55  ;;  %18611 = vmatmul.mubr.bf16.vlgmr.msra.gmra.mrb[16].mxu1 %v25949_v55  ;;  %v25704_v55 = vld [vmem:[%s26929_s12 + $0x1d00] ss:$80 sps:$4 sm:$0xff]  }
 0xf07   : > { %18450 = vmatpush1.bf16.msra.mxu0 %v25620_v7  ;;  %18622 = vmatpush1.bf16.msra.mxu1 %v25623_v10  ;;  %v25698_v7 = vld [vmem:[%s26929_s12 + $0x1c60] ss:$80 sps:$4 sm:$0xff]   ;;  %v25701_v10 = vld [vmem:[%s26929_s12 + $0x1c68] ss:$80 sps:$4 sm:$0xff]  }
 0xf08   : > { %18451 = vmatprep.subr.bf16.mxu0 %v25628_v30  ;;  %18623 = vmatprep.subr.bf16.mxu1 %v25631_v35  ;;  %v25706_v30 = vld [vmem:[%s26929_s12 + $0x1d04] ss:$80 sps:$4 sm:$0xff]   ;;  %v25709_v35 = vld [vmem:[%s26929_s12 + $0x1d0c] ss:$80 sps:$4 sm:$0xff]  }
 0xf09   : > { %18481 = vmatprep.mubr.bf16.mxu0 %v25950_v49  ;;  %18653 = vmatprep.mubr.bf16.mxu1 %v25950_v49  ;;  %v25713_v49 = vld [vmem:[%s26929_s12 + $0x1da8] ss:$80 sps:$4 sm:$0xff]  }
 0xf0b   : > { %18452 = vmatpush1.bf16.msra.mxu0 %v25626_v36  ;;  %18624 = vmatpush1.bf16.msra.mxu1 %v25629_v9  ;;  %v25707_v36 = vld [vmem:[%s26929_s12 + $0x1d08] ss:$80 sps:$4 sm:$0xff]   ;;  %v25712_v9 = vld [vmem:[%s26929_s12 + $0x1da4] ss:$80 sps:$4 sm:$0xff]  }
 0xf0c   : > { %18453 = vmatprep.subr.bf16.mxu0 %v25634_v47  ;;  %18625 = vmatprep.subr.bf16.mxu1 %v25637_v14  ;;  %v25715_v47 = vld [vmem:[%s26929_s12 + $0x1dac] ss:$80 sps:$4 sm:$0xff]   ;;  %v25710_v14 = vld [vmem:[%s26929_s12 + $0x1da0] ss:$80 sps:$4 sm:$0xff]  }
 0xf0f   : > { %18454 = vmatpush1.bf16.msra.mxu0 %v25632_v38  ;;  %18626 = vmatpush1.bf16.msra.mxu1 %v25635_v39  ;;  %v25718_v38 = vld [vmem:[%s26929_s12 + $0x1e44] ss:$80 sps:$4 sm:$0xff]   ;;  %v25721_v39 = vld [vmem:[%s26929_s12 + $0x1e4c] ss:$80 sps:$4 sm:$0xff]  }
 0xf10   : > { %18455 = vmatprep.subr.bf16.mxu0 %v25640_v15  ;;  %18627 = vmatprep.subr.bf16.mxu1 %v25643_v41  ;;  %v25716_v15 = vld [vmem:[%s26929_s12 + $0x1e40] ss:$80 sps:$4 sm:$0xff]   ;;  %v25719_v41 = vld [vmem:[%s26929_s12 + $0x1e48] ss:$80 sps:$4 sm:$0xff]  }
 0xf13   : > { %18456 = vmatpush1.bf16.msra.mxu0 %v25638_v42  ;;  %18628 = vmatpush1.bf16.msra.mxu1 %v25641_v45  ;;  %v25724_v42 = vld [vmem:[%s26929_s12 + $0x1ee4] ss:$80 sps:$4 sm:$0xff]   ;;  %v25727_v45 = vld [vmem:[%s26929_s12 + $0x1eec] ss:$80 sps:$4 sm:$0xff]  }
 0xf14   : > { %18457 = vmatprep.subr.bf16.mxu0 %v25646_v46  ;;  %18629 = vmatprep.subr.bf16.mxu1 %v25649_v48  ;;  %v25951_v46 = vld [vmem:[#allocation3 + $0x20] sm:$0xff] }
 0xf15   : > { %v25722_v48 = vld [vmem:[%s26929_s12 + $0x1ee0] ss:$80 sps:$4 sm:$0xff]  }
 0xf17   : > { %18458 = vmatpush1.bf16.msra.mxu0 %v25644_v50  ;;  %18630 = vmatpush1.bf16.msra.mxu1 %v25647_v27  ;;  %v25725_v50 = vld [vmem:[%s26929_s12 + $0x1ee8] ss:$80 sps:$4 sm:$0xff]   ;;  %v25730_v27 = vld [vmem:[%s26929_s12 + $0x1f84] ss:$80 sps:$4 sm:$0xff]  }
 0xf18   : > { %18459 = vmatprep.subr.bf16.mxu0 %v25652_v51  ;;  %18631 = vmatprep.subr.bf16.mxu1 %v25655_v52  ;;  %v25733_v51 = vld [vmem:[%s26929_s12 + $0x1f8c] ss:$80 sps:$4 sm:$0xff]   ;;  %v25728_v52 = vld [vmem:[%s26929_s12 + $0x1f80] ss:$80 sps:$4 sm:$0xff]  }
 0xf1b   : > { %18460 = vmatpush1.bf16.msra.mxu0 %v25650_v53  ;;  %18632 = vmatpush1.bf16.msra.mxu1 %v25653_v54  ;;  %v25731_v53 = vld [vmem:[%s26929_s12 + $0x1f88] ss:$80 sps:$4 sm:$0xff]   ;;  %v25736_v54 = vld [vmem:[%s26929_s12 + $0x2024] ss:$80 sps:$4 sm:$0xff]  }
 0xf1c   : > { %18461 = vmatprep.subr.bf16.mxu0 %v25658_v58  ;;  %18633 = vmatprep.subr.bf16.mxu1 %v25661_v61  ;;  %v25739_v58 = vld [vmem:[%s26929_s12 + $0x202c] ss:$80 sps:$4 sm:$0xff]   ;;  %v25734_v61 = vld [vmem:[%s26929_s12 + $0x2020] ss:$80 sps:$4 sm:$0xff]  }
 0xf1f   : > { %18462 = vmatpush1.bf16.msra.mxu0 %v25656_v43  ;;  %18634 = vmatpush1.bf16.msra.mxu1 %v25659_v1  ;;  %v25737_v43 = vld [vmem:[%s26929_s12 + $0x2028] ss:$80 sps:$4 sm:$0xff]   ;;  %v25745_v1 = vld [vmem:[%s26929_s12 + $0x20cc] ss:$80 sps:$4 sm:$0xff]  }
 0xf20   : > { %18463 = vmatprep.subr.bf16.mxu0 %v25664_v2  ;;  %18635 = vmatprep.subr.bf16.mxu1 %v25667_v8  ;;  %v25740_v2 = vld [vmem:[%s26929_s12 + $0x20c0] ss:$80 sps:$4 sm:$0xff]   ;;  %v25743_v8 = vld [vmem:[%s26929_s12 + $0x20c8] ss:$80 sps:$4 sm:$0xff]  }
 0xf23   : > { %18464 = vmatpush1.bf16.msra.mxu0 %v25662_v31  ;;  %18636 = vmatpush1.bf16.msra.mxu1 %v25665_v25  ;;  %v25748_v31 = vld [vmem:[%s26929_s12 + $0x2164] ss:$80 sps:$4 sm:$0xff]   ;;  %v25751_v25 = vld [vmem:[%s26929_s12 + $0x216c] ss:$80 sps:$4 sm:$0xff]  }
 0xf24   : > { %18465 = vmatprep.subr.bf16.mxu0 %v25670_v28  ;;  %18637 = vmatprep.subr.bf16.mxu1 %v25673_v26  ;;  %v25952_v28 = vld [vmem:[%s26935_s14 + $0x8] sm:$0xff] }
 0xf25   : > { %v11338_v26 = vrot.slane %v25952_v28, %v11305_v5  ;;  %v25757_v5 = vld [vmem:[%s26929_s12 + $0x220c] ss:$80 sps:$4 sm:$0xff]  }
 0xf27   : > { %18466 = vmatpush1.bf16.msra.mxu0 %v25668_v4  ;;  %18638 = vmatpush1.bf16.msra.mxu1 %v25671_v6  ;;  %v11346_v4 = vrot.slane %v25952_v28, %v11313_v16  ;;  %v11342_v6 = vrot.slane %v25952_v28, %v11309_v20 }
 0xf28   : > { %18467 = vmatprep.subr.bf16.mxu0 %v25676_v59  ;;  %18639 = vmatprep.subr.bf16.mxu1 %v25679_v12  ;;  %v11350_v59 = vrot.slane %v25952_v28, %v11317_v22  ;;  %v25746_v12 = vld [vmem:[%s26929_s12 + $0x2160] ss:$80 sps:$4 sm:$0xff]  }
 0xf2b   : > { %18468 = vmatpush1.bf16.msra.mxu0 %v25674_v44  ;;  %18640 = vmatpush1.bf16.msra.mxu1 %v25677_v13  ;;  %v25749_v44 = vld [vmem:[%s26929_s12 + $0x2168] ss:$80 sps:$4 sm:$0xff]   ;;  %v25754_v13 = vld [vmem:[%s26929_s12 + $0x2204] ss:$80 sps:$4 sm:$0xff]  }
 0xf2c   : > { %18469 = vmatprep.subr.bf16.mxu0 %v25682_v63  ;;  %18641 = vmatprep.subr.bf16.mxu1 %v25685_v62 }
 0xf2f   : > { %18470 = vmatpush1.bf16.msra.mxu0 %v25680_v56  ;;  %18642 = vmatpush1.bf16.msra.mxu1 %v25683_v57 }
 0xf30   : > { %18471 = vmatprep.subr.bf16.mxu0 %v25688_v0  ;;  %18643 = vmatprep.subr.bf16.mxu1 %v25691_v32  ;;  %v25752_v32 = vld [vmem:[%s26929_s12 + $0x2200] ss:$80 sps:$4 sm:$0xff]  }
 0xf33   : > { %18472 = vmatpush1.bf16.msra.mxu0 %v25686_v19  ;;  %18644 = vmatpush1.bf16.msra.mxu1 %v25689_v17  ;;  %v25755_v19 = vld [vmem:[%s26929_s12 + $0x2208] ss:$80 sps:$4 sm:$0xff]  }
 0xf34   : > { %18473 = vmatprep.subr.bf16.mxu0 %v25694_v29  ;;  %18645 = vmatprep.subr.bf16.mxu1 %v25697_v34  ;;  %v25760_v29 = vld [vmem:[%s26929_s12 + $0x22a4] ss:$80 sps:$4 sm:$0xff]   ;;  %v25763_v34 = vld [vmem:[%s26929_s12 + $0x22ac] ss:$80 sps:$4 sm:$0xff]  }
 0xf37   : > { %18474 = vmatpush1.bf16.msra.mxu0 %v25692_v23  ;;  %18646 = vmatpush1.bf16.msra.mxu1 %v25695_v24 }
 0xf38   : > { %18475 = vmatprep.subr.bf16.mxu0 %v25700_v40  ;;  %18647 = vmatprep.subr.bf16.mxu1 %v25703_v11 }
 0xf3b   : > { %18476 = vmatpush1.bf16.msra.mxu0 %v25698_v7  ;;  %18648 = vmatpush1.bf16.msra.mxu1 %v25701_v10 }
 0xf3c   : > { %18477 = vmatprep.subr.bf16.mxu0 %v25706_v30  ;;  %18649 = vmatprep.subr.bf16.mxu1 %v25709_v35 }
 0xf3f   : > { %18478 = vmatpush1.bf16.msra.mxu0 %v25704_v55  ;;  %18650 = vmatpush1.bf16.msra.mxu1 %v25707_v36 }
 0xf40   : > { %18479 = vmatprep.subr.bf16.mxu0 %v25712_v9  ;;  %18651 = vmatprep.subr.bf16.mxu1 %v25715_v47 }
 0xf43   : > { %18480 = vmatpush1.bf16.msra.mxu0 %v25710_v14  ;;  %18652 = vmatpush1.bf16.msra.mxu1 %v25713_v49  ;;  %v25758_v14 = vld [vmem:[%s26929_s12 + $0x22a0] ss:$80 sps:$4 sm:$0xff]   ;;  %v25761_v49 = vld [vmem:[%s26929_s12 + $0x22a8] ss:$80 sps:$4 sm:$0xff]  }
 0xf44   : > { %18492 = vmatprep.subr.bf16.mxu0 %v25718_v38  ;;  %18664 = vmatprep.subr.bf16.mxu1 %v25721_v39 }
 0xf46   : > { %18482 = vmatmul.mubr.bf16.vlgmr.msra.gmra.mrb[16].mxu0 %v25951_v46  ;;  %18654 = vmatmul.mubr.bf16.vlgmr.msra.gmra.mrb[16].mxu1 %v25951_v46 }
 0xf47   : > { %18493 = vmatpush1.bf16.msra.mxu0 %v25716_v15  ;;  %18665 = vmatpush1.bf16.msra.mxu1 %v25719_v41  ;;  %v25953_v15 = vld [vmem:[#allocation3 + $0x30] sm:$0xff] }
 0xf48   : > { %18494 = vmatprep.subr.bf16.mxu0 %v25724_v42  ;;  %18666 = vmatprep.subr.bf16.mxu1 %v25727_v45 }
 0xf49   : > { %18524 = vmatprep.mubr.bf16.mxu0 %v26398_v33  ;;  %18696 = vmatprep.mubr.bf16.mxu1 %v26398_v33  ;;  %v25742_v33 = vld [vmem:[%s26929_s12 + $0x20c4] ss:$80 sps:$4 sm:$0xff]  }
 0xf4b   : > { %18495 = vmatpush1.bf16.msra.mxu0 %v25722_v48  ;;  %18667 = vmatpush1.bf16.msra.mxu1 %v25725_v50 }
 0xf4c   : > { %18496 = vmatprep.subr.bf16.mxu0 %v25730_v27  ;;  %18668 = vmatprep.subr.bf16.mxu1 %v25733_v51 }
 0xf4f   : > { %18497 = vmatpush1.bf16.msra.mxu0 %v25728_v52  ;;  %18669 = vmatpush1.bf16.msra.mxu1 %v25731_v53 }
 0xf50   : > { %18498 = vmatprep.subr.bf16.mxu0 %v25736_v54  ;;  %18670 = vmatprep.subr.bf16.mxu1 %v25739_v58 }
 0xf53   : > { %18499 = vmatpush1.bf16.msra.mxu0 %v25734_v61  ;;  %18671 = vmatpush1.bf16.msra.mxu1 %v25737_v43 }
 0xf54   : > { %18500 = vmatprep.subr.bf16.mxu0 %v25742_v33  ;;  %18672 = vmatprep.subr.bf16.mxu1 %v25745_v1 }
 0xf57   : > { %18501 = vmatpush1.bf16.msra.mxu0 %v25740_v2  ;;  %18673 = vmatpush1.bf16.msra.mxu1 %v25743_v8 }
 0xf58   : > { %18502 = vmatprep.subr.bf16.mxu0 %v25748_v31  ;;  %18674 = vmatprep.subr.bf16.mxu1 %v25751_v25 }
 0xf59   : > { %v18182_v63 = vpop.f32.mrb[12].mxu0  ;;  %v18354_v16 = vpop.f32.mrb[12].mxu1 }
 0xf5a   : > { %v22124_v62 = vadd.f32 %v18182_v63, %v11338_v26  ;;  %v22128_v56 = vadd.f32 %v18354_v16, %v11346_v4  ;;  %v18184_v57 = vpop.f32.mrb[13].mxu0  ;;  %v18356_v0 = vpop.f32.mrb[13].mxu1 }
 0xf5b   : > { %v22125_v20 = vadd.f32 %v18184_v57, %v11342_v6  ;;  %v22129_v17 = vadd.f32 %v18356_v0, %v11350_v59  ;;  %v18186_v60 = vpop.f32.mrb[14].mxu0  ;;  %v18358_v22 = vpop.f32.mrb[14].mxu1  ;;  %18503 = vmatpush1.bf16.msra.mxu0 %v25746_v12  ;;  %18675 = vmatpush1.bf16.msra.mxu1 %v25749_v44 }
 0xf5c   : > { %v21705_v23 = vmul.f32 -1.442695, %v22124_v62  ;;  %v21707_v24 = vmul.f32 -1.442695, %v22128_v56  ;;  %v22126_v40 = vadd.f32 %v18186_v60, %v11338_v26  ;;  %v22130_v11 = vadd.f32 %v18358_v22, %v11346_v4  ;;  %v18188_v7 = vpop.f32.mrb[15].mxu0  ;;  %v18360_v10 = vpop.f32.mrb[15].mxu1  ;;  %18504 = vmatprep.subr.bf16.mxu0 %v25754_v13  ;;  %18676 = vmatprep.subr.bf16.mxu1 %v25757_v5 }
 0xf5d   : > { %v21706_v30 = vmul.f32 -1.442695, %v22125_v20  ;;  %v21708_v35 = vmul.f32 -1.442695, %v22129_v17  ;;  %v22127_v55 = vadd.f32 %v18188_v7, %v11342_v6  ;;  %v22131_v36 = vadd.f32 %v18360_v10, %v11350_v59  ;;  %v11283_v5 = vld [vmem:[%s26935_s14 + $0x10] sm:$0xf] }
 0xf5e   : > { %25860 = vpow2.f32 %v21705_v23  ;;  %v21725_v9 = vmul.f32 -1.442695, %v22126_v40  ;;  %v21727_v47 = vmul.f32 -1.442695, %v22130_v11  ;;  %v11354_v63 = vrot.slane %v11283_v5, %v28517_v18 }
 0xf5f   : > { %25862 = vpow2.f32 %v21707_v24  ;;  %18505 = vmatpush1.bf16.msra.mxu0 %v25752_v32  ;;  %18677 = vmatpush1.bf16.msra.mxu1 %v25755_v19  ;;  %v21726_v38 = vmul.f32 -1.442695, %v22127_v55  ;;  %v21728_v39 = vmul.f32 -1.442695, %v22131_v36  ;;  %v11362_v16 = vrot.slane %v11283_v5, %v28520_v3 }
 0xf60   : > { %25864 = vpow2.f32 %v21706_v30  ;;  %18506 = vmatprep.subr.bf16.mxu0 %v25760_v29  ;;  %18678 = vmatprep.subr.bf16.mxu1 %v25763_v34  ;;  %v11358_v62 = vrot.slane %v11283_v5, %v28525_v21  ;;  %v11366_v56 = vrot.slane %v11283_v5, %v28528_v37 }
 0xf61   : > { %25866 = vpow2.f32 %v21708_v35 }
 0xf62   : > { %25868 = vpow2.f32 %v21725_v9 }
 0xf63   : > { %25870 = vpow2.f32 %v21727_v47  ;;  %18507 = vmatpush1.bf16.msra.mxu0 %v25758_v14  ;;  %18679 = vmatpush1.bf16.msra.mxu1 %v25761_v49 }
 0xf64   : > { %25872 = vpow2.f32 %v21726_v38 }
 0xf65   : > { %25874 = vpow2.f32 %v21728_v39 }
 0xf66   : > { %18525 = vmatmul.mubr.bf16.vlgmr.msra.gmra.mrb[16].mxu0 %v25953_v15  ;;  %18697 = vmatmul.mubr.bf16.vlgmr.msra.gmra.mrb[16].mxu1 %v25953_v15 }
 0xf68   : > { %v25861_v41 = vpop.eup %25860 }
 0xf69   : > { %v25863_v42 = vpop.eup %25862  ;;  %v18839_v45 = vadd.f32 1.0, %v25861_v41 }
 0xf6a   : > { %v25865_v46 = vpop.eup %25864  ;;  %v18841_v48 = vadd.f32 1.0, %v25863_v42 }
 0xf6b   : > { %v25867_v50 = vpop.eup %25866  ;;  %25876 = vrcp.f32 %v18839_v45  ;;  %v18840_v27 = vadd.f32 1.0, %v25865_v46 }
 0xf6c   : > { %v25869_v51 = vpop.eup %25868  ;;  %25878 = vrcp.f32 %v18841_v48  ;;  %v18842_v52 = vadd.f32 1.0, %v25867_v50 }
 0xf6d   : > { %v25871_v53 = vpop.eup %25870  ;;  %25880 = vrcp.f32 %v18840_v27  ;;  %v18859_v54 = vadd.f32 1.0, %v25869_v51 }
 0xf6e   : > { %v25873_v58 = vpop.eup %25872  ;;  %25882 = vrcp.f32 %v18842_v52  ;;  %v18861_v61 = vadd.f32 1.0, %v25871_v53 }
 0xf6f   : > { %v25875_v43 = vpop.eup %25874  ;;  %25884 = vrcp.f32 %v18859_v54  ;;  %v18860_v33 = vadd.f32 1.0, %v25873_v58 }
 0xf70   : > { %25886 = vrcp.f32 %v18861_v61  ;;  %v18862_v1 = vadd.f32 1.0, %v25875_v43 }
 0xf71   : > { %25888 = vrcp.f32 %v18860_v33 }
 0xf72   : > { %25890 = vrcp.f32 %v18862_v1 }
 0xf75   : > { %v25877_v2 = vpop.eup %25876 }
 0xf76   : > { %v25879_v8 = vpop.eup %25878 }
 0xf77   : > { %v25881_v31 = vpop.eup %25880 }
 0xf78   : > { %v25883_v25 = vpop.eup %25882  ;;  %v21765_v28 = vpack.c.bf16 %v25881_v31, %v25877_v2 }
 0xf79   : > { %v25885_v26 = vpop.eup %25884  ;;  %v21766_v4 = vpack.c.bf16 %v25883_v25, %v25879_v8 }
 0xf7a   : > { %v25887_v6 = vpop.eup %25886  ;;  %19073 = vst [vmem:[%s26937_s25 + $0x30] sm:$0xff] %v21765_v28 }
 0xf7b   : > { %v25889_v59 = vpop.eup %25888  ;;  %19074 = vst [vmem:[%s26937_s25 + $0x38] sm:$0xff] %v21766_v4 }
 0xf7c   : > { %v25891_v12 = vpop.eup %25890  ;;  %v21775_v44 = vpack.c.bf16 %v25889_v59, %v25885_v26 }
 0xf7d   : > { %v21776_v13 = vpack.c.bf16 %v25891_v12, %v25887_v6 }
 0xf7e   : > { %19083 = vst [vmem:[%s26937_s25 + $0x80] sm:$0xff] %v21775_v44 }
 0xf7f   : > { %19084 = vst [vmem:[%s26937_s25 + $0x88] sm:$0xff] %v21776_v13 }
0x1039   : > { %v18526_v57 = vpop.f32.mrb[16].mxu0  ;;  %v18698_v0 = vpop.f32.mrb[16].mxu1 }
0x103a   : > { %v22132_v32 = vadd.f32 %v18526_v57, %v11354_v63  ;;  %v22136_v19 = vadd.f32 %v18698_v0, %v11362_v16  ;;  %v18528_v20 = vpop.f32.mrb[17].mxu0  ;;  %v18700_v17 = vpop.f32.mrb[17].mxu1 }
0x103b   : > { %v22133_v60 = vadd.f32 %v18528_v20, %v11358_v62  ;;  %v22137_v22 = vadd.f32 %v18700_v17, %v11366_v56  ;;  %v18530_v29 = vpop.f32.mrb[18].mxu0  ;;  %v18702_v34 = vpop.f32.mrb[18].mxu1 }
0x103c   : > { %v21709_v23 = vmul.f32 -1.442695, %v22132_v32  ;;  %v21711_v24 = vmul.f32 -1.442695, %v22136_v19  ;;  %v22134_v40 = vadd.f32 %v18530_v29, %v11354_v63  ;;  %v22138_v18 = vadd.f32 %v18702_v34, %v11362_v16  ;;  %v18532_v11 = vpop.f32.mrb[19].mxu0  ;;  %v18704_v3 = vpop.f32.mrb[19].mxu1 }
0x103d   : > { %v21710_v7 = vmul.f32 -1.442695, %v22133_v60  ;;  %v21712_v21 = vmul.f32 -1.442695, %v22137_v22  ;;  %v22135_v10 = vadd.f32 %v18532_v11, %v11358_v62  ;;  %v22139_v37 = vadd.f32 %v18704_v3, %v11366_v56 }
0x103e   : > { %25892 = vpow2.f32 %v21709_v23  ;;  %v21729_v30 = vmul.f32 -1.442695, %v22134_v40  ;;  %v21731_v35 = vmul.f32 -1.442695, %v22138_v18 }
0x103f   : > { %25894 = vpow2.f32 %v21711_v24  ;;  %v21730_v55 = vmul.f32 -1.442695, %v22135_v10  ;;  %v21732_v36 = vmul.f32 -1.442695, %v22139_v37 }
0x1040   : > { %25896 = vpow2.f32 %v21710_v7 }
0x1041   : > { %25898 = vpow2.f32 %v21712_v21 }
0x1042   : > { %25900 = vpow2.f32 %v21729_v30 }
0x1043   : > { %25902 = vpow2.f32 %v21731_v35 }
0x1044   : > { %25904 = vpow2.f32 %v21730_v55 }
0x1045   : > { %25906 = vpow2.f32 %v21732_v36 }
0x1048   : > { %v25893_v9 = vpop.eup %25892 }
0x1049   : > { %v25895_v47 = vpop.eup %25894  ;;  %v18843_v14 = vadd.f32 1.0, %v25893_v9 }
0x104a   : > { %v25897_v49 = vpop.eup %25896  ;;  %v18845_v38 = vadd.f32 1.0, %v25895_v47 }
0x104b   : > { %v25899_v39 = vpop.eup %25898  ;;  %25908 = vrcp.f32 %v18843_v14  ;;  %v18844_v15 = vadd.f32 1.0, %v25897_v49 }
0x104c   : > { %v25901_v41 = vpop.eup %25900  ;;  %25910 = vrcp.f32 %v18845_v38  ;;  %v18846_v42 = vadd.f32 1.0, %v25899_v39 }
0x104d   : > { %v25903_v45 = vpop.eup %25902  ;;  %25912 = vrcp.f32 %v18844_v15  ;;  %v18863_v46 = vadd.f32 1.0, %v25901_v41 }
0x104e   : > { %v25905_v48 = vpop.eup %25904  ;;  %25914 = vrcp.f32 %v18846_v42  ;;  %v18865_v50 = vadd.f32 1.0, %v25903_v45 }
0x104f   : > { %v25907_v27 = vpop.eup %25906  ;;  %25916 = vrcp.f32 %v18863_v46  ;;  %v18864_v51 = vadd.f32 1.0, %v25905_v48 }
0x1050   : > { %25918 = vrcp.f32 %v18865_v50  ;;  %v18866_v52 = vadd.f32 1.0, %v25907_v27 }
0x1051   : > { %25920 = vrcp.f32 %v18864_v51 }
0x1052   : > { %25922 = vrcp.f32 %v18866_v52 }
0x1055   : > { %v25909_v53 = vpop.eup %25908 }
0x1056   : > { %v25911_v54 = vpop.eup %25910 }
0x1057   : > { %v25913_v58 = vpop.eup %25912 }
0x1058   : > { %v25915_v61 = vpop.eup %25914  ;;  %v21767_v43 = vpack.c.bf16 %v25913_v58, %v25909_v53 }
0x1059   : > { %v25917_v33 = vpop.eup %25916  ;;  %v21768_v1 = vpack.c.bf16 %v25915_v61, %v25911_v54 }
0x105a   : > { %v25919_v2 = vpop.eup %25918  ;;  %19075 = vst [vmem:[%s26937_s25 + $0x40] sm:$0xff] %v21767_v43 }
0x105b   : > { %v25921_v8 = vpop.eup %25920  ;;  %19076 = vst [vmem:[%s26937_s25 + $0x48] sm:$0xff] %v21768_v1 }
0x105c   : > { %v25923_v31 = vpop.eup %25922  ;;  %v21777_v25 = vpack.c.bf16 %v25921_v8, %v25917_v33 }
0x105d   : > { %v21778_v28 = vpack.c.bf16 %v25923_v31, %v25919_v2 }
0x105e   : > { %19085 = vst [vmem:[%s26937_s25 + $0x90] sm:$0xff] %v21777_v25 }
0x105f   : > { %19086 = vst [vmem:[%s26937_s25 + $0x98] sm:$0xff] %v21778_v28 }
0x1060 PF: > { %s29430_s11 = sld [smem:[#allocation40_spill]] }
0x1066   : > { %p29431_p4 = scmp.ne.s32.totalorder %s29430_s11, 0 }
0x1067   : > { %s29432_s18 = sld [smem:[#allocation33_spill]] (%p29431_p4)  ;;  %v19112_v26 = vld [vmem:[%s26937_s25] sm:$0xff] (%p29431_p4)  ;;  %v19114_v4 = vld [vmem:[%s26937_s25 + $0x8] sm:$0xff] (%p29431_p4)  ;;  %v19116_v6 = vld [vmem:[%s26937_s25 + $0x10] sm:$0xff] (%p29431_p4)  ;;  %s29433_s28 = sld [smem:[#allocation50_spill]] (%p29431_p4) }
0x1068   : > { %19093 = sbr.rel (!%p29431_p4) target bundleno = 4222 (0x107e), region = 163  ;;  %v19118_v59 = vld [vmem:[%s26937_s25 + $0x18] sm:$0xff] (%p29431_p4)  ;;  %v19120_v12 = vld [vmem:[%s26937_s25 + $0x20] sm:$0xff] (%p29431_p4)  ;;  %v19122_v44 = vld [vmem:[%s26937_s25 + $0x28] sm:$0xff] (%p29431_p4) }
0x1069   : > { %v19124_v13 = vld [vmem:[%s26937_s25 + $0x30] sm:$0xff] (%p29431_p4)  ;;  %v19126_v5 = vld [vmem:[%s26937_s25 + $0x38] sm:$0xff] (%p29431_p4)  ;;  %v19128_v63 = vld [vmem:[%s26937_s25 + $0x40] sm:$0xff] (%p29431_p4) }
0x106a   : > { %v19130_v16 = vld [vmem:[%s26937_s25 + $0x48] sm:$0xff] (%p29431_p4)  ;;  %v19132_v62 = vld [vmem:[%s26937_s25 + $0x50] sm:$0xff] (%p29431_p4)  ;;  %v19134_v56 = vld [vmem:[%s26937_s25 + $0x58] sm:$0xff] (%p29431_p4) }
0x106b   : > { %v19136_v57 = vld [vmem:[%s26937_s25 + $0x60] sm:$0xff] (%p29431_p4)  ;;  %v19138_v0 = vld [vmem:[%s26937_s25 + $0x68] sm:$0xff] (%p29431_p4)  ;;  %v19140_v32 = vld [vmem:[%s26937_s25 + $0x70] sm:$0xff] (%p29431_p4) }
0x106c   : > { %v19142_v19 = vld [vmem:[%s26937_s25 + $0x78] sm:$0xff] (%p29431_p4)  ;;  %v19144_v20 = vld [vmem:[%s26937_s25 + $0x80] sm:$0xff] (%p29431_p4)  ;;  %v19146_v17 = vld [vmem:[%s26937_s25 + $0x88] sm:$0xff] (%p29431_p4) }
0x106d   : > { %s21753_s15 = sadd.s32 (%p29431_p4), 4294967291, %s29432_s18  ;;  %v19148_v60 = vld [vmem:[%s26937_s25 + $0x90] sm:$0xff] (%p29431_p4)  ;;  %v19150_v22 = vld [vmem:[%s26937_s25 + $0x98] sm:$0xff] (%p29431_p4) }
0x106e   : > { %p19095_p7 = scmp.gt.s32.totalorder (%p29431_p4), %s21753_s15, 0 }
0x1070   : > { %s29448_s15 = smov (!%p19095_p7, %s21753_s15), 0 }
0x1071   : > { %s21779_s26 = smul.u32 80, %s29448_s15 }
0x1073   : > { %s19099_s3 = scalar_lea.vmem %s29433_s28, %s21779_s26 }
0x1074   : > { %19113 = vst [vmem:[%s19099_s3] sm:$0xff] %v19112_v26  ;;  %19115 = vst [vmem:[%s19099_s3 + $0x8] sm:$0xff] %v19114_v4 }
0x1075   : > { %19117 = vst [vmem:[%s19099_s3 + $0x10] sm:$0xff] %v19116_v6  ;;  %19119 = vst [vmem:[%s19099_s3 + $0x18] sm:$0xff] %v19118_v59 }
0x1076   : > { %19121 = vst [vmem:[%s19099_s3 + $0x20] sm:$0xff] %v19120_v12  ;;  %19123 = vst [vmem:[%s19099_s3 + $0x28] sm:$0xff] %v19122_v44 }
0x1077   : > { %19125 = vst [vmem:[%s19099_s3 + $0x30] sm:$0xff] %v19124_v13  ;;  %19127 = vst [vmem:[%s19099_s3 + $0x38] sm:$0xff] %v19126_v5 }
0x1078   : > { %19129 = vst [vmem:[%s19099_s3 + $0x40] sm:$0xff] %v19128_v63  ;;  %19131 = vst [vmem:[%s19099_s3 + $0x48] sm:$0xff] %v19130_v16 }
0x1079   : > { %19133 = vst [vmem:[%s19099_s3 + $0x140] sm:$0xff] %v19132_v62  ;;  %19135 = vst [vmem:[%s19099_s3 + $0x148] sm:$0xff] %v19134_v56 }
0x107a   : > { %19137 = vst [vmem:[%s19099_s3 + $0x150] sm:$0xff] %v19136_v57  ;;  %19139 = vst [vmem:[%s19099_s3 + $0x158] sm:$0xff] %v19138_v0 }
0x107b   : > { %19141 = vst [vmem:[%s19099_s3 + $0x160] sm:$0xff] %v19140_v32  ;;  %19143 = vst [vmem:[%s19099_s3 + $0x168] sm:$0xff] %v19142_v19 }
0x107c   : > { %19145 = vst [vmem:[%s19099_s3 + $0x170] sm:$0xff] %v19144_v20  ;;  %19147 = vst [vmem:[%s19099_s3 + $0x178] sm:$0xff] %v19146_v17 }
0x107d   : > { %19149 = vst [vmem:[%s19099_s3 + $0x180] sm:$0xff] %v19148_v60  ;;  %19151 = vst [vmem:[%s19099_s3 + $0x188] sm:$0xff] %v19150_v22 }
0x107e PF: > { %s29434_s14 = sld [smem:[#allocation34_spill]]  ;;  %s29435_s25 = sld [smem:[#allocation31_spill]] }
0x107f   : > { %s29436_s20 = sld [smem:[#allocation41_spill]]  ;;  %s29437_s28 = sld [smem:[#allocation32_spill]] }
0x1080   : > { %s29438_s13 = sld [smem:[#allocation36_spill]]  ;;  %s29439_s26 = smov %s26356_s27 }
0x1081   : > { %s29441_s29 = smov %s26368_s30 }
0x1084   : > { %p28_p11 = scmp.ge.s32.totalorder %s29434_s14, 11  }
0x1085   : > { %s29440_s27 = smov %s29436_s20 }
0x1086   : > { %s29442_s30 = smov %s29438_s13  ;;  %30 = sbr.rel (!%p28_p11) target bundleno = 19 (0x13), region = 240 }
0x108d   :  { %19167 = vsyncpa [#allocation6], 1 }
0x108e   :  { %19169 = vsyncpa [#allocation6 + $0x1], 1 }
0x108f   :  { %19170 = vsyncpa [#allocation8], 1 }
0x1090   :  { %19171 = vsyncpa [#allocation11], 1 }
0x1091   :  { %19172 = vsyncpa [#allocation14], 1 }
0x1092   :  { %19173 = vsyncpa [#allocation17], 1 }
0x1093   :  { %19174 = vsyncpa [#allocation20], 1 }

</bundles_post_ra>
